<compile_context>
chip_gen: v7x
topology: tpu7x:2x2x1
jax: 0.10.0
libtpu: 0.0.40
codegen_flags: <defaults>
</compile_context>

<pallas_src>
import functools
import math

import jax
import jax.numpy as jnp
import numpy as np
from jax import lax
from jax.experimental import pallas as pl
from jax.experimental.pallas import tpu as pltpu


def _round_up(n: int, m: int) -> int:
    return ((n + m - 1) // m) * m


def pos_encoding_kernel(x_ref, w_ref, out_ref, *, chunk: int, num_freq: int):
    """One grid step.

    x_ref:   (TB, P*D)       packed coordinates: P samples x D features per row.
    w_ref:   (P*D, P*out_w)  block-diagonal encoding matrix (compile-time data,
                             passed as an input since Pallas can't capture it).
    out_ref: (TB, P*out_w)   packed [x_d | sin(x_d*f_k) | cos(x_d*f_k)] features.
    """
    x = x_ref[...].astype(jnp.float32)

    # Single MXU matmul builds, per output lane, either x_d (pass-through
    # columns, weight 1.0) or x_d * f_k (sin/cos columns, weight f_k).
    # HIGHEST precision keeps the f32 trig arguments exact (f_k up to ~100).
    lin = jnp.dot(x, w_ref[...],
                  preferred_element_type=jnp.float32,
                  precision=jax.lax.Precision.HIGHEST)

    # Lane classification from iota (no captured constant arrays): inside each
    # (1 + 2F)-wide per-feature chunk, offset 0 is the x column, 1..F are sin
    # columns, F+1..2F are cos columns.
    col = lax.broadcasted_iota(jnp.int32, lin.shape, 1)
    off = col % chunk
    phase = jnp.where(off > num_freq, 0.5 * math.pi, 0.0).astype(jnp.float32)
    trig = jnp.sin(lin + phase)          # sin(t) or sin(t + pi/2) == cos(t)

    # One dense, lane-aligned store of the whole block.
    out_ref[...] = jnp.where(off == 0, lin, trig).astype(out_ref.dtype)


def pos_encoding(x: jax.Array, num_frequencies: int,
                 *, block_samples: int = 8192) -> jax.Array:
    """Pallas implementation of PosEncoding.forward for 2-D input (B, in_features)."""
    B, D = x.shape
    F = int(num_frequencies)
    chunk = 1 + 2 * F
    out_w = D * chunk
    freqs = ((2.0 ** np.arange(F)) * np.pi).astype(np.float32)

    # Pack P samples per row so both the input row (P*D lanes) and the output
    # row (P*out_w lanes) are multiples of 128 -> unmasked lane-dense loads and
    # stores (the biggest single lever per the perf review).
    P = 128 // math.gcd(D, 128)

    # Constant encoding matrix: block-diagonal over the P packed samples; each
    # (D, out_w) block maps feature d to [1, f_0..f_{F-1}, f_0..f_{F-1}] inside
    # its per-feature chunk. Fetched into VMEM once (block index never changes).
    w_small = np.zeros((D, out_w), dtype=np.float32)
    for d in range(D):
        base = d * chunk
        w_small[d, base] = 1.0
        w_small[d, base + 1:base + 1 + F] = freqs
        w_small[d, base + 1 + F:base + 1 + 2 * F] = freqs
    W = jnp.asarray(np.kron(np.eye(P, dtype=np.float32), w_small))

    # Pad only up to the packing factor (not up to the block size); the partial
    # last *block* is handled by Pallas' boundary masking via pl.cdiv below.
    B_pad = _round_up(B, P)
    x_in = x if B_pad == B else jnp.pad(x, ((0, B_pad - B), (0, 0)))
    pB = B_pad // P
    x_packed = x_in.reshape(pB, P * D)          # free row-major reshape

    # ~block_samples original rows per grid step; lane-dense buffers keep the
    # double-buffered in+out tiles at a few MiB (v5e/v6e/v7x safe). Sublane-
    # align the block when it is not the full array.
    block_rows = min(pB, max(1, block_samples // P))
    if block_rows < pB and block_rows % 8 != 0:
        block_rows = min(pB, _round_up(block_rows, 8))
    grid = (pl.cdiv(pB, block_rows),)

    kernel = functools.partial(pos_encoding_kernel, chunk=chunk, num_freq=F)

    itemsize = jnp.dtype(x.dtype).itemsize
    cost = pl.CostEstimate(
        flops=2 * pB * (P * D) * (P * out_w),
        transcendentals=pB * P * out_w,
        bytes_accessed=(pB * P * D + pB * P * out_w) * itemsize + int(W.size) * 4,
    )

    out_packed = pl.pallas_call(
        kernel,
        out_shape=jax.ShapeDtypeStruct((pB, P * out_w), x.dtype),
        grid_spec=pltpu.PrefetchScalarGridSpec(
            num_scalar_prefetch=0,
            grid=grid,
            in_specs=[
                pl.BlockSpec((block_rows, P * D), lambda i: (i, 0)),
                pl.BlockSpec((P * D, P * out_w), lambda i: (0, 0)),
            ],
            out_specs=pl.BlockSpec((block_rows, P * out_w), lambda i: (i, 0)),
        ),
        compiler_params=pltpu.CompilerParams(
            dimension_semantics=("parallel",),
        ),
        cost_estimate=cost,
    )(x_packed, W)

    out = out_packed.reshape(B_pad, out_w)      # free row-major reshape back
    return out if B_pad == B else out[:B]


if __name__ == "__main__":
    key = jax.random.PRNGKey(0)

    in_features = 4
    num_frequencies = 6
    out_w = in_features * (1 + 2 * num_frequencies)

    def reference(x):
        freqs_ref = (2.0 ** jnp.arange(num_frequencies, dtype=jnp.float32)) * jnp.pi
        xe = x[..., None]                                       # (B, D, 1)
        return jnp.concatenate(
            [xe, jnp.sin(xe * freqs_ref), jnp.cos(xe * freqs_ref)], axis=-1
        ).reshape(x.shape[0], out_w)

    # B=10 exercises the pad-to-packing + slice-back path; B=64 is pack-aligned.
    for B in (10, 64):
        kx, key = jax.random.split(key)
        x = jax.random.uniform(kx, (B, in_features), dtype=jnp.float32,
                               minval=-1.0, maxval=1.0)
        out = jax.block_until_ready(pos_encoding(x, num_frequencies))
        assert out.shape == (B, out_w), out.shape
        np.testing.assert_allclose(np.asarray(out), np.asarray(reference(x)),
                                   rtol=1e-5, atol=1e-5)

    print("KERNEL_OK")
</pallas_src>

<mosaic_0001>
module attributes {stable_mosaic.version = 11 : i64} {
  func.func @pos_encoding_kernel(%arg0: i32, %arg1: memref<1x128xf32, #tpu.memory_space<vmem>>, %arg2: memref<128x1664xf32, #tpu.memory_space<vmem>>, %arg3: memref<1x1664xf32, #tpu.memory_space<vmem>>) attributes {dimension_semantics = [#tpu.dimension_semantics<parallel>], iteration_bounds = array<i64: 1>, scalar_prefetch = 0 : i64, scratch_operands = 0 : i64, tpu.core_type = #tpu.core_type<tc>, window_params = [{transform_indices = @transform_0, window_bounds = array<i64: 1, 128>}, {pipeline_mode = #tpu.pipeline_mode<synchronous>, transform_indices = @transform_1, window_bounds = array<i64: 128, 1664>}, {transform_indices = @transform_2, window_bounds = array<i64: 1, 1664>}]} {
    %c0 = arith.constant 0 : index
    %c0_0 = arith.constant 0 : index
    %0 = vector.load %arg1[%c0, %c0_0] : memref<1x128xf32, #tpu.memory_space<vmem>>, vector<1x128xf32>
    %c0_1 = arith.constant 0 : index
    %c0_2 = arith.constant 0 : index
    %1 = vector.load %arg2[%c0_1, %c0_2] : memref<128x1664xf32, #tpu.memory_space<vmem>>, vector<128x1664xf32>
    %cst = arith.constant dense<0.000000e+00> : vector<1x1664xf32>
    %2 = tpu.matmul %0, %1, %cst {dimension_numbers = #tpu.dot_dimension_numbers<[1], [0], [0], [1], [0, 0, 1, 1], [], []>, precision = #tpu.contract_precision<fp32>} : vector<1x128xf32>, vector<128x1664xf32>, vector<1x1664xf32> -> vector<1x1664xf32>
    %3 = tpu.iota {dimensions = array<i32: 1>} : vector<1x1664xi32>
    %c13_i32 = arith.constant 13 : i32
    %c0_i32 = arith.constant 0 : i32
    %4 = arith.cmpi eq, %c13_i32, %c0_i32 : i32
    %c1_i32 = arith.constant 1 : i32
    %5 = arith.select %4, %c1_i32, %c13_i32 : i32
    %6 = vector.broadcast %5 : i32 to vector<1x1664xi32>
    %7 = arith.remsi %3, %6 : vector<1x1664xi32>
    %c0_i32_3 = arith.constant 0 : i32
    %8 = vector.broadcast %c0_i32_3 : i32 to vector<1x1664xi32>
    %9 = arith.cmpi ne, %7, %8 : vector<1x1664xi32>
    %c0_i32_4 = arith.constant 0 : i32
    %10 = vector.broadcast %c0_i32_4 : i32 to vector<1x1664xi32>
    %11 = arith.cmpi slt, %7, %10 : vector<1x1664xi32>
    %c0_i32_5 = arith.constant 0 : i32
    %12 = arith.cmpi slt, %5, %c0_i32_5 : i32
    %13 = vector.broadcast %12 : i1 to vector<1x1664xi1>
    %14 = vector.broadcast %13 : vector<1x1664xi1> to vector<1x1664xi1>
    %15 = arith.xori %11, %14 : vector<1x1664xi1>
    %16 = arith.andi %15, %9 : vector<1x1664xi1>
    %17 = vector.broadcast %5 : i32 to vector<1x1664xi32>
    %18 = arith.addi %7, %17 : vector<1x1664xi32>
    %19 = arith.select %16, %18, %7 : vector<1x1664xi1>, vector<1x1664xi32>
    %c6_i32 = arith.constant 6 : i32
    %20 = vector.broadcast %c6_i32 : i32 to vector<1x1664xi32>
    %21 = arith.cmpi sgt, %19, %20 : vector<1x1664xi32>
    %cst_6 = arith.constant 1.57079637 : f32
    %cst_7 = arith.constant 0.000000e+00 : f32
    %22 = vector.broadcast %cst_6 : f32 to vector<1x1664xf32>
    %23 = vector.broadcast %cst_7 : f32 to vector<1x1664xf32>
    %24 = arith.select %21, %22, %23 : vector<1x1664xi1>, vector<1x1664xf32>
    %25 = arith.addf %2, %24 : vector<1x1664xf32>
    %26 = math.sin %25 : vector<1x1664xf32>
    %c0_i32_8 = arith.constant 0 : i32
    %27 = vector.broadcast %c0_i32_8 : i32 to vector<1x1664xi32>
    %28 = arith.cmpi eq, %19, %27 : vector<1x1664xi32>
    %29 = arith.select %28, %2, %26 : vector<1x1664xi1>, vector<1x1664xf32>
    %c0_9 = arith.constant 0 : index
    %c0_10 = arith.constant 0 : index
    %30 = vector.load %arg3[%c0_9, %c0_10] : memref<1x1664xf32, #tpu.memory_space<vmem>>, vector<1x1664xf32>
    tpu.vector_store %arg3[%c0_9, %c0_10], %29 {strides = array<i32>} : memref<1x1664xf32, #tpu.memory_space<vmem>>, vector<1x1664xf32>,
    return
  }
  func.func @transform_0(%arg0: i32) -> (i32, i32) {
    %c0_i32 = arith.constant 0 : i32
    %c0_i32_0 = arith.constant 0 : i32
    return %arg0, %c0_i32 : i32, i32
  }
  func.func @transform_1(%arg0: i32) -> (i32, i32) {
    %c0_i32 = arith.constant 0 : i32
    %c0_i32_0 = arith.constant 0 : i32
    %c0_i32_1 = arith.constant 0 : i32
    return %c0_i32, %c0_i32_0 : i32, i32
  }
  func.func @transform_2(%arg0: i32) -> (i32, i32) {
    %c0_i32 = arith.constant 0 : i32
    %c0_i32_0 = arith.constant 0 : i32
    return %arg0, %c0_i32 : i32, i32
  }
}

</mosaic_0001>

<bundles_post_ra>
// kernel: tpu_custom_call.1
= control target key start
LH: loop header
LB: loop body
LE: loop exit
PB: predicated region body
PF: predicated region fallthrough
CT: control target
= control target key end

     0   :  { %7 = vsyncpa [#allocation3], 0  ;;  %s14512_s0 = inlined_call_operand.hbm [shape: f32[1,128], index: 0, kind: input, shape index: {}]   ;;  %s14513_s1 = inlined_call_operand.hbm [shape: f32[128,1664], index: 1, kind: input, shape index: {}]   ;;  %s14514_s2 = inlined_call_operand.hbm [shape: f32[1,1664], index: 2, kind: output, shape index: {}]  }
   0x1   :  { %8 = vsyncpa [#allocation6], 0 }
   0x2   :  { %9 = vsyncpa [#allocation4], 0  ;;  %s9729_s9 = smov [#allocation2]   ;;  %s9730_s11 = smov [#allocation5]  }
   0x3   :  { %s16_s10 = sshll.u32 %s9729_s9, 4  ;;  %s25_s12 = sshll.u32 %s9730_s11, 4  ;;  %s17_s10 = int_to_ptr.vmem [resolvable:$true] %s16_s10  ;;  %s9759_s12 = int_to_ptr.vmem [resolvable:$true] %s25_s12 }
   0x4   :  { %s9657_s15 = scalar_lea.hbm %s14512_s0, 16 }
   0x5   :  { %p9658_p0 = scmp.ne.s32.totalorder %s14512_s0, %s9657_s15  ;;  %p9661_p1 = scmp.lt.u32.totalorder %s9657_s15, %s14512_s0 }
   0x7   :  { %p9663_p2 = pnand %p9661_p1, %p9658_p0 }
   0x9   :  { %9666 = shalt.err (!%p9663_p2)
}
   0xa   :  { %s9667_s20 = scalar_lea.vmem %s17_s10, 16  ;;  %s9671_s21 = scalar_lea.vmem %s17_s10, 32 }
   0xb   :  { %p9668_p3 = scmp.ne.s32.totalorder %s17_s10, %s9667_s20  ;;  %p9672_p4 = scmp.lt.s32.totalorder %s17_s10, %s17_s10 }
   0xc   :  { %p9673_p5 = scmp.lt.s32.totalorder %s9671_s21, %s9667_s20 }
   0xe   :  { %p9674_p6 = por %p9673_p5, %p9672_p4 }
  0x10   :  { %p9675_p7 = pnand %p9674_p6, %p9668_p3 }
  0x12   :  { %9678 = shalt.err (!%p9675_p7)
}
  0x13   :  { %19 = dma.hbm_to_vmem [thread:$0]  %s14512_s0, 16, %s17_s10, [#allocation3]  }
  0x14   :  { %s9679_s26 = scalar_lea.hbm %s14513_s1, 26624 }
  0x15   :  { %p9680_p8 = scmp.ne.s32.totalorder %s14513_s1, %s9679_s26  ;;  %p9683_p9 = scmp.lt.u32.totalorder %s9679_s26, %s14513_s1 }
  0x17   :  { %p9685_p10 = pnand %p9683_p9, %p9680_p8 }
  0x19   :  { %9688 = shalt.err (!%p9685_p10)
}
  0x1a   :  { %s9689_s3 = scalar_lea.vmem %s9759_s12, 26624  ;;  %p9694_p12 = scmp.lt.s32.totalorder %s9759_s12, %s9759_s12 }
  0x1b   :  { %p9690_p11 = scmp.ne.s32.totalorder %s9759_s12, %s9689_s3  ;;  %p9695_p13 = scmp.lt.s32.totalorder %s9689_s3, %s9689_s3 }
  0x1d   :  { %p9696_p0 = por %p9695_p13, %p9694_p12 }
  0x1f   :  { %p9697_p1 = pnand %p9696_p0, %p9690_p11 }
  0x21   :  { %9700 = shalt.err (!%p9697_p1)
}
  0x22   :  { %s9731_s0 = smov 1664   ;;  %s9732_s4 = smov 104  }
  0x23   :  { %31 = dma.hbm_to_vmem [thread:$0]  %s14513_s1, 26624, %s9759_s12, [#allocation6], %s9731_s0, %s9731_s0, %s9732_s4  }
  0x24   :  { %9723 = dma.done.wait [#allocation3], 16  }
  0x25   :  { %9724 = vsyncadd [#allocation3], 4294967280 }
  0x26   :  { %9725 = dma.done.wait [#allocation6], 26624  }
  0x27   :  { %9726 = vsyncadd [#allocation6], 4294940672  ;;  %v14515_v0 = vmov 0.0   ;;  %v40_v1 = vld [vmem:[#allocation5 + $0x8] sm:$0xff]  ;;  %v53_v2 = vld [vmem:[#allocation5 + $0x70] sm:$0xff]  ;;  %s9743_s1 = smov [#allocation7]  }
  0x28   :  { %343 = vmatprep.mubr.f32.mxu1 %v14515_v0  ;;  %820 = vmatprep.mubr.f32.mxu0 %v14515_v0  ;;  %v39_v3 = vld [vmem:[#allocation5] sm:$0xff]  ;;  %v247_v4 = vand.u32 4294901760, %v40_v1  ;;  %v251_v5 = vand.u32 4294901760, %v53_v2  ;;  %v52_v6 = vld [vmem:[#allocation5 + $0x68] sm:$0xff]  ;;  %v66_v8 = vld [vmem:[#allocation5 + $0xd8] sm:$0xff]  ;;  %s7772_s7 = sshll.u32 %s9743_s1, 4  ;;  %s7773_s7 = int_to_ptr.vmem [resolvable:$true] %s7772_s7 }
  0x29   :  { %v249_v7 = vand.u32 4294901760, %v39_v3  ;;  %v79_v9 = vld [vmem:[#allocation5 + $0x140] sm:$0xff]  ;;  %v253_v10 = vand.u32 4294901760, %v52_v6  ;;  %v255_v11 = vand.u32 4294901760, %v66_v8  ;;  %v65_v13 = vld [vmem:[#allocation5 + $0xd0] sm:$0xff]  ;;  %v78_v14 = vld [vmem:[#allocation5 + $0x138] sm:$0xff]  ;;  %p9706_p3 = scmp.lt.s32.totalorder %s7773_s7, %s7773_s7 }
  0x2a   :  { %v259_v12 = vand.u32 4294901760, %v79_v9  ;;  %v92_v15 = vld [vmem:[#allocation5 + $0x1a8] sm:$0xff]  ;;  %v9792_v16 = vpack.c.bf16 %v251_v5, %v247_v4  ;;  %v9794_v17 = vsub.f32 %v40_v1, %v247_v4  ;;  %v9796_v18 = vsub.f32 %v53_v2, %v251_v5  ;;  %v105_v19 = vld [vmem:[#allocation5 + $0x210] sm:$0xff]  ;;  %v91_v20 = vld [vmem:[#allocation5 + $0x1a0] sm:$0xff]  ;;  %s9701_s8 = scalar_lea.vmem %s7773_s7, 208  ;;  %s9705_s9 = scalar_lea.vmem %s7773_s7, 224 }
  0x2b   :  { %v104_v21 = vld [vmem:[#allocation5 + $0x208] sm:$0xff]  ;;  %v9798_v22 = vpack.c.bf16 %v253_v10, %v249_v7  ;;  %v9800_v23 = vsub.f32 %v39_v3, %v249_v7  ;;  %v9802_v24 = vsub.f32 %v52_v6, %v253_v10  ;;  %v118_v26 = vld [vmem:[#allocation5 + $0x278] sm:$0xff]  ;;  %v131_v27 = vld [vmem:[#allocation5 + $0x2e0] sm:$0xff]  ;;  %v9808_v28 = vsub.f32 %v66_v8, %v255_v11  ;;  %p9702_p2 = scmp.ne.s32.totalorder %s7773_s7, %s9701_s8  ;;  %p9707_p4 = scmp.lt.s32.totalorder %s9705_s9, %s9701_s8 }
  0x2c   :  { %15094 = vst [vmem:[#allocation11_spill] sm:$0xff] %v9792_v16  ;;  %v9804_v25 = vpack.c.bf16 %v259_v12, %v255_v11  ;;  %8147 = vmatprep.subr.bf16.mxu1 %v9792_v16  ;;  %8243 = vmatprep.subr.bf16.mxu0 %v9792_v16  ;;  %v257_v29 = vand.u32 4294901760, %v65_v13  ;;  %v261_v30 = vand.u32 4294901760, %v78_v14  ;;  %v263_v31 = vand.u32 4294901760, %v92_v15  ;;  %v117_v40 = vld [vmem:[#allocation5 + $0x270] sm:$0xff]  ;;  %v130_v41 = vld [vmem:[#allocation5 + $0x2d8] sm:$0xff] }
  0x2d   :  { %15095 = vst [vmem:[#allocation12_spill] sm:$0xff] %v9798_v22  ;;  %8149 = vmatpush1.bf16.msra.mxu1 %v9798_v22  ;;  %8245 = vmatpush1.bf16.msra.mxu0 %v9798_v22  ;;  %v267_v32 = vand.u32 4294901760, %v105_v19  ;;  %v265_v33 = vand.u32 4294901760, %v91_v20  ;;  %v269_v34 = vand.u32 4294901760, %v104_v21  ;;  %v271_v35 = vand.u32 4294901760, %v118_v26  ;;  %v144_v42 = vld [vmem:[#allocation5 + $0x348] sm:$0xff]  ;;  %p9708_p5 = por %p9707_p4, %p9706_p3 }
  0x2e   :  { %15096 = vst [vmem:[#allocation13_spill] sm:$0xff] %v9804_v25  ;;  %8151 = vmatprep.subr.bf16.mxu1 %v9804_v25  ;;  %v9813_v36 = vsub.f32 %v79_v9, %v259_v12  ;;  %8247 = vmatprep.subr.bf16.mxu0 %v9804_v25  ;;  %v9816_v37 = vpack.c.bf16 %v261_v30, %v257_v29  ;;  %v275_v39 = vand.u32 4294901760, %v131_v27  ;;  %v157_v47 = vld [vmem:[#allocation5 + $0x3b0] sm:$0xff]  ;;  %v143_v48 = vld [vmem:[#allocation5 + $0x340] sm:$0xff]  ;;  %v156_v49 = vld [vmem:[#allocation5 + $0x3a8] sm:$0xff]  ;;  %v273_v56 = vand.u32 4294901760, %v117_v40 }
  0x2f   :  { %v9818_v38 = vsub.f32 %v65_v13, %v257_v29  ;;  %v9820_v43 = vsub.f32 %v78_v14, %v261_v30  ;;  %v9822_v44 = vpack.c.bf16 %v267_v32, %v263_v31  ;;  %v9824_v45 = vsub.f32 %v92_v15, %v263_v31  ;;  %v170_v54 = vld [vmem:[#allocation5 + $0x418] sm:$0xff]  ;;  %v183_v63 = vld [vmem:[#allocation5 + $0x480] sm:$0xff]  ;;  %v169_v1 = vld [vmem:[#allocation5 + $0x410] sm:$0xff]  ;;  %p9709_p6 = pnand %p9708_p5, %p9702_p2 }
  0x30   :  { %15097 = vst [vmem:[#allocation14_spill] sm:$0xff] %v9816_v37  ;;  %v9826_v46 = vsub.f32 %v105_v19, %v267_v32  ;;  %v9828_v50 = vpack.c.bf16 %v269_v34, %v265_v33  ;;  %v9830_v51 = vsub.f32 %v91_v20, %v265_v33  ;;  %v9832_v52 = vsub.f32 %v104_v21, %v269_v34  ;;  %v182_v2 = vld [vmem:[#allocation5 + $0x478] sm:$0xff]  ;;  %v196_v7 = vld [vmem:[#allocation5 + $0x4e8] sm:$0xff]  ;;  %v209_v8 = vld [vmem:[#allocation5 + $0x550] sm:$0xff] }
  0x31   :  { %15098 = vst [vmem:[#allocation15_spill] sm:$0xff] %v9822_v44  ;;  %v9834_v53 = vpack.c.bf16 %v275_v39, %v271_v35  ;;  %8153 = vmatpush1.bf16.msra.mxu1 %v9816_v37  ;;  %8249 = vmatpush1.bf16.msra.mxu0 %v9816_v37  ;;  %v9838_v55 = vsub.f32 %v118_v26, %v271_v35  ;;  %v277_v57 = vand.u32 4294901760, %v130_v41  ;;  %v279_v58 = vand.u32 4294901760, %v144_v42  ;;  %v195_v9 = vld [vmem:[#allocation5 + $0x4e0] sm:$0xff]  ;;  %v208_v14 = vld [vmem:[#allocation5 + $0x548] sm:$0xff]  ;;  %v222_v31 = vld [vmem:[#allocation5 + $0x5b8] sm:$0xff] }
  0x32   :  { %15099 = vst [vmem:[#allocation16_spill] sm:$0xff] %v9828_v50  ;;  %8155 = vmatprep.subr.bf16.mxu1 %v9822_v44  ;;  %8251 = vmatprep.subr.bf16.mxu0 %v9822_v44  ;;  %v9842_v59 = vsub.f32 %v131_v27, %v275_v39  ;;  %v283_v60 = vand.u32 4294901760, %v157_v47  ;;  %v281_v61 = vand.u32 4294901760, %v143_v48  ;;  %v285_v62 = vand.u32 4294901760, %v156_v49  ;;  %v235_v39 = vld [vmem:[#allocation5 + $0x620] sm:$0xff] }
  0x33   :  { %15100 = vst [vmem:[#allocation17_spill] sm:$0xff] %v9834_v53  ;;  %v9844_v3 = vpack.c.bf16 %v277_v57, %v273_v56  ;;  %v9846_v4 = vsub.f32 %v117_v40, %v273_v56  ;;  %v9848_v5 = vsub.f32 %v130_v41, %v277_v57  ;;  %v287_v6 = vand.u32 4294901760, %v170_v54  ;;  %v221_v40 = vld [vmem:[#allocation5 + $0x5b0] sm:$0xff]  ;;  %v234_v41 = vld [vmem:[#allocation5 + $0x618] sm:$0xff] }
  0x34   :  { %v9850_v10 = vpack.c.bf16 %v283_v60, %v279_v58  ;;  %v9852_v11 = vsub.f32 %v144_v42, %v279_v58  ;;  %v9854_v12 = vsub.f32 %v157_v47, %v283_v60  ;;  %v9856_v13 = vpack.c.bf16 %v285_v62, %v281_v61  ;;  %v38_v56 = vld [vmem:[#allocation2] sm:$0x1] }
  0x35   :  { %15101 = vst [vmem:[#allocation18_spill] sm:$0xff] %v9844_v3  ;;  %8157 = vmatpush1.bf16.msra.mxu1 %v9828_v50  ;;  %8253 = vmatpush1.bf16.msra.mxu0 %v9828_v50  ;;  %v9860_v15 = vsub.f32 %v143_v48, %v281_v61  ;;  %v9862_v19 = vsub.f32 %v156_v49, %v285_v62  ;;  %v291_v20 = vand.u32 4294901760, %v183_v63  ;;  %v289_v21 = vand.u32 4294901760, %v169_v1 }
  0x36   :  { %15102 = vst [vmem:[#allocation19_spill] sm:$0xff] %v9850_v10  ;;  %15103 = vst [vmem:[#allocation20_spill] sm:$0xff] %v9856_v13  ;;  %8159 = vmatprep.subr.bf16.mxu1 %v9834_v53  ;;  %8255 = vmatprep.subr.bf16.mxu0 %v9834_v53  ;;  %v293_v26 = vand.u32 4294901760, %v182_v2  ;;  %v295_v27 = vand.u32 4294901760, %v196_v7  ;;  %v299_v29 = vand.u32 4294901760, %v209_v8  ;;  %v297_v30 = vand.u32 4294901760, %v195_v9 }
  0x37   :  { %v9866_v32 = vpack.c.bf16 %v291_v20, %v287_v6  ;;  %v9868_v33 = vsub.f32 %v170_v54, %v287_v6  ;;  %v9870_v34 = vsub.f32 %v183_v63, %v291_v20  ;;  %v301_v35 = vand.u32 4294901760, %v208_v14 }
  0x38   :  { %v9872_v42 = vpack.c.bf16 %v293_v26, %v289_v21  ;;  %v9874_v47 = vsub.f32 %v169_v1, %v289_v21  ;;  %v9876_v48 = vsub.f32 %v182_v2, %v293_v26  ;;  %v9878_v49 = vpack.c.bf16 %v299_v29, %v295_v27 }
  0x39   :  { %15104 = vst [vmem:[#allocation21_spill] sm:$0xff] %v9866_v32  ;;  %8161 = vmatpush1.bf16.msra.mxu1 %v9844_v3  ;;  %8257 = vmatpush1.bf16.msra.mxu0 %v9844_v3  ;;  %v9882_v54 = vsub.f32 %v196_v7, %v295_v27  ;;  %v9884_v57 = vsub.f32 %v209_v8, %v299_v29  ;;  %v303_v60 = vand.u32 4294901760, %v222_v31  ;;  %v307_v62 = vand.u32 4294901760, %v235_v39 }
  0x3a   :  { %15105 = vst [vmem:[#allocation22_spill] sm:$0xff] %v9872_v42  ;;  %15106 = vst [vmem:[#allocation23_spill] sm:$0xff] %v9878_v49  ;;  %v9886_v58 = vpack.c.bf16 %v301_v35, %v297_v30  ;;  %8163 = vmatprep.subr.bf16.mxu1 %v9850_v10  ;;  %8259 = vmatprep.subr.bf16.mxu0 %v9850_v10  ;;  %v9890_v61 = vsub.f32 %v195_v9, %v297_v30  ;;  %v305_v63 = vand.u32 4294901760, %v221_v40 }
  0x3b   :  { %v309_v1 = vand.u32 4294901760, %v234_v41  ;;  %v9892_v2 = vsub.f32 %v208_v14, %v301_v35  ;;  %v357_v6 = vand.u32 4294901760, %v9794_v17  ;;  %v369_v7 = vand.u32 4294901760, %v9796_v18 }
  0x3c   :  { %15107 = vst [vmem:[#allocation24_spill] sm:$0xff] %v9886_v58  ;;  %v9896_v8 = vand.u32 4294901760, %v38_v56  ;;  %v9898_v20 = vpack.c.bf16 %v307_v62, %v303_v60  ;;  %v9900_v21 = vsub.f32 %v222_v31, %v303_v60  ;;  %v9902_v26 = vsub.f32 %v235_v39, %v307_v62 }
  0x3d   :  { %v9904_v27 = vpack.c.bf16 %v309_v1, %v305_v63  ;;  %8165 = vmatpush1.bf16.msra.mxu1 %v9856_v13  ;;  %8261 = vmatpush1.bf16.msra.mxu0 %v9856_v13  ;;  %v9908_v9 = vsub.f32 %v221_v40, %v305_v63  ;;  %v358_v14 = vsub.f32 %v9794_v17, %v357_v6  ;;  %v363_v30 = vand.u32 4294901760, %v9800_v23 }
  0x3e   :  { %15108 = vst [vmem:[#allocation25_spill] sm:$0xff] %v9896_v8  ;;  %15109 = vst [vmem:[#allocation26_spill] sm:$0xff] %v9898_v20  ;;  %v370_v29 = vsub.f32 %v9796_v18, %v369_v7  ;;  %8167 = vmatprep.subr.bf16.mxu1 %v9866_v32  ;;  %8263 = vmatprep.subr.bf16.mxu0 %v9866_v32  ;;  %v9915_v31 = vsub.f32 %v234_v41, %v309_v1  ;;  %v375_v39 = vand.u32 4294901760, %v9802_v24 }
  0x3f   :  { %15110 = vst [vmem:[#allocation27_spill] sm:$0xff] %v9900_v21  ;;  %15111 = vst [vmem:[#allocation28_spill] sm:$0xff] %v9902_v26  ;;  %v9918_v35 = vsub.f32 %v38_v56, %v9896_v8  ;;  %v381_v40 = vand.u32 4294901760, %v9808_v28  ;;  %v359_v60 = vand.u32 4294901760, %v358_v14  ;;  %v364_v63 = vsub.f32 %v9800_v23, %v363_v30 }
  0x40   :  { %15112 = vst [vmem:[#allocation29_spill] sm:$0xff] %v9904_v27  ;;  %15113 = vst [vmem:[#allocation30_spill] sm:$0xff] %v9908_v9  ;;  %v371_v62 = vand.u32 4294901760, %v370_v29  ;;  %v393_v0 = vand.u32 4294901760, %v9813_v36  ;;  %v8274_v13 = vpack.c.bf16 %v369_v7, %v357_v6  ;;  %v376_v41 = vsub.f32 %v9802_v24, %v375_v39 }
  0x41   :  { %15114 = vst [vmem:[#allocation31_spill] sm:$0xff] %v9915_v31  ;;  %15115 = vst [vmem:[#allocation32_spill] sm:$0xff] %v9918_v35  ;;  %v9925_v10 = vand.u32 4294901760, %v9918_v35  ;;  %v382_v1 = vsub.f32 %v9808_v28, %v381_v40  ;;  %8169 = vmatpush1.bf16.msra.mxu1 %v9872_v42  ;;  %8265 = vmatpush1.bf16.msra.mxu0 %v9872_v42  ;;  %v365_v32 = vand.u32 4294901760, %v364_v63  ;;  %v387_v53 = vand.u32 4294901760, %v9818_v38 }
  0x42   :  { %v8178_v56 = vpack.c.bf16 %v371_v62, %v359_v60  ;;  %v8276_v14 = vpack.c.bf16 %v375_v39, %v363_v30  ;;  %v394_v29 = vsub.f32 %v9813_v36, %v393_v0  ;;  %8171 = vmatprep.subr.bf16.mxu1 %v9878_v49  ;;  %8267 = vmatprep.subr.bf16.mxu0 %v9878_v49  ;;  %v377_v7 = vand.u32 4294901760, %v376_v41 }
  0x43   :  { %15116 = vst [vmem:[#allocation33_spill] sm:$0xff] %v9925_v10  ;;  %v347_v6 = vsub.f32 %v9918_v35, %v9925_v10  ;;  %v383_v3 = vand.u32 4294901760, %v382_v1  ;;  %v399_v44 = vand.u32 4294901760, %v9820_v43  ;;  %v405_v60 = vand.u32 4294901760, %v9824_v45 }
  0x44   :  { %v395_v50 = vand.u32 4294901760, %v394_v29  ;;  %v417_v30 = vand.u32 4294901760, %v9826_v46  ;;  %v8278_v62 = vpack.c.bf16 %v393_v0, %v381_v40  ;;  %v388_v63 = vsub.f32 %v9818_v38, %v387_v53 }
  0x45   :  { %v9940_v39 = vand.u32 4294901760, %v347_v6  ;;  %v411_v49 = vand.u32 4294901760, %v9830_v51  ;;  %8173 = vmatpush1.bf16.msra.mxu1 %v9886_v58  ;;  %8269 = vmatpush1.bf16.msra.mxu0 %v9886_v58  ;;  %v8180_v41 = vpack.c.bf16 %v377_v7, %v365_v32  ;;  %v400_v29 = vsub.f32 %v9820_v43, %v399_v44 }
  0x46   :  { %v8182_v1 = vpack.c.bf16 %v395_v50, %v383_v3  ;;  %v423_v35 = vand.u32 4294901760, %v9832_v52  ;;  %8175 = vmatprep.subr.bf16.mxu1 %v9898_v20  ;;  %8271 = vmatprep.subr.bf16.mxu0 %v9898_v20  ;;  %v389_v6 = vand.u32 4294901760, %v388_v63  ;;  %v8280_v0 = vpack.c.bf16 %v399_v44, %v387_v53 }
  0x47   :  { %15117 = vst [vmem:[#allocation34_spill] sm:$0xff] %v9940_v39  ;;  %v406_v40 = vsub.f32 %v9824_v45, %v405_v60  ;;  %v418_v42 = vsub.f32 %v9826_v46, %v417_v30  ;;  %v401_v37 = vand.u32 4294901760, %v400_v29  ;;  %v8282_v25 = vpack.c.bf16 %v417_v30, %v405_v60 }
  0x48   :  { %v412_v58 = vsub.f32 %v9830_v51, %v411_v49  ;;  %v424_v50 = vsub.f32 %v9832_v52, %v423_v35  ;;  %v429_v7 = vand.u32 4294901760, %v9838_v55  ;;  %v441_v22 = vand.u32 4294901760, %v9842_v59 }
  0x49   :  { %v407_v3 = vand.u32 4294901760, %v406_v40  ;;  %v419_v32 = vand.u32 4294901760, %v418_v42  ;;  %8177 = vmatpush1.bf16.msra.mxu1 %v9904_v27  ;;  %8273 = vmatpush1.bf16.msra.mxu0 %v9904_v27  ;;  %v8284_v63 = vpack.c.bf16 %v423_v35, %v411_v49  ;;  %v435_v29 = vand.u32 4294901760, %v9846_v4 }
  0x4a   :  { %v413_v44 = vand.u32 4294901760, %v412_v58  ;;  %v425_v53 = vand.u32 4294901760, %v424_v50  ;;  %8179 = vmatprep.subr.bf16.mxu1 %v8178_v56  ;;  %8275 = vmatprep.subr.bf16.mxu0 %v8274_v13  ;;  %v8184_v60 = vpack.c.bf16 %v401_v37, %v389_v6  ;;  %v430_v30 = vsub.f32 %v9838_v55, %v429_v7 }
  0x4b   :  { %v442_v42 = vsub.f32 %v9842_v59, %v441_v22  ;;  %v447_v40 = vand.u32 4294901760, %v9848_v5  ;;  %v8186_v20 = vpack.c.bf16 %v419_v32, %v407_v3  ;;  %v436_v16 = vsub.f32 %v9846_v4, %v435_v29 }
  0x4c   :  { %v8188_v8 = vpack.c.bf16 %v425_v53, %v413_v44  ;;  %v453_v27 = vand.u32 4294901760, %v9852_v11  ;;  %349 = vmatmul.mubr.f32.vlgmr.msra.gmra.mrb[0].mxu1 %v9940_v39  ;;  %824 = vmatmul.mubr.f32.vlgmr.msra.gmra.mrb[0].mxu0 %v9925_v10  ;;  %v431_v49 = vand.u32 4294901760, %v430_v30  ;;  %v8286_v13 = vpack.c.bf16 %v441_v22, %v429_v7 }
  0x4d   :  { %v443_v58 = vand.u32 4294901760, %v442_v42  ;;  %v448_v37 = vsub.f32 %v9848_v5, %v447_v40  ;;  %8181 = vmatpush1.bf16.msra.mxu1 %v8180_v41  ;;  %8277 = vmatpush1.bf16.msra.mxu0 %v8276_v14  ;;  %v437_v35 = vand.u32 4294901760, %v436_v16  ;;  %v465_v6 = vand.u32 4294901760, %v9854_v12 }
  0x4e   :  { %v454_v56 = vsub.f32 %v9852_v11, %v453_v27  ;;  %v459_v50 = vand.u32 4294901760, %v9860_v15  ;;  %8183 = vmatprep.subr.bf16.mxu1 %v8182_v1  ;;  %8279 = vmatprep.subr.bf16.mxu0 %v8278_v62  ;;  %v8288_v32 = vpack.c.bf16 %v447_v40, %v435_v29  ;;  %v471_v44 = vand.u32 4294901760, %v9862_v19 }
  0x4f   :  { %v449_v3 = vand.u32 4294901760, %v448_v37  ;;  %v477_v53 = vand.u32 4294901760, %v9868_v33  ;;  %v8190_v22 = vpack.c.bf16 %v443_v58, %v431_v49  ;;  %v466_v41 = vsub.f32 %v9854_v12, %v465_v6 }
  0x50   :  { %v455_v7 = vand.u32 4294901760, %v454_v56  ;;  %v460_v16 = vsub.f32 %v9860_v15, %v459_v50  ;;  %v15118_v14 = vmov 0.0   ;;  %v8290_v42 = vpack.c.bf16 %v465_v6, %v453_v27 }
  0x51   :  { %579 = vmatprep.mubr.f32.mxu1 %v15118_v14  ;;  %990 = vmatprep.mubr.f32.mxu0 %v15118_v14  ;;  %v8192_v30 = vpack.c.bf16 %v449_v3, %v437_v35  ;;  %v472_v62 = vsub.f32 %v9862_v19, %v471_v44  ;;  %v478_v1 = vsub.f32 %v9868_v33, %v477_v53  ;;  %v467_v29 = vand.u32 4294901760, %v466_v41 }
  0x52   :  { %8185 = vmatpush1.bf16.msra.mxu1 %v8184_v60  ;;  %8281 = vmatpush1.bf16.msra.mxu0 %v8280_v0  ;;  %v461_v40 = vand.u32 4294901760, %v460_v16  ;;  %v489_v49 = vand.u32 4294901760, %v9870_v34  ;;  %v483_v58 = vand.u32 4294901760, %v9874_v47  ;;  %v8292_v56 = vpack.c.bf16 %v471_v44, %v459_v50 }
  0x53   :  { %8187 = vmatprep.subr.bf16.mxu1 %v8186_v20  ;;  %8283 = vmatprep.subr.bf16.mxu0 %v8282_v25  ;;  %v473_v37 = vand.u32 4294901760, %v472_v62  ;;  %v495_v10 = vand.u32 4294901760, %v9876_v48  ;;  %v501_v27 = vand.u32 4294901760, %v9882_v54  ;;  %v8194_v35 = vpack.c.bf16 %v467_v29, %v455_v7 }
  0x54   :  { %v479_v6 = vand.u32 4294901760, %v478_v1  ;;  %v490_v3 = vsub.f32 %v9870_v34, %v489_v49  ;;  %v484_v0 = vsub.f32 %v9874_v47, %v483_v58  ;;  %v8294_v41 = vpack.c.bf16 %v489_v49, %v477_v53 }
  0x55   :  { %v8196_v60 = vpack.c.bf16 %v473_v37, %v461_v40  ;;  %v496_v16 = vsub.f32 %v9876_v48, %v495_v10  ;;  %v502_v39 = vsub.f32 %v9882_v54, %v501_v27  ;;  %v513_v50 = vand.u32 4294901760, %v9884_v57 }
  0x56   :  { %8189 = vmatpush1.bf16.msra.mxu1 %v8188_v8  ;;  %8285 = vmatpush1.bf16.msra.mxu0 %v8284_v63  ;;  %v491_v25 = vand.u32 4294901760, %v490_v3  ;;  %v485_v20 = vand.u32 4294901760, %v484_v0  ;;  %v507_v44 = vand.u32 4294901760, %v9890_v61  ;;  %v8296_v62 = vpack.c.bf16 %v495_v10, %v483_v58 }
  0x57   :  { %8191 = vmatprep.subr.bf16.mxu1 %v8190_v22  ;;  %8287 = vmatprep.subr.bf16.mxu0 %v8286_v13  ;;  %v497_v7 = vand.u32 4294901760, %v496_v16  ;;  %v519_v1 = vand.u32 4294901760, %v9892_v2  ;;  %v525_v53 = vand.u32 4294901760, %v9900_v21  ;;  %v503_v40 = vand.u32 4294901760, %v502_v39 }
  0x58   :  { %v8198_v29 = vpack.c.bf16 %v491_v25, %v479_v6  ;;  %v514_v49 = vsub.f32 %v9884_v57, %v513_v50  ;;  %v508_v8 = vsub.f32 %v9890_v61, %v507_v44  ;;  %v8298_v37 = vpack.c.bf16 %v513_v50, %v501_v27 }
  0x59   :  { %v8200_v63 = vpack.c.bf16 %v497_v7, %v485_v20  ;;  %v520_v3 = vsub.f32 %v9892_v2, %v519_v1  ;;  %v526_v0 = vsub.f32 %v9900_v21, %v525_v53  ;;  %v537_v22 = vand.u32 4294901760, %v9902_v26 }
  0x5a   :  { %8193 = vmatpush1.bf16.msra.mxu1 %v8192_v30  ;;  %8289 = vmatpush1.bf16.msra.mxu0 %v8288_v32  ;;  %v515_v13 = vand.u32 4294901760, %v514_v49  ;;  %v509_v10 = vand.u32 4294901760, %v508_v8  ;;  %v531_v58 = vand.u32 4294901760, %v9908_v9  ;;  %v9996_v6 = vpack.c.bf16 %v519_v1, %v507_v44  ;;  %v81_v49 = vld [vmem:[#allocation5 + $0x150] sm:$0xff]  ;;  %v83_v32 = vld [vmem:[#allocation5 + $0x160] sm:$0xff] }
  0x5b   :  { %8195 = vmatprep.subr.bf16.mxu1 %v8194_v35  ;;  %8291 = vmatprep.subr.bf16.mxu0 %v8290_v42  ;;  %v521_v39 = vand.u32 4294901760, %v520_v3  ;;  %v527_v16 = vand.u32 4294901760, %v526_v0  ;;  %v543_v27 = vand.u32 4294901760, %v9915_v31  ;;  %v538_v20 = vsub.f32 %v9902_v26, %v537_v22  ;;  %v55_v0 = vld [vmem:[#allocation5 + $0x80] sm:$0xff]  ;;  %v68_v3 = vld [vmem:[#allocation5 + $0xe8] sm:$0xff] }
  0x5c   :  { %v8202_v25 = vpack.c.bf16 %v515_v13, %v503_v40  ;;  %v532_v30 = vsub.f32 %v9908_v9, %v531_v58  ;;  %v10003_v7 = vpack.c.bf16 %v537_v22, %v525_v53  ;;  %v44_v22 = vld [vmem:[#allocation5 + $0x28] sm:$0xff]  ;;  %v67_v26 = vld [vmem:[#allocation5 + $0xe0] sm:$0xff] }
  0x5d   :  { %v8204_v50 = vpack.c.bf16 %v521_v39, %v509_v10  ;;  %v544_v35 = vsub.f32 %v9915_v31, %v543_v27  ;;  %v10006_v42 = vpack.c.bf16 %v543_v27, %v531_v58  ;;  %v539_v44 = vand.u32 4294901760, %v538_v20  ;;  %v57_v58 = vld [vmem:[#allocation5 + $0x90] sm:$0xff]  ;;  %v56_v10 = vld [vmem:[#allocation5 + $0x88] sm:$0xff] }
  0x5e   :  { %8197 = vmatpush1.bf16.msra.mxu1 %v8196_v60  ;;  %8293 = vmatpush1.bf16.msra.mxu0 %v8292_v56  ;;  %v533_v1 = vand.u32 4294901760, %v532_v30  ;;  %v42_v60 = vld [vmem:[#allocation5 + $0x18] sm:$0xff]  ;;  %v41_v39 = vld [vmem:[#allocation5 + $0x10] sm:$0xff]  ;;  %v1106_v30 = vand.u32 4294901760, %v55_v0  ;;  %v1110_v31 = vand.u32 4294901760, %v68_v3 }
  0x5f   :  { %8199 = vmatprep.subr.bf16.mxu1 %v8198_v29  ;;  %8295 = vmatprep.subr.bf16.mxu0 %v8294_v41  ;;  %v545_v8 = vand.u32 4294901760, %v544_v35  ;;  %v8206_v13 = vpack.c.bf16 %v539_v44, %v527_v16  ;;  %v54_v35 = vld [vmem:[#allocation5 + $0x78] sm:$0xff]  ;;  %v43_v44 = vld [vmem:[#allocation5 + $0x20] sm:$0xff]  ;;  %v1102_v20 = vand.u32 4294901760, %v42_v60  ;;  %v1957_v29 = vand.u32 4294901760, %v44_v22 }
  0x60   :  { %v1961_v16 = vand.u32 4294901760, %v57_v58  ;;  %v1104_v56 = vand.u32 4294901760, %v41_v39  ;;  %v1959_v53 = vand.u32 4294901760, %v43_v44  ;;  %v1963_v41 = vand.u32 4294901760, %v56_v10 }
  0x61   :  { %v8208_v27 = vpack.c.bf16 %v545_v8, %v533_v1  ;;  %v10038_v40 = vpack.c.bf16 %v1106_v30, %v1102_v20  ;;  %v10040_v1 = vsub.f32 %v42_v60, %v1102_v20  ;;  %v10042_v8 = vsub.f32 %v55_v0, %v1106_v30 }
  0x62   :  { %8201 = vmatpush1.bf16.msra.mxu1 %v8200_v63  ;;  %8297 = vmatpush1.bf16.msra.mxu0 %v8296_v62  ;;  %v1108_v63 = vand.u32 4294901760, %v54_v35  ;;  %v10047_v21 = vsub.f32 %v44_v22, %v1957_v29  ;;  %v10049_v62 = vsub.f32 %v57_v58, %v1961_v16  ;;  %v10054_v60 = vsub.f32 %v41_v39, %v1104_v56  ;;  %v94_v39 = vld [vmem:[#allocation5 + $0x1b8] sm:$0xff] }
  0x63   :  { %8203 = vmatprep.subr.bf16.mxu1 %v8202_v25  ;;  %8299 = vmatprep.subr.bf16.mxu0 %v8298_v37  ;;  %15119 = vst [vmem:[#allocation35_spill] sm:$0xff] %v10038_v40  ;;  %15120 = vst [vmem:[#allocation36_spill] sm:$0xff] %v10042_v8  ;;  %v10044_v25 = vpack.c.bf16 %v1961_v16, %v1957_v29  ;;  %v70_v37 = vld [vmem:[#allocation5 + $0xf8] sm:$0xff]  ;;  %v80_v40 = vld [vmem:[#allocation5 + $0x148] sm:$0xff]  ;;  %v10058_v20 = vpack.c.bf16 %v1963_v41, %v1959_v53  ;;  %v1969_v30 = vand.u32 4294901760, %v83_v32 }
  0x64   :  { %15122 = vst [vmem:[#allocation38_spill] sm:$0xff] %v10047_v21  ;;  %15123 = vst [vmem:[#allocation39_spill] sm:$0xff] %v10049_v62  ;;  %v10051_v9 = vpack.c.bf16 %v1108_v63, %v1104_v56  ;;  %v10056_v0 = vsub.f32 %v54_v35, %v1108_v63  ;;  %v10060_v29 = vsub.f32 %v43_v44, %v1959_v53  ;;  %v1965_v58 = vand.u32 4294901760, %v70_v37  ;;  %v82_v16 = vld [vmem:[#allocation5 + $0x158] sm:$0xff]  ;;  %v107_v35 = vld [vmem:[#allocation5 + $0x220] sm:$0xff] }
  0x65   :  { %15121 = vst [vmem:[#allocation37_spill] sm:$0xff] %v10044_v25  ;;  %15125 = vst [vmem:[#allocation41_spill] sm:$0xff] %v10054_v60  ;;  %v10062_v22 = vsub.f32 %v56_v10, %v1963_v41  ;;  %v1116_v56 = vand.u32 4294901760, %v80_v40  ;;  %v96_v63 = vld [vmem:[#allocation5 + $0x1c8] sm:$0xff]  ;;  %v109_v44 = vld [vmem:[#allocation5 + $0x230] sm:$0xff] }
  0x66   :  { %8205 = vmatpush1.bf16.msra.mxu1 %v8204_v50  ;;  %8301 = vmatpush1.bf16.msra.mxu0 %v9996_v6  ;;  %15124 = vst [vmem:[#allocation40_spill] sm:$0xff] %v10051_v9  ;;  %15126 = vst [vmem:[#allocation42_spill] sm:$0xff] %v10058_v20  ;;  %v1114_v50 = vand.u32 4294901760, %v81_v49  ;;  %v69_v6 = vld [vmem:[#allocation5 + $0xf0] sm:$0xff]  ;;  %v10071_v53 = vpack.c.bf16 %v1969_v30, %v1965_v58  ;;  %v10073_v10 = vsub.f32 %v70_v37, %v1965_v58 }
  0x67   :  { %8207 = vmatprep.subr.bf16.mxu1 %v8206_v13  ;;  %8303 = vmatprep.subr.bf16.mxu0 %v10003_v7  ;;  %15127 = vst [vmem:[#allocation43_spill] sm:$0xff] %v10062_v22  ;;  %v10066_v13 = vsub.f32 %v68_v3, %v1110_v31  ;;  %v1112_v7 = vand.u32 4294901760, %v67_v26  ;;  %v1967_v41 = vand.u32 4294901760, %v69_v6  ;;  %v93_v22 = vld [vmem:[#allocation5 + $0x1b0] sm:$0xff]  ;;  %v1118_v37 = vand.u32 4294901760, %v94_v39 }
  0x68   :  { %v10064_v9 = vpack.c.bf16 %v1114_v50, %v1110_v31  ;;  %v10069_v20 = vsub.f32 %v81_v49, %v1114_v50  ;;  %15131 = vst [vmem:[#allocation47_spill] sm:$0xff] %v10071_v53  ;;  %15132 = vst [vmem:[#allocation48_spill] sm:$0xff] %v10073_v10  ;;  %v15133_v31 = vpack.c.bf16 %v9796_v18, %v9794_v17  ;;  %v15134_v3 = vld [vmem:[#allocation11_spill] sm:$0xff]  ;;  %v1971_v49 = vand.u32 4294901760, %v82_v16  ;;  %v106_v50 = vld [vmem:[#allocation5 + $0x218] sm:$0xff] }
  0x69   :  { %15129 = vst [vmem:[#allocation45_spill] sm:$0xff] %v10066_v13  ;;  %v10079_v13 = vsub.f32 %v83_v32, %v1969_v30  ;;  %v1122_v58 = vand.u32 4294901760, %v107_v35  ;;  %v1973_v10 = vand.u32 4294901760, %v96_v63  ;;  %v95_v53 = vld [vmem:[#allocation5 + $0x1c0] sm:$0xff]  ;;  %v10091_v18 = vsub.f32 %v69_v6, %v1967_v41  ;;  %v122_v6 = vld [vmem:[#allocation5 + $0x298] sm:$0xff] }
  0x6a   :  { %15128 = vst [vmem:[#allocation44_spill] sm:$0xff] %v10064_v9  ;;  %8209 = vmatpush1.bf16.msra.mxu1 %v8208_v27  ;;  %8305 = vmatpush1.bf16.msra.mxu0 %v10006_v42  ;;  %15130 = vst [vmem:[#allocation46_spill] sm:$0xff] %v10069_v20  ;;  %v10081_v27 = vpack.c.bf16 %v1116_v56, %v1112_v7  ;;  %v10083_v42 = vsub.f32 %v67_v26, %v1112_v7  ;;  %v15139_v9 = vld [vmem:[#allocation25_spill] sm:$0xff]  ;;  %v1977_v32 = vand.u32 4294901760, %v109_v44  ;;  %v108_v26 = vld [vmem:[#allocation5 + $0x228] sm:$0xff] }
  0x6b   :  { %8211 = vmatprep.subr.bf16.mxu1 %v15133_v31  ;;  %8307 = vmatprep.subr.bf16.mxu0 %v15134_v3  ;;  %15135 = vst [vmem:[#allocation11_spill] sm:$0xff] %v10079_v13  ;;  %v10085_v20 = vsub.f32 %v80_v40, %v1116_v56  ;;  %v10089_v17 = vpack.c.bf16 %v1971_v49, %v1967_v41  ;;  %15141 = vst [vmem:[#allocation53_spill] sm:$0xff] %v10091_v18  ;;  %v1120_v30 = vand.u32 4294901760, %v93_v22  ;;  %v15143_v40 = vld [vmem:[#allocation12_spill] sm:$0xff]  ;;  %v15147_v18 = vld [vmem:[#allocation13_spill] sm:$0xff] }
  0x6c   :  { %15136 = vst [vmem:[#allocation49_spill] sm:$0xff] %v10081_v27  ;;  %15137 = vst [vmem:[#allocation50_spill] sm:$0xff] %v10083_v42  ;;  %v15142_v7 = vpack.c.bf16 %v9802_v24, %v9800_v23  ;;  %v10097_v56 = vsub.f32 %v82_v16, %v1971_v49  ;;  %v10099_v31 = vpack.c.bf16 %v1122_v58, %v1118_v37  ;;  %v120_v42 = vld [vmem:[#allocation5 + $0x288] sm:$0xff]  ;;  %v133_v13 = vld [vmem:[#allocation5 + $0x2f0] sm:$0xff]  ;;  %v1975_v49 = vand.u32 4294901760, %v95_v53 }
  0x6d   :  { %15138 = vst [vmem:[#allocation51_spill] sm:$0xff] %v10085_v20  ;;  %581 = vmatmul.mubr.f32.vlgmr.msra.gmra.mrb[0].mxu1 %v15139_v9  ;;  %992 = vmatmul.mubr.f32.vlgmr.msra.gmra.mrb[0].mxu0 %v15139_v9  ;;  %15140 = vst [vmem:[#allocation52_spill] sm:$0xff] %v10089_v17  ;;  %v10101_v3 = vsub.f32 %v94_v39, %v1118_v37  ;;  %v1124_v20 = vand.u32 4294901760, %v106_v50  ;;  %v15146_v41 = vpack.c.bf16 %v9813_v36, %v9808_v28  ;;  %v119_v39 = vld [vmem:[#allocation5 + $0x280] sm:$0xff] }
  0x6e   :  { %8213 = vmatpush1.bf16.msra.mxu1 %v15142_v7  ;;  %8309 = vmatpush1.bf16.msra.mxu0 %v15143_v40  ;;  %15144 = vst [vmem:[#allocation12_spill] sm:$0xff] %v10099_v31  ;;  %v10107_v23 = vsub.f32 %v107_v35, %v1122_v58  ;;  %v10109_v24 = vpack.c.bf16 %v1977_v32, %v1973_v10  ;;  %v135_v7 = vld [vmem:[#allocation5 + $0x300] sm:$0xff]  ;;  %v1979_v36 = vand.u32 4294901760, %v108_v26  ;;  %v132_v35 = vld [vmem:[#allocation5 + $0x2e8] sm:$0xff] }
  0x6f   :  { %15145 = vst [vmem:[#allocation54_spill] sm:$0xff] %v10101_v3  ;;  %8215 = vmatprep.subr.bf16.mxu1 %v15146_v41  ;;  %8311 = vmatprep.subr.bf16.mxu0 %v15147_v18  ;;  %v10111_v16 = vsub.f32 %v96_v63, %v1973_v10  ;;  %v10115_v37 = vsub.f32 %v109_v44, %v1977_v32  ;;  %v1126_v18 = vand.u32 4294901760, %v120_v42  ;;  %v1130_v63 = vand.u32 4294901760, %v133_v13 }
  0x70   :  { %15148 = vst [vmem:[#allocation13_spill] sm:$0xff] %v10107_v23  ;;  %15149 = vst [vmem:[#allocation55_spill] sm:$0xff] %v10109_v24  ;;  %715 = vmatprep.mubr.f32.mxu1 %v15118_v14  ;;  %1094 = vmatprep.mubr.f32.mxu0 %v15118_v14  ;;  %v10117_v40 = vpack.c.bf16 %v1124_v20, %v1120_v30  ;;  %v10119_v28 = vsub.f32 %v93_v22, %v1120_v30  ;;  %v1981_v10 = vand.u32 4294901760, %v122_v6  ;;  %v121_v30 = vld [vmem:[#allocation5 + $0x290] sm:$0xff] }
  0x71   :  { %15150 = vst [vmem:[#allocation56_spill] sm:$0xff] %v10111_v16  ;;  %15151 = vst [vmem:[#allocation57_spill] sm:$0xff] %v10115_v37  ;;  %v10121_v58 = vsub.f32 %v106_v50, %v1124_v20  ;;  %v15155_v41 = vpack.c.bf16 %v9820_v43, %v9818_v38  ;;  %v15156_v16 = vld [vmem:[#allocation14_spill] sm:$0xff]  ;;  %v10127_v23 = vpack.c.bf16 %v1979_v36, %v1975_v49  ;;  %v1985_v32 = vand.u32 4294901760, %v135_v7  ;;  %v146_v37 = vld [vmem:[#allocation5 + $0x358] sm:$0xff] }
  0x72   :  { %15152 = vst [vmem:[#allocation58_spill] sm:$0xff] %v10117_v40  ;;  %15153 = vst [vmem:[#allocation59_spill] sm:$0xff] %v10119_v28  ;;  %8313 = vmatpush1.bf16.msra.mxu0 %v15156_v16  ;;  %v10129_v44 = vsub.f32 %v95_v53, %v1975_v49  ;;  %v1128_v22 = vand.u32 4294901760, %v119_v39  ;;  %v134_v28 = vld [vmem:[#allocation5 + $0x2f8] sm:$0xff]  ;;  %v15159_v20 = vpack.c.bf16 %v9826_v46, %v9824_v45  ;;  %v15160_v50 = vld [vmem:[#allocation15_spill] sm:$0xff]  ;;  %v1132_v16 = vand.u32 4294901760, %v132_v35 }
  0x73   :  { %15154 = vst [vmem:[#allocation60_spill] sm:$0xff] %v10121_v58  ;;  %8217 = vmatpush1.bf16.msra.mxu1 %v15155_v41  ;;  %15157 = vst [vmem:[#allocation14_spill] sm:$0xff] %v10127_v23  ;;  %8315 = vmatprep.subr.bf16.mxu0 %v15160_v50  ;;  %v10135_v58 = vsub.f32 %v108_v26, %v1979_v36  ;;  %v10137_v38 = vpack.c.bf16 %v1130_v63, %v1126_v18  ;;  %v159_v53 = vld [vmem:[#allocation5 + $0x3c0] sm:$0xff]  ;;  %v148_v49 = vld [vmem:[#allocation5 + $0x368] sm:$0xff]  ;;  %v1983_v36 = vand.u32 4294901760, %v121_v30 }
  0x74   :  { %15158 = vst [vmem:[#allocation61_spill] sm:$0xff] %v10129_v44  ;;  %8219 = vmatprep.subr.bf16.mxu1 %v15159_v20  ;;  %v10139_v43 = vsub.f32 %v120_v42, %v1126_v18  ;;  %v161_v41 = vld [vmem:[#allocation5 + $0x3d0] sm:$0xff]  ;;  %v10141_v44 = vsub.f32 %v133_v13, %v1130_v63  ;;  %v10143_v23 = vpack.c.bf16 %v1985_v32, %v1981_v10  ;;  %v1987_v20 = vand.u32 4294901760, %v134_v28 }
  0x75   :  { %15161 = vst [vmem:[#allocation15_spill] sm:$0xff] %v10135_v58  ;;  %15162 = vst [vmem:[#allocation62_spill] sm:$0xff] %v10137_v38  ;;  %v10145_v40 = vsub.f32 %v122_v6, %v1981_v10  ;;  %v10147_v45 = vsub.f32 %v135_v7, %v1985_v32  ;;  %v10149_v46 = vpack.c.bf16 %v1132_v16, %v1128_v22  ;;  %v145_v42 = vld [vmem:[#allocation5 + $0x350] sm:$0xff]  ;;  %v1134_v13 = vand.u32 4294901760, %v146_v37  ;;  %v158_v10 = vld [vmem:[#allocation5 + $0x3b8] sm:$0xff] }
  0x76   :  { %15163 = vst [vmem:[#allocation63_spill] sm:$0xff] %v10139_v43  ;;  %15164 = vst [vmem:[#allocation64_spill] sm:$0xff] %v10141_v44  ;;  %v10151_v26 = vsub.f32 %v119_v39, %v1128_v22  ;;  %v15170_v18 = vpack.c.bf16 %v9832_v52, %v9830_v51  ;;  %v15171_v50 = vld [vmem:[#allocation16_spill] sm:$0xff]  ;;  %v1138_v63 = vand.u32 4294901760, %v159_v53  ;;  %v1989_v44 = vand.u32 4294901760, %v148_v49  ;;  %v147_v7 = vld [vmem:[#allocation5 + $0x360] sm:$0xff] }
  0x77   :  { %15165 = vst [vmem:[#allocation65_spill] sm:$0xff] %v10143_v23  ;;  %15166 = vst [vmem:[#allocation66_spill] sm:$0xff] %v10145_v40  ;;  %8317 = vmatpush1.bf16.msra.mxu0 %v15171_v50  ;;  %v1993_v6 = vand.u32 4294901760, %v161_v41  ;;  %v15172_v32 = vpack.c.bf16 %v9842_v59, %v9838_v55  ;;  %v15173_v39 = vld [vmem:[#allocation17_spill] sm:$0xff]  ;;  %v10161_v22 = vsub.f32 %v132_v35, %v1132_v16  ;;  %v160_v52 = vld [vmem:[#allocation5 + $0x3c8] sm:$0xff]  ;;  %v1136_v58 = vand.u32 4294901760, %v145_v42 }
  0x78   :  { %15167 = vst [vmem:[#allocation67_spill] sm:$0xff] %v10147_v45  ;;  %15168 = vst [vmem:[#allocation68_spill] sm:$0xff] %v10149_v46  ;;  %8221 = vmatpush1.bf16.msra.mxu1 %v15170_v18  ;;  %8319 = vmatprep.subr.bf16.mxu0 %v15173_v39  ;;  %v10165_v51 = vsub.f32 %v121_v30, %v1983_v36  ;;  %v172_v18 = vld [vmem:[#allocation5 + $0x428] sm:$0xff]  ;;  %v185_v50 = vld [vmem:[#allocation5 + $0x490] sm:$0xff]  ;;  %v10167_v45 = vsub.f32 %v134_v28, %v1987_v20  ;;  %v1140_v30 = vand.u32 4294901760, %v158_v10 }
  0x79   :  { %15169 = vst [vmem:[#allocation69_spill] sm:$0xff] %v10151_v26  ;;  %8223 = vmatprep.subr.bf16.mxu1 %v15172_v32  ;;  %15174 = vst [vmem:[#allocation16_spill] sm:$0xff] %v10161_v22  ;;  %v10163_v26 = vpack.c.bf16 %v1987_v20, %v1983_v36  ;;  %v10169_v40 = vpack.c.bf16 %v1138_v63, %v1134_v13  ;;  %v10171_v43 = vsub.f32 %v146_v37, %v1134_v13  ;;  %v174_v55 = vld [vmem:[#allocation5 + $0x438] sm:$0xff]  ;;  %v187_v59 = vld [vmem:[#allocation5 + $0x4a0] sm:$0xff] }
  0x7a   :  { %15176 = vst [vmem:[#allocation70_spill] sm:$0xff] %v10165_v51  ;;  %15177 = vst [vmem:[#allocation71_spill] sm:$0xff] %v10167_v45  ;;  %v10173_v32 = vsub.f32 %v159_v53, %v1138_v63  ;;  %v10175_v35 = vpack.c.bf16 %v1993_v6, %v1989_v44  ;;  %v10177_v16 = vsub.f32 %v148_v49, %v1989_v44  ;;  %v15184_v28 = vld [vmem:[#allocation18_spill] sm:$0xff]  ;;  %v1991_v20 = vand.u32 4294901760, %v147_v7  ;;  %v15186_v53 = vld [vmem:[#allocation19_spill] sm:$0xff] }
  0x7b   :  { %15175 = vst [vmem:[#allocation17_spill] sm:$0xff] %v10163_v26  ;;  %15178 = vst [vmem:[#allocation72_spill] sm:$0xff] %v10169_v40  ;;  %v15183_v36 = vpack.c.bf16 %v9848_v5, %v9846_v4  ;;  %8321 = vmatpush1.bf16.msra.mxu0 %v15184_v28  ;;  %v1995_v39 = vand.u32 4294901760, %v160_v52  ;;  %v1142_v37 = vand.u32 4294901760, %v172_v18  ;;  %v1146_v13 = vand.u32 4294901760, %v185_v50  ;;  %v171_v4 = vld [vmem:[#allocation5 + $0x420] sm:$0xff] }
  0x7c   :  { %15179 = vst [vmem:[#allocation73_spill] sm:$0xff] %v10171_v43  ;;  %15180 = vst [vmem:[#allocation74_spill] sm:$0xff] %v10173_v32  ;;  %v15185_v43 = vpack.c.bf16 %v9854_v12, %v9852_v11  ;;  %8323 = vmatprep.subr.bf16.mxu0 %v15186_v53  ;;  %v10187_v63 = vsub.f32 %v161_v41, %v1993_v6  ;;  %v10189_v44 = vsub.f32 %v145_v42, %v1136_v58  ;;  %v184_v5 = vld [vmem:[#allocation5 + $0x488] sm:$0xff]  ;;  %v186_v11 = vld [vmem:[#allocation5 + $0x498] sm:$0xff] }
  0x7d   :  { %15181 = vst [vmem:[#allocation75_spill] sm:$0xff] %v10175_v35  ;;  %15182 = vst [vmem:[#allocation76_spill] sm:$0xff] %v10177_v16  ;;  %8225 = vmatpush1.bf16.msra.mxu1 %v15183_v36  ;;  %v1997_v49 = vand.u32 4294901760, %v174_v55  ;;  %v2001_v16 = vand.u32 4294901760, %v187_v59  ;;  %v173_v36 = vld [vmem:[#allocation5 + $0x430] sm:$0xff]  ;;  %v10191_v28 = vpack.c.bf16 %v1140_v30, %v1136_v58  ;;  %v10193_v32 = vsub.f32 %v158_v10, %v1140_v30  ;;  %v198_v12 = vld [vmem:[#allocation5 + $0x4f8] sm:$0xff] }
  0x7e   :  { %8227 = vmatprep.subr.bf16.mxu1 %v15185_v43  ;;  %15187 = vst [vmem:[#allocation18_spill] sm:$0xff] %v10189_v44  ;;  %v10195_v45 = vpack.c.bf16 %v1995_v39, %v1991_v20  ;;  %v10197_v51 = vsub.f32 %v147_v7, %v1991_v20  ;;  %v211_v43 = vld [vmem:[#allocation5 + $0x560] sm:$0xff]  ;;  %v10199_v41 = vsub.f32 %v160_v52, %v1995_v39  ;;  %v200_v44 = vld [vmem:[#allocation5 + $0x508] sm:$0xff]  ;;  %v15197_v10 = vld [vmem:[#allocation20_spill] sm:$0xff]  ;;  %v1144_v30 = vand.u32 4294901760, %v171_v4 }
  0x7f   :  { %15188 = vst [vmem:[#allocation19_spill] sm:$0xff] %v10191_v28  ;;  %15189 = vst [vmem:[#allocation77_spill] sm:$0xff] %v10193_v32  ;;  %v10201_v42 = vpack.c.bf16 %v1146_v13, %v1142_v37  ;;  %v10203_v6 = vsub.f32 %v172_v18, %v1142_v37  ;;  %v10205_v53 = vsub.f32 %v185_v50, %v1146_v13  ;;  %8325 = vmatpush1.bf16.msra.mxu0 %v15197_v10  ;;  %v15200_v18 = vld [vmem:[#allocation21_spill] sm:$0xff] }
  0x80   :  { %15190 = vst [vmem:[#allocation78_spill] sm:$0xff] %v10195_v45  ;;  %15191 = vst [vmem:[#allocation79_spill] sm:$0xff] %v10197_v51  ;;  %v15196_v58 = vpack.c.bf16 %v9862_v19, %v9860_v15  ;;  %v10211_v7 = vpack.c.bf16 %v2001_v16, %v1997_v49  ;;  %v1148_v20 = vand.u32 4294901760, %v184_v5  ;;  %v1999_v51 = vand.u32 4294901760, %v173_v36  ;;  %8327 = vmatprep.subr.bf16.mxu0 %v15200_v18  ;;  %v213_v15 = vld [vmem:[#allocation5 + $0x570] sm:$0xff]  ;;  %v199_v32 = vld [vmem:[#allocation5 + $0x500] sm:$0xff] }
  0x81   :  { %15192 = vst [vmem:[#allocation80_spill] sm:$0xff] %v10199_v41  ;;  %15193 = vst [vmem:[#allocation81_spill] sm:$0xff] %v10201_v42  ;;  %v15199_v52 = vpack.c.bf16 %v9870_v34, %v9868_v33  ;;  %v10217_v50 = vsub.f32 %v174_v55, %v1997_v49  ;;  %v2003_v39 = vand.u32 4294901760, %v186_v11  ;;  %v1150_v37 = vand.u32 4294901760, %v198_v12  ;;  %v197_v19 = vld [vmem:[#allocation5 + $0x4f0] sm:$0xff]  ;;  %v212_v33 = vld [vmem:[#allocation5 + $0x568] sm:$0xff] }
  0x82   :  { %15194 = vst [vmem:[#allocation82_spill] sm:$0xff] %v10203_v6  ;;  %15195 = vst [vmem:[#allocation83_spill] sm:$0xff] %v10205_v53  ;;  %8229 = vmatpush1.bf16.msra.mxu1 %v15196_v58  ;;  %v1154_v13 = vand.u32 4294901760, %v211_v43  ;;  %v210_v58 = vld [vmem:[#allocation5 + $0x558] sm:$0xff]  ;;  %v10219_v10 = vsub.f32 %v187_v59, %v2001_v16  ;;  %v10221_v53 = vpack.c.bf16 %v1148_v20, %v1144_v30  ;;  %v2005_v41 = vand.u32 4294901760, %v200_v44  ;;  %v224_v34 = vld [vmem:[#allocation5 + $0x5c8] sm:$0xff] }
  0x83   :  { %15198 = vst [vmem:[#allocation20_spill] sm:$0xff] %v10211_v7  ;;  %8231 = vmatprep.subr.bf16.mxu1 %v15199_v52  ;;  %15201 = vst [vmem:[#allocation21_spill] sm:$0xff] %v10217_v50  ;;  %v10223_v6 = vsub.f32 %v171_v4, %v1144_v30  ;;  %v10225_v52 = vsub.f32 %v184_v5, %v1148_v20  ;;  %v10227_v55 = vpack.c.bf16 %v2003_v39, %v1999_v51  ;;  %v237_v50 = vld [vmem:[#allocation5 + $0x630] sm:$0xff]  ;;  %v15210_v16 = vld [vmem:[#allocation22_spill] sm:$0xff] }
  0x84   :  { %15202 = vst [vmem:[#allocation84_spill] sm:$0xff] %v10219_v10  ;;  %15203 = vst [vmem:[#allocation85_spill] sm:$0xff] %v10221_v53  ;;  %v10229_v49 = vsub.f32 %v173_v36, %v1999_v51  ;;  %v10231_v18 = vsub.f32 %v186_v11, %v2003_v39  ;;  %v15209_v59 = vpack.c.bf16 %v9876_v48, %v9874_v47  ;;  %8329 = vmatpush1.bf16.msra.mxu0 %v15210_v16  ;;  %v15214_v51 = vld [vmem:[#allocation23_spill] sm:$0xff]  ;;  %v226_v47 = vld [vmem:[#allocation5 + $0x5d8] sm:$0xff] }
  0x85   :  { %15204 = vst [vmem:[#allocation86_spill] sm:$0xff] %v10223_v6  ;;  %15205 = vst [vmem:[#allocation87_spill] sm:$0xff] %v10225_v52  ;;  %v10237_v4 = vpack.c.bf16 %v1154_v13, %v1150_v37  ;;  %v10239_v30 = vsub.f32 %v198_v12, %v1150_v37  ;;  %v2009_v6 = vand.u32 4294901760, %v213_v15  ;;  %v1152_v5 = vand.u32 4294901760, %v197_v19  ;;  %8331 = vmatprep.subr.bf16.mxu0 %v15214_v51  ;;  %v239_v37 = vld [vmem:[#allocation5 + $0x640] sm:$0xff]  ;;  %v225_v51 = vld [vmem:[#allocation5 + $0x5d0] sm:$0xff] }
  0x86   :  { %15206 = vst [vmem:[#allocation88_spill] sm:$0xff] %v10227_v55  ;;  %15207 = vst [vmem:[#allocation89_spill] sm:$0xff] %v10229_v49  ;;  %8233 = vmatpush1.bf16.msra.mxu1 %v15209_v59  ;;  %v15213_v20 = vpack.c.bf16 %v9884_v57, %v9882_v54  ;;  %v1156_v36 = vand.u32 4294901760, %v210_v58  ;;  %v2007_v11 = vand.u32 4294901760, %v199_v32  ;;  %v2011_v39 = vand.u32 4294901760, %v212_v33  ;;  %v236_v49 = vld [vmem:[#allocation5 + $0x628] sm:$0xff] }
  0x87   :  { %15208 = vst [vmem:[#allocation90_spill] sm:$0xff] %v10231_v18  ;;  %15211 = vst [vmem:[#allocation22_spill] sm:$0xff] %v10237_v4  ;;  %v1158_v18 = vand.u32 4294901760, %v224_v34  ;;  %v10245_v48 = vsub.f32 %v211_v43, %v1154_v13  ;;  %v10247_v59 = vpack.c.bf16 %v2009_v6, %v2005_v41  ;;  %v10249_v16 = vsub.f32 %v200_v44, %v2005_v41  ;;  %v238_v10 = vld [vmem:[#allocation5 + $0x638] sm:$0xff] }
  0x88   :  { %15212 = vst [vmem:[#allocation91_spill] sm:$0xff] %v10239_v30  ;;  %8235 = vmatprep.subr.bf16.mxu1 %v15213_v20  ;;  %v1162_v12 = vand.u32 4294901760, %v237_v50  ;;  %v223_v30 = vld [vmem:[#allocation5 + $0x5c0] sm:$0xff]  ;;  %v10251_v52 = vsub.f32 %v213_v15, %v2009_v6  ;;  %v10253_v54 = vpack.c.bf16 %v1156_v36, %v1152_v5  ;;  %v10255_v57 = vsub.f32 %v197_v19, %v1152_v5  ;;  %v15222_v44 = vld [vmem:[#allocation24_spill] sm:$0xff]  ;;  %v15227_v19 = vld [vmem:[#allocation27_spill] sm:$0xff] }
  0x89   :  { %15215 = vst [vmem:[#allocation23_spill] sm:$0xff] %v10245_v48  ;;  %15216 = vst [vmem:[#allocation92_spill] sm:$0xff] %v10247_v59  ;;  %v10257_v20 = vsub.f32 %v210_v58, %v1156_v36  ;;  %v15221_v43 = vpack.c.bf16 %v9892_v2, %v9890_v61  ;;  %8333 = vmatpush1.bf16.msra.mxu0 %v15222_v44  ;;  %v10263_v41 = vpack.c.bf16 %v2011_v39, %v2007_v11  ;;  %v15229_v58 = vld [vmem:[#allocation26_spill] sm:$0xff] }
  0x8a   :  { %15217 = vst [vmem:[#allocation93_spill] sm:$0xff] %v10251_v52  ;;  %15218 = vst [vmem:[#allocation94_spill] sm:$0xff] %v10253_v54  ;;  %v10265_v13 = vsub.f32 %v199_v32, %v2007_v11  ;;  %v10267_v6 = vsub.f32 %v212_v33, %v2011_v39  ;;  %v2013_v15 = vand.u32 4294901760, %v226_v47  ;;  %v15226_v52 = vld [vmem:[#allocation28_spill] sm:$0xff]  ;;  %8335 = vmatprep.subr.bf16.mxu0 %v15229_v58  ;;  %v1160_v61 = vand.u32 4294901760, %v223_v30 }
  0x8b   :  { %15219 = vst [vmem:[#allocation95_spill] sm:$0xff] %v10255_v57  ;;  %15220 = vst [vmem:[#allocation96_spill] sm:$0xff] %v10257_v20  ;;  %8237 = vmatpush1.bf16.msra.mxu1 %v15221_v43  ;;  %v15228_v5 = vpack.c.bf16 %v15226_v52, %v15227_v19  ;;  %v10273_v36 = vpack.c.bf16 %v1162_v12, %v1158_v18  ;;  %v2017_v20 = vand.u32 4294901760, %v239_v37  ;;  %v1164_v2 = vand.u32 4294901760, %v236_v49  ;;  %v15236_v19 = vld [vmem:[#allocation31_spill] sm:$0xff] }
  0x8c   :  { %15223 = vst [vmem:[#allocation24_spill] sm:$0xff] %v10263_v41  ;;  %15224 = vst [vmem:[#allocation97_spill] sm:$0xff] %v10265_v13  ;;  %v10275_v43 = vsub.f32 %v224_v34, %v1158_v18  ;;  %v2015_v44 = vand.u32 4294901760, %v225_v51  ;;  %v2019_v57 = vand.u32 4294901760, %v238_v10  ;;  %v14596_v32 = vand.u32 4294901760, %v10040_v1 }
  0x8d   :  { %15225 = vst [vmem:[#allocation98_spill] sm:$0xff] %v10267_v6  ;;  %8239 = vmatprep.subr.bf16.mxu1 %v15228_v5  ;;  %15230 = vst [vmem:[#allocation28_spill] sm:$0xff] %v10273_v36  ;;  %v10278_v33 = vsub.f32 %v237_v50, %v1162_v12  ;;  %v10280_v11 = vpack.c.bf16 %v2017_v20, %v2013_v15  ;;  %v10282_v39 = vsub.f32 %v226_v47, %v2013_v15  ;;  %v15237_v5 = vld [vmem:[#allocation30_spill] sm:$0xff]  ;;  %v15239_v6 = vld [vmem:[#allocation29_spill] sm:$0xff] }
  0x8e   :  { %15231 = vst [vmem:[#allocation27_spill] sm:$0xff] %v10275_v43  ;;  %v10284_v52 = vsub.f32 %v239_v37, %v2017_v20  ;;  %v15238_v58 = vpack.c.bf16 %v15236_v19, %v15237_v5  ;;  %8337 = vmatpush1.bf16.msra.mxu0 %v15239_v6  ;;  %v10290_v34 = vpack.c.bf16 %v1164_v2, %v1160_v61  ;;  %v14595_v50 = vand.u32 4294901760, %v10042_v8  ;;  %v15243_v12 = vld [vmem:[#allocation35_spill] sm:$0xff]  ;;  %v15248_v15 = vld [vmem:[#allocation42_spill] sm:$0xff] }
  0x8f   :  { %15232 = vst [vmem:[#allocation26_spill] sm:$0xff] %v10278_v33  ;;  %15233 = vst [vmem:[#allocation99_spill] sm:$0xff] %v10280_v11  ;;  %v10292_v18 = vsub.f32 %v223_v30, %v1160_v61  ;;  %v10294_v43 = vsub.f32 %v236_v49, %v1164_v2  ;;  %8531 = vmatprep.subr.bf16.mxu0 %v10044_v25  ;;  %v10299_v47 = vpack.c.bf16 %v2019_v57, %v2015_v44  ;;  %v15245_v2 = vld [vmem:[#allocation32_spill] sm:$0xff] }
  0x90   :  { %15234 = vst [vmem:[#allocation100_spill] sm:$0xff] %v10282_v39  ;;  %15235 = vst [vmem:[#allocation101_spill] sm:$0xff] %v10284_v52  ;;  %8241 = vmatpush1.bf16.msra.mxu1 %v15238_v58  ;;  %v1213_v37 = vsub.f32 %v10040_v1, %v14596_v32  ;;  %v14599_v20 = vand.u32 4294901760, %v10047_v21  ;;  %v14601_v6 = vand.u32 4294901760, %v10049_v62  ;;  %v1225_v49 = vsub.f32 %v10042_v8, %v14595_v50  ;;  %v15246_v50 = vld [vmem:[#allocation43_spill] sm:$0xff]  ;;  %v15247_v30 = vld [vmem:[#allocation40_spill] sm:$0xff] }
  0x91   :  { %15240 = vst [vmem:[#allocation31_spill] sm:$0xff] %v10290_v34  ;;  %15241 = vst [vmem:[#allocation30_spill] sm:$0xff] %v10292_v18  ;;  %8339 = vmatprep.subr.bf16.mxu1 %v15243_v12  ;;  %1096 = vmatmul.mubr.f32.vlgmr.msra.gmra.mrb[0].mxu0 %v15139_v9  ;;  %v15253_v32 = vld [vmem:[#allocation47_spill] sm:$0xff]  ;;  %v10340_v8 = vsub.f32 %v238_v10, %v2019_v57  ;;  %v15259_v57 = vld [vmem:[#allocation48_spill] sm:$0xff] }
  0x92   :  { %15242 = vst [vmem:[#allocation29_spill] sm:$0xff] %v10294_v43  ;;  %15244 = vst [vmem:[#allocation102_spill] sm:$0xff] %v10299_v47  ;;  %v1214_v19 = vand.u32 4294901760, %v1213_v37  ;;  %v2068_v5 = vsub.f32 %v10047_v21, %v14599_v20  ;;  %v2080_v58 = vsub.f32 %v10049_v62, %v14601_v6  ;;  %8533 = vmatpush1.bf16.msra.mxu0 %v15248_v15  ;;  %v1226_v61 = vand.u32 4294901760, %v1225_v49  ;;  %v15252_v6 = vld [vmem:[#allocation44_spill] sm:$0xff]  ;;  %v15255_v21 = vld [vmem:[#allocation45_spill] sm:$0xff] }
  0x93   :  { %718 = vmatmul.mubr.f32.vlgmr.msra.gmra.mrb[0].mxu1 %v15245_v2  ;;  %v15249_v2 = vand.u32 4294901760, %v10054_v60  ;;  %v15250_v37 = vand.u32 4294901760, %v10056_v0  ;;  %v15251_v20 = vand.u32 4294901760, %v10060_v29  ;;  %8535 = vmatprep.subr.bf16.mxu0 %v15253_v32  ;;  %v15254_v49 = vand.u32 4294901760, %v15246_v50  ;;  %15257 = vst [vmem:[#allocation103_spill] sm:$0xff] %v10340_v8 }
  0x94   :  { %8341 = vmatpush1.bf16.msra.mxu1 %v15247_v30  ;;  %v2069_v30 = vand.u32 4294901760, %v2068_v5  ;;  %v2081_v62 = vand.u32 4294901760, %v2080_v58  ;;  %1198 = vmatprep.mubr.f32.mxu1 %v15118_v14 }
  0x95   :  { %v1219_v25 = vsub.f32 %v10054_v60, %v15249_v2  ;;  %v1231_v12 = vsub.f32 %v10056_v0, %v15250_v37  ;;  %v2074_v9 = vsub.f32 %v10060_v29, %v15251_v20  ;;  %8343 = vmatprep.subr.bf16.mxu1 %v15252_v6  ;;  %v2086_v15 = vsub.f32 %v15246_v50, %v15254_v49  ;;  %v15258_v49 = vld [vmem:[#allocation46_spill] sm:$0xff] }
  0x96   :  { %v14611_v2 = vand.u32 4294901760, %v15255_v21  ;;  %v10338_v60 = vsub.f32 %v225_v51, %v2015_v44  ;;  %v10343_v37 = vpack.c.bf16 %v1226_v61, %v1214_v19  ;;  %2053 = vmatprep.mubr.f32.mxu0 %v15118_v14  ;;  %v14618_v6 = vand.u32 4294901760, %v15258_v49  ;;  %8537 = vmatpush1.bf16.msra.mxu0 %v10089_v17  ;;  %v15260_v44 = vld [vmem:[#allocation11_spill] sm:$0xff]  ;;  %v15261_v19 = vld [vmem:[#allocation50_spill] sm:$0xff] }
  0x97   :  { %v1220_v20 = vand.u32 4294901760, %v1219_v25  ;;  %v1232_v32 = vand.u32 4294901760, %v1231_v12  ;;  %v2075_v5 = vand.u32 4294901760, %v2074_v9  ;;  %v2087_v10 = vand.u32 4294901760, %v2086_v15  ;;  %8539 = vmatprep.subr.bf16.mxu0 %v10109_v24 }
  0x98   :  { %15256 = vst [vmem:[#allocation45_spill] sm:$0xff] %v10338_v60  ;;  %v1237_v58 = vsub.f32 %v15255_v21, %v14611_v2  ;;  %8345 = vmatpush1.bf16.msra.mxu1 %v10081_v27  ;;  %v14622_v51 = vand.u32 4294901760, %v15259_v57  ;;  %v14624_v61 = vand.u32 4294901760, %v15260_v44  ;;  %v10357_v9 = vpack.c.bf16 %v2081_v62, %v2069_v30  ;;  %v15262_v2 = vld [vmem:[#allocation51_spill] sm:$0xff]  ;;  %v15264_v30 = vld [vmem:[#allocation53_spill] sm:$0xff] }
  0x99   :  { %8347 = vmatprep.subr.bf16.mxu1 %v10099_v31  ;;  %v1249_v12 = vsub.f32 %v15258_v49, %v14618_v6  ;;  %v14626_v17 = vand.u32 4294901760, %v15262_v2  ;;  %v15263_v31 = vand.u32 4294901760, %v15261_v19  ;;  %v15267_v49 = vand.u32 4294901760, %v10097_v56 }
  0x9a   :  { %v1238_v25 = vand.u32 4294901760, %v1237_v58  ;;  %v2092_v15 = vsub.f32 %v15259_v57, %v14622_v51  ;;  %v2104_v50 = vsub.f32 %v15260_v44, %v14624_v61  ;;  %v14627_v58 = vand.u32 4294901760, %v15264_v30  ;;  %v15265_v51 = vld [vmem:[#allocation58_spill] sm:$0xff] }
  0x9b   :  { %v1243_v62 = vsub.f32 %v15261_v19, %v15263_v31  ;;  %v1250_v24 = vand.u32 4294901760, %v1249_v12  ;;  %v1255_v6 = vsub.f32 %v15262_v2, %v14626_v17  ;;  %v15266_v57 = vld [vmem:[#allocation14_spill] sm:$0xff]  ;;  %v10380_v61 = vpack.c.bf16 %v1232_v32, %v1220_v20 }
  0x9c   :  { %8349 = vmatpush1.bf16.msra.mxu1 %v15265_v51  ;;  %8541 = vmatpush1.bf16.msra.mxu0 %v15266_v57  ;;  %v10382_v44 = vpack.c.bf16 %v2087_v10, %v2075_v5  ;;  %v2093_v31 = vand.u32 4294901760, %v2092_v15  ;;  %v2098_v12 = vsub.f32 %v15264_v30, %v14627_v58  ;;  %v2105_v17 = vand.u32 4294901760, %v2104_v50  ;;  %v15269_v15 = vld [vmem:[#allocation13_spill] sm:$0xff]  ;;  %v15270_v58 = vld [vmem:[#allocation56_spill] sm:$0xff] }
  0x9d   :  { %8351 = vmatprep.subr.bf16.mxu1 %v10137_v38  ;;  %8543 = vmatprep.subr.bf16.mxu0 %v10143_v23  ;;  %v1244_v27 = vand.u32 4294901760, %v1243_v62  ;;  %v2110_v51 = vsub.f32 %v10097_v56, %v15267_v49  ;;  %v15268_v32 = vand.u32 4294901760, %v10101_v3  ;;  %v10395_v5 = vpack.c.bf16 %v1250_v24, %v1238_v25  ;;  %v15271_v50 = vld [vmem:[#allocation57_spill] sm:$0xff] }
  0x9e   :  { %v1256_v10 = vand.u32 4294901760, %v1255_v6  ;;  %v14636_v57 = vand.u32 4294901760, %v15269_v15  ;;  %v14642_v30 = vand.u32 4294901760, %v15270_v58  ;;  %v2099_v38 = vand.u32 4294901760, %v2098_v12  ;;  %v15272_v6 = vld [vmem:[#allocation59_spill] sm:$0xff] }
  0x9f   :  { %v1261_v20 = vsub.f32 %v10101_v3, %v15268_v32  ;;  %v2111_v2 = vand.u32 4294901760, %v2110_v51  ;;  %v14647_v62 = vand.u32 4294901760, %v15271_v50  ;;  %v14649_v25 = vand.u32 4294901760, %v15272_v6  ;;  %v15273_v32 = vld [vmem:[#allocation60_spill] sm:$0xff] }
  0xa0   :  { %8353 = vmatpush1.bf16.msra.mxu1 %v10149_v46  ;;  %8545 = vmatpush1.bf16.msra.mxu0 %v10163_v26  ;;  %v1273_v49 = vsub.f32 %v15269_v15, %v14636_v57  ;;  %v2116_v24 = vsub.f32 %v15270_v58, %v14642_v30  ;;  %v10412_v51 = vpack.c.bf16 %v2105_v17, %v2093_v31  ;;  %v15274_v26 = vld [vmem:[#allocation61_spill] sm:$0xff]  ;;  %v15275_v46 = vld [vmem:[#allocation15_spill] sm:$0xff] }
  0xa1   :  { %v1262_v23 = vand.u32 4294901760, %v1261_v20  ;;  %8355 = vmatprep.subr.bf16.mxu1 %v10169_v40  ;;  %8547 = vmatprep.subr.bf16.mxu0 %v10175_v35  ;;  %v2128_v20 = vsub.f32 %v15271_v50, %v14647_v62  ;;  %v14651_v57 = vand.u32 4294901760, %v15274_v26  ;;  %v14652_v15 = vand.u32 4294901760, %v15275_v46  ;;  %v15277_v50 = vld [vmem:[#allocation63_spill] sm:$0xff] }
  0xa2   :  { %v1274_v3 = vand.u32 4294901760, %v1273_v49  ;;  %v2117_v30 = vand.u32 4294901760, %v2116_v24  ;;  %v1267_v12 = vsub.f32 %v15272_v6, %v14649_v25  ;;  %v15276_v40 = vand.u32 4294901760, %v15273_v32 }
  0xa3   :  { %v2129_v17 = vand.u32 4294901760, %v2128_v20  ;;  %v2122_v31 = vsub.f32 %v15274_v26, %v14651_v57  ;;  %v2134_v62 = vsub.f32 %v15275_v46, %v14652_v15  ;;  %v14663_v49 = vand.u32 4294901760, %v15277_v50  ;;  %v15278_v20 = vld [vmem:[#allocation64_spill] sm:$0xff] }
  0xa4   :  { %v1279_v35 = vsub.f32 %v15273_v32, %v15276_v40  ;;  %8357 = vmatpush1.bf16.msra.mxu1 %v10191_v28  ;;  %8549 = vmatpush1.bf16.msra.mxu0 %v10195_v45  ;;  %v10434_v24 = vpack.c.bf16 %v1256_v10, %v1244_v27  ;;  %v10436_v25 = vpack.c.bf16 %v2111_v2, %v2099_v38  ;;  %v14662_v32 = vand.u32 4294901760, %v15278_v20  ;;  %v15280_v38 = vld [vmem:[#allocation67_spill] sm:$0xff] }
  0xa5   :  { %v10438_v40 = vpack.c.bf16 %v1274_v3, %v1262_v23  ;;  %8359 = vmatprep.subr.bf16.mxu1 %v10201_v42  ;;  %8551 = vmatprep.subr.bf16.mxu0 %v10211_v7  ;;  %v1268_v57 = vand.u32 4294901760, %v1267_v12  ;;  %v2123_v46 = vand.u32 4294901760, %v2122_v31  ;;  %v1285_v28 = vsub.f32 %v15277_v50, %v14663_v49  ;;  %v15279_v3 = vld [vmem:[#allocation66_spill] sm:$0xff]  ;;  %v15281_v7 = vld [vmem:[#allocation69_spill] sm:$0xff]  ;;  %v15283_v49 = vld [vmem:[#allocation71_spill] sm:$0xff] }
  0xa6   :  { %v1280_v15 = vand.u32 4294901760, %v1279_v35  ;;  %v2135_v45 = vand.u32 4294901760, %v2134_v62  ;;  %v1297_v27 = vsub.f32 %v15278_v20, %v14662_v32  ;;  %v14664_v23 = vand.u32 4294901760, %v15279_v3 }
  0xa7   :  { %v14670_v2 = vand.u32 4294901760, %v15280_v38  ;;  %v10451_v10 = vpack.c.bf16 %v2129_v17, %v2117_v30  ;;  %v1286_v42 = vand.u32 4294901760, %v1285_v28  ;;  %v14676_v12 = vand.u32 4294901760, %v15281_v7  ;;  %v15282_v30 = vld [vmem:[#allocation70_spill] sm:$0xff] }
  0xa8   :  { %v14677_v35 = vand.u32 4294901760, %v10161_v22  ;;  %8361 = vmatpush1.bf16.msra.mxu1 %v10221_v53  ;;  %8553 = vmatpush1.bf16.msra.mxu0 %v10227_v55  ;;  %v1298_v62 = vand.u32 4294901760, %v1297_v27  ;;  %v2140_v31 = vsub.f32 %v15279_v3, %v14664_v23  ;;  %v14680_v23 = vand.u32 4294901760, %v15283_v49  ;;  %v15284_v55 = vld [vmem:[#allocation73_spill] sm:$0xff] }
  0xa9   :  { %v2152_v32 = vsub.f32 %v15280_v38, %v14670_v2  ;;  %8363 = vmatprep.subr.bf16.mxu1 %v10237_v4  ;;  %8555 = vmatprep.subr.bf16.mxu0 %v10247_v59  ;;  %v1291_v28 = vsub.f32 %v15281_v7, %v14676_v12  ;;  %v14681_v53 = vand.u32 4294901760, %v15284_v55  ;;  %v10474_v3 = vpack.c.bf16 %v1280_v15, %v1268_v57  ;;  %v15287_v15 = vld [vmem:[#allocation76_spill] sm:$0xff] }
  0xaa   :  { %v1303_v27 = vsub.f32 %v10161_v22, %v14677_v35  ;;  %v10476_v2 = vpack.c.bf16 %v2135_v45, %v2123_v46  ;;  %v10478_v17 = vpack.c.bf16 %v1298_v62, %v1286_v42  ;;  %v15285_v59 = vand.u32 4294901760, %v15282_v30  ;;  %v15286_v42 = vld [vmem:[#allocation74_spill] sm:$0xff] }
  0xab   :  { %v2141_v38 = vand.u32 4294901760, %v2140_v31  ;;  %v2153_v12 = vand.u32 4294901760, %v2152_v32  ;;  %v2158_v35 = vsub.f32 %v15283_v49, %v14680_v23  ;;  %v1309_v22 = vsub.f32 %v15284_v55, %v14681_v53 }
  0xac   :  { %v2146_v4 = vsub.f32 %v15282_v30, %v15285_v59  ;;  %8365 = vmatpush1.bf16.msra.mxu1 %v10253_v54  ;;  %8557 = vmatpush1.bf16.msra.mxu0 %v10263_v41  ;;  %v1292_v45 = vand.u32 4294901760, %v1291_v28  ;;  %v1304_v46 = vand.u32 4294901760, %v1303_v27  ;;  %v14692_v57 = vand.u32 4294901760, %v15286_v42  ;;  %v15288_v27 = vld [vmem:[#allocation18_spill] sm:$0xff]  ;;  %v15289_v54 = vld [vmem:[#allocation77_spill] sm:$0xff] }
  0xad   :  { %v14693_v59 = vand.u32 4294901760, %v15287_v15  ;;  %8367 = vmatprep.subr.bf16.mxu1 %v10273_v36  ;;  %8559 = vmatprep.subr.bf16.mxu0 %v10280_v11  ;;  %v2159_v62 = vand.u32 4294901760, %v2158_v35  ;;  %v1310_v31 = vand.u32 4294901760, %v1309_v22  ;;  %v14694_v23 = vand.u32 4294901760, %v10187_v63  ;;  %v15291_v11 = vld [vmem:[#allocation80_spill] sm:$0xff] }
  0xae   :  { %v2147_v32 = vand.u32 4294901760, %v2146_v4  ;;  %v1321_v53 = vsub.f32 %v15286_v42, %v14692_v57  ;;  %v14699_v41 = vand.u32 4294901760, %v15288_v27  ;;  %v10504_v36 = vpack.c.bf16 %v2153_v12, %v2141_v38  ;;  %v15290_v4 = vld [vmem:[#allocation79_spill] sm:$0xff] }
  0xaf   :  { %v2164_v28 = vsub.f32 %v15287_v15, %v14693_v59  ;;  %v2176_v22 = vsub.f32 %v10187_v63, %v14694_v23  ;;  %v14702_v35 = vand.u32 4294901760, %v15290_v4  ;;  %v15292_v38 = vand.u32 4294901760, %v15289_v54 }
  0xb0   :  { %8369 = vmatpush1.bf16.msra.mxu1 %v10290_v34  ;;  %8561 = vmatpush1.bf16.msra.mxu0 %v10299_v47  ;;  %v1322_v57 = vand.u32 4294901760, %v1321_v53  ;;  %v1315_v55 = vsub.f32 %v15288_v27, %v14699_v41  ;;  %v15293_v53 = vand.u32 4294901760, %v15291_v11  ;;  %v15294_v47 = vld [vmem:[#allocation82_spill] sm:$0xff]  ;;  %v10528_v41 = vpack.c.bf16 %v1304_v46, %v1292_v45 }
  0xb1   :  { %v2165_v59 = vand.u32 4294901760, %v2164_v28  ;;  %v1327_v12 = vsub.f32 %v15289_v54, %v15292_v38  ;;  %8371 = vmatprep.subr.bf16.mxu1 %v10343_v37  ;;  %8563 = vmatprep.subr.bf16.mxu0 %v10357_v9  ;;  %v2177_v23 = vand.u32 4294901760, %v2176_v22  ;;  %v2170_v49 = vsub.f32 %v15290_v4, %v14702_v35  ;;  %v15295_v37 = vld [vmem:[#allocation83_spill] sm:$0xff]  ;;  %v15296_v9 = vld [vmem:[#allocation34_spill] sm:$0xff] }
  0xb2   :  { %v2182_v28 = vsub.f32 %v15291_v11, %v15293_v53  ;;  %v14704_v34 = vand.u32 4294901760, %v15294_v47  ;;  %v10530_v27 = vpack.c.bf16 %v2159_v62, %v2147_v32  ;;  %v10532_v38 = vpack.c.bf16 %v1322_v57, %v1310_v31  ;;  %v15297_v57 = vld [vmem:[#allocation21_spill] sm:$0xff]  ;;  %v15298_v62 = vld [vmem:[#allocation84_spill] sm:$0xff] }
  0xb3   :  { %v14706_v54 = vand.u32 4294901760, %v15295_v37  ;;  %1204 = vmatmul.mubr.f32.vlgmr.msra.gmra.mrb[2].mxu1 %v15296_v9  ;;  %2059 = vmatmul.mubr.f32.vlgmr.msra.gmra.mrb[2].mxu0 %v15296_v9  ;;  %v1316_v22 = vand.u32 4294901760, %v1315_v55  ;;  %v1328_v35 = vand.u32 4294901760, %v1327_v12  ;;  %v2171_v4 = vand.u32 4294901760, %v2170_v49  ;;  %v15299_v12 = vld [vmem:[#allocation86_spill] sm:$0xff] }
  0xb4   :  { %v1333_v53 = vsub.f32 %v15294_v47, %v14704_v34  ;;  %8373 = vmatpush1.bf16.msra.mxu1 %v10380_v61  ;;  %8565 = vmatpush1.bf16.msra.mxu0 %v10382_v44  ;;  %v2183_v45 = vand.u32 4294901760, %v2182_v28  ;;  %v14710_v32 = vand.u32 4294901760, %v15297_v57  ;;  %v14709_v31 = vand.u32 4294901760, %v15298_v62  ;;  %v15300_v61 = vld [vmem:[#allocation87_spill] sm:$0xff] }
  0xb5   :  { %v1345_v46 = vsub.f32 %v15295_v37, %v14706_v54  ;;  %8375 = vmatprep.subr.bf16.mxu1 %v10395_v5  ;;  %8567 = vmatprep.subr.bf16.mxu0 %v10412_v51  ;;  %v8578_v55 = vpack.c.bf16 %v2177_v23, %v2165_v59  ;;  %v14712_v34 = vand.u32 4294901760, %v15299_v12  ;;  %v14713_v9 = vand.u32 4294901760, %v15300_v61  ;;  %v15301_v37 = vld [vmem:[#allocation89_spill] sm:$0xff]  ;;  %v15302_v23 = vld [vmem:[#allocation90_spill] sm:$0xff] }
  0xb6   :  { %v1334_v49 = vand.u32 4294901760, %v1333_v53  ;;  %v2188_v28 = vsub.f32 %v15297_v57, %v14710_v32  ;;  %v2200_v54 = vsub.f32 %v15298_v62, %v14709_v31  ;;  %v14714_v47 = vand.u32 4294901760, %v15301_v37  ;;  %1434 = vmatprep.mubr.f32.mxu1 %v15118_v14  ;;  %2289 = vmatprep.mubr.f32.mxu0 %v15118_v14  ;;  %v15303_v53 = vld [vmem:[#allocation91_spill] sm:$0xff] }
  0xb7   :  { %v1346_v44 = vand.u32 4294901760, %v1345_v46  ;;  %v1339_v5 = vsub.f32 %v15299_v12, %v14712_v34  ;;  %v1351_v51 = vsub.f32 %v15300_v61, %v14713_v9  ;;  %v14717_v59 = vand.u32 4294901760, %v15302_v23 }
  0xb8   :  { %8377 = vmatpush1.bf16.msra.mxu1 %v10434_v24  ;;  %8569 = vmatpush1.bf16.msra.mxu0 %v10436_v25  ;;  %v8388_v31 = vpack.c.bf16 %v1328_v35, %v1316_v22  ;;  %v8580_v32 = vpack.c.bf16 %v2183_v45, %v2171_v4  ;;  %v2194_v62 = vsub.f32 %v15301_v37, %v14714_v47  ;;  %v2189_v9 = vand.u32 4294901760, %v2188_v28  ;;  %v15306_v28 = vld [vmem:[#allocation95_spill] sm:$0xff] }
  0xb9   :  { %8379 = vmatprep.subr.bf16.mxu1 %v10438_v40  ;;  %8571 = vmatprep.subr.bf16.mxu0 %v10451_v10  ;;  %v8390_v34 = vpack.c.bf16 %v1346_v44, %v1334_v49  ;;  %v2206_v46 = vsub.f32 %v15302_v23, %v14717_v59  ;;  %v15304_v24 = vand.u32 4294901760, %v15303_v53  ;;  %v2201_v35 = vand.u32 4294901760, %v2200_v54  ;;  %v15305_v10 = vld [vmem:[#allocation93_spill] sm:$0xff] }
  0xba   :  { %v1340_v4 = vand.u32 4294901760, %v1339_v5  ;;  %v14716_v22 = vand.u32 4294901760, %v10245_v48  ;;  %v14720_v45 = vand.u32 4294901760, %v10249_v16  ;;  %v1352_v47 = vand.u32 4294901760, %v1351_v51 }
  0xbb   :  { %v1357_v25 = vsub.f32 %v15303_v53, %v15304_v24  ;;  %v2195_v40 = vand.u32 4294901760, %v2194_v62  ;;  %v2207_v37 = vand.u32 4294901760, %v2206_v46  ;;  %v14721_v49 = vand.u32 4294901760, %v15305_v10  ;;  %v15307_v24 = vld [vmem:[#allocation96_spill] sm:$0xff]  ;;  %v15308_v46 = vld [vmem:[#allocation98_spill] sm:$0xff] }
  0xbc   :  { %8381 = vmatpush1.bf16.msra.mxu1 %v10474_v3  ;;  %8573 = vmatpush1.bf16.msra.mxu0 %v10476_v2  ;;  %v1369_v44 = vsub.f32 %v10245_v48, %v14716_v22  ;;  %v2212_v54 = vsub.f32 %v10249_v16, %v14720_v45  ;;  %v14723_v5 = vand.u32 4294901760, %v15306_v28  ;;  %v14725_v51 = vand.u32 4294901760, %v15307_v24 }
  0xbd   :  { %8383 = vmatprep.subr.bf16.mxu1 %v10478_v17  ;;  %8575 = vmatprep.subr.bf16.mxu0 %v10504_v36  ;;  %v1358_v62 = vand.u32 4294901760, %v1357_v25  ;;  %v2224_v3 = vsub.f32 %v15305_v10, %v14721_v49  ;;  %v14726_v2 = vand.u32 4294901760, %v10265_v13  ;;  %v14729_v22 = vand.u32 4294901760, %v15308_v46  ;;  %v15309_v10 = vld [vmem:[#allocation27_spill] sm:$0xff] }
  0xbe   :  { %v1370_v59 = vand.u32 4294901760, %v1369_v44  ;;  %v2213_v48 = vand.u32 4294901760, %v2212_v54  ;;  %v1363_v45 = vsub.f32 %v15306_v28, %v14723_v5  ;;  %v1375_v17 = vsub.f32 %v15307_v24, %v14725_v51 }
  0xbf   :  { %v2225_v36 = vand.u32 4294901760, %v2224_v3  ;;  %v2218_v25 = vsub.f32 %v10265_v13, %v14726_v2  ;;  %v2230_v49 = vsub.f32 %v15308_v46, %v14729_v22  ;;  %v14738_v44 = vand.u32 4294901760, %v15309_v10 }
  0xc0   :  { %8385 = vmatpush1.bf16.msra.mxu1 %v10528_v41  ;;  %8577 = vmatpush1.bf16.msra.mxu0 %v10530_v27  ;;  %v8582_v54 = vpack.c.bf16 %v2201_v35, %v2189_v9  ;;  %v8392_v5 = vpack.c.bf16 %v1352_v47, %v1340_v4  ;;  %v8584_v28 = vpack.c.bf16 %v2207_v37, %v2195_v40  ;;  %v14737_v51 = vand.u32 4294901760, %v10278_v33 }
  0xc1   :  { %8387 = vmatprep.subr.bf16.mxu1 %v10532_v38  ;;  %8579 = vmatprep.subr.bf16.mxu0 %v8578_v55  ;;  %v8394_v3 = vpack.c.bf16 %v1370_v59, %v1358_v62  ;;  %v1364_v2 = vand.u32 4294901760, %v1363_v45  ;;  %v1376_v13 = vand.u32 4294901760, %v1375_v17  ;;  %v1381_v22 = vsub.f32 %v15309_v10, %v14738_v44  ;;  %v15325_v44 = vld [vmem:[#allocation66_spill] sm:$0xff] }
  0xc2   :  { %v8586_v46 = vpack.c.bf16 %v2225_v36, %v2213_v48  ;;  %v1393_v41 = vsub.f32 %v10278_v33, %v14737_v51  ;;  %v14736_v47 = vand.u32 4294901760, %v10282_v39  ;;  %v14735_v27 = vand.u32 4294901760, %v10284_v52 }
  0xc3   :  { %v2219_v37 = vand.u32 4294901760, %v2218_v25  ;;  %v2231_v9 = vand.u32 4294901760, %v2230_v49  ;;  %v14732_v38 = vand.u32 4294901760, %v10292_v18  ;;  %v14731_v55 = vand.u32 4294901760, %v10294_v43 }
  0xc4   :  { %8389 = vmatpush1.bf16.msra.mxu1 %v8388_v31  ;;  %8581 = vmatpush1.bf16.msra.mxu0 %v8580_v32  ;;  %v1382_v59 = vand.u32 4294901760, %v1381_v22  ;;  %v2236_v48 = vsub.f32 %v10282_v39, %v14736_v47  ;;  %v2248_v35 = vsub.f32 %v10284_v52, %v14735_v27  ;;  %v14733_v4 = vand.u32 4294901760, %v10338_v60  ;;  %v15324_v27 = vld [vmem:[#allocation15_spill] sm:$0xff] }
  0xc5   :  { %8391 = vmatprep.subr.bf16.mxu1 %v8390_v34  ;;  %8583 = vmatprep.subr.bf16.mxu0 %v8582_v54  ;;  %v1394_v45 = vand.u32 4294901760, %v1393_v41  ;;  %v1387_v40 = vsub.f32 %v10292_v18, %v14732_v38  ;;  %v1399_v32 = vsub.f32 %v10294_v43, %v14731_v55  ;;  %v14734_v31 = vand.u32 4294901760, %v10340_v8 }
  0xc6   :  { %v2237_v22 = vand.u32 4294901760, %v2236_v48  ;;  %v2249_v49 = vand.u32 4294901760, %v2248_v35  ;;  %v2242_v62 = vsub.f32 %v10338_v60, %v14733_v4  ;;  %v8396_v17 = vpack.c.bf16 %v1376_v13, %v1364_v2  ;;  %v15310_v13 = vld [vmem:[#allocation36_spill] sm:$0xff] }
  0xc7   :  { %v2254_v34 = vsub.f32 %v10340_v8, %v14734_v31  ;;  %v8588_v36 = vpack.c.bf16 %v2231_v9, %v2219_v37  ;;  %v1388_v25 = vand.u32 4294901760, %v1387_v40  ;;  %v1400_v54 = vand.u32 4294901760, %v1399_v32  ;;  %v15313_v9 = vld [vmem:[#allocation41_spill] sm:$0xff]  ;;  %v15316_v32 = vld [vmem:[#allocation48_spill] sm:$0xff]  ;;  %v15326_v8 = vld [vmem:[#allocation67_spill] sm:$0xff] }
  0xc8   :  { %8393 = vmatpush1.bf16.msra.mxu1 %v8392_v5  ;;  %8585 = vmatpush1.bf16.msra.mxu0 %v8584_v28  ;;  %v2243_v41 = vand.u32 4294901760, %v2242_v62  ;;  %v8398_v55 = vpack.c.bf16 %v1394_v45, %v1382_v59  ;;  %v8590_v48 = vpack.c.bf16 %v2249_v49, %v2237_v22  ;;  %v8402_v2 = vpack.c.bf16 %v15310_v13, %v10040_v1  ;;  %v15311_v5 = vld [vmem:[#allocation38_spill] sm:$0xff]  ;;  %v15312_v28 = vld [vmem:[#allocation39_spill] sm:$0xff] }
  0xc9   :  { %8395 = vmatprep.subr.bf16.mxu1 %v8394_v3  ;;  %8587 = vmatprep.subr.bf16.mxu0 %v8586_v46  ;;  %v2255_v35 = vand.u32 4294901760, %v2254_v34  ;;  %v8400_v38 = vpack.c.bf16 %v1400_v54, %v1388_v25  ;;  %v8594_v37 = vpack.c.bf16 %v15312_v28, %v15311_v5  ;;  %v8404_v40 = vpack.c.bf16 %v10056_v0, %v15313_v9  ;;  %v15314_v46 = vld [vmem:[#allocation43_spill] sm:$0xff]  ;;  %v15315_v59 = vld [vmem:[#allocation46_spill] sm:$0xff]  ;;  %v15321_v25 = vld [vmem:[#allocation13_spill] sm:$0xff] }
  0xca   :  { %v8596_v3 = vpack.c.bf16 %v15314_v46, %v10060_v29  ;;  %v8406_v45 = vpack.c.bf16 %v15315_v59, %v15255_v21  ;;  %v15317_v22 = vld [vmem:[#allocation11_spill] sm:$0xff]  ;;  %v8604_v47 = vpack.c.bf16 %v15324_v27, %v15274_v26  ;;  %v8414_v51 = vpack.c.bf16 %v15278_v20, %v15277_v50 }
  0xcb   :  { %v8592_v4 = vpack.c.bf16 %v2255_v35, %v2243_v41  ;;  %v8598_v49 = vpack.c.bf16 %v15317_v22, %v15316_v32  ;;  %v15322_v41 = vld [vmem:[#allocation57_spill] sm:$0xff]  ;;  %v15323_v35 = vld [vmem:[#allocation60_spill] sm:$0xff]  ;;  %v8606_v60 = vpack.c.bf16 %v15326_v8, %v15325_v44  ;;  %v15329_v18 = vand.u32 4294901760, %v15311_v5 }
  0xcc   :  { %8397 = vmatpush1.bf16.msra.mxu1 %v8396_v17  ;;  %8589 = vmatpush1.bf16.msra.mxu0 %v8588_v36  ;;  %v15319_v17 = vld [vmem:[#allocation53_spill] sm:$0xff]  ;;  %v15320_v36 = vld [vmem:[#allocation54_spill] sm:$0xff]  ;;  %v8412_v31 = vpack.c.bf16 %v15323_v35, %v15272_v6  ;;  %v15330_v52 = vand.u32 4294901760, %v15312_v28  ;;  %v15333_v10 = vand.u32 4294901760, %v10060_v29  ;;  %v15336_v5 = vand.u32 4294901760, %v15315_v59 }
  0xcd   :  { %8399 = vmatprep.subr.bf16.mxu1 %v8398_v55  ;;  %8591 = vmatprep.subr.bf16.mxu0 %v8590_v48  ;;  %v15318_v55 = vld [vmem:[#allocation51_spill] sm:$0xff]  ;;  %v8600_v34 = vpack.c.bf16 %v10097_v56, %v15319_v17  ;;  %v8410_v54 = vpack.c.bf16 %v15321_v25, %v15320_v36  ;;  %v8602_v48 = vpack.c.bf16 %v15322_v41, %v15270_v58  ;;  %v15340_v29 = vand.u32 4294901760, %v15261_v19 }
  0xce   :  { %v8408_v62 = vpack.c.bf16 %v15318_v55, %v15261_v19  ;;  %v10686_v39 = vpack.c.bf16 %v15330_v52, %v15329_v18  ;;  %v15337_v52 = vld [vmem:[#allocation25_spill] sm:$0xff]  ;;  %v15339_v18 = vand.u32 4294901760, %v15317_v22  ;;  %v15345_v22 = vand.u32 4294901760, %v15321_v25 }
  0xcf   :  { %v15346_v19 = vand.u32 4294901760, %v15270_v58  ;;  %v15353_v58 = vand.u32 4294901760, %v15277_v50  ;;  %v15354_v25 = vand.u32 4294901760, %v15278_v20  ;;  %v15363_v50 = vand.u32 4294901760, %v15282_v30  ;;  %v15364_v20 = vld [vmem:[#allocation71_spill] sm:$0xff] }
  0xd0   :  { %8401 = vmatpush1.bf16.msra.mxu1 %v8400_v38  ;;  %8593 = vmatpush1.bf16.msra.mxu0 %v8592_v4  ;;  %v15327_v38 = vand.u32 4294901760, %v10040_v1  ;;  %v15328_v4 = vand.u32 4294901760, %v15310_v13  ;;  %v15334_v1 = vand.u32 4294901760, %v15314_v46  ;;  %v15335_v13 = vand.u32 4294901760, %v15255_v21 }
  0xd1   :  { %8403 = vmatprep.subr.bf16.mxu1 %v8402_v2  ;;  %8595 = vmatprep.subr.bf16.mxu0 %v8594_v37  ;;  %v15331_v2 = vand.u32 4294901760, %v15313_v9  ;;  %v15332_v37 = vand.u32 4294901760, %v10056_v0  ;;  %v15338_v0 = vand.u32 4294901760, %v15316_v32  ;;  %v15342_v21 = vand.u32 4294901760, %v15319_v17 }
  0xd2   :  { %v10680_v43 = vpack.c.bf16 %v15328_v4, %v15327_v38  ;;  %v10698_v24 = vpack.c.bf16 %v15334_v1, %v15333_v10  ;;  %v10704_v38 = vpack.c.bf16 %v15336_v5, %v15335_v13  ;;  %v15341_v10 = vand.u32 4294901760, %v15318_v55 }
  0xd3   :  { %v10692_v33 = vpack.c.bf16 %v15332_v37, %v15331_v2  ;;  %1436 = vmatmul.mubr.f32.vlgmr.msra.gmra.mrb[2].mxu1 %v15337_v52  ;;  %2291 = vmatmul.mubr.f32.vlgmr.msra.gmra.mrb[2].mxu0 %v15337_v52  ;;  %v10712_v28 = vpack.c.bf16 %v15339_v18, %v15338_v0  ;;  %v15343_v46 = vand.u32 4294901760, %v10097_v56  ;;  %v15344_v32 = vand.u32 4294901760, %v15320_v36 }
  0xd4   :  { %v10718_v9 = vpack.c.bf16 %v15341_v10, %v15340_v29  ;;  %8405 = vmatpush1.bf16.msra.mxu1 %v8404_v40  ;;  %8597 = vmatpush1.bf16.msra.mxu0 %v8596_v3  ;;  %v15347_v55 = vand.u32 4294901760, %v15322_v41  ;;  %v15348_v17 = vand.u32 4294901760, %v15272_v6  ;;  %v15349_v56 = vand.u32 4294901760, %v15323_v35 }
  0xd5   :  { %v10724_v59 = vpack.c.bf16 %v15343_v46, %v15342_v21  ;;  %v10730_v4 = vpack.c.bf16 %v15345_v22, %v15344_v32  ;;  %8407 = vmatprep.subr.bf16.mxu1 %v8406_v45  ;;  %8599 = vmatprep.subr.bf16.mxu0 %v8598_v49  ;;  %v15350_v40 = vand.u32 4294901760, %v15274_v26  ;;  %v15351_v3 = vand.u32 4294901760, %v15324_v27  ;;  %v15360_v27 = vld [vmem:[#allocation16_spill] sm:$0xff]  ;;  %v15374_v46 = vld [vmem:[#allocation18_spill] sm:$0xff]  ;;  %v15376_v22 = vld [vmem:[#allocation77_spill] sm:$0xff] }
  0xd6   :  { %v10736_v2 = vpack.c.bf16 %v15347_v55, %v15346_v19  ;;  %v10742_v37 = vpack.c.bf16 %v15349_v56, %v15348_v17  ;;  %v10754_v41 = vpack.c.bf16 %v15354_v25, %v15353_v58  ;;  %v15356_v6 = vand.u32 4294901760, %v15325_v44  ;;  %1570 = vmatprep.mubr.f32.mxu1 %v15118_v14  ;;  %2425 = vmatprep.mubr.f32.mxu0 %v15118_v14  ;;  %v15367_v44 = vld [vmem:[#allocation73_spill] sm:$0xff]  ;;  %v15379_v17 = vld [vmem:[#allocation79_spill] sm:$0xff]  ;;  %v15383_v58 = vld [vmem:[#allocation82_spill] sm:$0xff] }
  0xd7   :  { %v10748_v36 = vpack.c.bf16 %v15351_v3, %v15350_v40  ;;  %v15357_v35 = vand.u32 4294901760, %v15326_v8  ;;  %v15359_v26 = vand.u32 4294901760, %v15281_v7  ;;  %v15361_v45 = vand.u32 4294901760, %v15360_v27 }
  0xd8   :  { %15355 = vst [vmem:[#allocation56_spill] sm:$0xff] %v10754_v41  ;;  %v15365_v13 = vand.u32 4294901760, %v15364_v20  ;;  %v15368_v8 = vand.u32 4294901760, %v15367_v44  ;;  %v15369_v0 = vand.u32 4294901760, %v15286_v42  ;;  %v15371_v29 = vand.u32 4294901760, %v15287_v15  ;;  %8409 = vmatpush1.bf16.msra.mxu1 %v8408_v62  ;;  %8601 = vmatpush1.bf16.msra.mxu0 %v8600_v34  ;;  %v15400_v34 = vld [vmem:[#allocation23_spill] sm:$0xff] }
  0xd9   :  { %15352 = vst [vmem:[#allocation50_spill] sm:$0xff] %v10748_v36  ;;  %v10760_v1 = vpack.c.bf16 %v15357_v35, %v15356_v6  ;;  %v10768_v49 = vpack.c.bf16 %v15361_v45, %v15359_v26  ;;  %v15372_v10 = vand.u32 4294901760, %v10187_v63  ;;  %v15375_v32 = vand.u32 4294901760, %v15374_v46  ;;  %v15385_v6 = vld [vmem:[#allocation83_spill] sm:$0xff]  ;;  %8411 = vmatprep.subr.bf16.mxu1 %v8410_v54  ;;  %8603 = vmatprep.subr.bf16.mxu0 %v8602_v48  ;;  %v15412_v54 = vld [vmem:[#allocation97_spill] sm:$0xff] }
  0xda   :  { %v10774_v5 = vpack.c.bf16 %v15365_v13, %v15363_v50  ;;  %v10780_v18 = vpack.c.bf16 %v15369_v0, %v15368_v8  ;;  %v15377_v19 = vand.u32 4294901760, %v15376_v22  ;;  %v15380_v56 = vand.u32 4294901760, %v15379_v17  ;;  %v15389_v50 = vld [vmem:[#allocation84_spill] sm:$0xff] }
  0xdb   :  { %15358 = vst [vmem:[#allocation59_spill] sm:$0xff] %v10760_v1  ;;  %15362 = vst [vmem:[#allocation61_spill] sm:$0xff] %v10768_v49  ;;  %v10786_v21 = vpack.c.bf16 %v15372_v10, %v15371_v29  ;;  %v15381_v40 = vand.u32 4294901760, %v15291_v11  ;;  %v15384_v25 = vand.u32 4294901760, %v15383_v58  ;;  %v15386_v35 = vand.u32 4294901760, %v15385_v6 }
  0xdc   :  { %15366 = vst [vmem:[#allocation63_spill] sm:$0xff] %v10774_v5  ;;  %15370 = vst [vmem:[#allocation64_spill] sm:$0xff] %v10780_v18  ;;  %v10792_v55 = vpack.c.bf16 %v15377_v19, %v15375_v32  ;;  %v15388_v45 = vand.u32 4294901760, %v15297_v57  ;;  %v15390_v13 = vand.u32 4294901760, %v15389_v50  ;;  %v15392_v0 = vand.u32 4294901760, %v15299_v12  ;;  %v15395_v32 = vld [vmem:[#allocation89_spill] sm:$0xff]  ;;  %8413 = vmatpush1.bf16.msra.mxu1 %v8412_v31  ;;  %8605 = vmatpush1.bf16.msra.mxu0 %v8604_v47 }
  0xdd   :  { %15373 = vst [vmem:[#allocation69_spill] sm:$0xff] %v10786_v21  ;;  %v10798_v3 = vpack.c.bf16 %v15381_v40, %v15380_v56  ;;  %v10804_v26 = vpack.c.bf16 %v15386_v35, %v15384_v25  ;;  %v15393_v29 = vand.u32 4294901760, %v15300_v61  ;;  %v15396_v19 = vand.u32 4294901760, %v15395_v32  ;;  %8415 = vmatprep.subr.bf16.mxu1 %v8414_v51  ;;  %8607 = vmatprep.subr.bf16.mxu0 %v8606_v60  ;;  %v15434_v51 = vld [vmem:[#allocation37_spill] sm:$0xff] }
  0xde   :  { %15378 = vst [vmem:[#allocation70_spill] sm:$0xff] %v10792_v55  ;;  %v10810_v8 = vpack.c.bf16 %v15390_v13, %v15388_v45  ;;  %v15397_v56 = vand.u32 4294901760, %v15302_v23  ;;  %v15399_v62 = vand.u32 4294901760, %v15303_v53  ;;  %v15401_v25 = vand.u32 4294901760, %v15400_v34  ;;  %v15404_v13 = vld [vmem:[#allocation93_spill] sm:$0xff] }
  0xdf   :  { %15382 = vst [vmem:[#allocation74_spill] sm:$0xff] %v10798_v3  ;;  %15387 = vst [vmem:[#allocation76_spill] sm:$0xff] %v10804_v26  ;;  %v10816_v10 = vpack.c.bf16 %v15393_v29, %v15392_v0  ;;  %v15403_v45 = vand.u32 4294901760, %v10249_v16  ;;  %v15405_v52 = vand.u32 4294901760, %v15404_v13  ;;  %v15407_v29 = vld [vmem:[#allocation95_spill] sm:$0xff]  ;;  %v15413_v48 = vand.u32 4294901760, %v15412_v54 }
  0xe0   :  { %15391 = vst [vmem:[#allocation80_spill] sm:$0xff] %v10810_v8  ;;  %v10822_v40 = vpack.c.bf16 %v15397_v56, %v15396_v19  ;;  %v10828_v35 = vpack.c.bf16 %v15401_v25, %v15399_v62  ;;  %v15409_v8 = vld [vmem:[#allocation96_spill] sm:$0xff]  ;;  %v15414_v56 = vld [vmem:[#allocation98_spill] sm:$0xff]  ;;  %v15417_v62 = vld [vmem:[#allocation27_spill] sm:$0xff]  ;;  %v8420_v31 = vpack.c.bf16 %v15376_v22, %v15374_v46  ;;  %v8612_v47 = vpack.c.bf16 %v15291_v11, %v15379_v17 }
  0xe1   :  { %15394 = vst [vmem:[#allocation21_spill] sm:$0xff] %v10816_v10  ;;  %v10834_v0 = vpack.c.bf16 %v15405_v52, %v15403_v45  ;;  %v15408_v10 = vand.u32 4294901760, %v15407_v29  ;;  %v15410_v26 = vand.u32 4294901760, %v15409_v8  ;;  %v15418_v25 = vand.u32 4294901760, %v15417_v62  ;;  %v15421_v52 = vld [vmem:[#allocation100_spill] sm:$0xff]  ;;  %v15439_v46 = vld [vmem:[#allocation47_spill] sm:$0xff] }
  0xe2   :  { %15398 = vst [vmem:[#allocation86_spill] sm:$0xff] %v10822_v40  ;;  %15402 = vst [vmem:[#allocation87_spill] sm:$0xff] %v10828_v35  ;;  %v15415_v40 = vand.u32 4294901760, %v15414_v56  ;;  %v15419_v35 = vld [vmem:[#allocation26_spill] sm:$0xff]  ;;  %v15422_v45 = vand.u32 4294901760, %v15421_v52  ;;  %v8614_v60 = vpack.c.bf16 %v15389_v50, %v15297_v57  ;;  %v8426_v11 = vpack.c.bf16 %v15400_v34, %v15303_v53  ;;  %v15433_v53 = vld [vmem:[#allocation35_spill] sm:$0xff] }
  0xe3   :  { %15406 = vst [vmem:[#allocation90_spill] sm:$0xff] %v10834_v0  ;;  %v10840_v19 = vpack.c.bf16 %v15410_v26, %v15408_v10  ;;  %v15420_v55 = vand.u32 4294901760, %v15419_v35  ;;  %v15423_v0 = vld [vmem:[#allocation101_spill] sm:$0xff]  ;;  %v15425_v26 = vld [vmem:[#allocation30_spill] sm:$0xff]  ;;  %v8620_v57 = vpack.c.bf16 %v15414_v56, %v15412_v54  ;;  %v15441_v17 = vld [vmem:[#allocation52_spill] sm:$0xff] }
  0xe4   :  { %v10846_v3 = vpack.c.bf16 %v15415_v40, %v15413_v48  ;;  %v15424_v18 = vand.u32 4294901760, %v15423_v0  ;;  %v15426_v10 = vand.u32 4294901760, %v15425_v26  ;;  %v15429_v40 = vld [vmem:[#allocation45_spill] sm:$0xff]  ;;  %v15445_v50 = vld [vmem:[#allocation14_spill] sm:$0xff]  ;;  %v15448_v34 = vld [vmem:[#allocation68_spill] sm:$0xff] }
  0xe5   :  { %15411 = vst [vmem:[#allocation91_spill] sm:$0xff] %v10840_v19  ;;  %v10852_v21 = vpack.c.bf16 %v15420_v55, %v15418_v25  ;;  %v15427_v19 = vld [vmem:[#allocation29_spill] sm:$0xff]  ;;  %v15430_v48 = vand.u32 4294901760, %v15429_v40  ;;  %v8416_v55 = vpack.c.bf16 %v15360_v27, %v15281_v7  ;;  %v8610_v25 = vpack.c.bf16 %v10187_v63, %v15287_v15  ;;  %v15436_v27 = vld [vmem:[#allocation40_spill] sm:$0xff]  ;;  %v15452_v54 = vld [vmem:[#allocation19_spill] sm:$0xff] }
  0xe6   :  { %15416 = vst [vmem:[#allocation36_spill] sm:$0xff] %v10846_v3  ;;  %v10858_v5 = vpack.c.bf16 %v15424_v18, %v15422_v45  ;;  %v15428_v49 = vand.u32 4294901760, %v15427_v19  ;;  %v15431_v3 = vld [vmem:[#allocation103_spill] sm:$0xff]  ;;  %v8608_v18 = vpack.c.bf16 %v15364_v20, %v15282_v30  ;;  %v8422_v7 = vpack.c.bf16 %v15385_v6, %v15383_v58  ;;  %v15437_v20 = vld [vmem:[#allocation42_spill] sm:$0xff]  ;;  %v15440_v22 = vld [vmem:[#allocation49_spill] sm:$0xff] }
  0xe7   :  { %v15432_v41 = vand.u32 4294901760, %v15431_v3  ;;  %8417 = vmatpush1.bf16.msra.mxu1 %v8416_v55  ;;  %v8424_v63 = vpack.c.bf16 %v15300_v61, %v15299_v12  ;;  %v8616_v30 = vpack.c.bf16 %v15302_v23, %v15395_v32  ;;  %v8428_v15 = vpack.c.bf16 %v15409_v8, %v15407_v29  ;;  %v15443_v58 = vld [vmem:[#allocation55_spill] sm:$0xff]  ;;  %v15444_v6 = vld [vmem:[#allocation58_spill] sm:$0xff]  ;;  %v15447_v32 = vld [vmem:[#allocation65_spill] sm:$0xff] }
  0xe8   :  { %v10864_v1 = vpack.c.bf16 %v15428_v49, %v15426_v10  ;;  %v8418_v49 = vpack.c.bf16 %v15286_v42, %v15367_v44  ;;  %8609 = vmatpush1.bf16.msra.mxu0 %v8608_v18  ;;  %v8618_v42 = vpack.c.bf16 %v15404_v13, %v10249_v16  ;;  %v8430_v12 = vpack.c.bf16 %v15419_v35, %v15417_v62  ;;  %v15438_v44 = vld [vmem:[#allocation44_spill] sm:$0xff]  ;;  %v15446_v8 = vld [vmem:[#allocation62_spill] sm:$0xff]  ;;  %v15449_v35 = vld [vmem:[#allocation17_spill] sm:$0xff] }
  0xe9   :  { %v10870_v36 = vpack.c.bf16 %v15432_v41, %v15430_v48  ;;  %8611 = vmatprep.subr.bf16.mxu0 %v8610_v25  ;;  %v8622_v61 = vpack.c.bf16 %v15423_v0, %v15421_v52  ;;  %v8432_v16 = vpack.c.bf16 %v15427_v19, %v15425_v26  ;;  %v8624_v23 = vpack.c.bf16 %v15431_v3, %v15429_v40  ;;  %v15435_v41 = vld [vmem:[#allocation32_spill] sm:$0xff]  ;;  %v15451_v0 = vld [vmem:[#allocation75_spill] sm:$0xff]  ;;  %v59_v19 = vld [vmem:[#allocation5 + $0xa0] sm:$0xff] }
  0xea   :  { %8419 = vmatprep.subr.bf16.mxu1 %v8418_v49  ;;  %v15442_v3 = vld [vmem:[#allocation12_spill] sm:$0xff]  ;;  %v15453_v56 = vld [vmem:[#allocation78_spill] sm:$0xff]  ;;  %v15454_v45 = vld [vmem:[#allocation81_spill] sm:$0xff]  ;;  %v2816_v40 = vand.u32 4294901760, %v59_v19 }
  0xeb   :  { %8421 = vmatpush1.bf16.msra.mxu1 %v8420_v31  ;;  %v15450_v13 = vld [vmem:[#allocation72_spill] sm:$0xff]  ;;  %v48_v62 = vld [vmem:[#allocation5 + $0x48] sm:$0xff]  ;;  %v47_v25 = vld [vmem:[#allocation5 + $0x40] sm:$0xff] }
  0xec   :  { %8613 = vmatpush1.bf16.msra.mxu0 %v8612_v47  ;;  %8423 = vmatprep.subr.bf16.mxu1 %v8422_v7  ;;  %v46_v29 = vld [vmem:[#allocation5 + $0x38] sm:$0xff]  ;;  %v61_v52 = vld [vmem:[#allocation5 + $0xb0] sm:$0xff]  ;;  %v3667_v18 = vand.u32 4294901760, %v48_v62  ;;  %v60_v31 = vld [vmem:[#allocation5 + $0xa8] sm:$0xff] }
  0xed   :  { %8615 = vmatprep.subr.bf16.mxu0 %v8614_v60  ;;  %v15455_v26 = vld [vmem:[#allocation20_spill] sm:$0xff]  ;;  %v2812_v10 = vand.u32 4294901760, %v46_v29  ;;  %v3671_v49 = vand.u32 4294901760, %v61_v52  ;;  %v15456_v47 = vld [vmem:[#allocation85_spill] sm:$0xff]  ;;  %v72_v60 = vld [vmem:[#allocation5 + $0x108] sm:$0xff] }
  0xee   :  { %v45_v48 = vld [vmem:[#allocation5 + $0x30] sm:$0xff]  ;;  %v58_v55 = vld [vmem:[#allocation5 + $0x98] sm:$0xff] }
  0xef   :  { %8425 = vmatpush1.bf16.msra.mxu1 %v8424_v63  ;;  %v15457_v7 = vld [vmem:[#allocation88_spill] sm:$0xff]  ;;  %v15458_v63 = vld [vmem:[#allocation22_spill] sm:$0xff] }
  0xf0   :  { %8617 = vmatpush1.bf16.msra.mxu0 %v8616_v30  ;;  %8427 = vmatprep.subr.bf16.mxu1 %v8426_v11  ;;  %v15459_v30 = vld [vmem:[#allocation92_spill] sm:$0xff]  ;;  %v2814_v11 = vand.u32 4294901760, %v45_v48 }
  0xf1   :  { %8619 = vmatprep.subr.bf16.mxu0 %v8618_v42  ;;  %v2818_v42 = vand.u32 4294901760, %v58_v55 }
  0xf3   :  { %8429 = vmatpush1.bf16.msra.mxu1 %v8428_v15  ;;  %v85_v15 = vld [vmem:[#allocation5 + $0x170] sm:$0xff] }
  0xf4   :  { %8621 = vmatpush1.bf16.msra.mxu0 %v8620_v57  ;;  %8431 = vmatprep.subr.bf16.mxu1 %v8430_v12  ;;  %v74_v57 = vld [vmem:[#allocation5 + $0x118] sm:$0xff]  ;;  %v87_v12 = vld [vmem:[#allocation5 + $0x180] sm:$0xff] }
  0xf5   :  { %8623 = vmatprep.subr.bf16.mxu0 %v8622_v61  ;;  %v10938_v61 = vpack.c.bf16 %v2816_v40, %v2812_v10 }
  0xf7   :  { %8433 = vmatpush1.bf16.msra.mxu1 %v8432_v16  ;;  %15460 = vst [vmem:[#allocation38_spill] sm:$0xff] %v10938_v61  ;;  %v10940_v16 = vsub.f32 %v46_v29, %v2812_v10  ;;  %v2824_v61 = vand.u32 4294901760, %v85_v15  ;;  %v3675_v29 = vand.u32 4294901760, %v74_v57  ;;  %v3679_v10 = vand.u32 4294901760, %v87_v12 }
  0xf8   :  { %8625 = vmatpush1.bf16.msra.mxu0 %v8624_v23  ;;  %8435 = vmatprep.subr.bf16.mxu1 %v15433_v53  ;;  %v3669_v23 = vand.u32 4294901760, %v47_v25 }
  0xf9   :  { %8627 = vmatprep.subr.bf16.mxu0 %v15434_v51  ;;  %15461 = vst [vmem:[#allocation39_spill] sm:$0xff] %v10940_v16 }
  0xfa   :  { %1573 = vmatmul.mubr.f32.vlgmr.msra.gmra.mrb[2].mxu1 %v15435_v41 }
  0xfb   :  { %2428 = vmatmul.mubr.f32.vlgmr.msra.gmra.mrb[2].mxu0 %v15435_v41  ;;  %8437 = vmatpush1.bf16.msra.mxu1 %v15436_v27  ;;  %v3673_v41 = vand.u32 4294901760, %v60_v31 }
  0xfc   :  { %8629 = vmatpush1.bf16.msra.mxu0 %v15437_v20  ;;  %8439 = vmatprep.subr.bf16.mxu1 %v15438_v44 }
  0xfd   :  { %8631 = vmatprep.subr.bf16.mxu0 %v15439_v46  ;;  %1675 = vmatprep.mubr.f32.mxu1 %v15118_v14 }
  0xfe   :  { %2530 = vmatprep.mubr.f32.mxu0 %v15118_v14 }
  0xff   :  { %8441 = vmatpush1.bf16.msra.mxu1 %v15440_v22 }
 0x100   :  { %8633 = vmatpush1.bf16.msra.mxu0 %v15441_v17  ;;  %8443 = vmatprep.subr.bf16.mxu1 %v15442_v3 }
 0x101   :  { %8635 = vmatprep.subr.bf16.mxu0 %v15443_v58 }
 0x103   :  { %8445 = vmatpush1.bf16.msra.mxu1 %v15444_v6  ;;  %v100_v6 = vld [vmem:[#allocation5 + $0x1e8] sm:$0xff] }
 0x104   :  { %8637 = vmatpush1.bf16.msra.mxu0 %v15445_v50  ;;  %8447 = vmatprep.subr.bf16.mxu1 %v15446_v8 }
 0x105   :  { %8639 = vmatprep.subr.bf16.mxu0 %v15447_v32  ;;  %v10964_v32 = vsub.f32 %v60_v31, %v3673_v41  ;;  %v10980_v31 = vsub.f32 %v87_v12, %v3679_v10 }
 0x107   :  { %8449 = vmatpush1.bf16.msra.mxu1 %v15448_v34  ;;  %v98_v34 = vld [vmem:[#allocation5 + $0x1d8] sm:$0xff]  ;;  %15475 = vst [vmem:[#allocation57_spill] sm:$0xff] %v10964_v32  ;;  %15483 = vst [vmem:[#allocation71_spill] sm:$0xff] %v10980_v31  ;;  %v137_v31 = vld [vmem:[#allocation5 + $0x310] sm:$0xff] }
 0x108   :  { %8641 = vmatpush1.bf16.msra.mxu0 %v15449_v35  ;;  %8451 = vmatprep.subr.bf16.mxu1 %v15450_v13  ;;  %v73_v13 = vld [vmem:[#allocation5 + $0x110] sm:$0xff]  ;;  %v86_v35 = vld [vmem:[#allocation5 + $0x178] sm:$0xff] }
 0x109   :  { %8643 = vmatprep.subr.bf16.mxu0 %v15451_v0  ;;  %v2820_v0 = vand.u32 4294901760, %v72_v60  ;;  %v3681_v50 = vand.u32 4294901760, %v86_v35 }
 0x10b   :  { %8453 = vmatpush1.bf16.msra.mxu1 %v15452_v54  ;;  %v15467_v54 = vld [vmem:[#allocation24_spill] sm:$0xff]  ;;  %v10966_v8 = vsub.f32 %v72_v60, %v2820_v0  ;;  %v2828_v60 = vand.u32 4294901760, %v98_v34 }
 0x10c   :  { %8645 = vmatpush1.bf16.msra.mxu0 %v15453_v56  ;;  %8455 = vmatprep.subr.bf16.mxu1 %v15454_v45  ;;  %v84_v45 = vld [vmem:[#allocation5 + $0x168] sm:$0xff] }
 0x10d   :  { %8647 = vmatprep.subr.bf16.mxu0 %v15455_v26  ;;  %v10942_v26 = vsub.f32 %v59_v19, %v2816_v40  ;;  %v15466_v56 = vld [vmem:[#allocation94_spill] sm:$0xff]  ;;  %v15468_v19 = vld [vmem:[#allocation28_spill] sm:$0xff]  ;;  %v15469_v40 = vld [vmem:[#allocation99_spill] sm:$0xff]  ;;  %15476 = vst [vmem:[#allocation60_spill] sm:$0xff] %v10966_v8 }
 0x10f   :  { %8457 = vmatpush1.bf16.msra.mxu1 %v15456_v47  ;;  %15462 = vst [vmem:[#allocation41_spill] sm:$0xff] %v10942_v26  ;;  %v10944_v47 = vpack.c.bf16 %v3671_v49, %v3667_v18 }
 0x110   :  { %8649 = vmatpush1.bf16.msra.mxu0 %v15457_v7  ;;  %8459 = vmatprep.subr.bf16.mxu1 %v15458_v63  ;;  %v10946_v7 = vsub.f32 %v48_v62, %v3667_v18  ;;  %v10948_v63 = vsub.f32 %v61_v52, %v3671_v49  ;;  %v10954_v62 = vpack.c.bf16 %v2818_v42, %v2814_v11 }
 0x111   :  { %8651 = vmatprep.subr.bf16.mxu0 %v15459_v30  ;;  %15463 = vst [vmem:[#allocation43_spill] sm:$0xff] %v10944_v47  ;;  %v71_v30 = vld [vmem:[#allocation5 + $0x100] sm:$0xff]  ;;  %v10956_v52 = vsub.f32 %v45_v48, %v2814_v11  ;;  %v10958_v18 = vsub.f32 %v58_v55, %v2818_v42  ;;  %v10960_v49 = vpack.c.bf16 %v3673_v41, %v3669_v23  ;;  %v15477_v48 = vld [vmem:[#allocation31_spill] sm:$0xff] }
 0x112   :  { %15464 = vst [vmem:[#allocation46_spill] sm:$0xff] %v10946_v7  ;;  %15465 = vst [vmem:[#allocation48_spill] sm:$0xff] %v10948_v63  ;;  %v10962_v47 = vsub.f32 %v47_v25, %v3669_v23  ;;  %v15478_v55 = vld [vmem:[#allocation102_spill] sm:$0xff]  ;;  %v10970_v11 = vpack.c.bf16 %v2824_v61, %v2820_v0  ;;  %v10972_v25 = vsub.f32 %v85_v15, %v2824_v61  ;;  %v97_v23 = vld [vmem:[#allocation5 + $0x1d0] sm:$0xff] }
 0x113   :  { %8461 = vmatpush1.bf16.msra.mxu1 %v15466_v56  ;;  %15470 = vst [vmem:[#allocation11_spill] sm:$0xff] %v10954_v62  ;;  %15471 = vst [vmem:[#allocation51_spill] sm:$0xff] %v10956_v52  ;;  %v2826_v56 = vand.u32 4294901760, %v84_v45  ;;  %v113_v62 = vld [vmem:[#allocation5 + $0x250] sm:$0xff]  ;;  %v10974_v42 = vpack.c.bf16 %v3679_v10, %v3675_v29  ;;  %v10978_v41 = vsub.f32 %v74_v57, %v3675_v29  ;;  %v99_v61 = vld [vmem:[#allocation5 + $0x1e0] sm:$0xff]  ;;  %v2830_v10 = vand.u32 4294901760, %v97_v23 }
 0x114   :  { %8653 = vmatpush1.bf16.msra.mxu0 %v15467_v54  ;;  %8463 = vmatprep.subr.bf16.mxu1 %v15468_v19  ;;  %15472 = vst [vmem:[#allocation53_spill] sm:$0xff] %v10958_v18  ;;  %15473 = vst [vmem:[#allocation54_spill] sm:$0xff] %v10960_v49  ;;  %v2822_v54 = vand.u32 4294901760, %v71_v30  ;;  %v3677_v19 = vand.u32 4294901760, %v73_v13  ;;  %v110_v49 = vld [vmem:[#allocation5 + $0x238] sm:$0xff]  ;;  %v3687_v15 = vand.u32 4294901760, %v113_v62  ;;  %v10996_v29 = vsub.f32 %v86_v35, %v3681_v50 }
 0x115   :  { %8655 = vmatprep.subr.bf16.mxu0 %v15469_v40  ;;  %15474 = vst [vmem:[#allocation13_spill] sm:$0xff] %v10962_v47  ;;  %v111_v40 = vld [vmem:[#allocation5 + $0x240] sm:$0xff]  ;;  %15479 = vst [vmem:[#allocation15_spill] sm:$0xff] %v10970_v11  ;;  %v3683_v11 = vand.u32 4294901760, %v100_v6 }
 0x116   :  { %15480 = vst [vmem:[#allocation66_spill] sm:$0xff] %v10972_v25  ;;  %15481 = vst [vmem:[#allocation67_spill] sm:$0xff] %v10974_v42  ;;  %v10982_v58 = vpack.c.bf16 %v2826_v56, %v2822_v54  ;;  %v2832_v0 = vand.u32 4294901760, %v111_v40  ;;  %v15485_v42 = vld [vmem:[#allocation33_spill] sm:$0xff]  ;;  %v10990_v57 = vpack.c.bf16 %v3681_v50, %v3677_v19  ;;  %v10994_v12 = vsub.f32 %v73_v13, %v3677_v19 }
 0x117   :  { %8465 = vmatpush1.bf16.msra.mxu1 %v15477_v48  ;;  %15482 = vst [vmem:[#allocation16_spill] sm:$0xff] %v10978_v41  ;;  %15490 = vst [vmem:[#allocation83_spill] sm:$0xff] %v10996_v29  ;;  %v2834_v48 = vand.u32 4294901760, %v110_v49  ;;  %v11011_v35 = vpack.c.bf16 %v3687_v15, %v3683_v11  ;;  %v11013_v13 = vsub.f32 %v100_v6, %v3683_v11  ;;  %v2840_v19 = vand.u32 4294901760, %v137_v31 }
 0x118   :  { %8657 = vmatpush1.bf16.msra.mxu0 %v15478_v55  ;;  %8467 = vmatprep.subr.bf16.mxu1 %v10680_v43  ;;  %15484 = vst [vmem:[#allocation73_spill] sm:$0xff] %v10982_v58  ;;  %v112_v55 = vld [vmem:[#allocation5 + $0x248] sm:$0xff]  ;;  %v10986_v43 = vsub.f32 %v71_v30, %v2822_v54  ;;  %15488 = vst [vmem:[#allocation79_spill] sm:$0xff] %v10990_v57  ;;  %v11000_v54 = vsub.f32 %v98_v34, %v2828_v60  ;;  %v15492_v30 = vlaneseq }
 0x119   :  { %8659 = vmatprep.subr.bf16.mxu0 %v10686_v39  ;;  %v10988_v39 = vsub.f32 %v84_v45, %v2826_v56  ;;  %15489 = vst [vmem:[#allocation82_spill] sm:$0xff] %v10994_v12  ;;  %v124_v58 = vld [vmem:[#allocation5 + $0x2a8] sm:$0xff]  ;;  %v3685_v56 = vand.u32 4294901760, %v99_v61  ;;  %v3689_v45 = vand.u32 4294901760, %v112_v55  ;;  %v11009_v50 = vsub.f32 %v111_v40, %v2832_v0  ;;  %15496 = vst [vmem:[#allocation95_spill] sm:$0xff] %v11011_v35  ;;  %v125_v35 = vld [vmem:[#allocation5 + $0x2b0] sm:$0xff] }
 0x11a   :  { %1679 = vmatmul.mubr.f32.vlgmr.msra.gmra.mrb[2].mxu1 %v15485_v42  ;;  %15486 = vst [vmem:[#allocation18_spill] sm:$0xff] %v10986_v43  ;;  %15491 = vst [vmem:[#allocation84_spill] sm:$0xff] %v11000_v54  ;;  %v2836_v34 = vand.u32 4294901760, %v124_v58  ;;  %v136_v57 = vld [vmem:[#allocation5 + $0x308] sm:$0xff]  ;;  %v11021_v40 = vsub.f32 %v97_v23, %v2830_v10 }
 0x11b   :  { %2534 = vmatmul.mubr.f32.vlgmr.msra.gmra.mrb[2].mxu0 %v15485_v42  ;;  %15487 = vst [vmem:[#allocation77_spill] sm:$0xff] %v10988_v39  ;;  %8469 = vmatpush1.bf16.msra.mxu1 %v10692_v33  ;;  %v11003_v33 = vand.u32 127, %v15492_v30  ;;  %15495 = vst [vmem:[#allocation93_spill] sm:$0xff] %v11009_v50  ;;  %v139_v42 = vld [vmem:[#allocation5 + $0x320] sm:$0xff]  ;;  %v11027_v6 = vpack.c.bf16 %v3689_v45, %v3685_v56  ;;  %v11031_v11 = vsub.f32 %v112_v55, %v3689_v45 }
 0x11c   :  { %8661 = vmatpush1.bf16.msra.mxu0 %v10698_v24  ;;  %8471 = vmatprep.subr.bf16.mxu1 %v10704_v38  ;;  %v11007_v24 = vpack.c.bf16 %v2832_v0, %v2828_v60  ;;  %v126_v38 = vld [vmem:[#allocation5 + $0x2b8] sm:$0xff]  ;;  %15497 = vst [vmem:[#allocation96_spill] sm:$0xff] %v11013_v13  ;;  %v123_v30 = vld [vmem:[#allocation5 + $0x2a0] sm:$0xff]  ;;  %v11019_v60 = vpack.c.bf16 %v2834_v48, %v2830_v10  ;;  %15500 = vst [vmem:[#allocation27_spill] sm:$0xff] %v11021_v40  ;;  %v3695_v23 = vand.u32 4294901760, %v139_v42 }
 0x11d   :  { %8663 = vmatprep.subr.bf16.mxu0 %v10712_v28  ;;  %15493 = vst [vmem:[#allocation89_spill] sm:$0xff] %v11003_v33  ;;  %1845 = vmatprep.mubr.f32.mxu1 %v15118_v14  ;;  %v11015_v28 = vsub.f32 %v113_v62, %v3687_v15  ;;  %v11023_v0 = vsub.f32 %v110_v49, %v2834_v48  ;;  %15502 = vst [vmem:[#allocation100_spill] sm:$0xff] %v11027_v6  ;;  %v3691_v15 = vand.u32 4294901760, %v126_v38  ;;  %v150_v48 = vld [vmem:[#allocation5 + $0x378] sm:$0xff]  ;;  %v15506_v55 = vld [vmem:[#allocation50_spill] sm:$0xff] }
 0x11e   :  { %2700 = vmatprep.mubr.f32.mxu0 %v15118_v14  ;;  %15494 = vst [vmem:[#allocation23_spill] sm:$0xff] %v11007_v24  ;;  %15499 = vst [vmem:[#allocation98_spill] sm:$0xff] %v11019_v60  ;;  %v11029_v62 = vsub.f32 %v99_v61, %v3685_v56  ;;  %v2838_v10 = vand.u32 4294901760, %v123_v30  ;;  %v2842_v49 = vand.u32 4294901760, %v136_v57  ;;  %v163_v60 = vld [vmem:[#allocation5 + $0x3e0] sm:$0xff]  ;;  %v11036_v24 = vpack.c.bf16 %v2840_v19, %v2836_v34  ;;  %v149_v40 = vld [vmem:[#allocation5 + $0x370] sm:$0xff] }
 0x11f   :  { %15498 = vst [vmem:[#allocation97_spill] sm:$0xff] %v11015_v28  ;;  %8473 = vmatpush1.bf16.msra.mxu1 %v10718_v9  ;;  %15501 = vst [vmem:[#allocation26_spill] sm:$0xff] %v11023_v0  ;;  %v138_v9 = vld [vmem:[#allocation5 + $0x318] sm:$0xff]  ;;  %v165_v0 = vld [vmem:[#allocation5 + $0x3f0] sm:$0xff]  ;;  %v11039_v61 = vmul.u32.u64.low 2643056798, %v11003_v33  ;;  %v11040_v56 = vmul.u32.u64.high 2643056798, %v11003_v33, %v11039_v61  ;;  %v11044_v45 = vsub.f32 %v124_v58, %v2836_v34  ;;  %v11046_v6 = vsub.f32 %v137_v31, %v2840_v19 }
 0x120   :  { %8665 = vmatpush1.bf16.msra.mxu0 %v10724_v59  ;;  %8475 = vmatprep.subr.bf16.mxu1 %v10730_v4  ;;  %15503 = vst [vmem:[#allocation101_spill] sm:$0xff] %v11029_v62  ;;  %15504 = vst [vmem:[#allocation30_spill] sm:$0xff] %v11031_v11  ;;  %v11034_v59 = vadd.s32 128, %v11003_v33  ;;  %v3693_v4 = vand.u32 4294901760, %v125_v35  ;;  %v11048_v11 = vsub.f32 %v126_v38, %v3691_v15  ;;  %v3697_v62 = vand.u32 4294901760, %v138_v9  ;;  %v15510_v28 = vld [vmem:[#allocation56_spill] sm:$0xff] }
 0x121   :  { %8667 = vmatprep.subr.bf16.mxu0 %v10736_v2  ;;  %15505 = vst [vmem:[#allocation29_spill] sm:$0xff] %v11036_v24  ;;  %v152_v2 = vld [vmem:[#allocation5 + $0x388] sm:$0xff]  ;;  %15507 = vst [vmem:[#allocation45_spill] sm:$0xff] %v11044_v45  ;;  %v162_v24 = vld [vmem:[#allocation5 + $0x3d8] sm:$0xff]  ;;  %v2844_v50 = vand.u32 4294901760, %v150_v48  ;;  %v2848_v54 = vand.u32 4294901760, %v163_v60  ;;  %v11058_v58 = vsub.f32 %v139_v42, %v3695_v23  ;;  %v11060_v34 = vpack.c.bf16 %v2842_v49, %v2838_v10 }
 0x122   :  { %15508 = vst [vmem:[#allocation103_spill] sm:$0xff] %v11046_v6  ;;  %15509 = vst [vmem:[#allocation35_spill] sm:$0xff] %v11048_v11  ;;  %v15511_v13 = vld [vmem:[#allocation59_spill] sm:$0xff]  ;;  %v3699_v31 = vand.u32 4294901760, %v152_v2  ;;  %v3703_v38 = vand.u32 4294901760, %v165_v0  ;;  %v11062_v19 = vsub.f32 %v123_v30, %v2838_v10  ;;  %v2846_v11 = vand.u32 4294901760, %v149_v40 }
 0x123   :  { %8477 = vmatpush1.bf16.msra.mxu1 %v10742_v37  ;;  %v11053_v61 = vmul.u32.u64.low 2643056798, %v11034_v59  ;;  %v11054_v37 = vmul.u32.u64.high 2643056798, %v11034_v59, %v11053_v61  ;;  %15513 = vst [vmem:[#allocation40_spill] sm:$0xff] %v11058_v58  ;;  %15514 = vst [vmem:[#allocation42_spill] sm:$0xff] %v11060_v34  ;;  %v15516_v6 = vld [vmem:[#allocation61_spill] sm:$0xff]  ;;  %v11066_v45 = vsub.f32 %v136_v57, %v2842_v49  ;;  %v11068_v29 = vpack.c.bf16 %v3697_v62, %v3693_v4  ;;  %v11082_v57 = vld [vmem:[#allocation5 + $0x4b0] sm:$0xff] }
 0x124   :  { %8669 = vmatpush1.bf16.msra.mxu0 %v15506_v55  ;;  %8479 = vmatprep.subr.bf16.mxu1 %v15510_v28  ;;  %v11056_v55 = vpack.c.bf16 %v3695_v23, %v3691_v15  ;;  %15515 = vst [vmem:[#allocation44_spill] sm:$0xff] %v11062_v19  ;;  %v2850_v28 = vand.u32 4294901760, %v162_v24  ;;  %v11070_v15 = vsub.f32 %v125_v35, %v3693_v4  ;;  %v151_v42 = vld [vmem:[#allocation5 + $0x380] sm:$0xff]  ;;  %v164_v23 = vld [vmem:[#allocation5 + $0x3e8] sm:$0xff]  ;;  %v11084_v49 = vld [vmem:[#allocation5 + $0x458] sm:$0xff] }
 0x125   :  { %8671 = vmatprep.subr.bf16.mxu0 %v15511_v13  ;;  %v15517_v13 = vld [vmem:[#allocation63_spill] sm:$0xff]  ;;  %15518 = vst [vmem:[#allocation47_spill] sm:$0xff] %v11068_v29  ;;  %v15521_v30 = vld [vmem:[#allocation69_spill] sm:$0xff]  ;;  %v11076_v10 = vsub.f32 %v138_v9, %v3697_v62  ;;  %v11078_v34 = vpack.c.bf16 %v2848_v54, %v2844_v50  ;;  %v11088_v4 = vsub.f32 %v163_v60, %v2848_v54  ;;  %v15530_v60 = vld [vmem:[#allocation70_spill] sm:$0xff] }
 0x126   :  { %15512 = vst [vmem:[#allocation37_spill] sm:$0xff] %v11056_v55  ;;  %15519 = vst [vmem:[#allocation49_spill] sm:$0xff] %v11070_v15  ;;  %v11072_v61 = vld [vmem:[#allocation5 + $0x448] sm:$0xff]  ;;  %v15520_v55 = vld [vmem:[#allocation64_spill] sm:$0xff]  ;;  %v11092_v29 = vsub.f32 %v152_v2, %v3699_v31  ;;  %v11098_v9 = vpack.c.bf16 %v2850_v28, %v2846_v11 }
 0x127   :  { %8481 = vmatpush1.bf16.msra.mxu1 %v15516_v6  ;;  %15522 = vst [vmem:[#allocation52_spill] sm:$0xff] %v11076_v10  ;;  %15523 = vst [vmem:[#allocation12_spill] sm:$0xff] %v11078_v34  ;;  %v11080_v6 = vsub.f32 %v150_v48, %v2844_v50  ;;  %v11086_v35 = vld [vmem:[#allocation5 + $0x4c0] sm:$0xff]  ;;  %v3701_v50 = vand.u32 4294901760, %v151_v42  ;;  %v3705_v48 = vand.u32 4294901760, %v164_v23  ;;  %v11101_v34 = vld [vmem:[#allocation5 + $0x4a8] sm:$0xff] }
 0x128   :  { %8673 = vmatpush1.bf16.msra.mxu0 %v15517_v13  ;;  %8483 = vmatprep.subr.bf16.mxu1 %v15520_v55  ;;  %15525 = vst [vmem:[#allocation56_spill] sm:$0xff] %v11088_v4  ;;  %v11090_v13 = vpack.c.bf16 %v3703_v38, %v3699_v31  ;;  %15527 = vst [vmem:[#allocation61_spill] sm:$0xff] %v11092_v29  ;;  %v11094_v55 = vsub.f32 %v165_v0, %v3703_v38  ;;  %v11096_v62 = vld [vmem:[#allocation5 + $0x440] sm:$0xff]  ;;  %v11105_v54 = vld [vmem:[#allocation5 + $0x4b8] sm:$0xff]  ;;  %v15542_v31 = vand.u32 4294901760, %v11082_v57 }
 0x129   :  { %8675 = vmatprep.subr.bf16.mxu0 %v15521_v30  ;;  %15524 = vst [vmem:[#allocation50_spill] sm:$0xff] %v11080_v6  ;;  %15529 = vst [vmem:[#allocation64_spill] sm:$0xff] %v11098_v9  ;;  %v6038_v30 = vshrl.u32 %v11040_v56, 3  ;;  %v11103_v6 = vld [vmem:[#allocation5 + $0x450] sm:$0xff]  ;;  %v15531_v2 = vld [vmem:[#allocation74_spill] sm:$0xff]  ;;  %v11119_v4 = vsub.f32 %v149_v40, %v2846_v11  ;;  %v11127_v38 = vsub.f32 %v151_v42, %v3701_v50 }
 0x12a   :  { %15526 = vst [vmem:[#allocation59_spill] sm:$0xff] %v11090_v13  ;;  %15528 = vst [vmem:[#allocation63_spill] sm:$0xff] %v11094_v55  ;;  %v11113_v13 = vld [vmem:[#allocation5 + $0x518] sm:$0xff]  ;;  %v11115_v56 = vld [vmem:[#allocation5 + $0x580] sm:$0xff]  ;;  %v11138_v40 = vpack.c.bf16 %v3705_v48, %v3701_v50  ;;  %v11144_v10 = vsub.f32 %v164_v23, %v3705_v48  ;;  %v15544_v50 = vand.u32 4294901760, %v11084_v49 }
 0x12b   :  { %8485 = vmatpush1.bf16.msra.mxu1 %v15530_v60  ;;  %v15532_v55 = vld [vmem:[#allocation76_spill] sm:$0xff]  ;;  %15534 = vst [vmem:[#allocation69_spill] sm:$0xff] %v11119_v4  ;;  %v11121_v60 = vsub.f32 %v162_v24, %v2850_v28  ;;  %v11125_v0 = vld [vmem:[#allocation5 + $0x528] sm:$0xff]  ;;  %15536 = vst [vmem:[#allocation74_spill] sm:$0xff] %v11127_v38  ;;  %v6039_v11 = vmul.u32 13, %v6038_v30  ;;  %v15545_v30 = vand.u32 4294901760, %v11086_v35 }
 0x12c   :  { %8677 = vmatpush1.bf16.msra.mxu0 %v15531_v2  ;;  %8487 = vmatprep.subr.bf16.mxu1 %v15532_v55  ;;  %v15533_v29 = vld [vmem:[#allocation80_spill] sm:$0xff]  ;;  %v6049_v2 = vshrl.u32 %v11054_v37, 3  ;;  %15537 = vst [vmem:[#allocation76_spill] sm:$0xff] %v11138_v40  ;;  %v15538_v42 = vld [vmem:[#allocation21_spill] sm:$0xff]  ;;  %v15539_v9 = vld [vmem:[#allocation86_spill] sm:$0xff]  ;;  %v15541_v55 = vand.u32 4294901760, %v11072_v61 }
 0x12d   :  { %8679 = vmatprep.subr.bf16.mxu0 %v15533_v29  ;;  %15535 = vst [vmem:[#allocation70_spill] sm:$0xff] %v11121_v60  ;;  %v11132_v15 = vld [vmem:[#allocation5 + $0x590] sm:$0xff]  ;;  %v11136_v24 = vld [vmem:[#allocation5 + $0x578] sm:$0xff]  ;;  %15540 = vst [vmem:[#allocation80_spill] sm:$0xff] %v11144_v10  ;;  %v11156_v40 = vpack.c.bf16 %v15545_v30, %v15544_v50  ;;  %v15549_v50 = vand.u32 4294901760, %v11096_v62  ;;  %v15550_v30 = vand.u32 4294901760, %v11101_v34 }
 0x12e   :  { %v11134_v29 = vld [vmem:[#allocation5 + $0x510] sm:$0xff]  ;;  %v11150_v38 = vpack.c.bf16 %v15542_v31, %v15541_v55  ;;  %v6050_v23 = vmul.u32 13, %v6049_v2  ;;  %v11164_v55 = vld [vmem:[#allocation5 + $0x520] sm:$0xff]  ;;  %v15553_v2 = vand.u32 4294901760, %v11105_v54  ;;  %v11185_v31 = vsub.s32 %v11003_v33, %v6039_v11 }
 0x12f   :  { %8489 = vmatpush1.bf16.msra.mxu1 %v15538_v42  ;;  %15546 = vst [vmem:[#allocation86_spill] sm:$0xff] %v11156_v40  ;;  %v15547_v37 = vld [vmem:[#allocation87_spill] sm:$0xff]  ;;  %v15548_v42 = vld [vmem:[#allocation90_spill] sm:$0xff]  ;;  %v11172_v28 = vpack.c.bf16 %v15550_v30, %v15549_v50  ;;  %v15555_v40 = vand.u32 4294901760, %v11113_v13  ;;  %v15556_v10 = vand.u32 4294901760, %v11115_v56  ;;  %v11193_v50 = vld [vmem:[#allocation5 + $0x5f8] sm:$0xff] }
 0x130   :  { %8681 = vmatpush1.bf16.msra.mxu0 %v15539_v9  ;;  %15543 = vst [vmem:[#allocation21_spill] sm:$0xff] %v11150_v38  ;;  %8491 = vmatprep.subr.bf16.mxu1 %v15547_v37  ;;  %v11166_v38 = vld [vmem:[#allocation5 + $0x588] sm:$0xff]  ;;  %v15552_v37 = vand.u32 4294901760, %v11103_v6  ;;  %v11182_v48 = vld [vmem:[#allocation5 + $0x650] sm:$0xff]  ;;  %v11195_v30 = vld [vmem:[#allocation5 + $0x660] sm:$0xff]  ;;  %v15564_v4 = vand.u32 4294901760, %v11136_v24 }
 0x131   :  { %8683 = vmatprep.subr.bf16.mxu0 %v15548_v42  ;;  %15551 = vst [vmem:[#allocation87_spill] sm:$0xff] %v11172_v28  ;;  %v11180_v9 = vld [vmem:[#allocation5 + $0x5e8] sm:$0xff]  ;;  %v11191_v60 = vpack.c.bf16 %v15556_v10, %v15555_v40  ;;  %v11197_v28 = vld [vmem:[#allocation5 + $0x5e0] sm:$0xff]  ;;  %v15559_v11 = vld [vmem:[#allocation36_spill] sm:$0xff]  ;;  %vm6175_vm0 = vcmp.ne.s32.totalorder %v11185_v31, 0  ;;  %vm6188_vm1 = vcmp.lt.s32.totalorder %v11185_v31, 0 }
 0x132   :  { %v11178_v42 = vpack.c.bf16 %v15553_v2, %v15552_v37  ;;  %v6051_v37 = vsub.s32 %v11034_v59, %v6050_v23  ;;  %v15560_v2 = vand.u32 4294901760, %v11125_v0  ;;  %v11232_v10 = vld [vmem:[#allocation5 + $0x658] sm:$0xff]  ;;  %v15568_v23 = vand.u32 4294901760, %v10946_v7  ;;  %vm11265_vm4 = vmand %vm6188_vm1, %vm6175_vm0 }
 0x133   :  { %15557 = vst [vmem:[#allocation104_spill] sm:$0xff] %v11191_v60 }
 0x134   :  { %15554 = vst [vmem:[#allocation90_spill] sm:$0xff] %v11178_v42  ;;  %v15558_v42 = vld [vmem:[#allocation91_spill] sm:$0xff]  ;;  %8685 = vmatpush1.bf16.msra.mxu0 %v15559_v11  ;;  %v15563_v11 = vand.u32 4294901760, %v11134_v29  ;;  %v3778_v40 = vsub.f32 %v10946_v7, %v15568_v23  ;;  %vm6176_vm2 = vcmp.ne.s32.totalorder %v6051_v37, 0  ;;  %vm6189_vm3 = vcmp.lt.s32.totalorder %v6051_v37, 0 }
 0x135   :  { %8493 = vmatpush1.bf16.msra.mxu1 %v15558_v42  ;;  %8687 = vmatprep.subr.bf16.mxu0 %v10858_v5  ;;  %v15561_v42 = vand.u32 4294901760, %v11132_v15  ;;  %v15573_v23 = vand.u32 4294901760, %v10956_v52  ;;  %vm11276_vm5 = vmand %vm6189_vm3, %vm6176_vm2 }
 0x136   :  { %8495 = vmatprep.subr.bf16.mxu1 %v10852_v21  ;;  %v11220_v33 = vpack.c.bf16 %v15564_v4, %v15563_v11  ;;  %v15566_v4 = vand.u32 4294901760, %v10940_v16  ;;  %v15567_v21 = vand.u32 4294901760, %v10942_v26 }
 0x137   :  { %v11214_v60 = vpack.c.bf16 %v15561_v42, %v15560_v2  ;;  %v11228_v2 = vld [vmem:[#allocation5 + $0x648] sm:$0xff]  ;;  %v11230_v42 = vld [vmem:[#allocation5 + $0x5f0] sm:$0xff]  ;;  %v2929_v59 = vsub.f32 %v10956_v52, %v15573_v23  ;;  %v15580_v52 = vand.u32 4294901760, %v10962_v47 }
 0x138   :  { %15565 = vst [vmem:[#allocation36_spill] sm:$0xff] %v11220_v33  ;;  %v2923_v11 = vsub.f32 %v10940_v16, %v15566_v4  ;;  %v2935_v5 = vsub.f32 %v10942_v26, %v15567_v21  ;;  %8689 = vmatpush1.bf16.msra.mxu0 %v10870_v36  ;;  %v15569_v33 = vand.u32 4294901760, %v10948_v63  ;;  %v6214_v21 = vadd.s32 13, %v11185_v31 }
 0x139   :  { %15562 = vst [vmem:[#allocation91_spill] sm:$0xff] %v11214_v60  ;;  %8497 = vmatpush1.bf16.msra.mxu1 %v10864_v1  ;;  %8691 = vmatprep.subr.bf16.mxu0 %v15434_v51  ;;  %v6215_v51 = vadd.s32 13, %v6051_v37  ;;  %v3779_v16 = vand.u32 4294901760, %v3778_v40  ;;  %v15576_v26 = vand.u32 4294901760, %v10958_v18  ;;  %v3784_v40 = vsub.f32 %v10962_v47, %v15580_v52 }
 0x13a   :  { %v3790_v4 = vsub.f32 %v10948_v63, %v15569_v33  ;;  %8499 = vmatprep.subr.bf16.mxu1 %v15433_v53  ;;  %v15570_v63 = vld [vmem:[#allocation25_spill] sm:$0xff]  ;;  %v2924_v1 = vand.u32 4294901760, %v2923_v11  ;;  %v2936_v36 = vand.u32 4294901760, %v2935_v5  ;;  %v15586_v52 = vand.u32 4294901760, %v11195_v30  ;;  %v15599_v33 = vld [vmem:[#allocation55_spill] sm:$0xff] }
 0x13b   :  { %2702 = vmatmul.mubr.f32.vlgmr.msra.gmra.mrb[2].mxu0 %v15570_v63  ;;  %v2941_v5 = vsub.f32 %v10958_v18, %v15576_v26  ;;  %v15589_v11 = vand.u32 4294901760, %v11228_v2  ;;  %v11322_v18 = vsel %vm11265_vm4, %v6214_v21, %v11185_v31  ;;  %v15598_v21 = vand.u32 4294901760, %v10966_v8 }
 0x13c   :  { %1847 = vmatmul.mubr.f32.vlgmr.msra.gmra.mrb[2].mxu1 %v15570_v63  ;;  %8693 = vmatpush1.bf16.msra.mxu0 %v15437_v20  ;;  %v3791_v7 = vand.u32 4294901760, %v3790_v4  ;;  %v15578_v20 = vand.u32 4294901760, %v11166_v38  ;;  %v15581_v4 = vand.u32 4294901760, %v10964_v32  ;;  %15591 = vst [vmem:[#allocation109_spill] sm:$0xff] %v11322_v18  ;;  %vm6240_vm6 = vcmp.gt.s32.totalorder %v11322_v18, 6 }
 0x13d   :  { %8501 = vmatpush1.bf16.msra.mxu1 %v15436_v27  ;;  %8695 = vmatprep.subr.bf16.mxu0 %v15439_v46  ;;  %v15577_v27 = vand.u32 4294901760, %v11164_v55  ;;  %v15583_v46 = vand.u32 4294901760, %v11182_v48  ;;  %v2942_v31 = vand.u32 4294901760, %v2941_v5 }
 0x13e   :  { %8503 = vmatprep.subr.bf16.mxu1 %v15438_v44  ;;  %v3796_v26 = vsub.f32 %v10964_v32, %v15581_v4  ;;  %1949 = vmatprep.mubr.f32.mxu1 %v15118_v14  ;;  %v15582_v44 = vand.u32 4294901760, %v11180_v9  ;;  %v15588_v4 = vand.u32 4294901760, %v11197_v28  ;;  %v11338_v53 = vpack.c.bf16 %v3791_v7, %v3779_v16 }
 0x13f   :  { %v11290_v23 = vpack.c.bf16 %v15578_v20, %v15577_v27  ;;  %2804 = vmatprep.mubr.f32.mxu0 %v15118_v14  ;;  %v15585_v20 = vand.u32 4294901760, %v11193_v50  ;;  %v15601_v7 = vand.u32 4294901760, %v11072_v61 }
 0x140   :  { %v11305_v27 = vpack.c.bf16 %v15583_v46, %v15582_v44  ;;  %v11317_v32 = vpack.c.bf16 %v15589_v11, %v15588_v4  ;;  %v11326_v44 = vsel %vm11276_vm5, %v6215_v51, %v6051_v37  ;;  %v15593_v46 = vand.u32 4294901760, %v11230_v42  ;;  %8697 = vmatpush1.bf16.msra.mxu0 %v15441_v17  ;;  %15597 = vst [vmem:[#allocation113_spill] sm:$0xff] %v11338_v53  ;;  %v15699_v53 = vld [vmem:[#allocation52_spill] sm:$0xff] }
 0x141   :  { %15579 = vst [vmem:[#allocation105_spill] sm:$0xff] %v11290_v23  ;;  %v11311_v47 = vpack.c.bf16 %v15586_v52, %v15585_v20  ;;  %15592 = vst [vmem:[#allocation110_spill] sm:$0xff] %v11326_v44  ;;  %v15594_v20 = vand.u32 4294901760, %v11232_v10  ;;  %8505 = vmatpush1.bf16.msra.mxu1 %v15440_v22  ;;  %v11336_v11 = vpack.c.bf16 %v2936_v36, %v2924_v1  ;;  %8699 = vmatprep.subr.bf16.mxu0 %v15599_v33 }
 0x142   :  { %15584 = vst [vmem:[#allocation106_spill] sm:$0xff] %v11305_v27  ;;  %15590 = vst [vmem:[#allocation108_spill] sm:$0xff] %v11317_v32  ;;  %v2947_v37 = vsub.f32 %v10966_v8, %v15598_v21  ;;  %8507 = vmatprep.subr.bf16.mxu1 %v15442_v3  ;;  %v3785_v51 = vand.u32 4294901760, %v3784_v40  ;;  %v3797_v4 = vand.u32 4294901760, %v3796_v26  ;;  %v14828_v17 = vand.u32 4294901760, %v10978_v41  ;;  %v15607_v40 = vld [vmem:[#allocation71_spill] sm:$0xff] }
 0x143   :  { %15587 = vst [vmem:[#allocation107_spill] sm:$0xff] %v11311_v47  ;;  %v11332_v52 = vpack.c.bf16 %v15594_v20, %v15593_v46  ;;  %v2930_v47 = vand.u32 4294901760, %v2929_v59  ;;  %15596 = vst [vmem:[#allocation112_spill] sm:$0xff] %v11336_v11  ;;  %v15600_v59 = vand.u32 4294901760, %v10972_v25  ;;  %v11352_v16 = vsub.f32 %v11072_v61, %v15601_v7  ;;  %v15616_v7 = vld [vmem:[#allocation58_spill] sm:$0xff] }
 0x144   :  { %v15603_v36 = vand.u32 4294901760, %v11082_v57  ;;  %v15605_v3 = vand.u32 4294901760, %v11084_v49  ;;  %v14827_v26 = vand.u32 4294901760, %v15607_v40  ;;  %v15608_v46 = vand.u32 4294901760, %v11086_v35  ;;  %v15728_v27 = vld [vmem:[#allocation74_spill] sm:$0xff] }
 0x145   :  { %15595 = vst [vmem:[#allocation111_spill] sm:$0xff] %v11332_v52  ;;  %v2959_v22 = vsub.f32 %v10972_v25, %v15600_v59  ;;  %15602 = vst [vmem:[#allocation55_spill] sm:$0xff] %v11352_v16  ;;  %v15610_v61 = vand.u32 4294901760, %v11096_v62  ;;  %8509 = vmatpush1.bf16.msra.mxu1 %v15616_v7  ;;  %v3802_v7 = vsub.f32 %v10978_v41, %v14828_v17  ;;  %v15666_v41 = vld [vmem:[#allocation97_spill] sm:$0xff]  ;;  %v15683_v25 = vld [vmem:[#allocation92_spill] sm:$0xff]  ;;  %v15707_v52 = vand.u32 4294901760, %v11058_v58 }
 0x146   :  { %v11357_v1 = vsub.f32 %v11082_v57, %v15603_v36  ;;  %v11362_v5 = vsub.f32 %v11084_v49, %v15605_v3  ;;  %v11368_v20 = vsub.f32 %v11086_v35, %v15608_v46  ;;  %v15612_v57 = vand.u32 4294901760, %v11101_v34  ;;  %v15617_v36 = vld [vmem:[#allocation14_spill] sm:$0xff] }
 0x147   :  { %v11373_v21 = vsub.f32 %v11096_v62, %v15610_v61  ;;  %v15614_v49 = vand.u32 4294901760, %v11103_v6  ;;  %8701 = vmatpush1.bf16.msra.mxu0 %v15617_v36  ;;  %v15618_v35 = vand.u32 4294901760, %v11105_v54  ;;  %v11392_v62 = vpack.c.bf16 %v2942_v31, %v2930_v47  ;;  %v15621_v61 = vld [vmem:[#allocation62_spill] sm:$0xff] }
 0x148   :  { %15604 = vst [vmem:[#allocation114_spill] sm:$0xff] %v11357_v1  ;;  %15606 = vst [vmem:[#allocation115_spill] sm:$0xff] %v11362_v5  ;;  %v11378_v33 = vsub.f32 %v11101_v34, %v15612_v57  ;;  %v2948_v46 = vand.u32 4294901760, %v2947_v37  ;;  %v14829_v34 = vand.u32 4294901760, %v10986_v43  ;;  %8511 = vmatprep.subr.bf16.mxu1 %v15621_v61  ;;  %v15622_v57 = vld [vmem:[#allocation65_spill] sm:$0xff]  ;;  %v14833_v36 = vand.u32 4294901760, %v10988_v39 }
 0x149   :  { %15609 = vst [vmem:[#allocation116_spill] sm:$0xff] %v11368_v20  ;;  %15611 = vst [vmem:[#allocation117_spill] sm:$0xff] %v11373_v21  ;;  %v11383_v59 = vsub.f32 %v11103_v6, %v15614_v49  ;;  %v11390_v3 = vsub.f32 %v11105_v54, %v15618_v35  ;;  %8703 = vmatprep.subr.bf16.mxu0 %v15622_v57  ;;  %v11397_v6 = vpack.c.bf16 %v3797_v4, %v3785_v51  ;;  %v15626_v51 = vld [vmem:[#allocation83_spill] sm:$0xff]  ;;  %v15635_v4 = vld [vmem:[#allocation68_spill] sm:$0xff] }
 0x14a   :  { %15613 = vst [vmem:[#allocation118_spill] sm:$0xff] %v11378_v33  ;;  %15620 = vst [vmem:[#allocation14_spill] sm:$0xff] %v11392_v62  ;;  %v2960_v49 = vand.u32 4294901760, %v2959_v22  ;;  %v15624_v54 = vand.u32 4294901760, %v11113_v13  ;;  %v3814_v31 = vsub.f32 %v15607_v40, %v14827_v26  ;;  %v15627_v22 = vand.u32 4294901760, %v11115_v56  ;;  %8513 = vmatpush1.bf16.msra.mxu1 %v15635_v4  ;;  %v15636_v37 = vld [vmem:[#allocation17_spill] sm:$0xff] }
 0x14b   :  { %15615 = vst [vmem:[#allocation119_spill] sm:$0xff] %v11383_v59  ;;  %15619 = vst [vmem:[#allocation58_spill] sm:$0xff] %v11390_v3  ;;  %v15629_v61 = vand.u32 4294901760, %v11125_v0  ;;  %v15633_v26 = vand.u32 4294901760, %v11134_v29  ;;  %8705 = vmatpush1.bf16.msra.mxu0 %v15636_v37  ;;  %v15643_v37 = vand.u32 4294901760, %v11166_v38  ;;  %v15649_v40 = vld [vmem:[#allocation93_spill] sm:$0xff] }
 0x14c   :  { %15623 = vst [vmem:[#allocation62_spill] sm:$0xff] %v11397_v6  ;;  %v11406_v47 = vsub.f32 %v11113_v13, %v15624_v54  ;;  %v11416_v35 = vsub.f32 %v11115_v56, %v15627_v22  ;;  %v15631_v13 = vand.u32 4294901760, %v11132_v15  ;;  %v15637_v56 = vand.u32 4294901760, %v11136_v24  ;;  %v15677_v6 = vld [vmem:[#allocation88_spill] sm:$0xff]  ;;  %v15705_v62 = vld [vmem:[#allocation102_spill] sm:$0xff] }
 0x14d   :  { %v11421_v57 = vsub.f32 %v11125_v0, %v15629_v61  ;;  %v11431_v17 = vsub.f32 %v11134_v29, %v15633_v26  ;;  %v15639_v0 = vand.u32 4294901760, %v11164_v55  ;;  %v15641_v29 = vld [vmem:[#allocation72_spill] sm:$0xff]  ;;  %v15642_v26 = vld [vmem:[#allocation75_spill] sm:$0xff]  ;;  %v11453_v4 = vsub.f32 %v11166_v38, %v15643_v37 }
 0x14e   :  { %15625 = vst [vmem:[#allocation65_spill] sm:$0xff] %v11406_v47  ;;  %15628 = vst [vmem:[#allocation120_spill] sm:$0xff] %v11416_v35  ;;  %v11426_v54 = vsub.f32 %v11132_v15, %v15631_v13  ;;  %v11438_v22 = vsub.f32 %v11136_v24, %v15637_v56  ;;  %v2953_v15 = vsub.f32 %v10986_v43, %v14829_v34  ;;  %8515 = vmatprep.subr.bf16.mxu1 %v15641_v29 }
 0x14f   :  { %15630 = vst [vmem:[#allocation121_spill] sm:$0xff] %v11421_v57  ;;  %15634 = vst [vmem:[#allocation123_spill] sm:$0xff] %v11431_v17  ;;  %v11443_v61 = vsub.f32 %v11164_v55, %v15639_v0  ;;  %8707 = vmatprep.subr.bf16.mxu0 %v15642_v26  ;;  %v3803_v24 = vand.u32 4294901760, %v3802_v7  ;;  %v2965_v13 = vsub.f32 %v10988_v39, %v14833_v36  ;;  %v15645_v55 = vld [vmem:[#allocation84_spill] sm:$0xff]  ;;  %v15647_v34 = vand.u32 4294901760, %v10994_v12 }
 0x150   :  { %15632 = vst [vmem:[#allocation122_spill] sm:$0xff] %v11426_v54  ;;  %15638 = vst [vmem:[#allocation68_spill] sm:$0xff] %v11438_v22  ;;  %v11459_v0 = vpack.c.bf16 %v2960_v49, %v2948_v46  ;;  %v15648_v26 = vand.u32 4294901760, %v15626_v51  ;;  %v15650_v7 = vand.u32 4294901760, %v11180_v9  ;;  %v15652_v36 = vand.u32 4294901760, %v11182_v48 }
 0x151   :  { %15640 = vst [vmem:[#allocation17_spill] sm:$0xff] %v11443_v61  ;;  %15644 = vst [vmem:[#allocation72_spill] sm:$0xff] %v11453_v4  ;;  %v3808_v29 = vsub.f32 %v10994_v12, %v15647_v34  ;;  %v15654_v49 = vand.u32 4294901760, %v11193_v50  ;;  %v3815_v56 = vand.u32 4294901760, %v3814_v31  ;;  %v15656_v12 = vld [vmem:[#allocation19_spill] sm:$0xff]  ;;  %v15658_v38 = vand.u32 4294901760, %v11195_v30 }
 0x152   :  { %15646 = vst [vmem:[#allocation75_spill] sm:$0xff] %v11459_v0  ;;  %v3820_v43 = vsub.f32 %v15626_v51, %v15648_v26  ;;  %v11471_v37 = vsub.f32 %v11180_v9, %v15650_v7  ;;  %v11476_v46 = vsub.f32 %v11182_v48, %v15652_v36  ;;  %8517 = vmatpush1.bf16.msra.mxu1 %v15656_v12  ;;  %v15657_v26 = vld [vmem:[#allocation78_spill] sm:$0xff]  ;;  %v15660_v7 = vand.u32 4294901760, %v11197_v28  ;;  %v15662_v51 = vld [vmem:[#allocation96_spill] sm:$0xff] }
 0x153   :  { %v11481_v34 = vsub.f32 %v11193_v50, %v15654_v49  ;;  %8709 = vmatpush1.bf16.msra.mxu0 %v15657_v26  ;;  %v11488_v9 = vsub.f32 %v11195_v30, %v15658_v38  ;;  %v2954_v36 = vand.u32 4294901760, %v2953_v15  ;;  %v15663_v50 = vld [vmem:[#allocation81_spill] sm:$0xff]  ;;  %v15664_v31 = vld [vmem:[#allocation20_spill] sm:$0xff]  ;;  %v2966_v12 = vand.u32 4294901760, %v2965_v13  ;;  %v15667_v38 = vld [vmem:[#allocation27_spill] sm:$0xff] }
 0x154   :  { %15651 = vst [vmem:[#allocation124_spill] sm:$0xff] %v11471_v37  ;;  %15653 = vst [vmem:[#allocation125_spill] sm:$0xff] %v11476_v46  ;;  %v11493_v48 = vsub.f32 %v11197_v28, %v15660_v7  ;;  %8519 = vmatprep.subr.bf16.mxu1 %v15663_v50  ;;  %8711 = vmatprep.subr.bf16.mxu0 %v15664_v31  ;;  %v15665_v49 = vand.u32 4294901760, %v15645_v55  ;;  %v3809_v8 = vand.u32 4294901760, %v3808_v29  ;;  %v3821_v0 = vand.u32 4294901760, %v3820_v43  ;;  %v15669_v7 = vld [vmem:[#allocation26_spill] sm:$0xff] }
 0x155   :  { %15655 = vst [vmem:[#allocation126_spill] sm:$0xff] %v11481_v34  ;;  %15659 = vst [vmem:[#allocation19_spill] sm:$0xff] %v11488_v9  ;;  %v15668_v28 = vand.u32 4294901760, %v15649_v40  ;;  %v15670_v50 = vand.u32 4294901760, %v11228_v2  ;;  %v15672_v31 = vand.u32 4294901760, %v11230_v42  ;;  %v15674_v30 = vld [vmem:[#allocation101_spill] sm:$0xff] }
 0x156   :  { %15661 = vst [vmem:[#allocation78_spill] sm:$0xff] %v11493_v48  ;;  %v2971_v26 = vsub.f32 %v15645_v55, %v15665_v49  ;;  %v15675_v29 = vld [vmem:[#allocation30_spill] sm:$0xff]  ;;  %v15676_v55 = vld [vmem:[#allocation85_spill] sm:$0xff]  ;;  %v15724_v9 = vld [vmem:[#allocation67_spill] sm:$0xff]  ;;  %vm6241_vm7 = vcmp.gt.s32.totalorder %v11326_v44, 6 }
 0x157   :  { %v2983_v15 = vsub.f32 %v15649_v40, %v15668_v28  ;;  %v11510_v13 = vsub.f32 %v11228_v2, %v15670_v50  ;;  %v11515_v49 = vsub.f32 %v11230_v42, %v15672_v31  ;;  %8521 = vmatpush1.bf16.msra.mxu1 %v15676_v55  ;;  %8713 = vmatpush1.bf16.msra.mxu0 %v15677_v6  ;;  %v15678_v28 = vand.u32 4294901760, %v11232_v10  ;;  %v15682_v31 = vld [vmem:[#allocation22_spill] sm:$0xff]  ;;  %v15710_v40 = vld [vmem:[#allocation43_spill] sm:$0xff]  ;;  %v15722_v48 = vld [vmem:[#allocation61_spill] sm:$0xff] }
 0x158   :  { %v11526_v2 = vpack.c.bf16 %v3815_v56, %v3803_v24  ;;  %v15681_v50 = vand.u32 4294901760, %v15662_v51  ;;  %8523 = vmatprep.subr.bf16.mxu1 %v15682_v31  ;;  %8715 = vmatprep.subr.bf16.mxu0 %v15683_v25  ;;  %v11534_v55 = vpack.c.bf16 %v2966_v12, %v2954_v36  ;;  %v15685_v6 = vand.u32 4294901760, %v15666_v41 }
 0x159   :  { %15671 = vst [vmem:[#allocation81_spill] sm:$0xff] %v11510_v13  ;;  %15673 = vst [vmem:[#allocation20_spill] sm:$0xff] %v11515_v49  ;;  %v11524_v39 = vsub.f32 %v11232_v10, %v15678_v28  ;;  %v15686_v10 = vand.u32 4294901760, %v15667_v38  ;;  %v11542_v56 = vpack.c.bf16 %v3821_v0, %v3809_v8  ;;  %v2972_v28 = vand.u32 4294901760, %v2971_v26  ;;  %v15693_v8 = vld [vmem:[#allocation94_spill] sm:$0xff]  ;;  %v15694_v0 = vld [vmem:[#allocation24_spill] sm:$0xff] }
 0x15a   :  { %15680 = vst [vmem:[#allocation88_spill] sm:$0xff] %v11526_v2  ;;  %v3826_v42 = vsub.f32 %v15662_v51, %v15681_v50  ;;  %15684 = vst [vmem:[#allocation22_spill] sm:$0xff] %v11534_v55  ;;  %v3838_v43 = vsub.f32 %v15666_v41, %v15685_v6  ;;  %v2984_v50 = vand.u32 4294901760, %v2983_v15  ;;  %v15688_v31 = vand.u32 4294901760, %v15669_v7  ;;  %v15691_v41 = vld [vmem:[#allocation45_spill] sm:$0xff]  ;;  %v15692_v55 = vld [vmem:[#allocation103_spill] sm:$0xff] }
 0x15b   :  { %15679 = vst [vmem:[#allocation85_spill] sm:$0xff] %v11524_v39  ;;  %v2977_v24 = vsub.f32 %v15667_v38, %v15686_v10  ;;  %15687 = vst [vmem:[#allocation92_spill] sm:$0xff] %v11542_v56  ;;  %v15689_v51 = vand.u32 4294901760, %v15674_v30  ;;  %v15690_v12 = vand.u32 4294901760, %v15675_v29  ;;  %8525 = vmatpush1.bf16.msra.mxu1 %v15693_v8  ;;  %8717 = vmatpush1.bf16.msra.mxu0 %v15694_v0  ;;  %v15695_v15 = vld [vmem:[#allocation35_spill] sm:$0xff]  ;;  %v15698_v10 = vld [vmem:[#allocation49_spill] sm:$0xff] }
 0x15c   :  { %v2989_v25 = vsub.f32 %v15669_v7, %v15688_v31  ;;  %v3827_v26 = vand.u32 4294901760, %v3826_v42  ;;  %v15697_v56 = vld [vmem:[#allocation99_spill] sm:$0xff]  ;;  %v15700_v42 = vld [vmem:[#allocation50_spill] sm:$0xff]  ;;  %v15701_v38 = vld [vmem:[#allocation56_spill] sm:$0xff]  ;;  %v15702_v7 = vand.u32 4294901760, %v15691_v41 }
 0x15d   :  { %v3832_v36 = vsub.f32 %v15674_v30, %v15689_v51  ;;  %v3844_v6 = vsub.f32 %v15675_v29, %v15690_v12  ;;  %v15696_v51 = vld [vmem:[#allocation28_spill] sm:$0xff]  ;;  %8719 = vmatprep.subr.bf16.mxu0 %v15697_v56  ;;  %v3839_v12 = vand.u32 4294901760, %v3838_v43  ;;  %v2978_v2 = vand.u32 4294901760, %v2977_v24  ;;  %v15704_v56 = vld [vmem:[#allocation31_spill] sm:$0xff]  ;;  %v15709_v0 = vld [vmem:[#allocation38_spill] sm:$0xff] }
 0x15e   :  { %8527 = vmatprep.subr.bf16.mxu1 %v15696_v51  ;;  %v2990_v8 = vand.u32 4294901760, %v2989_v25  ;;  %v2995_v51 = vsub.f32 %v15691_v41, %v15702_v7  ;;  %v15703_v43 = vand.u32 4294901760, %v15692_v55  ;;  %v15706_v25 = vand.u32 4294901760, %v15695_v15 }
 0x15f   :  { %v3833_v31 = vand.u32 4294901760, %v3832_v36  ;;  %v3845_v32 = vand.u32 4294901760, %v3844_v6  ;;  %8529 = vmatpush1.bf16.msra.mxu1 %v15704_v56  ;;  %8721 = vmatpush1.bf16.msra.mxu0 %v15705_v62  ;;  %v3862_v36 = vsub.f32 %v11058_v58, %v15707_v52  ;;  %v15708_v6 = vand.u32 4294901760, %v11062_v19 }
 0x160   :  { %v3007_v24 = vsub.f32 %v15692_v55, %v15703_v43  ;;  %v3850_v11 = vsub.f32 %v15695_v15, %v15706_v25  ;;  %8723 = vmatprep.subr.bf16.mxu1 %v15709_v0  ;;  %8915 = vmatprep.subr.bf16.mxu0 %v15710_v40  ;;  %v11589_v62 = vsel %vm6240_vm6, 1.5707964, %v15118_v14  ;;  %v11591_v43 = vpack.c.bf16 %v2984_v50, %v2972_v28 }
 0x161   :  { %v3001_v7 = vsub.f32 %v11062_v19, %v15708_v6  ;;  %v15712_v56 = vand.u32 4294901760, %v11066_v45  ;;  %v15713_v52 = vand.u32 4294901760, %v15698_v10  ;;  %v11599_v6 = vpack.c.bf16 %v3839_v12, %v3827_v26 }
 0x162   :  { %15711 = vst [vmem:[#allocation94_spill] sm:$0xff] %v11591_v43  ;;  %v15715_v0 = vand.u32 4294901760, %v15699_v53  ;;  %v15716_v18 = vand.u32 4294901760, %v15700_v42  ;;  %v15717_v28 = vand.u32 4294901760, %v15701_v38  ;;  %1951 = vmatmul.mubr.f32.vlgmr.msra.gmra.mrb[2].mxu1 %v15570_v63  ;;  %2806 = vmatmul.mubr.f32.vlgmr.msra.gmra.mrb[2].mxu0 %v15570_v63  ;;  %v11614_v26 = vpack.c.bf16 %v3845_v32, %v3833_v31  ;;  %v15726_v31 = vld [vmem:[#allocation69_spill] sm:$0xff] }
 0x163   :  { %v3013_v25 = vsub.f32 %v11066_v45, %v15712_v56  ;;  %v3856_v39 = vsub.f32 %v15698_v10, %v15713_v52  ;;  %15714 = vst [vmem:[#allocation24_spill] sm:$0xff] %v11599_v6  ;;  %v11612_v56 = vpack.c.bf16 %v2990_v8, %v2978_v2  ;;  %v2996_v12 = vand.u32 4294901760, %v2995_v51  ;;  %v15720_v6 = vld [vmem:[#allocation11_spill] sm:$0xff]  ;;  %2908 = vmatprep.mubr.f32.mxu1 %v15118_v14  ;;  %v15730_v32 = vld [vmem:[#allocation73_spill] sm:$0xff] }
 0x164   :  { %v3868_v40 = vsub.f32 %v15699_v53, %v15715_v0  ;;  %v3019_v49 = vsub.f32 %v15700_v42, %v15716_v18  ;;  %v3031_v50 = vsub.f32 %v15701_v38, %v15717_v28  ;;  %15719 = vst [vmem:[#allocation28_spill] sm:$0xff] %v11614_v26  ;;  %v3008_v52 = vand.u32 4294901760, %v3007_v24  ;;  %8725 = vmatpush1.bf16.msra.mxu1 %v15720_v6  ;;  %v15721_v0 = vld [vmem:[#allocation54_spill] sm:$0xff]  ;;  %v15723_v28 = vld [vmem:[#allocation15_spill] sm:$0xff] }
 0x165   :  { %15718 = vst [vmem:[#allocation35_spill] sm:$0xff] %v11612_v56  ;;  %8917 = vmatpush1.bf16.msra.mxu0 %v15721_v0  ;;  %v3851_v43 = vand.u32 4294901760, %v3850_v11  ;;  %v3863_v18 = vand.u32 4294901760, %v3862_v36  ;;  %v3002_v13 = vand.u32 4294901760, %v3001_v7  ;;  %8727 = vmatprep.subr.bf16.mxu1 %v15723_v28  ;;  %v3014_v63 = vand.u32 4294901760, %v3013_v25  ;;  %v15725_v8 = vld [vmem:[#allocation63_spill] sm:$0xff] }
 0x166   :  { %8919 = vmatprep.subr.bf16.mxu0 %v15724_v9  ;;  %v3857_v2 = vand.u32 4294901760, %v3856_v39  ;;  %3763 = vmatprep.mubr.f32.mxu0 %v15118_v14  ;;  %v3869_v24 = vand.u32 4294901760, %v3868_v40  ;;  %v3020_v11 = vand.u32 4294901760, %v3019_v49  ;;  %v3032_v36 = vand.u32 4294901760, %v3031_v50  ;;  %v15727_v7 = vld [vmem:[#allocation70_spill] sm:$0xff]  ;;  %v15729_v28 = vld [vmem:[#allocation80_spill] sm:$0xff] }
 0x167   :  { %v3036_v0 = vand.u32 4294901760, %v15727_v7  ;;  %v15731_v51 = vld [vmem:[#allocation79_spill] sm:$0xff]  ;;  %v11632_v9 = vpack.c.bf16 %v3008_v52, %v2996_v12  ;;  %v15732_v40 = vand.u32 4294901760, %v15722_v48  ;;  %v11642_v39 = vpack.c.bf16 %v3863_v18, %v3851_v43  ;;  %v719_v44 = vpop.f32.mrb[0].mxu1 }
 0x168   :  { %8729 = vmatpush1.bf16.msra.mxu1 %v15730_v32  ;;  %v15733_v56 = vld [vmem:[#allocation23_spill] sm:$0xff]  ;;  %v11644_v25 = vpack.c.bf16 %v3014_v63, %v3002_v13  ;;  %v15737_v12 = vand.u32 4294901760, %v15725_v8  ;;  %v15740_v6 = vand.u32 4294901760, %v15726_v31  ;;  %v15742_v63 = vand.u32 4294901760, %v15729_v28 }
 0x169   :  { %8921 = vmatpush1.bf16.msra.mxu0 %v15731_v51  ;;  %v3874_v49 = vsub.f32 %v15722_v48, %v15732_v40  ;;  %8731 = vmatprep.subr.bf16.mxu1 %v15733_v56  ;;  %v15734_v26 = vld [vmem:[#allocation95_spill] sm:$0xff]  ;;  %15735 = vst [vmem:[#allocation99_spill] sm:$0xff] %v11642_v39  ;;  %v11649_v51 = vpack.c.bf16 %v3869_v24, %v3857_v2  ;;  %v15741_v56 = vand.u32 4294901760, %v15728_v27  ;;  %v15743_v18 = vand.u32 4294901760, %v11352_v16 }
 0x16a   :  { %8923 = vmatprep.subr.bf16.mxu0 %v15734_v26  ;;  %15736 = vst [vmem:[#allocation49_spill] sm:$0xff] %v11644_v25  ;;  %v3886_v52 = vsub.f32 %v15725_v8, %v15737_v12  ;;  %v11651_v40 = vpack.c.bf16 %v3032_v36, %v3020_v11  ;;  %v3025_v50 = vsub.f32 %v15726_v31, %v15740_v6  ;;  %v15744_v24 = vand.u32 4294901760, %v11357_v1  ;;  %v15745_v36 = vld [vmem:[#allocation98_spill] sm:$0xff]  ;;  %v15746_v6 = vld [vmem:[#allocation100_spill] sm:$0xff] }
 0x16b   :  { %15738 = vst [vmem:[#allocation52_spill] sm:$0xff] %v11649_v51  ;;  %v3037_v26 = vsub.f32 %v15727_v7, %v3036_v0  ;;  %v3880_v43 = vsub.f32 %v15728_v27, %v15741_v56  ;;  %v3892_v13 = vsub.f32 %v15729_v28, %v15742_v63  ;;  %v3043_v2 = vsub.f32 %v11352_v16, %v15743_v18 }
 0x16c   :  { %15739 = vst [vmem:[#allocation50_spill] sm:$0xff] %v11651_v40  ;;  %v3055_v11 = vsub.f32 %v11357_v1, %v15744_v24  ;;  %8733 = vmatpush1.bf16.msra.mxu1 %v15745_v36  ;;  %v3875_v12 = vand.u32 4294901760, %v3874_v49  ;;  %v15747_v32 = vand.u32 4294901760, %v11362_v5  ;;  %v15748_v7 = vand.u32 4294901760, %v11368_v20  ;;  %v15752_v24 = vld [vmem:[#allocation29_spill] sm:$0xff] }
 0x16d   :  { %8925 = vmatpush1.bf16.msra.mxu0 %v15746_v6  ;;  %v15749_v40 = vand.u32 4294901760, %v15674_v30  ;;  %v15750_v18 = vand.u32 4294901760, %v15675_v29  ;;  %8735 = vmatprep.subr.bf16.mxu1 %v15752_v24  ;;  %v15753_v36 = vld [vmem:[#allocation37_spill] sm:$0xff]  ;;  %v3887_v6 = vand.u32 4294901760, %v3886_v52  ;;  %v3048_v49 = vand.u32 4294901760, %v11373_v21 }
 0x16e   :  { %v3898_v56 = vsub.f32 %v11362_v5, %v15747_v32  ;;  %v3910_v63 = vsub.f32 %v11368_v20, %v15748_v7  ;;  %8927 = vmatprep.subr.bf16.mxu0 %v15753_v36  ;;  %v15754_v25 = vand.u32 4294901760, %v15691_v41  ;;  %v15755_v32 = vand.u32 4294901760, %v15692_v55 }
 0x16f   :  { %v11681_v51 = vpack.c.bf16 %v15750_v18, %v15749_v40  ;;  %v15757_v7 = vand.u32 4294901760, %v15695_v15  ;;  %v15758_v30 = vand.u32 4294901760, %v11058_v58  ;;  %v3026_v40 = vand.u32 4294901760, %v3025_v50  ;;  %v15764_v58 = vld [vmem:[#allocation47_spill] sm:$0xff] }
 0x170   :  { %v11690_v39 = vpack.c.bf16 %v15755_v32, %v15754_v25  ;;  %v3038_v18 = vand.u32 4294901760, %v3037_v26  ;;  %v15760_v52 = vand.u32 4294901760, %v11062_v19  ;;  %v15761_v36 = vand.u32 4294901760, %v11066_v45 }
 0x171   :  { %15751 = vst [vmem:[#allocation56_spill] sm:$0xff] %v11681_v51  ;;  %v11696_v29 = vpack.c.bf16 %v15758_v30, %v15757_v7  ;;  %v3060_v51 = vand.u32 4294901760, %v11378_v33  ;;  %v3881_v41 = vand.u32 4294901760, %v3880_v43  ;;  %v3893_v55 = vand.u32 4294901760, %v3892_v13  ;;  %8929 = vmatpush1.bf16.msra.mxu0 %v15764_v58  ;;  %v15769_v43 = vld [vmem:[#allocation59_spill] sm:$0xff] }
 0x172   :  { %15756 = vst [vmem:[#allocation31_spill] sm:$0xff] %v11690_v39  ;;  %v11703_v24 = vpack.c.bf16 %v15761_v36, %v15760_v52  ;;  %v3044_v25 = vand.u32 4294901760, %v3043_v2  ;;  %v3903_v32 = vand.u32 4294901760, %v11383_v59  ;;  %v15763_v39 = vld [vmem:[#allocation42_spill] sm:$0xff]  ;;  %v3056_v30 = vand.u32 4294901760, %v3055_v11  ;;  %v15768_v36 = vld [vmem:[#allocation12_spill] sm:$0xff]  ;;  %8931 = vmatprep.subr.bf16.mxu0 %v15769_v43 }
 0x173   :  { %15759 = vst [vmem:[#allocation102_spill] sm:$0xff] %v11696_v29  ;;  %8737 = vmatpush1.bf16.msra.mxu1 %v15763_v39  ;;  %v3899_v50 = vand.u32 4294901760, %v3898_v56  ;;  %v3911_v26 = vand.u32 4294901760, %v3910_v63  ;;  %v15765_v7 = vand.u32 4294901760, %v15698_v10  ;;  %v15766_v29 = vand.u32 4294901760, %v15699_v53 }
 0x174   :  { %15762 = vst [vmem:[#allocation61_spill] sm:$0xff] %v11703_v24  ;;  %8739 = vmatprep.subr.bf16.mxu1 %v15768_v36  ;;  %v11717_v13 = vsub.f32 %v11373_v21, %v3048_v49  ;;  %v3915_v2 = vand.u32 4294901760, %v11390_v3  ;;  %v15770_v52 = vand.u32 4294901760, %v15700_v42  ;;  %v15771_v11 = vand.u32 4294901760, %v15701_v38 }
 0x175   :  { %v11712_v19 = vpack.c.bf16 %v15766_v29, %v15765_v7  ;;  %v15773_v63 = vand.u32 4294901760, %v15722_v48  ;;  %v15774_v29 = vand.u32 4294901760, %v15725_v8  ;;  %v11735_v24 = vsub.f32 %v11378_v33, %v3060_v51  ;;  %v15811_v33 = vld [vmem:[#allocation85_spill] sm:$0xff] }
 0x176   :  { %v11724_v56 = vpack.c.bf16 %v15771_v11, %v15770_v52  ;;  %v3066_v43 = vand.u32 4294901760, %v11406_v47  ;;  %v15776_v36 = vand.u32 4294901760, %v15726_v31  ;;  %v11742_v39 = vpack.c.bf16 %v3038_v18, %v3026_v40  ;;  %v15783_v18 = vld [vmem:[#allocation21_spill] sm:$0xff] }
 0x177   :  { %15767 = vst [vmem:[#allocation63_spill] sm:$0xff] %v11712_v19  ;;  %v11730_v7 = vpack.c.bf16 %v15774_v29, %v15773_v63  ;;  %v11732_v19 = vpack.c.bf16 %v3887_v6, %v3875_v12  ;;  %v11744_v52 = vpack.c.bf16 %v3893_v55, %v3881_v41  ;;  %v11747_v11 = vsub.f32 %v11383_v59, %v3903_v32  ;;  %v15778_v6 = vld [vmem:[#allocation64_spill] sm:$0xff] }
 0x178   :  { %15772 = vst [vmem:[#allocation69_spill] sm:$0xff] %v11724_v56  ;;  %v11740_v58 = vpack.c.bf16 %v3036_v0, %v15776_v36  ;;  %v3078_v63 = vand.u32 4294901760, %v11416_v35  ;;  %8741 = vmatpush1.bf16.msra.mxu1 %v15778_v6  ;;  %v15779_v12 = vld [vmem:[#allocation76_spill] sm:$0xff]  ;;  %v6254_v29 = vsel %vm6241_vm7, 1.5707964, %v15118_v14  ;;  %v11757_v0 = vpack.c.bf16 %v3911_v26, %v3899_v50  ;;  %v15784_v36 = vld [vmem:[#allocation86_spill] sm:$0xff] }
 0x179   :  { %15775 = vst [vmem:[#allocation127_spill] sm:$0xff] %v11730_v7  ;;  %8933 = vmatpush1.bf16.msra.mxu0 %v15779_v12  ;;  %v11755_v7 = vpack.c.bf16 %v3056_v30, %v3044_v25  ;;  %v15780_v41 = vand.u32 4294901760, %v15728_v27  ;;  %v15781_v55 = vand.u32 4294901760, %v15729_v28  ;;  %8743 = vmatprep.subr.bf16.mxu1 %v15783_v18  ;;  %v11769_v56 = vsub.f32 %v11390_v3, %v3915_v2  ;;  %v15810_v59 = vld [vmem:[#allocation20_spill] sm:$0xff] }
 0x17a   :  { %15777 = vst [vmem:[#allocation128_spill] sm:$0xff] %v11740_v58  ;;  %8935 = vmatprep.subr.bf16.mxu0 %v15784_v36  ;;  %v15785_v25 = vand.u32 4294901760, %v11352_v16  ;;  %v15786_v30 = vand.u32 4294901760, %v11357_v1  ;;  %v15788_v26 = vand.u32 4294901760, %v11362_v5  ;;  %v11785_v58 = vsub.f32 %v11406_v47, %v3066_v43  ;;  %v15794_v36 = vld [vmem:[#allocation87_spill] sm:$0xff]  ;;  %v15795_v47 = vld [vmem:[#allocation90_spill] sm:$0xff] }
 0x17b   :  { %v11763_v40 = vpack.c.bf16 %v15781_v55, %v15780_v41  ;;  %v15789_v41 = vand.u32 4294901760, %v11368_v20  ;;  %v3921_v18 = vand.u32 4294901760, %v11421_v57  ;;  %v11788_v12 = vpack.c.bf16 %v3060_v51, %v3048_v49  ;;  %v15815_v16 = vld [vmem:[#allocation108_spill] sm:$0xff] }
 0x17c   :  { %v11775_v50 = vpack.c.bf16 %v15786_v30, %v15785_v25  ;;  %v721_v25 = vpop.f32.mrb[1].mxu1  ;;  %8745 = vmatpush1.bf16.msra.mxu1 %v15794_v36  ;;  %v3072_v51 = vand.u32 4294901760, %v11431_v17  ;;  %v11803_v49 = vpack.c.bf16 %v3915_v2, %v3903_v32  ;;  %v15804_v32 = vld [vmem:[#allocation19_spill] sm:$0xff]  ;;  %v15807_v36 = vld [vmem:[#allocation78_spill] sm:$0xff]  ;;  %v15832_v27 = vld [vmem:[#allocation28_spill] sm:$0xff] }
 0x17d   :  { %15782 = vst [vmem:[#allocation129_spill] sm:$0xff] %v11763_v40  ;;  %v11781_v55 = vpack.c.bf16 %v15789_v41, %v15788_v26  ;;  %v1097_v40 = vpop.f32.mrb[0].mxu0  ;;  %15791 = vst [vmem:[#allocation132_spill] sm:$0xff] %v11788_v12  ;;  %v11794_v26 = vsub.f32 %v11416_v35, %v3078_v63  ;;  %v3933_v41 = vand.u32 4294901760, %v11426_v54  ;;  %8937 = vmatpush1.bf16.msra.mxu0 %v15795_v47 }
 0x17e   :  { %15787 = vst [vmem:[#allocation130_spill] sm:$0xff] %v11775_v50  ;;  %v11790_v6 = vadd.f32 %v1097_v40, %v719_v44  ;;  %v1099_v30 = vpop.f32.mrb[1].mxu0  ;;  %v3084_v44 = vand.u32 4294901760, %v11438_v22  ;;  %15796 = vst [vmem:[#allocation135_spill] sm:$0xff] %v11803_v49  ;;  %v15798_v50 = vld [vmem:[#allocation104_spill] sm:$0xff]  ;;  %8939 = vmatprep.subr.bf16.mxu0 %v11214_v60  ;;  %v11821_v2 = vsub.f32 %v11421_v57, %v3921_v18  ;;  %v3927_v60 = vand.u32 4294901760, %v11443_v61 }
 0x17f   :  { %15790 = vst [vmem:[#allocation131_spill] sm:$0xff] %v11781_v55  ;;  %v11797_v55 = vadd.f32 %v1099_v30, %v721_v25  ;;  %8747 = vmatprep.subr.bf16.mxu1 %v15798_v50  ;;  %v11812_v30 = vpack.c.bf16 %v3078_v63, %v3066_v43  ;;  %v11814_v12 = vpack.c.bf16 %v3933_v41, %v3921_v18  ;;  %v3939_v25 = vand.u32 4294901760, %v11453_v4  ;;  %v15806_v50 = vld [vmem:[#allocation107_spill] sm:$0xff]  ;;  %v15808_v57 = vld [vmem:[#allocation81_spill] sm:$0xff] }
 0x180   :  { %15792 = vst [vmem:[#allocation133_spill] sm:$0xff] %v11790_v6  ;;  %v11807_v40 = vadd.f32 %v11790_v6, %v11589_v62  ;;  %v11823_v62 = vpack.c.bf16 %v3084_v44, %v3072_v51  ;;  %v3090_v43 = vand.u32 4294901760, %v11471_v37  ;;  %v3945_v18 = vand.u32 4294901760, %v11481_v34 }
 0x181   :  { %15793 = vst [vmem:[#allocation134_spill] sm:$0xff] %v11797_v55  ;;  %15799 = vst [vmem:[#allocation137_spill] sm:$0xff] %v11812_v30  ;;  %v11817_v47 = vadd.f32 %v11797_v55, %v6254_v29  ;;  %8941 = vmatpush1.bf16.msra.mxu0 %v11290_v23  ;;  %v3102_v29 = vand.u32 4294901760, %v11476_v46  ;;  %v3957_v55 = vand.u32 4294901760, %v15804_v32  ;;  %v15805_v30 = vld [vmem:[#allocation106_spill] sm:$0xff]  ;;  %v3096_v6 = vand.u32 4294901760, %v15807_v36 }
 0x182   :  { %15797 = vst [vmem:[#allocation136_spill] sm:$0xff] %v11807_v40  ;;  %15800 = vst [vmem:[#allocation138_spill] sm:$0xff] %v11814_v12  ;;  %v6282_v49 = vand.u32 2139095040, %v11807_v40  ;;  %v15803_v12 = vld [vmem:[#allocation36_spill] sm:$0xff]  ;;  %8943 = vmatprep.subr.bf16.mxu0 %v15806_v50  ;;  %v14887_v35 = vand.u32 4294901760, %v15808_v57  ;;  %v11839_v3 = vpack.c.bf16 %v3939_v25, %v3927_v60  ;;  %v14888_v23 = vand.u32 4294901760, %v15810_v59 }
 0x183   :  { %15801 = vst [vmem:[#allocation139_spill] sm:$0xff] %v11817_v47  ;;  %15802 = vst [vmem:[#allocation140_spill] sm:$0xff] %v11823_v62  ;;  %v6386_v63 = vand.u32 2139095040, %v11817_v47  ;;  %8749 = vmatpush1.bf16.msra.mxu1 %v15803_v12  ;;  %v11843_v20 = vpack.c.bf16 %v3102_v29, %v3090_v43  ;;  %v11846_v1 = vpack.c.bf16 %v3957_v55, %v3945_v18 }
 0x184   :  { %v6283_v62 = vshrl.u32 %v6282_v49, 23  ;;  %8751 = vmatprep.subr.bf16.mxu1 %v15805_v30  ;;  %15809 = vst [vmem:[#allocation81_spill] sm:$0xff] %v11839_v3  ;;  %v11850_v50 = vpack.c.bf16 %v14887_v35, %v3096_v6  ;;  %v15816_v3 = vld [vmem:[#allocation111_spill] sm:$0xff]  ;;  %v11858_v21 = vsub.f32 %v11431_v17, %v3072_v51  ;;  %v15819_v35 = vld [vmem:[#allocation112_spill] sm:$0xff]  ;;  %v11875_v51 = vsub.f32 %v11453_v4, %v3939_v25 }
 0x185   :  { %v6387_v12 = vshrl.u32 %v6386_v63, 23  ;;  %15812 = vst [vmem:[#allocation20_spill] sm:$0xff] %v11843_v20  ;;  %15813 = vst [vmem:[#allocation85_spill] sm:$0xff] %v11846_v1  ;;  %8945 = vmatpush1.bf16.msra.mxu0 %v15816_v3  ;;  %v11855_v63 = vsub.f32 %v11426_v54, %v3933_v41  ;;  %v11872_v41 = vsub.f32 %v11443_v61, %v3927_v60  ;;  %v15822_v60 = vld [vmem:[#allocation34_spill] sm:$0xff]  ;;  %v14898_v25 = vmov 2475754826  }
 0x186   :  { %v7782_v49 = vadd.s32 4294967169, %v6283_v62  ;;  %15814 = vst [vmem:[#allocation141_spill] sm:$0xff] %v11850_v50  ;;  %v15817_v62 = vand.u32 4294901760, %v15811_v33  ;;  %v11869_v50 = vsub.f32 %v11438_v22, %v3084_v44  ;;  %v11878_v3 = vsub.f32 %v11471_v37, %v3090_v43  ;;  %v15830_v61 = vld [vmem:[#allocation24_spill] sm:$0xff] }
 0x187   :  { %v7786_v30 = vadd.s32 4294967169, %v6387_v12  ;;  %8753 = vmatpush1.bf16.msra.mxu1 %v15815_v16  ;;  %v15820_v12 = vld [vmem:[#allocation113_spill] sm:$0xff]  ;;  %v15825_v16 = vld [vmem:[#allocation75_spill] sm:$0xff] }
 0x188   :  { %v11864_v5 = vpack.c.bf16 %v15817_v62, %v14888_v23  ;;  %v6289_v1 = vadd.s32 1, %v7782_v49  ;;  %8755 = vmatprep.subr.bf16.mxu1 %v15819_v35  ;;  %8947 = vmatprep.subr.bf16.mxu0 %v15820_v12  ;;  %v11881_v62 = vsub.f32 %v11476_v46, %v3102_v29  ;;  %v11884_v35 = vsub.f32 %v11481_v34, %v3945_v18  ;;  %v15823_v29 = vld [vmem:[#allocation14_spill] sm:$0xff]  ;;  %v15828_v34 = vld [vmem:[#allocation92_spill] sm:$0xff] }
 0x189   :  { %v6393_v20 = vadd.s32 1, %v7786_v30  ;;  %v15821_v49 = vand.u32 2147483647, %v11807_v40  ;;  %3769 = vmatmul.mubr.f32.vlgmr.msra.gmra.mrb[4].mxu0 %v15822_v60  ;;  %v11894_v30 = vsub.f32 %v15804_v32, %v3957_v55  ;;  %v15824_v12 = vld [vmem:[#allocation62_spill] sm:$0xff]  ;;  %v11914_v55 = vsub.f32 %v15807_v36, %v3096_v6 }
 0x18a   :  { %15818 = vst [vmem:[#allocation142_spill] sm:$0xff] %v11864_v5  ;;  %vm6290_vm8 = vcmp.gt.s32.totalorder %v6289_v1, 0  ;;  %2914 = vmatmul.mubr.f32.vlgmr.msra.gmra.mrb[4].mxu1 %v15822_v60  ;;  %8949 = vmatpush1.bf16.msra.mxu0 %v15824_v12  ;;  %v15826_v60 = vld [vmem:[#allocation88_spill] sm:$0xff]  ;;  %v15827_v32 = vld [vmem:[#allocation22_spill] sm:$0xff]  ;;  %v14908_v36 = vmov 2102212464  }
 0x18b   :  { %v11888_v44 = vand.u32 8388607, %v15821_v49  ;;  %v6291_v43 = vsel %vm6290_vm8, %v6289_v1, 0  ;;  %8757 = vmatpush1.bf16.msra.mxu1 %v15823_v29  ;;  %vm6394_vm9 = vcmp.gt.s32.totalorder %v6393_v20, 0  ;;  %8951 = vmatprep.subr.bf16.mxu0 %v15826_v60  ;;  %v14893_v29 = vmov 683565275  }
 0x18c   :  { %v6293_v5 = vand.u32 31, %v6291_v43  ;;  %8759 = vmatprep.subr.bf16.mxu1 %v15825_v16  ;;  %3144 = vmatprep.mubr.f32.mxu1 %v15118_v14  ;;  %v6292_v1 = vshrl.u32 %v6291_v43, 5  ;;  %v11919_v49 = vsel %vm6394_vm9, %v6393_v20, 0  ;;  %v14904_v60 = vmov 2131351028   ;;  %v15829_v46 = vld [vmem:[#allocation94_spill] sm:$0xff] }
 0x18d   :  { %3999 = vmatprep.mubr.f32.mxu0 %v15118_v14  ;;  %v6287_v16 = vor.u32 8388608, %v11888_v44  ;;  %v14911_v20 = vmov 920167782   ;;  %v11934_v17 = vand.u32 31, %v11919_v49 }
 0x18e   :  { %v6294_v23 = vsub.s32 32, %v6293_v5  ;;  %v6296_v12 = vshll.u32 %v14893_v29, %v6293_v5  ;;  %v6299_v18 = vshll.u32 %v14898_v25, %v6293_v5  ;;  %8953 = vmatpush1.bf16.msra.mxu0 %v15828_v34  ;;  %v6302_v43 = vshll.u32 %v14904_v60, %v6293_v5 }
 0x18f   :  { %8761 = vmatpush1.bf16.msra.mxu1 %v15827_v32  ;;  %v6305_v37 = vshll.u32 %v14908_v36, %v6293_v5  ;;  %v6308_v32 = vshll.u32 %v14911_v20, %v6293_v5  ;;  %v14913_v34 = vmov 1326507024   ;;  %8955 = vmatprep.subr.bf16.mxu0 %v15830_v61  ;;  %vm6311_vm10 = vcmp.lt.s32.totalorder %v6292_v1, 1 }
 0x190   :  { %v6297_v44 = vshrl.u32 %v14898_v25, %v6294_v23  ;;  %v6300_v6 = vshrl.u32 %v14904_v60, %v6294_v23  ;;  %v6303_v29 = vshrl.u32 %v14908_v36, %v6294_v23  ;;  %8763 = vmatprep.subr.bf16.mxu1 %v15829_v46  ;;  %v6306_v4 = vshrl.u32 %v14911_v20, %v6294_v23  ;;  %v15831_v36 = vld [vmem:[#allocation35_spill] sm:$0xff] }
 0x191   :  { %v6309_v25 = vshrl.u32 %v14913_v34, %v6294_v23  ;;  %vm6314_vm11 = vcmp.lt.s32.totalorder %v6292_v1, 4  ;;  %v6327_v34 = vshll.u32 %v6287_v16, 8  ;;  %v15833_v61 = vmov 683565275  }
 0x192   :  { %v6298_v40 = vor.u32 %v6297_v44, %v6296_v12  ;;  %v6301_v22 = vor.u32 %v6300_v6, %v6299_v18  ;;  %v6304_v60 = vor.u32 %v6303_v29, %v6302_v43  ;;  %v6307_v54 = vor.u32 %v6306_v4, %v6305_v37  ;;  %8957 = vmatpush1.bf16.msra.mxu0 %v15832_v27  ;;  %v15834_v37 = vld [vmem:[#allocation99_spill] sm:$0xff]  ;;  %v15835_v6 = vld [vmem:[#allocation49_spill] sm:$0xff] }
 0x193   :  { %v6310_v46 = vor.u32 %v6309_v25, %v6308_v32  ;;  %8765 = vmatpush1.bf16.msra.mxu1 %v15831_v36  ;;  %v6295_v18 = vshrl.u32 %v15833_v61, %v6294_v23  ;;  %vm6313_vm12 = vcmp.lt.s32.totalorder %v6292_v1, 3  ;;  %8959 = vmatprep.subr.bf16.mxu0 %v15834_v37  ;;  %vm6312_vm13 = vcmp.lt.s32.totalorder %v6292_v1, 2 }
 0x194   :  { %v6316_v28 = vsel %vm6314_vm11, %v6304_v60, 2102212464  ;;  %v6319_v5 = vsel %vm6311_vm10, %v6298_v40, %v6301_v22  ;;  %v6323_v20 = vsel %vm6311_vm10, %v6301_v22, %v6304_v60  ;;  %8767 = vmatprep.subr.bf16.mxu1 %v11632_v9  ;;  %v6320_v29 = vsel %vm6314_vm11, %v6307_v54, 920167782 }
 0x195   :  { %v6324_v4 = vsel %vm6314_vm11, %v6310_v46, 1326507024  ;;  %v6321_v25 = vsel %vm6313_vm12, %v6304_v60, %v6320_v29  ;;  %v11944_v12 = vsub.s32 32, %v11934_v17  ;;  %v6315_v44 = vsel %vm6311_vm10, %v6295_v18, %v6298_v40  ;;  %v15837_v60 = vld [vmem:[#allocation50_spill] sm:$0xff] }
 0x196   :  { %v6325_v36 = vsel %vm6313_vm12, %v6307_v54, %v6324_v4  ;;  %v6317_v16 = vsel %vm6313_vm12, %v6301_v22, %v6316_v28  ;;  %v6322_v27 = vsel %vm6312_vm13, %v6319_v5, %v6321_v25  ;;  %v15836_v54 = vld [vmem:[#allocation52_spill] sm:$0xff]  ;;  %v15838_v22 = vand.u32 4294901760, %v11717_v13 }
 0x197   :  { %v6326_v9 = vsel %vm6312_vm13, %v6323_v20, %v6325_v36  ;;  %8769 = vmatpush1.bf16.msra.mxu1 %v15835_v6  ;;  %v11953_v32 = vmul.u32.u64.low %v6327_v34, %v6322_v27  ;;  %v11954_v46 = vmul.u32.u64.high %v6327_v34, %v6322_v27, %v11953_v32  ;;  %8961 = vmatpush1.bf16.msra.mxu0 %v15836_v54  ;;  %v15839_v28 = vand.u32 4294901760, %v11735_v24 }
 0x198   :  { %v11950_v23 = vmul.u32.u64.low %v6327_v34, %v6326_v9  ;;  %v11951_v43 = vmul.u32.u64.high %v6327_v34, %v6326_v9, %v11950_v23  ;;  %8771 = vmatprep.subr.bf16.mxu1 %v15837_v60  ;;  %8963 = vmatprep.subr.bf16.mxu0 %v11732_v19  ;;  %v15840_v20 = vand.u32 4294901760, %v11747_v11  ;;  %v15841_v5 = vand.u32 4294901760, %v11769_v56 }
 0x199   :  { %v8776_v40 = vpack.c.bf16 %v15839_v28, %v15838_v22  ;;  %v15842_v29 = vand.u32 4294901760, %v11785_v58  ;;  %v15843_v4 = vand.u32 4294901760, %v11794_v26  ;;  %v15844_v25 = vand.u32 4294901760, %v15808_v57 }
 0x19a   :  { %v8968_v18 = vpack.c.bf16 %v15841_v5, %v15840_v20  ;;  %v6318_v19 = vsel %vm6312_vm13, %v6315_v44, %v6317_v16  ;;  %v15845_v13 = vand.u32 4294901760, %v11821_v2  ;;  %v15846_v24 = vand.u32 4294901760, %v11855_v63 }
 0x19b   :  { %v8778_v37 = vpack.c.bf16 %v15843_v4, %v15842_v29  ;;  %v3109_v36 = vsub.f32 %v15808_v57, %v15844_v25  ;;  %v15847_v11 = vand.u32 4294901760, %v11858_v21  ;;  %v15848_v56 = vand.u32 4294901760, %v11869_v50  ;;  %8773 = vmatpush1.bf16.msra.mxu1 %v11742_v39  ;;  %8965 = vmatpush1.bf16.msra.mxu0 %v11744_v52 }
 0x19c   :  { %v8970_v27 = vpack.c.bf16 %v15846_v24, %v15845_v13  ;;  %v15849_v58 = vand.u32 4294901760, %v11872_v41  ;;  %v15850_v26 = vand.u32 4294901760, %v11875_v51  ;;  %v15851_v1 = vand.u32 4294901760, %v11878_v3  ;;  %8775 = vmatprep.subr.bf16.mxu1 %v11755_v7  ;;  %8967 = vmatprep.subr.bf16.mxu0 %v11757_v0 }
 0x19d   :  { %v8780_v9 = vpack.c.bf16 %v15848_v56, %v15847_v11  ;;  %v15852_v44 = vand.u32 4294901760, %v11881_v62  ;;  %v15853_v63 = vand.u32 4294901760, %v11884_v35  ;;  %v15854_v16 = vand.u32 4294901760, %v11894_v30 }
 0x19e   :  { %v8972_v6 = vpack.c.bf16 %v15850_v26, %v15849_v58  ;;  %v3098_v50 = vand.u32 4294901760, %v11914_v55  ;;  %v15855_v23 = vand.u32 4294901760, %v15810_v59  ;;  %vm6336_vm14 = vc.u32 %v11951_v43, %v11953_v32 }
 0x19f   :  { %v8782_v2 = vpack.c.bf16 %v15852_v44, %v15851_v1  ;;  %v8974_v21 = vpack.c.bf16 %v15854_v16, %v15853_v63  ;;  %v6337_v39 = vadd.s32 1, %v11954_v46  ;;  %v15856_v3 = vmov 920167782   ;;  %8777 = vmatpush1.bf16.msra.mxu1 %v8776_v40  ;;  %8969 = vmatpush1.bf16.msra.mxu0 %v8968_v18  ;;  %v15863_v16 = vld [vmem:[#allocation41_spill] sm:$0xff] }
 0x1a0   :  { %v3952_v41 = vsub.f32 %v15810_v59, %v15855_v23  ;;  %v6410_v51 = vshrl.u32 %v15856_v3, %v11944_v12  ;;  %v15857_v62 = vand.u32 4294901760, %v15811_v33  ;;  %v6334_v30 = vmul.u32 %v6327_v34, %v6318_v19  ;;  %8779 = vmatprep.subr.bf16.mxu1 %v8778_v37  ;;  %8971 = vmatprep.subr.bf16.mxu0 %v8970_v27  ;;  %v15862_v27 = vld [vmem:[#allocation39_spill] sm:$0xff] }
 0x1a1   :  { %v14916_v55 = vand.u32 2147483647, %v11817_v47  ;;  %v15858_v54 = vmov 1326507024   ;;  %v3110_v22 = vand.u32 4294901760, %v3109_v36  ;;  %v6338_v28 = vsel %vm6336_vm14, %v6337_v39, %v11954_v46  ;;  %v15864_v39 = vld [vmem:[#allocation46_spill] sm:$0xff] }
 0x1a2   :  { %v3964_v35 = vsub.f32 %v15811_v33, %v15857_v62  ;;  %v6413_v60 = vshrl.u32 %v15858_v54, %v11944_v12  ;;  %v12017_v20 = vshrl.u32 %v11919_v49, 5  ;;  %v15859_v7 = vmov 2475754826  }
 0x1a3   :  { %v6401_v52 = vshrl.u32 %v15859_v7, %v11944_v12  ;;  %v15860_v5 = vmov 2102212464   ;;  %v6339_v34 = vadd.s32 %v6338_v28, %v6334_v30  ;;  %v15861_v4 = vmov 2131351028   ;;  %8781 = vmatpush1.bf16.msra.mxu1 %v8780_v9  ;;  %8973 = vmatpush1.bf16.msra.mxu0 %v8972_v6  ;;  %v15866_v9 = vld [vmem:[#allocation51_spill] sm:$0xff]  ;;  %v15867_v6 = vld [vmem:[#allocation53_spill] sm:$0xff] }
 0x1a4   :  { %v6409_v29 = vshll.u32 %v15860_v5, %v11934_v17  ;;  %v6404_v25 = vshrl.u32 %v15861_v4, %v11944_v12  ;;  %v6407_v19 = vshrl.u32 %v15860_v5, %v11944_v12  ;;  %v6412_v0 = vshll.u32 %v15856_v3, %v11934_v17  ;;  %8783 = vmatprep.subr.bf16.mxu1 %v8782_v2  ;;  %v15869_v30 = vld [vmem:[#allocation57_spill] sm:$0xff]  ;;  %v15884_v3 = vld [vmem:[#allocation26_spill] sm:$0xff] }
 0x1a5   :  { %v6400_v49 = vshll.u32 %v15833_v61, %v11934_v17  ;;  %v3953_v36 = vand.u32 4294901760, %v3952_v41  ;;  %v3965_v13 = vand.u32 4294901760, %v3964_v35  ;;  %v6340_v24 = vadd.s32 536870912, %v6339_v34  ;;  %8975 = vmatprep.subr.bf16.mxu0 %v8974_v21  ;;  %v15868_v35 = vld [vmem:[#allocation13_spill] sm:$0xff] }
 0x1a6   :  { %v6411_v46 = vor.u32 %v6410_v51, %v6409_v29  ;;  %v6403_v11 = vshll.u32 %v15859_v7, %v11934_v17  ;;  %v6406_v56 = vshll.u32 %v15861_v4, %v11934_v17  ;;  %v6414_v58 = vor.u32 %v6413_v60, %v6412_v0  ;;  %v15865_v51 = vld [vmem:[#allocation48_spill] sm:$0xff]  ;;  %v15887_v7 = vld [vmem:[#allocation45_spill] sm:$0xff] }
 0x1a7   :  { %v6390_v40 = vand.u32 8388607, %v14916_v55  ;;  %v12037_v26 = vor.u32 %v6401_v52, %v6400_v49  ;;  %v8784_v1 = vpack.c.bf16 %v3110_v22, %v3098_v50  ;;  %v12039_v44 = vshrl.u32 %v6340_v24, 30 }
 0x1a8   :  { %v12041_v18 = vor.u32 %v6404_v25, %v6403_v11  ;;  %v6408_v37 = vor.u32 %v6407_v19, %v6406_v56  ;;  %vm6418_vm15 = vcmp.lt.s32.totalorder %v12017_v20, 4  ;;  %v8976_v17 = vpack.c.bf16 %v3965_v13, %v3953_v36  ;;  %v15871_v19 = vld [vmem:[#allocation66_spill] sm:$0xff]  ;;  %v15872_v36 = vld [vmem:[#allocation16_spill] sm:$0xff]  ;;  %v15873_v13 = vld [vmem:[#allocation71_spill] sm:$0xff] }
 0x1a9   :  { %v6424_v63 = vsel %vm6418_vm15, %v6411_v46, 920167782  ;;  %v8786_v23 = vpack.c.bf16 %v15863_v16, %v15862_v27  ;;  %v6342_v41 = vshll.u32 %v12039_v44, 30  ;;  %v6428_v50 = vsel %vm6418_vm15, %v6414_v58, 1326507024  ;;  %8785 = vmatpush1.bf16.msra.mxu1 %v8784_v1  ;;  %v15874_v56 = vld [vmem:[#allocation25_spill] sm:$0xff] }
 0x1aa   :  { %v8978_v62 = vpack.c.bf16 %v15865_v51, %v15864_v39  ;;  %vm6415_vm0 = vcmp.lt.s32.totalorder %v12017_v20, 1  ;;  %vm6417_vm1 = vcmp.lt.s32.totalorder %v12017_v20, 3  ;;  %v8788_v2 = vpack.c.bf16 %v15867_v6, %v15866_v9  ;;  %8977 = vmatpush1.bf16.msra.mxu0 %v8976_v17  ;;  %v15875_v1 = vld [vmem:[#allocation18_spill] sm:$0xff] }
 0x1ab   :  { %v8980_v60 = vpack.c.bf16 %v15869_v30, %v15868_v35  ;;  %v12059_v22 = vsub.s32 %v6339_v34, %v6342_v41  ;;  %v6391_v28 = vor.u32 8388608, %v6390_v40  ;;  %v6423_v21 = vsel %vm6415_vm0, %v12037_v26, %v12041_v18  ;;  %8787 = vmatprep.subr.bf16.mxu1 %v8786_v23  ;;  %v15870_v34 = vld [vmem:[#allocation60_spill] sm:$0xff]  ;;  %v15877_v23 = vld [vmem:[#allocation82_spill] sm:$0xff]  ;;  %v15878_v41 = vld [vmem:[#allocation83_spill] sm:$0xff] }
 0x1ac   :  { %v6425_v52 = vsel %vm6417_vm1, %v6408_v37, %v6424_v63  ;;  %v6427_v29 = vsel %vm6415_vm0, %v12041_v18, %v6408_v37  ;;  %v6429_v25 = vsel %vm6417_vm1, %v6411_v46, %v6428_v50  ;;  %v8790_v0 = vpack.c.bf16 %v15871_v19, %v15870_v34  ;;  %8979 = vmatprep.subr.bf16.mxu0 %v8978_v62  ;;  %v15876_v63 = vld [vmem:[#allocation77_spill] sm:$0xff]  ;;  %v15879_v62 = vld [vmem:[#allocation84_spill] sm:$0xff] }
 0x1ad   :  { %v6345_v49 = vsub.s32 0, %v12059_v22  ;;  %vm6416_vm2 = vcmp.lt.s32.totalorder %v12017_v20, 2  ;;  %v8982_v24 = vpack.c.bf16 %v15873_v13, %v15872_v36  ;;  %3146 = vmatmul.mubr.f32.vlgmr.msra.gmra.mrb[4].mxu1 %v15874_v56  ;;  %v12084_v40 = vshll.u32 %v6391_v28, 8  ;;  %4001 = vmatmul.mubr.f32.vlgmr.msra.gmra.mrb[4].mxu0 %v15874_v56  ;;  %v15882_v28 = vld [vmem:[#allocation97_spill] sm:$0xff]  ;;  %v15888_v56 = vld [vmem:[#allocation103_spill] sm:$0xff] }
 0x1ae   :  { %v6426_v11 = vsel %vm6416_vm2, %v6423_v21, %v6425_v52  ;;  %v6430_v58 = vsel %vm6416_vm2, %v6427_v29, %v6429_v25  ;;  %8789 = vmatpush1.bf16.msra.mxu1 %v8788_v2  ;;  %v8792_v17 = vpack.c.bf16 %v15876_v63, %v15875_v1  ;;  %8981 = vmatpush1.bf16.msra.mxu0 %v8980_v60  ;;  %v15880_v21 = vld [vmem:[#allocation93_spill] sm:$0xff]  ;;  %v15881_v2 = vld [vmem:[#allocation96_spill] sm:$0xff] }
 0x1af   :  { %v7783_v46 = vmin.u32 %v6345_v49, %v12059_v22  ;;  %8791 = vmatprep.subr.bf16.mxu1 %v8790_v0  ;;  %v8984_v50 = vpack.c.bf16 %v15878_v41, %v15877_v23  ;;  %v8794_v52 = vpack.c.bf16 %v15880_v21, %v15879_v62  ;;  %8983 = vmatprep.subr.bf16.mxu0 %v8982_v24  ;;  %v15886_v24 = vld [vmem:[#allocation30_spill] sm:$0xff] }
 0x1b0   :  { %v12094_v55 = vmul.u32.u64.low %v12084_v40, %v6426_v11  ;;  %v12095_v29 = vmul.u32.u64.high %v12084_v40, %v6426_v11, %v12094_v55  ;;  %v8986_v25 = vpack.c.bf16 %v15882_v28, %v15881_v2  ;;  %3280 = vmatprep.mubr.f32.mxu1 %v15118_v14  ;;  %4135 = vmatprep.mubr.f32.mxu0 %v15118_v14  ;;  %v15885_v11 = vld [vmem:[#allocation101_spill] sm:$0xff]  ;;  %v8798_v47 = vpack.c.bf16 %v15888_v56, %v15887_v7 }
 0x1b1   :  { %v6347_v49 = vclz %v7783_v46  ;;  %v12102_v60 = vmul.u32.u64.low %v12084_v40, %v6430_v58  ;;  %v12103_v0 = vmul.u32.u64.high %v12084_v40, %v6430_v58, %v12102_v60  ;;  %v15883_v46 = vld [vmem:[#allocation27_spill] sm:$0xff]  ;;  %v8988_v4 = vpack.c.bf16 %v15886_v24, %v15885_v11 }
 0x1b2   :  { %8793 = vmatpush1.bf16.msra.mxu1 %v8792_v17  ;;  %v8796_v5 = vpack.c.bf16 %v15884_v3, %v15883_v46  ;;  %8985 = vmatpush1.bf16.msra.mxu0 %v8984_v50  ;;  %v6420_v58 = vsel %vm6418_vm15, %v6408_v37, 2102212464  ;;  %v15889_v60 = vld [vmem:[#allocation40_spill] sm:$0xff]  ;;  %v6399_v3 = vshrl.u32 %v15833_v61, %v11944_v12  ;;  %v8992_v11 = vpack.c.bf16 %v15699_v53, %v15698_v10 }
 0x1b3   :  { %v7784_v54 = vadd.s32 4294967294, %v6347_v49  ;;  %8795 = vmatprep.subr.bf16.mxu1 %v8794_v52  ;;  %8987 = vmatprep.subr.bf16.mxu0 %v8986_v25  ;;  %v8990_v49 = vpack.c.bf16 %v15889_v60, %v15695_v15  ;;  %v15890_v50 = vld [vmem:[#allocation44_spill] sm:$0xff]  ;;  %v6335_v7 = vadd.s32 %v11953_v32, %v11951_v43  ;;  %v8802_v37 = vpack.c.bf16 %v15701_v38, %v15700_v42 }
 0x1b4   :  { %v8800_v52 = vpack.c.bf16 %v11066_v45, %v15890_v50  ;;  %v6419_v15 = vsel %vm6415_vm0, %v6399_v3, %v12037_v26  ;;  %v6421_v45 = vsel %vm6417_vm1, %v12041_v18, %v6420_v58  ;;  %v8994_v53 = vpack.c.bf16 %v15725_v8, %v15722_v48  ;;  %v15892_v48 = vld [vmem:[#allocation74_spill] sm:$0xff]  ;;  %v15893_v8 = vld [vmem:[#allocation80_spill] sm:$0xff]  ;;  %v15896_v58 = vld [vmem:[#allocation115_spill] sm:$0xff] }
 0x1b5   :  { %vm7785_vm3 = vcmp.lt.s32.totalorder %v7784_v54, 0  ;;  %v6441_v32 = vadd.s32 1, %v12095_v29  ;;  %vm6440_vm4 = vc.u32 %v12103_v0, %v12094_v55  ;;  %v6422_v3 = vsel %vm6416_vm2, %v6419_v15, %v6421_v45  ;;  %v15895_v26 = vld [vmem:[#allocation114_spill] sm:$0xff]  ;;  %v15897_v60 = vld [vmem:[#allocation116_spill] sm:$0xff]  ;;  %v15902_v15 = vld [vmem:[#allocation65_spill] sm:$0xff] }
 0x1b6   :  { %v6350_v17 = vsel %vm7785_vm3, 0, %v7784_v54  ;;  %8797 = vmatpush1.bf16.msra.mxu1 %v8796_v5  ;;  %8989 = vmatpush1.bf16.msra.mxu0 %v8988_v4  ;;  %v8996_v5 = vpack.c.bf16 %v15893_v8, %v15892_v48  ;;  %v15894_v4 = vld [vmem:[#allocation55_spill] sm:$0xff]  ;;  %v8998_v20 = vpack.c.bf16 %v15897_v60, %v15896_v58  ;;  %v15909_v48 = vld [vmem:[#allocation17_spill] sm:$0xff]  ;;  %v15910_v8 = vld [vmem:[#allocation72_spill] sm:$0xff]  ;;  %v15957_v61 = vand.u32 4294901760, %v15864_v39 }
 0x1b7   :  { %v6351_v56 = vsub.s32 32, %v6350_v17  ;;  %v6355_v24 = vsub.s32 4294967266, %v6350_v17  ;;  %8799 = vmatprep.subr.bf16.mxu1 %v8798_v47  ;;  %v6352_v10 = vshll.u32 %v12059_v22, %v6350_v17  ;;  %8991 = vmatprep.subr.bf16.mxu0 %v8990_v49  ;;  %v15891_v47 = vld [vmem:[#allocation70_spill] sm:$0xff]  ;;  %v8806_v18 = vpack.c.bf16 %v15895_v26, %v15894_v4  ;;  %v15911_v4 = vld [vmem:[#allocation124_spill] sm:$0xff]  ;;  %v15912_v26 = vld [vmem:[#allocation125_spill] sm:$0xff] }
 0x1b8   :  { %v8804_v54 = vpack.c.bf16 %v15891_v47, %v15726_v31  ;;  %v6442_v25 = vsel %vm6440_vm4, %v6441_v32, %v12095_v29  ;;  %v6438_v49 = vmul.u32 %v12084_v40, %v6422_v3  ;;  %v15898_v31 = vld [vmem:[#allocation117_spill] sm:$0xff]  ;;  %v15903_v29 = vld [vmem:[#allocation120_spill] sm:$0xff]  ;;  %v15963_v39 = vand.u32 4294901760, %v15870_v34 }
 0x1b9   :  { %v6353_v12 = vshrl.u32 %v6335_v7, %v6351_v56  ;;  %v6356_v43 = vadd.s32 127, %v6355_v24  ;;  %v15900_v56 = vld [vmem:[#allocation119_spill] sm:$0xff]  ;;  %v15901_v24 = vld [vmem:[#allocation58_spill] sm:$0xff]  ;;  %v8810_v45 = vpack.c.bf16 %v15903_v29, %v15902_v15  ;;  %v15904_v40 = vld [vmem:[#allocation121_spill] sm:$0xff] }
 0x1ba   :  { %8801 = vmatpush1.bf16.msra.mxu1 %v8800_v52  ;;  %8993 = vmatpush1.bf16.msra.mxu0 %v8992_v11  ;;  %v15899_v52 = vld [vmem:[#allocation118_spill] sm:$0xff]  ;;  %v6443_v7 = vadd.s32 %v6442_v25, %v6438_v49  ;;  %v15908_v47 = vld [vmem:[#allocation136_spill] sm:$0xff]  ;;  %v15917_v49 = vld [vmem:[#allocation19_spill] sm:$0xff] }
 0x1bb   :  { %v6354_v38 = vor.u32 %v6353_v12, %v6352_v10  ;;  %v6357_v42 = vshll.u32 %v6356_v43, 23  ;;  %8803 = vmatprep.subr.bf16.mxu1 %v8802_v37  ;;  %8995 = vmatprep.subr.bf16.mxu0 %v8994_v53  ;;  %v8808_v11 = vpack.c.bf16 %v15899_v52, %v15898_v31  ;;  %v9000_v37 = vpack.c.bf16 %v15901_v24, %v15900_v56  ;;  %v15905_v12 = vld [vmem:[#allocation122_spill] sm:$0xff]  ;;  %v15922_v29 = vld [vmem:[#allocation32_spill] sm:$0xff]  ;;  %v15933_v25 = vld [vmem:[#allocation133_spill] sm:$0xff] }
 0x1bc   :  { %v6365_v10 = vsub.s32 4, %v12039_v44  ;;  %v9002_v43 = vpack.c.bf16 %v15905_v12, %v15904_v40  ;;  %vm6281_vm5 = vcmp.lt.s32.totalorder %v15908_v47, 0  ;;  %v15918_v31 = vld [vmem:[#allocation78_spill] sm:$0xff]  ;;  %v15926_v12 = vld [vmem:[#allocation67_spill] sm:$0xff]  ;;  %vm6371_vm11 = vweird.f32 %v15908_v47 }
 0x1bd   :  { %v6358_v22 = vor.u32 4788187, %v6357_v42  ;;  %v6361_v50 = vcvt.s32.f32 %v6354_v38  ;;  %v15906_v38 = vld [vmem:[#allocation123_spill] sm:$0xff]  ;;  %v15907_v42 = vld [vmem:[#allocation68_spill] sm:$0xff]  ;;  %v8816_v52 = vpack.c.bf16 %v15808_v57, %v15918_v31  ;;  %v15920_v15 = vld [vmem:[#allocation38_spill] sm:$0xff] }
 0x1be   :  { %8805 = vmatpush1.bf16.msra.mxu1 %v8804_v54  ;;  %8997 = vmatpush1.bf16.msra.mxu0 %v8996_v5  ;;  %v8812_v3 = vpack.c.bf16 %v15907_v42, %v15906_v38  ;;  %v6444_v54 = vadd.s32 536870912, %v6443_v7  ;;  %v9004_v5 = vpack.c.bf16 %v15910_v8, %v15909_v48  ;;  %v6366_v60 = vsel %vm6281_vm5, %v6365_v10, %v12039_v44  ;;  %v15921_v57 = vld [vmem:[#allocation43_spill] sm:$0xff]  ;;  %v15927_v42 = vld [vmem:[#allocation73_spill] sm:$0xff] }
 0x1bf   :  { %v6359_v17 = vand.u32 2147483647, %v6358_v22  ;;  %8807 = vmatprep.subr.bf16.mxu1 %v8806_v18  ;;  %8999 = vmatprep.subr.bf16.mxu0 %v8998_v20  ;;  %v8814_v18 = vpack.c.bf16 %v15912_v26, %v15911_v4  ;;  %v15913_v22 = vand.u32 2147483647, %v15908_v47  ;;  %v15916_v20 = vld [vmem:[#allocation126_spill] sm:$0xff]  ;;  %v9008_v44 = vpack.c.bf16 %v15811_v33, %v15810_v59  ;;  %v15925_v59 = vld [vmem:[#allocation15_spill] sm:$0xff] }
 0x1c0   :  { %v12182_v56 = vshrl.u32 %v6444_v54, 30  ;;  %v15924_v33 = vld [vmem:[#allocation54_spill] sm:$0xff]  ;;  %v15928_v54 = vld [vmem:[#allocation79_spill] sm:$0xff] }
 0x1c1   :  { %v6362_v53 = vmul.f32 %v6361_v50, %v6359_v17  ;;  %vm12168_vm6 = vcmp.le.f32.partialorder %v15913_v22, 0.7853982  ;;  %v9006_v17 = vpack.c.bf16 %v15917_v49, %v15916_v20  ;;  %v15929_v48 = vld [vmem:[#allocation23_spill] sm:$0xff]  ;;  %v15932_v22 = vld [vmem:[#allocation98_spill] sm:$0xff]  ;;  %v15935_v20 = vld [vmem:[#allocation100_spill] sm:$0xff] }
 0x1c2   :  { %8809 = vmatpush1.bf16.msra.mxu1 %v8808_v11  ;;  %9001 = vmatpush1.bf16.msra.mxu0 %v9000_v37  ;;  %v6368_v11 = vsel %vm12168_vm6, 0, %v6366_v60  ;;  %15919 = vst [vmem:[#allocation112_spill] sm:$0xff] %v12182_v56  ;;  %v6446_v37 = vshll.u32 %v12182_v56, 30  ;;  %v15931_v4 = vld [vmem:[#allocation95_spill] sm:$0xff]  ;;  %v15936_v49 = vld [vmem:[#allocation29_spill] sm:$0xff] }
 0x1c3   :  { %v6363_v32 = vxor.u32 2147483648, %v6362_v53  ;;  %8811 = vmatprep.subr.bf16.mxu1 %v8810_v45  ;;  %9003 = vmatprep.subr.bf16.mxu0 %v9002_v43  ;;  %v6372_v24 = vadd.s32 3, %v6368_v11  ;;  %v15941_v11 = vld [vmem:[#allocation59_spill] sm:$0xff] }
 0x1c4   :  { %v12192_v10 = vsub.s32 %v6443_v7, %v6446_v37  ;;  %v15943_v37 = vld [vmem:[#allocation76_spill] sm:$0xff] }
 0x1c5   :  { %v6364_v58 = vsel %vm6281_vm5, %v6363_v32, %v6362_v53  ;;  %v6373_v45 = vand.u32 3, %v6372_v24  ;;  %v15923_v53 = vld [vmem:[#allocation11_spill] sm:$0xff] }
 0x1c6   :  { %v6367_v50 = vsel %vm12168_vm6, %v15908_v47, %v6364_v58  ;;  %8813 = vmatpush1.bf16.msra.mxu1 %v8812_v3  ;;  %9005 = vmatpush1.bf16.msra.mxu0 %v9004_v5  ;;  %v6449_v3 = vsub.s32 0, %v12192_v10  ;;  %v15930_v5 = vld [vmem:[#allocation109_spill] sm:$0xff]  ;;  %v15940_v47 = vld [vmem:[#allocation12_spill] sm:$0xff] }
 0x1c7   :  { %9605 = vcosq.f32 %v6367_v50  ;;  %8815 = vmatprep.subr.bf16.mxu1 %v8814_v18  ;;  %9007 = vmatprep.subr.bf16.mxu0 %v9006_v17  ;;  %vm6378_vm7 = vcmp.eq.s32.totalorder %v6373_v45, 2  ;;  %vm6375_vm8 = vcmp.eq.s32.totalorder %v6373_v45, 0  ;;  %vm6374_vm9 = vcmp.lt.s32.totalorder %v6373_v45, 2  ;;  %v15937_v17 = vld [vmem:[#allocation37_spill] sm:$0xff] }
 0x1c8   :  { %9607 = vsinq.f32 %v6367_v50  ;;  %vm7631_vm10 = vcmp.eq.s32.totalorder %v15930_v5, 0  ;;  %v7787_v60 = vmin.u32 %v6449_v3, %v12192_v10  ;;  %v15938_v50 = vld [vmem:[#allocation42_spill] sm:$0xff]  ;;  %v15944_v45 = vld [vmem:[#allocation21_spill] sm:$0xff] }
 0x1c9   :  { %v15951_v5 = vld [vmem:[#allocation105_spill] sm:$0xff] }
 0x1ca   :  { %8817 = vmatpush1.bf16.msra.mxu1 %v8816_v52  ;;  %9009 = vmatpush1.bf16.msra.mxu0 %v9008_v44  ;;  %v6451_v31 = vclz %v7787_v60  ;;  %v15939_v52 = vld [vmem:[#allocation47_spill] sm:$0xff]  ;;  %v15942_v44 = vld [vmem:[#allocation64_spill] sm:$0xff] }
 0x1cb   :  { %8819 = vmatprep.subr.bf16.mxu1 %v15920_v15  ;;  %9011 = vmatprep.subr.bf16.mxu0 %v15921_v57 }
 0x1cc   :  { %v7788_v24 = vadd.s32 4294967294, %v6451_v31  ;;  %v15955_v31 = vld [vmem:[#allocation89_spill] sm:$0xff] }
 0x1cd   :  { %3283 = vmatmul.mubr.f32.vlgmr.msra.gmra.mrb[4].mxu1 %v15922_v29  ;;  %4138 = vmatmul.mubr.f32.vlgmr.msra.gmra.mrb[4].mxu0 %v15922_v29  ;;  %v15956_v29 = vld [vmem:[#allocation107_spill] sm:$0xff] }
 0x1ce   :  { %8821 = vmatpush1.bf16.msra.mxu1 %v15923_v53  ;;  %9013 = vmatpush1.bf16.msra.mxu0 %v15924_v33  ;;  %vm7789_vm12 = vcmp.lt.s32.totalorder %v7788_v24, 0 }
 0x1cf   :  { %8823 = vmatprep.subr.bf16.mxu1 %v15925_v59  ;;  %9015 = vmatprep.subr.bf16.mxu0 %v15926_v12  ;;  %v12226_v3 = vsel %vm7789_vm12, 0, %v7788_v24  ;;  %v15958_v24 = vand.u32 4294901760, %v15865_v51 }
 0x1d0   :  { %3385 = vmatprep.mubr.f32.mxu1 %v15118_v14  ;;  %4240 = vmatprep.mubr.f32.mxu0 %v15118_v14 }
 0x1d1   :  { %v9606_v40 = vpop.eup %9605 }
 0x1d2   :  { %v9608_v43 = vpop.eup %9607  ;;  %v6379_v32 = vxor.u32 2147483648, %v9606_v40  ;;  %8825 = vmatpush1.bf16.msra.mxu1 %v15927_v42  ;;  %9017 = vmatpush1.bf16.msra.mxu0 %v15928_v54 }
 0x1d3   :  { %v6376_v38 = vxor.u32 2147483648, %v9608_v43  ;;  %8827 = vmatprep.subr.bf16.mxu1 %v15929_v48  ;;  %9019 = vmatprep.subr.bf16.mxu0 %v15931_v4 }
 0x1d4   :  { %v6380_v7 = vsel %vm6378_vm7, %v6379_v32, %v9608_v43  ;;  %v15946_v43 = vld [vmem:[#allocation87_spill] sm:$0xff]  ;;  %v15947_v32 = vld [vmem:[#allocation90_spill] sm:$0xff] }
 0x1d5   :  { %v6377_v8 = vsel %vm6375_vm8, %v9606_v40, %v6376_v38  ;;  %v15945_v40 = vld [vmem:[#allocation86_spill] sm:$0xff]  ;;  %v15948_v38 = vld [vmem:[#allocation104_spill] sm:$0xff] }
 0x1d6   :  { %v6381_v26 = vsel %vm6374_vm9, %v6377_v8, %v6380_v7  ;;  %8829 = vmatpush1.bf16.msra.mxu1 %v15932_v22  ;;  %9021 = vmatpush1.bf16.msra.mxu0 %v15935_v20  ;;  %v15949_v7 = vld [vmem:[#allocation91_spill] sm:$0xff]  ;;  %v15950_v8 = vld [vmem:[#allocation36_spill] sm:$0xff] }
 0x1d7   :  { %v6382_v18 = vsel %vm6371_vm11, nan, %v6381_v26  ;;  %8831 = vmatprep.subr.bf16.mxu1 %v15936_v49  ;;  %9023 = vmatprep.subr.bf16.mxu0 %v15937_v17  ;;  %v15952_v26 = vld [vmem:[#allocation106_spill] sm:$0xff] }
 0x1d8   :  { %v12208_v58 = vsel %vm7631_vm10, %v15933_v25, %v6382_v18  ;;  %v15953_v18 = vand.u32 4294901760, %v15862_v27  ;;  %v15954_v25 = vand.u32 4294901760, %v15863_v16  ;;  %v12248_v27 = vadd.s32 512, %v15955_v31 }
 0x1d9   :  { %15934 = vst [vmem:[#allocation113_spill] sm:$0xff] %v12208_v58  ;;  %v12236_v58 = vadd.s32 256, %v15955_v31  ;;  %v6459_v16 = vsub.s32 4294967266, %v12226_v3 }
 0x1da   :  { %8833 = vmatpush1.bf16.msra.mxu1 %v15938_v50  ;;  %9025 = vmatpush1.bf16.msra.mxu0 %v15939_v52  ;;  %v8850_v60 = vpack.c.bf16 %v15954_v25, %v15953_v18  ;;  %v15961_v18 = vand.u32 4294901760, %v15868_v35  ;;  %v15962_v25 = vand.u32 4294901760, %v15869_v30  ;;  %v15968_v30 = vand.u32 4294901760, %v15875_v1  ;;  %v141_v52 = vld [vmem:[#allocation5 + $0x330] sm:$0xff] }
 0x1db   :  { %8835 = vmatprep.subr.bf16.mxu1 %v15940_v47  ;;  %9027 = vmatprep.subr.bf16.mxu0 %v15941_v11 }
 0x1de   :  { %8837 = vmatpush1.bf16.msra.mxu1 %v15942_v44  ;;  %9029 = vmatpush1.bf16.msra.mxu0 %v15943_v37  ;;  %v15978_v37 = vand.u32 4294901760, %v15883_v46  ;;  %v15979_v44 = vld [vmem:[#allocation26_spill] sm:$0xff] }
 0x1df   :  { %8839 = vmatprep.subr.bf16.mxu1 %v15944_v45  ;;  %9031 = vmatprep.subr.bf16.mxu0 %v15945_v40  ;;  %v15980_v11 = vand.u32 4294901760, %v15979_v44  ;;  %v77_v44 = vld [vmem:[#allocation5 + $0x130] sm:$0xff] }
 0x1e1   :  { %v8860_v47 = vpack.c.bf16 %v15980_v11, %v15978_v37  ;;  %v90_v11 = vld [vmem:[#allocation5 + $0x198] sm:$0xff] }
 0x1e2   :  { %8841 = vmatpush1.bf16.msra.mxu1 %v15946_v43  ;;  %9033 = vmatpush1.bf16.msra.mxu0 %v15947_v32  ;;  %v15967_v32 = vand.u32 4294901760, %v15873_v13  ;;  %v12276_v43 = vadd.s32 640, %v15955_v31  ;;  %v15974_v13 = vand.u32 4294901760, %v15880_v21 }
 0x1e3   :  { %8843 = vmatprep.subr.bf16.mxu1 %v15948_v38  ;;  %9035 = vmatprep.subr.bf16.mxu0 %v15949_v7  ;;  %v9042_v7 = vpack.c.bf16 %v15958_v24, %v15957_v61  ;;  %v50_v38 = vld [vmem:[#allocation5 + $0x58] sm:$0xff]  ;;  %v15964_v61 = vand.u32 4294901760, %v15871_v19  ;;  %v49_v24 = vld [vmem:[#allocation5 + $0x50] sm:$0xff]  ;;  %v15970_v19 = vand.u32 4294901760, %v15877_v23 }
 0x1e4   :  { %v12298_v40 = vmul.u32.u64.low 2643056798, %v12276_v43  ;;  %v12299_v45 = vmul.u32.u64.high 2643056798, %v12276_v43, %v12298_v40 }
 0x1e5   :  { %v8854_v51 = vpack.c.bf16 %v15964_v61, %v15963_v39  ;;  %v62_v61 = vld [vmem:[#allocation5 + $0xb8] sm:$0xff] }
 0x1e6   :  { %8845 = vmatpush1.bf16.msra.mxu1 %v15950_v8  ;;  %9037 = vmatpush1.bf16.msra.mxu0 %v15951_v5  ;;  %v15959_v8 = vand.u32 4294901760, %v15866_v9  ;;  %v15960_v5 = vand.u32 4294901760, %v15867_v6  ;;  %v63_v9 = vld [vmem:[#allocation5 + $0xc0] sm:$0xff]  ;;  %v12260_v6 = vadd.s32 384, %v15955_v31 }
 0x1e7   :  { %8847 = vmatprep.subr.bf16.mxu1 %v15952_v26  ;;  %9039 = vmatprep.subr.bf16.mxu0 %v15956_v29  ;;  %v9044_v29 = vpack.c.bf16 %v15962_v25, %v15961_v18  ;;  %v15969_v18 = vand.u32 4294901760, %v15876_v63  ;;  %v15971_v25 = vand.u32 4294901760, %v15878_v41  ;;  %v51_v63 = vld [vmem:[#allocation5 + $0x60] sm:$0xff]  ;;  %v4526_v41 = vand.u32 4294901760, %v63_v9 }
 0x1e8   :  { %v8852_v26 = vpack.c.bf16 %v15960_v5, %v15959_v8  ;;  %v15965_v8 = vld [vmem:[#allocation108_spill] sm:$0xff]  ;;  %v15966_v5 = vand.u32 4294901760, %v15872_v36  ;;  %v15973_v36 = vand.u32 4294901760, %v15879_v62  ;;  %v15975_v31 = vld [vmem:[#allocation33_spill] sm:$0xff]  ;;  %v4528_v62 = vand.u32 4294901760, %v62_v61 }
 0x1e9   :  { %v8856_v34 = vpack.c.bf16 %v15969_v18, %v15968_v30  ;;  %v9048_v39 = vpack.c.bf16 %v15971_v25, %v15970_v19  ;;  %v12284_v23 = vmul.u32.u64.low 2643056798, %v12236_v58  ;;  %v12285_v30 = vmul.u32.u64.high 2643056798, %v12236_v58, %v12284_v23 }
 0x1ea   :  { %8849 = vmatpush1.bf16.msra.mxu1 %v15965_v8  ;;  %v9046_v35 = vpack.c.bf16 %v15967_v32, %v15966_v5  ;;  %v15972_v8 = vld [vmem:[#allocation111_spill] sm:$0xff]  ;;  %v8858_v1 = vpack.c.bf16 %v15974_v13, %v15973_v36  ;;  %v4522_v32 = vand.u32 4294901760, %v50_v38  ;;  %v4524_v18 = vand.u32 4294901760, %v49_v24 }
 0x1eb   :  { %9041 = vmatpush1.bf16.msra.mxu0 %v15972_v8  ;;  %8851 = vmatprep.subr.bf16.mxu1 %v8850_v60  ;;  %v64_v5 = vld [vmem:[#allocation5 + $0xc8] sm:$0xff]  ;;  %v12288_v19 = vmul.u32.u64.low 2643056798, %v12248_v27  ;;  %v12289_v25 = vmul.u32.u64.high 2643056798, %v12248_v27, %v12288_v19  ;;  %v6460_v60 = vadd.s32 127, %v6459_v16  ;;  %v5378_v13 = vand.u32 4294901760, %v51_v63  ;;  %v89_v8 = vld [vmem:[#allocation5 + $0x190] sm:$0xff] }
 0x1ec   :  { %9043 = vmatprep.subr.bf16.mxu0 %v9042_v7  ;;  %v12293_v21 = vmul.u32.u64.low 2643056798, %v12260_v6  ;;  %v12294_v36 = vmul.u32.u64.high 2643056798, %v12260_v6, %v12293_v21  ;;  %v5381_v23 = vand.u32 4294901760, %v64_v5  ;;  %v76_v7 = vld [vmem:[#allocation5 + $0x128] sm:$0xff]  ;;  %v6439_v16 = vadd.s32 %v12094_v55, %v12103_v0 }
 0x1ed   :  { %3389 = vmatmul.mubr.f32.vlgmr.msra.gmra.mrb[4].mxu1 %v15975_v31  ;;  %v6455_v19 = vsub.s32 32, %v12226_v3  ;;  %v15976_v21 = vand.u32 4294901760, %v15881_v2  ;;  %v12313_v40 = vpack.c.bf16 %v4526_v41, %v4522_v32  ;;  %v12315_v55 = vsub.f32 %v50_v38, %v4522_v32 }
 0x1ee   :  { %8853 = vmatpush1.bf16.msra.mxu1 %v8852_v26  ;;  %4244 = vmatmul.mubr.f32.vlgmr.msra.gmra.mrb[4].mxu0 %v15975_v31  ;;  %v15977_v26 = vand.u32 4294901760, %v15882_v28  ;;  %v12317_v0 = vsub.f32 %v63_v9, %v4526_v41  ;;  %v6461_v2 = vshll.u32 %v6460_v60, 23  ;;  %v12320_v28 = vsub.f32 %v49_v24, %v4524_v18 }
 0x1ef   :  { %9045 = vmatpush1.bf16.msra.mxu0 %v9044_v29  ;;  %8855 = vmatprep.subr.bf16.mxu1 %v8854_v51  ;;  %15981 = vst [vmem:[#allocation14_spill] sm:$0xff] %v12313_v40  ;;  %15982 = vst [vmem:[#allocation62_spill] sm:$0xff] %v12315_v55  ;;  %v75_v29 = vld [vmem:[#allocation5 + $0x120] sm:$0xff]  ;;  %v88_v51 = vld [vmem:[#allocation5 + $0x188] sm:$0xff]  ;;  %v4530_v46 = vand.u32 4294901760, %v76_v7  ;;  %v12322_v37 = vpack.c.bf16 %v4528_v62, %v4524_v18  ;;  %v12326_v38 = vpack.c.bf16 %v5381_v23, %v5378_v13 }
 0x1f0   :  { %v9050_v31 = vpack.c.bf16 %v15977_v26, %v15976_v21  ;;  %9047 = vmatprep.subr.bf16.mxu0 %v9046_v35  ;;  %3555 = vmatprep.mubr.f32.mxu1 %v15118_v14  ;;  %15983 = vst [vmem:[#allocation75_spill] sm:$0xff] %v12317_v0  ;;  %15984 = vst [vmem:[#allocation88_spill] sm:$0xff] %v12320_v28  ;;  %v4534_v21 = vand.u32 4294901760, %v89_v8  ;;  %v12324_v35 = vsub.f32 %v62_v61, %v4528_v62 }
 0x1f1   :  { %4410 = vmatprep.mubr.f32.mxu0 %v15118_v14  ;;  %15985 = vst [vmem:[#allocation22_spill] sm:$0xff] %v12322_v37  ;;  %15987 = vst [vmem:[#allocation94_spill] sm:$0xff] %v12326_v38  ;;  %v12328_v9 = vsub.f32 %v51_v63, %v5378_v13  ;;  %v6457_v32 = vshrl.u32 %v6439_v16, %v6455_v19  ;;  %v4532_v41 = vand.u32 4294901760, %v75_v29  ;;  %v4536_v60 = vand.u32 4294901760, %v88_v51  ;;  %v102_v13 = vld [vmem:[#allocation5 + $0x1f8] sm:$0xff] }
 0x1f2   :  { %8857 = vmatpush1.bf16.msra.mxu1 %v8856_v34  ;;  %15986 = vst [vmem:[#allocation92_spill] sm:$0xff] %v12324_v35  ;;  %v6060_v24 = vshrl.u32 %v12285_v30, 3  ;;  %v12331_v26 = vsub.f32 %v64_v5, %v5381_v23  ;;  %v5384_v40 = vand.u32 4294901760, %v77_v44  ;;  %v5387_v34 = vand.u32 4294901760, %v90_v11  ;;  %v101_v30 = vld [vmem:[#allocation5 + $0x1f0] sm:$0xff]  ;;  %v114_v23 = vld [vmem:[#allocation5 + $0x258] sm:$0xff] }
 0x1f3   :  { %15988 = vst [vmem:[#allocation24_spill] sm:$0xff] %v12328_v9  ;;  %9049 = vmatpush1.bf16.msra.mxu0 %v9048_v39  ;;  %8859 = vmatprep.subr.bf16.mxu1 %v8858_v1  ;;  %v6082_v18 = vshrl.u32 %v12289_v25, 3  ;;  %v6456_v61 = vshll.u32 %v12192_v10, %v12226_v3  ;;  %v6462_v62 = vor.u32 4788187, %v6461_v2  ;;  %v12336_v63 = vpack.c.bf16 %v4534_v21, %v4530_v46  ;;  %v115_v39 = vld [vmem:[#allocation5 + $0x260] sm:$0xff]  ;;  %v15994_v10 = vld [vmem:[#allocation56_spill] sm:$0xff] }
 0x1f4   :  { %9051 = vmatprep.subr.bf16.mxu0 %v9050_v31  ;;  %15989 = vst [vmem:[#allocation35_spill] sm:$0xff] %v12331_v26  ;;  %v6071_v1 = vshrl.u32 %v12294_v36, 3  ;;  %v12339_v16 = vsub.f32 %v76_v7, %v4530_v46  ;;  %v12341_v31 = vsub.f32 %v89_v8, %v4534_v21  ;;  %v12343_v5 = vsub.f32 %v75_v29, %v4532_v41  ;;  %v15995_v3 = vld [vmem:[#allocation31_spill] sm:$0xff]  ;;  %v15998_v36 = vld [vmem:[#allocation102_spill] sm:$0xff]  ;;  %v16000_v37 = vld [vmem:[#allocation61_spill] sm:$0xff] }
 0x1f5   :  { %15990 = vst [vmem:[#allocation28_spill] sm:$0xff] %v12336_v63  ;;  %v6093_v25 = vshrl.u32 %v12299_v45, 3  ;;  %v6458_v19 = vor.u32 %v6457_v32, %v6456_v61  ;;  %v12348_v2 = vpack.c.bf16 %v4536_v60, %v4532_v41  ;;  %v12350_v63 = vsub.f32 %v88_v51, %v4536_v60  ;;  %v103_v46 = vld [vmem:[#allocation5 + $0x200] sm:$0xff]  ;;  %v116_v21 = vld [vmem:[#allocation5 + $0x268] sm:$0xff] }
 0x1f6   :  { %8861 = vmatpush1.bf16.msra.mxu1 %v8860_v47  ;;  %15991 = vst [vmem:[#allocation99_spill] sm:$0xff] %v12339_v16  ;;  %15992 = vst [vmem:[#allocation49_spill] sm:$0xff] %v12341_v31  ;;  %v6061_v47 = vmul.u32 13, %v6060_v24  ;;  %v12353_v8 = vpack.c.bf16 %v5387_v34, %v5384_v40  ;;  %v4538_v7 = vand.u32 4294901760, %v102_v13  ;;  %v4542_v29 = vand.u32 4294901760, %v115_v39 }
 0x1f7   :  { %15993 = vst [vmem:[#allocation52_spill] sm:$0xff] %v12343_v5  ;;  %9053 = vmatpush1.bf16.msra.mxu0 %v15994_v10  ;;  %8863 = vmatprep.subr.bf16.mxu1 %v15995_v3  ;;  %15996 = vst [vmem:[#allocation50_spill] sm:$0xff] %v12348_v2  ;;  %v6083_v38 = vmul.u32 13, %v6082_v18  ;;  %v6463_v45 = vand.u32 2147483647, %v6462_v62  ;;  %v4540_v32 = vand.u32 4294901760, %v101_v30  ;;  %v12356_v41 = vsub.f32 %v77_v44, %v5384_v40 }
 0x1f8   :  { %15997 = vst [vmem:[#allocation39_spill] sm:$0xff] %v12350_v63  ;;  %9055 = vmatprep.subr.bf16.mxu0 %v15998_v36  ;;  %15999 = vst [vmem:[#allocation41_spill] sm:$0xff] %v12353_v8  ;;  %v4544_v61 = vand.u32 4294901760, %v114_v23  ;;  %v6072_v10 = vmul.u32 13, %v6071_v1  ;;  %v12358_v51 = vsub.f32 %v90_v11, %v5387_v34  ;;  %v12360_v60 = vsub.f32 %v102_v13, %v4538_v7  ;;  %v16004_v36 = vld [vmem:[#allocation63_spill] sm:$0xff]  ;;  %v16005_v8 = vld [vmem:[#allocation69_spill] sm:$0xff] }
 0x1f9   :  { %16001 = vst [vmem:[#allocation46_spill] sm:$0xff] %v12356_v41  ;;  %v6094_v24 = vmul.u32 13, %v6093_v25  ;;  %v6465_v3 = vcvt.s32.f32 %v6458_v19  ;;  %v5390_v2 = vand.u32 4294901760, %v103_v46  ;;  %v5393_v18 = vand.u32 4294901760, %v116_v21  ;;  %v128_v62 = vld [vmem:[#allocation5 + $0x2c8] sm:$0xff] }
 0x1fa   :  { %8865 = vmatpush1.bf16.msra.mxu1 %v16000_v37  ;;  %16002 = vst [vmem:[#allocation48_spill] sm:$0xff] %v12358_v51  ;;  %16003 = vst [vmem:[#allocation51_spill] sm:$0xff] %v12360_v60  ;;  %v12365_v1 = vsub.s32 %v12236_v58, %v6061_v47  ;;  %v16006_v37 = vld [vmem:[#allocation139_spill] sm:$0xff]  ;;  %v12369_v44 = vpack.c.bf16 %v4542_v29, %v4538_v7  ;;  %v12371_v11 = vsub.f32 %v115_v39, %v4542_v29  ;;  %v127_v58 = vld [vmem:[#allocation5 + $0x2c0] sm:$0xff] }
 0x1fb   :  { %9057 = vmatpush1.bf16.msra.mxu0 %v16004_v36  ;;  %8867 = vmatprep.subr.bf16.mxu1 %v16005_v8  ;;  %vm6385_vm13 = vcmp.lt.s32.totalorder %v16006_v37, 0  ;;  %v16007_v40 = vld [vmem:[#allocation127_spill] sm:$0xff]  ;;  %v12373_v34 = vsub.f32 %v101_v30, %v4540_v32  ;;  %v12376_v13 = vsub.s32 %v12248_v27, %v6083_v38  ;;  %v6466_v25 = vmul.f32 %v6465_v3, %v6463_v45  ;;  %v16013_v36 = vld [vmem:[#allocation128_spill] sm:$0xff] }
 0x1fc   :  { %9059 = vmatprep.subr.bf16.mxu0 %v16007_v40  ;;  %16008 = vst [vmem:[#allocation53_spill] sm:$0xff] %v12369_v44  ;;  %16009 = vst [vmem:[#allocation13_spill] sm:$0xff] %v12371_v11  ;;  %v12378_v19 = vpack.c.bf16 %v4544_v61, %v4540_v32  ;;  %v12380_v8 = vsub.f32 %v114_v23, %v4544_v61  ;;  %v12383_v47 = vsub.s32 %v12260_v6, %v6072_v10  ;;  %v140_v30 = vld [vmem:[#allocation5 + $0x328] sm:$0xff]  ;;  %v16016_v38 = vmov 0  ;;  %v16019_v23 = vld [vmem:[#allocation129_spill] sm:$0xff] }
 0x1fd   :  { %16010 = vst [vmem:[#allocation57_spill] sm:$0xff] %v12373_v34  ;;  %v12386_v7 = vsub.f32 %v103_v46, %v5390_v2  ;;  %v4546_v39 = vand.u32 4294901760, %v128_v62  ;;  %v4550_v29 = vand.u32 4294901760, %v141_v52  ;;  %v12389_v40 = vsub.s32 %v12276_v43, %v6094_v24  ;;  %v16020_v6 = vld [vmem:[#allocation130_spill] sm:$0xff]  ;;  %v129_v32 = vld [vmem:[#allocation5 + $0x2d0] sm:$0xff]  ;;  %v142_v61 = vld [vmem:[#allocation5 + $0x338] sm:$0xff] }
 0x1fe   :  { %16011 = vst [vmem:[#allocation60_spill] sm:$0xff] %v12378_v19  ;;  %16012 = vst [vmem:[#allocation66_spill] sm:$0xff] %v12380_v8  ;;  %8869 = vmatpush1.bf16.msra.mxu1 %v16013_v36  ;;  %v16015_v27 = vand.u32 2147483647, %v16006_v37  ;;  %v12399_v45 = vpack.c.bf16 %v5393_v18, %v5390_v2  ;;  %v12401_v46 = vsub.f32 %v116_v21, %v5393_v18  ;;  %vm6177_vm15 = vcmp.ne.s32.totalorder %v12365_v1, 0  ;;  %v16023_v43 = vld [vmem:[#allocation131_spill] sm:$0xff] }
 0x1ff   :  { %16014 = vst [vmem:[#allocation16_spill] sm:$0xff] %v12386_v7  ;;  %9061 = vmatpush1.bf16.msra.mxu0 %v16019_v23  ;;  %8871 = vmatprep.subr.bf16.mxu1 %v16020_v6  ;;  %vm6190_vm0 = vcmp.lt.s32.totalorder %v12365_v1, 0  ;;  %v12406_v10 = vsub.f32 %v128_v62, %v4546_v39  ;;  %v4548_v24 = vand.u32 4294901760, %v127_v58  ;;  %v154_v3 = vld [vmem:[#allocation5 + $0x398] sm:$0xff]  ;;  %v167_v36 = vld [vmem:[#allocation5 + $0x400] sm:$0xff]  ;;  %vm6179_vm1 = vcmp.ne.s32.totalorder %v12376_v13, 0 }
 0x200   :  { %vm12393_vm14 = vcmp.le.f32.partialorder %v16015_v27, 0.7853982  ;;  %16021 = vst [vmem:[#allocation18_spill] sm:$0xff] %v12399_v45  ;;  %16022 = vst [vmem:[#allocation77_spill] sm:$0xff] %v12401_v46  ;;  %9063 = vmatprep.subr.bf16.mxu0 %v16023_v43  ;;  %vm6192_vm2 = vcmp.lt.s32.totalorder %v12376_v13, 0  ;;  %v6467_v2 = vxor.u32 2147483648, %v6466_v25 }
 0x201   :  { %v16017_v38 = vsel %vm12393_vm14, 4294967295, %v16016_v38  ;;  %16024 = vst [vmem:[#allocation82_spill] sm:$0xff] %v12406_v10  ;;  %v4552_v21 = vand.u32 4294901760, %v140_v30  ;;  %vm6178_vm3 = vcmp.ne.s32.totalorder %v12383_v47, 0  ;;  %vm6191_vm4 = vcmp.lt.s32.totalorder %v12383_v47, 0  ;;  %v16025_v18 = vld [vmem:[#allocation132_spill] sm:$0xff]  ;;  %vm12417_vm5 = vmand %vm6190_vm0, %vm6177_vm15 }
 0x202   :  { %16018 = vst [vmem:[#allocation71_spill] sm:$0xff] %v16017_v38  ;;  %8873 = vmatpush1.bf16.msra.mxu1 %v16025_v18  ;;  %v5396_v27 = vand.u32 4294901760, %v129_v32  ;;  %v5399_v23 = vand.u32 4294901760, %v142_v61  ;;  %v153_v6 = vld [vmem:[#allocation5 + $0x390] sm:$0xff]  ;;  %vm6180_vm6 = vcmp.ne.s32.totalorder %v12389_v40, 0  ;;  %vm6193_vm7 = vcmp.lt.s32.totalorder %v12389_v40, 0  ;;  %vm12432_vm8 = vmand %vm6192_vm2, %vm6179_vm1 }
 0x203   :  { %v16028_v43 = vld [vmem:[#allocation135_spill] sm:$0xff]  ;;  %v16029_v45 = vld [vmem:[#allocation137_spill] sm:$0xff]  ;;  %v12425_v18 = vpack.c.bf16 %v4550_v29, %v4546_v39  ;;  %v4554_v19 = vand.u32 4294901760, %v154_v3  ;;  %v4558_v44 = vand.u32 4294901760, %v167_v36  ;;  %v6216_v46 = vadd.s32 13, %v12365_v1  ;;  %v16033_v8 = vld [vmem:[#allocation138_spill] sm:$0xff] }
 0x204   :  { %9065 = vmatpush1.bf16.msra.mxu0 %v16028_v43  ;;  %8875 = vmatprep.subr.bf16.mxu1 %v16029_v45  ;;  %v166_v10 = vld [vmem:[#allocation5 + $0x3f8] sm:$0xff]  ;;  %v12437_v43 = vsub.f32 %v141_v52, %v4550_v29  ;;  %v6218_v39 = vadd.s32 13, %v12376_v13  ;;  %vm12444_vm9 = vmand %vm6191_vm4, %vm6178_vm3  ;;  %v6219_v34 = vadd.s32 13, %v12389_v40  ;;  %v6468_v50 = vsel %vm6385_vm13, %v6467_v2, %v6466_v25  ;;  %v168_v51 = vld [vmem:[#allocation5 + $0x408] sm:$0xff] }
 0x205   :  { %16030 = vst [vmem:[#allocation83_spill] sm:$0xff] %v12425_v18  ;;  %9067 = vmatprep.subr.bf16.mxu0 %v16033_v8  ;;  %v6217_v18 = vadd.s32 13, %v12383_v47  ;;  %v12452_v8 = vpack.c.bf16 %v4552_v21, %v4548_v24  ;;  %v12454_v52 = vsub.f32 %v127_v58, %v4548_v24  ;;  %v4556_v29 = vand.u32 4294901760, %v153_v6  ;;  %vm12460_vm10 = vmand %vm6193_vm7, %vm6180_vm6  ;;  %v16041_v11 = vld [vmem:[#allocation140_spill] sm:$0xff]  ;;  %v155_v58 = vld [vmem:[#allocation5 + $0x3a0] sm:$0xff] }
 0x206   :  { %16034 = vst [vmem:[#allocation84_spill] sm:$0xff] %v12437_v43  ;;  %8877 = vmatpush1.bf16.msra.mxu1 %v16041_v11  ;;  %v12465_v60 = vsub.f32 %v140_v30, %v4552_v21  ;;  %v12467_v17 = vpack.c.bf16 %v5399_v23, %v5396_v27  ;;  %v12469_v25 = vsub.f32 %v129_v32, %v5396_v27  ;;  %v4560_v2 = vand.u32 4294901760, %v166_v10  ;;  %v16051_v32 = vld [vmem:[#allocation85_spill] sm:$0xff] }
 0x207   :  { %16037 = vst [vmem:[#allocation93_spill] sm:$0xff] %v12452_v8  ;;  %16038 = vst [vmem:[#allocation96_spill] sm:$0xff] %v12454_v52  ;;  %v16045_v8 = vld [vmem:[#allocation81_spill] sm:$0xff]  ;;  %v16046_v52 = vld [vmem:[#allocation20_spill] sm:$0xff]  ;;  %v12474_v49 = vsub.f32 %v142_v61, %v5399_v23  ;;  %v12476_v20 = vpack.c.bf16 %v4558_v44, %v4554_v19  ;;  %v12481_v11 = vsel %vm12417_vm5, %v6216_v46, %v12365_v1  ;;  %v5402_v62 = vand.u32 4294901760, %v155_v58 }
 0x208   :  { %16042 = vst [vmem:[#allocation97_spill] sm:$0xff] %v12465_v60  ;;  %16043 = vst [vmem:[#allocation27_spill] sm:$0xff] %v12467_v17  ;;  %9069 = vmatpush1.bf16.msra.mxu0 %v16045_v8  ;;  %8879 = vmatprep.subr.bf16.mxu1 %v16046_v52  ;;  %v12486_v30 = vsel %vm12393_vm14, %v16006_v37, %v6468_v50  ;;  %v12492_v61 = vsel %vm12432_vm8, %v6218_v39, %v12376_v13  ;;  %v12504_v46 = vld [vmem:[#allocation5 + $0x468] sm:$0xff]  ;;  %v12506_v50 = vld [vmem:[#allocation5 + $0x4d0] sm:$0xff]  ;;  %v5405_v45 = vand.u32 4294901760, %v168_v51  ;;  %vm9741_vm1 = vmmov 0  }
 0x209   :  { %16044 = vst [vmem:[#allocation101_spill] sm:$0xff] %v12469_v25  ;;  %16047 = vst [vmem:[#allocation30_spill] sm:$0xff] %v12474_v49  ;;  %9071 = vmatprep.subr.bf16.mxu0 %v16051_v32  ;;  %v12497_v21 = vsel %vm12444_vm9, %v6217_v18, %v12383_v47  ;;  %v12502_v1 = vsel %vm12460_vm10, %v6219_v34, %v12389_v40  ;;  %v12508_v27 = vld [vmem:[#allocation5 + $0x460] sm:$0xff]  ;;  %v12510_v23 = vsub.f32 %v154_v3, %v4554_v19  ;;  %v12516_v47 = vld [vmem:[#allocation5 + $0x4c8] sm:$0xff] }
 0x20a   :  { %16048 = vst [vmem:[#allocation45_spill] sm:$0xff] %v12476_v20  ;;  %16049 = vst [vmem:[#allocation103_spill] sm:$0xff] %v12481_v11  ;;  %v12512_v13 = vsub.f32 %v167_v36, %v4558_v44  ;;  %v12514_v7 = vsub.f32 %v153_v6, %v4556_v29  ;;  %v12518_v18 = vld [vmem:[#allocation5 + $0x470] sm:$0xff]  ;;  %v12520_v43 = vld [vmem:[#allocation5 + $0x4d8] sm:$0xff]  ;;  %v12523_v40 = vpack.c.bf16 %v4560_v2, %v4556_v29  ;;  %vm6242_vm11 = vcmp.gt.s32.totalorder %v12481_v11, 6 }
 0x20b   :  { %16050 = vst [vmem:[#allocation40_spill] sm:$0xff] %v12486_v30  ;;  %16052 = vst [vmem:[#allocation44_spill] sm:$0xff] %v12492_v61  ;;  %v16058_v34 = vld [vmem:[#allocation141_spill] sm:$0xff]  ;;  %v12525_v39 = vsub.f32 %v166_v10, %v4560_v2  ;;  %v12532_v3 = vld [vmem:[#allocation5 + $0x530] sm:$0xff]  ;;  %9609 = vcosq.f32 %v12486_v30  ;;  %vm6244_vm12 = vcmp.gt.s32.totalorder %v12492_v61, 6  ;;  %vm6243_vm15 = vcmp.gt.s32.totalorder %v12497_v21, 6 }
 0x20c   :  { %16053 = vst [vmem:[#allocation70_spill] sm:$0xff] %v12497_v21  ;;  %16054 = vst [vmem:[#allocation74_spill] sm:$0xff] %v12502_v1  ;;  %8881 = vmatpush1.bf16.msra.mxu1 %v16058_v34  ;;  %v12528_v44 = vld [vmem:[#allocation5 + $0x538] sm:$0xff]  ;;  %v12530_v19 = vld [vmem:[#allocation5 + $0x5a0] sm:$0xff]  ;;  %vm6245_vm0 = vcmp.gt.s32.totalorder %v12502_v1, 6  ;;  %v14955_v52 = vand.u32 4294901760, %v12504_v46  ;;  %v12566_v24 = vsub.f32 %v155_v58, %v5402_v62 }
 0x20d   :  { %16055 = vst [vmem:[#allocation80_spill] sm:$0xff] %v12510_v23  ;;  %16056 = vst [vmem:[#allocation55_spill] sm:$0xff] %v12512_v13  ;;  %v16061_v36 = vld [vmem:[#allocation142_spill] sm:$0xff]  ;;  %8883 = vmatprep.subr.bf16.mxu1 %v15920_v15  ;;  %v12540_v10 = vld [vmem:[#allocation5 + $0x598] sm:$0xff]  ;;  %v12576_v15 = vsel %vm6244_vm12, 1.5707964, %v15118_v14 }
 0x20e   :  { %16057 = vst [vmem:[#allocation114_spill] sm:$0xff] %v12514_v7  ;;  %16059 = vst [vmem:[#allocation115_spill] sm:$0xff] %v12523_v40  ;;  %9073 = vmatpush1.bf16.msra.mxu0 %v16061_v36  ;;  %v12542_v6 = vld [vmem:[#allocation5 + $0x540] sm:$0xff]  ;;  %v12544_v8 = vld [vmem:[#allocation5 + $0x5a8] sm:$0xff]  ;;  %v12564_v36 = vpack.c.bf16 %v5405_v45, %v5402_v62  ;;  %v16072_v38 = vand.u32 4294901760, %v12508_v27  ;;  %v16073_v34 = vand.u32 4294901760, %v12516_v47 }
 0x20f   :  { %16060 = vst [vmem:[#allocation116_spill] sm:$0xff] %v12525_v39  ;;  %9075 = vmatprep.subr.bf16.mxu0 %v15921_v57  ;;  %v16062_v32 = vld [vmem:[#allocation25_spill] sm:$0xff]  ;;  %16064 = vst [vmem:[#allocation118_spill] sm:$0xff] %v12566_v24  ;;  %v12578_v2 = vld [vmem:[#allocation5 + $0x608] sm:$0xff]  ;;  %v16075_v57 = vand.u32 4294901760, %v12518_v18  ;;  %v16076_v21 = vand.u32 4294901760, %v12520_v43 }
 0x210   :  { %3557 = vmatmul.mubr.f32.vlgmr.msra.gmra.mrb[4].mxu1 %v16062_v32  ;;  %16063 = vst [vmem:[#allocation117_spill] sm:$0xff] %v12564_v36  ;;  %16066 = vst [vmem:[#allocation58_spill] sm:$0xff] %v12576_v15  ;;  %v12589_v58 = vld [vmem:[#allocation5 + $0x670] sm:$0xff]  ;;  %v12591_v62 = vld [vmem:[#allocation5 + $0x600] sm:$0xff]  ;;  %v12611_v29 = vpack.c.bf16 %v16073_v34, %v16072_v38  ;;  %v16078_v1 = vand.u32 4294901760, %v12528_v44  ;;  %v16079_v37 = vand.u32 4294901760, %v12530_v19 }
 0x211   :  { %8885 = vmatpush1.bf16.msra.mxu1 %v15923_v53  ;;  %4412 = vmatmul.mubr.f32.vlgmr.msra.gmra.mrb[4].mxu0 %v16062_v32  ;;  %v12571_v53 = vsel %vm6242_vm11, 1.5707964, %v15118_v14  ;;  %v12617_v61 = vpack.c.bf16 %v16076_v21, %v16075_v57  ;;  %v16082_v56 = vand.u32 4294901760, %v12540_v10  ;;  %v16084_v34 = vand.u32 4294901760, %v12542_v6  ;;  %v12639_v57 = vld [vmem:[#allocation5 + $0x668] sm:$0xff]  ;;  %v12641_v11 = vld [vmem:[#allocation5 + $0x610] sm:$0xff] }
 0x212   :  { %9077 = vmatpush1.bf16.msra.mxu0 %v15924_v33  ;;  %8887 = vmatprep.subr.bf16.mxu1 %v15925_v59  ;;  %16065 = vst [vmem:[#allocation119_spill] sm:$0xff] %v12571_v53  ;;  %v12582_v33 = vsub.f32 %v168_v51, %v5405_v45  ;;  %v12587_v59 = vsel %vm6243_vm15, 1.5707964, %v15118_v14  ;;  %v16070_v51 = vand.u32 4294901760, %v12506_v50  ;;  %16074 = vst [vmem:[#allocation123_spill] sm:$0xff] %v12611_v29  ;;  %v16085_v30 = vand.u32 4294901760, %v12544_v8 }
 0x213   :  { %9079 = vmatprep.subr.bf16.mxu0 %v15926_v12  ;;  %3659 = vmatprep.mubr.f32.mxu1 %v15118_v14  ;;  %16068 = vst [vmem:[#allocation120_spill] sm:$0xff] %v12587_v59  ;;  %v12599_v12 = vsel %vm6245_vm0, 1.5707964, %v15118_v14  ;;  %16077 = vst [vmem:[#allocation68_spill] sm:$0xff] %v12617_v61  ;;  %v16099_v61 = vand.u32 4294901760, %v12328_v9  ;;  %v16112_v29 = vld [vmem:[#allocation57_spill] sm:$0xff] }
 0x214   :  { %16067 = vst [vmem:[#allocation65_spill] sm:$0xff] %v12582_v33  ;;  %4514 = vmatprep.mubr.f32.mxu0 %v15118_v14  ;;  %16069 = vst [vmem:[#allocation121_spill] sm:$0xff] %v12599_v12  ;;  %v12605_v45 = vpack.c.bf16 %v16070_v51, %v14955_v52  ;;  %v12624_v51 = vpack.c.bf16 %v16079_v37, %v16078_v1  ;;  %v16081_v52 = vand.u32 4294901760, %v12532_v3  ;;  %v16114_v15 = vld [vmem:[#allocation59_spill] sm:$0xff]  ;;  %v16115_v53 = vld [vmem:[#allocation16_spill] sm:$0xff] }
 0x215   :  { %8889 = vmatpush1.bf16.msra.mxu1 %v15927_v42  ;;  %v12636_v21 = vpack.c.bf16 %v16085_v30, %v16084_v34  ;;  %v12650_v30 = vld [vmem:[#allocation5 + $0x678] sm:$0xff]  ;;  %v16087_v34 = vand.u32 4294901760, %v12315_v55  ;;  %v12664_v37 = vpop.eup %9609 }
 0x216   :  { %16071 = vst [vmem:[#allocation122_spill] sm:$0xff] %v12605_v45  ;;  %16080 = vst [vmem:[#allocation136_spill] sm:$0xff] %v12624_v51  ;;  %v12630_v38 = vpack.c.bf16 %v16082_v56, %v16081_v52  ;;  %9081 = vmatpush1.bf16.msra.mxu0 %v15928_v54  ;;  %8891 = vmatprep.subr.bf16.mxu1 %v15929_v48  ;;  %v16088_v54 = vand.u32 4294901760, %v12317_v0  ;;  %v16091_v51 = vld [vmem:[#allocation100_spill] sm:$0xff]  ;;  %v16093_v52 = vand.u32 4294901760, %v12578_v2  ;;  %v16097_v56 = vand.u32 4294901760, %v12324_v35 }
 0x217   :  { %16086 = vst [vmem:[#allocation72_spill] sm:$0xff] %v12636_v21  ;;  %9083 = vmatprep.subr.bf16.mxu0 %v15931_v4  ;;  %v12655_v42 = vsub.f32 %v12315_v55, %v16087_v34  ;;  %16089 = vst [vmem:[#allocation124_spill] sm:$0xff] %v12664_v37  ;;  %v16092_v37 = vld [vmem:[#allocation29_spill] sm:$0xff]  ;;  %v16094_v4 = vand.u32 4294901760, %v12589_v58  ;;  %v16096_v21 = vand.u32 4294901760, %v12320_v28 }
 0x218   :  { %16083 = vst [vmem:[#allocation17_spill] sm:$0xff] %v12630_v38  ;;  %v12660_v48 = vsub.f32 %v12317_v0, %v16088_v54  ;;  %v16090_v38 = vld [vmem:[#allocation48_spill] sm:$0xff]  ;;  %v4651_v1 = vsub.f32 %v12324_v35, %v16097_v56  ;;  %v16098_v34 = vld [vmem:[#allocation37_spill] sm:$0xff]  ;;  %v16102_v56 = vand.u32 4294901760, %v12341_v31  ;;  %v16103_v35 = vld [vmem:[#allocation51_spill] sm:$0xff] }
 0x219   :  { %8893 = vmatpush1.bf16.msra.mxu1 %v15932_v22  ;;  %v12681_v12 = vpack.c.bf16 %v16094_v4, %v16093_v52  ;;  %v4639_v54 = vsub.f32 %v12320_v28, %v16096_v21  ;;  %v5472_v52 = vsub.f32 %v12328_v9, %v16099_v61  ;;  %v16100_v4 = vand.u32 4294901760, %v12331_v26  ;;  %v16104_v28 = vld [vmem:[#allocation13_spill] sm:$0xff]  ;;  %v16105_v0 = vld [vmem:[#allocation42_spill] sm:$0xff] }
 0x21a   :  { %9085 = vmatpush1.bf16.msra.mxu0 %v16091_v51  ;;  %8895 = vmatprep.subr.bf16.mxu1 %v16092_v37  ;;  %v4634_v51 = vand.u32 4294901760, %v12655_v42  ;;  %v4646_v37 = vand.u32 4294901760, %v12660_v48  ;;  %v16101_v21 = vand.u32 4294901760, %v12339_v16  ;;  %v16106_v61 = vand.u32 4294901760, %v12343_v5  ;;  %v16111_v48 = vld [vmem:[#allocation12_spill] sm:$0xff] }
 0x21b   :  { %16095 = vst [vmem:[#allocation125_spill] sm:$0xff] %v12681_v12  ;;  %9087 = vmatprep.subr.bf16.mxu0 %v16098_v34  ;;  %v5479_v22 = vsub.f32 %v12331_v26, %v16100_v4  ;;  %v4669_v34 = vsub.f32 %v12341_v31, %v16102_v56  ;;  %v16107_v4 = vand.u32 4294901760, %v12350_v63  ;;  %v16109_v56 = vand.u32 4294901760, %v16090_v38  ;;  %v16110_v31 = vld [vmem:[#allocation47_spill] sm:$0xff] }
 0x21c   :  { %v4657_v12 = vsub.f32 %v12339_v16, %v16101_v21  ;;  %v4663_v9 = vsub.f32 %v12343_v5, %v16106_v61  ;;  %v16108_v21 = vand.u32 4294901760, %v12356_v41  ;;  %v4652_v55 = vand.u32 4294901760, %v4651_v1  ;;  %v16113_v5 = vld [vmem:[#allocation66_spill] sm:$0xff]  ;;  %v16119_v61 = vld [vmem:[#allocation64_spill] sm:$0xff] }
 0x21d   :  { %8897 = vmatpush1.bf16.msra.mxu1 %v16105_v0  ;;  %v4675_v26 = vsub.f32 %v12350_v63, %v16107_v4  ;;  %v5493_v42 = vsub.f32 %v16090_v38, %v16109_v56  ;;  %v4640_v0 = vand.u32 4294901760, %v4639_v54  ;;  %v5473_v4 = vand.u32 4294901760, %v5472_v52  ;;  %v16120_v38 = vld [vmem:[#allocation76_spill] sm:$0xff] }
 0x21e   :  { %v5486_v16 = vsub.f32 %v12356_v41, %v16108_v21  ;;  %9089 = vmatpush1.bf16.msra.mxu0 %v16110_v31  ;;  %8899 = vmatprep.subr.bf16.mxu1 %v16111_v48  ;;  %v5480_v63 = vand.u32 4294901760, %v5479_v22  ;;  %v16116_v41 = vld [vmem:[#allocation77_spill] sm:$0xff]  ;;  %v4658_v36 = vand.u32 4294901760, %v4657_v12  ;;  %v4670_v56 = vand.u32 4294901760, %v4669_v34 }
 0x21f   :  { %9091 = vmatprep.subr.bf16.mxu0 %v16114_v15  ;;  %v16117_v31 = vand.u32 4294901760, %v16103_v35  ;;  %v16118_v1 = vand.u32 4294901760, %v16104_v28  ;;  %v4664_v59 = vand.u32 4294901760, %v4663_v9  ;;  %v4676_v15 = vand.u32 4294901760, %v4675_v26  ;;  %v16121_v21 = vld [vmem:[#allocation21_spill] sm:$0xff]  ;;  %v16126_v9 = vld [vmem:[#allocation86_spill] sm:$0xff] }
 0x220   :  { %v5487_v52 = vand.u32 4294901760, %v5486_v16  ;;  %v5494_v22 = vand.u32 4294901760, %v5493_v42  ;;  %v16122_v12 = vand.u32 4294901760, %v16112_v29  ;;  %v16127_v26 = vand.u32 4294901760, %v12591_v62 }
 0x221   :  { %v4681_v48 = vsub.f32 %v16103_v35, %v16117_v31  ;;  %v4693_v54 = vsub.f32 %v16104_v28, %v16118_v1  ;;  %8901 = vmatpush1.bf16.msra.mxu1 %v16119_v61  ;;  %v16123_v31 = vand.u32 4294901760, %v16113_v5  ;;  %v16124_v35 = vld [vmem:[#allocation82_spill] sm:$0xff]  ;;  %v16125_v28 = vld [vmem:[#allocation84_spill] sm:$0xff]  ;;  %v16128_v16 = vand.u32 4294901760, %v12639_v57 }
 0x222   :  { %9093 = vmatpush1.bf16.msra.mxu0 %v16120_v38  ;;  %8903 = vmatprep.subr.bf16.mxu1 %v16121_v21  ;;  %v4687_v34 = vsub.f32 %v16112_v29, %v16122_v12  ;;  %v16130_v42 = vand.u32 4294901760, %v12641_v11  ;;  %v16131_v21 = vand.u32 4294901760, %v12650_v30  ;;  %v16134_v61 = vand.u32 4294901760, %v16116_v41 }
 0x223   :  { %v4699_v45 = vsub.f32 %v16113_v5, %v16123_v31  ;;  %9095 = vmatprep.subr.bf16.mxu0 %v16126_v9  ;;  %v12749_v38 = vpack.c.bf16 %v16128_v16, %v16127_v26  ;;  %v16133_v31 = vand.u32 4294901760, %v16115_v53  ;;  %v12763_v5 = vpack.c.bf16 %v4646_v37, %v4634_v51 }
 0x224   :  { %v12755_v12 = vpack.c.bf16 %v16131_v21, %v16130_v42  ;;  %v5507_v9 = vsub.f32 %v16116_v41, %v16134_v61  ;;  %v12765_v29 = vpack.c.bf16 %v4652_v55, %v4640_v0  ;;  %v4682_v26 = vand.u32 4294901760, %v4681_v48 }
 0x225   :  { %16129 = vst [vmem:[#allocation126_spill] sm:$0xff] %v12749_v38  ;;  %v5500_v1 = vsub.f32 %v16115_v53, %v16133_v31  ;;  %v4694_v16 = vand.u32 4294901760, %v4693_v54  ;;  %v16135_v38 = vld [vmem:[#allocation87_spill] sm:$0xff]  ;;  %v12768_v40 = vpack.c.bf16 %v5480_v63, %v5473_v4  ;;  %v12770_v42 = vpack.c.bf16 %v4670_v56, %v4658_v36  ;;  %v16136_v31 = vld [vmem:[#allocation90_spill] sm:$0xff]  ;;  %v16137_v53 = vld [vmem:[#allocation104_spill] sm:$0xff] }
 0x226   :  { %16132 = vst [vmem:[#allocation19_spill] sm:$0xff] %v12755_v12  ;;  %8905 = vmatpush1.bf16.msra.mxu1 %v16135_v38  ;;  %v12772_v21 = vpack.c.bf16 %v4676_v15, %v4664_v59  ;;  %v12774_v12 = vpack.c.bf16 %v5494_v22, %v5487_v52  ;;  %9097 = vmatpush1.bf16.msra.mxu0 %v16136_v31  ;;  %v4688_v51 = vand.u32 4294901760, %v4687_v34  ;;  %v4700_v37 = vand.u32 4294901760, %v4699_v45  ;;  %v16140_v36 = vld [vmem:[#allocation91_spill] sm:$0xff]  ;;  %v16141_v56 = vld [vmem:[#allocation96_spill] sm:$0xff] }
 0x227   :  { %8907 = vmatprep.subr.bf16.mxu1 %v16137_v53  ;;  %v16138_v55 = vand.u32 4294901760, %v16124_v35  ;;  %v16139_v48 = vand.u32 4294901760, %v16125_v28  ;;  %9099 = vmatprep.subr.bf16.mxu0 %v16140_v36  ;;  %v5501_v59 = vand.u32 4294901760, %v5500_v1  ;;  %v5508_v4 = vand.u32 4294901760, %v5507_v9  ;;  %v16146_v1 = vld [vmem:[#allocation36_spill] sm:$0xff] }
 0x228   :  { %v15005_v54 = vand.u32 4294901760, %v16141_v56  ;;  %v15003_v15 = vand.u32 4294901760, %v12465_v60  ;;  %v16142_v53 = vand.u32 4294901760, %v12504_v46  ;;  %v16144_v52 = vand.u32 4294901760, %v12506_v50 }
 0x229   :  { %v4705_v0 = vsub.f32 %v16124_v35, %v16138_v55  ;;  %v4717_v63 = vsub.f32 %v16125_v28, %v16139_v48  ;;  %v12797_v34 = vpack.c.bf16 %v4694_v16, %v4682_v26  ;;  %v15002_v61 = vand.u32 4294901760, %v12469_v25  ;;  %v16153_v16 = vld [vmem:[#allocation105_spill] sm:$0xff]  ;;  %v16154_v48 = vld [vmem:[#allocation106_spill] sm:$0xff] }
 0x22a   :  { %v12790_v45 = vsub.f32 %v12504_v46, %v16142_v53  ;;  %v12795_v22 = vsub.f32 %v12506_v50, %v16144_v52  ;;  %8909 = vmatpush1.bf16.msra.mxu1 %v16146_v1  ;;  %v16147_v38 = vand.u32 4294901760, %v12508_v27  ;;  %v16149_v31 = vand.u32 4294901760, %v12516_v47  ;;  %9101 = vmatpush1.bf16.msra.mxu0 %v16153_v16  ;;  %v16157_v1 = vld [vmem:[#allocation107_spill] sm:$0xff]  ;;  %v16164_v16 = vld [vmem:[#allocation108_spill] sm:$0xff] }
 0x22b   :  { %v16151_v55 = vand.u32 4294901760, %v12518_v18  ;;  %v15001_v26 = vand.u32 4294901760, %v12474_v49  ;;  %8911 = vmatprep.subr.bf16.mxu1 %v16154_v48  ;;  %v16155_v36 = vand.u32 4294901760, %v12520_v43  ;;  %v12824_v53 = vpack.c.bf16 %v4700_v37, %v4688_v51  ;;  %9103 = vmatprep.subr.bf16.mxu0 %v16157_v1  ;;  %v16167_v1 = vld [vmem:[#allocation111_spill] sm:$0xff] }
 0x22c   :  { %16143 = vst [vmem:[#allocation78_spill] sm:$0xff] %v12790_v45  ;;  %16145 = vst [vmem:[#allocation38_spill] sm:$0xff] %v12795_v22  ;;  %v12804_v9 = vsub.f32 %v12508_v27, %v16147_v38  ;;  %v12809_v46 = vsub.f32 %v12516_v47, %v16149_v31  ;;  %v4706_v47 = vand.u32 4294901760, %v4705_v0  ;;  %v4718_v52 = vand.u32 4294901760, %v4717_v63 }
 0x22d   :  { %v12814_v50 = vsub.f32 %v12518_v18, %v16151_v55  ;;  %v12822_v27 = vsub.f32 %v12520_v43, %v16155_v36  ;;  %v12827_v38 = vpack.c.bf16 %v5508_v4, %v5501_v59  ;;  %v4711_v18 = vsub.f32 %v16141_v56, %v15005_v54 }
 0x22e   :  { %16148 = vst [vmem:[#allocation43_spill] sm:$0xff] %v12804_v9  ;;  %16150 = vst [vmem:[#allocation11_spill] sm:$0xff] %v12809_v46  ;;  %v4723_v31 = vsub.f32 %v12465_v60, %v15003_v15  ;;  %v15004_v55 = vand.u32 4294901760, %v12510_v23  ;;  %v16158_v43 = vand.u32 4294901760, %v12528_v44  ;;  %v16160_v37 = vand.u32 4294901760, %v12530_v19  ;;  %8913 = vmatpush1.bf16.msra.mxu1 %v16164_v16  ;;  %9105 = vmatpush1.bf16.msra.mxu0 %v16167_v1 }
 0x22f   :  { %16152 = vst [vmem:[#allocation54_spill] sm:$0xff] %v12814_v50  ;;  %16156 = vst [vmem:[#allocation15_spill] sm:$0xff] %v12822_v27  ;;  %v16162_v63 = vand.u32 4294901760, %v12532_v3  ;;  %v5514_v4 = vsub.f32 %v12469_v25, %v15002_v61  ;;  %v16165_v48 = vand.u32 4294901760, %v12540_v10  ;;  %v15006_v36 = vand.u32 4294901760, %v12512_v13 }
 0x230   :  { %v12839_v51 = vsub.f32 %v12528_v44, %v16158_v43  ;;  %v12844_v0 = vsub.f32 %v12530_v19, %v16160_v37  ;;  %v5521_v19 = vsub.f32 %v12474_v49, %v15001_v26  ;;  %v16168_v43 = vld [vmem:[#allocation14_spill] sm:$0xff]  ;;  %v16169_v37 = vand.u32 4294901760, %v12542_v6 }
 0x231   :  { %v12849_v59 = vsub.f32 %v12532_v3, %v16162_v63  ;;  %v12858_v44 = vsub.f32 %v12540_v10, %v16165_v48  ;;  %v15007_v3 = vand.u32 4294901760, %v12514_v7  ;;  %9107 = vmatprep.subr.bf16.mxu1 %v16168_v43  ;;  %v16171_v10 = vand.u32 4294901760, %v12544_v8  ;;  %3661 = vmatmul.mubr.f32.vlgmr.msra.gmra.mrb[4].mxu1 %v16062_v32 }
 0x232   :  { %16159 = vst [vmem:[#allocation67_spill] sm:$0xff] %v12839_v51  ;;  %16161 = vst [vmem:[#allocation73_spill] sm:$0xff] %v12844_v0  ;;  %v12870_v63 = vsub.f32 %v12542_v6, %v16169_v37  ;;  %v12877_v48 = vpack.c.bf16 %v4718_v52, %v4706_v47  ;;  %v15008_v26 = vmov 0.0|0.0   ;;  %v4712_v61 = vand.u32 4294901760, %v4711_v18  ;;  %4516 = vmatmul.mubr.f32.vlgmr.msra.gmra.mrb[4].mxu0 %v16062_v32  ;;  %4618 = vmatprep.mubr.f32.mxu1 %v15118_v14 }
 0x233   :  { %16163 = vst [vmem:[#allocation79_spill] sm:$0xff] %v12849_v59  ;;  %16166 = vst [vmem:[#allocation23_spill] sm:$0xff] %v12858_v44  ;;  %v12875_v16 = vsub.f32 %v12544_v8, %v16171_v10  ;;  %9298 = vmatprep.subr.bf16.mxu0 %v15008_v26  ;;  %v4724_v15 = vand.u32 4294901760, %v4723_v31  ;;  %v12883_v1 = vsub.f32 %v12510_v23, %v15004_v55  ;;  %v16173_v37 = vand.u32 4294901760, %v12578_v2  ;;  %v16177_v10 = vld [vmem:[#allocation22_spill] sm:$0xff] }
 0x234   :  { %16170 = vst [vmem:[#allocation109_spill] sm:$0xff] %v12870_v63  ;;  %v16175_v47 = vand.u32 4294901760, %v12589_v58  ;;  %v5515_v18 = vand.u32 4294901760, %v5514_v4  ;;  %9109 = vmatpush1.bf16.msra.mxu1 %v16177_v10  ;;  %v5522_v55 = vand.u32 4294901760, %v5521_v19  ;;  %v12903_v54 = vsub.f32 %v12512_v13, %v15006_v36  ;;  %v16178_v4 = vld [vmem:[#allocation94_spill] sm:$0xff]  ;;  %7968 = vmatprep.mubr.msk.f32.mxu0 %vm9741_vm1, %v15118_v14 }
 0x235   :  { %16172 = vst [vmem:[#allocation95_spill] sm:$0xff] %v12875_v16  ;;  %v12890_v8 = vsub.f32 %v12578_v2, %v16173_v37  ;;  %v12908_v2 = vsub.f32 %v12514_v7, %v15007_v3  ;;  %9300 = vmatpush3.bf16.msra.mxu0 %v16178_v4  ;;  %v16179_v37 = vld [vmem:[#allocation28_spill] sm:$0xff]  ;;  %v16182_v31 = vand.u32 4294901760, %v12639_v57  ;;  %v16184_v6 = vand.u32 4294901760, %v12641_v11 }
 0x236   :  { %v12895_v52 = vsub.f32 %v12589_v58, %v16175_v47  ;;  %9111 = vmatprep.subr.bf16.mxu1 %v16179_v37  ;;  %v16180_v47 = vand.u32 4294901760, %v12591_v62  ;;  %9301 = vmatprep.subr.bf16.mxu0 %v15008_v26  ;;  %v16186_v37 = vand.u32 4294901760, %v12650_v30  ;;  %v16192_v58 = vand.u32 4294901760, %v12582_v33 }
 0x237   :  { %16174 = vst [vmem:[#allocation98_spill] sm:$0xff] %v12890_v8  ;;  %v12921_v36 = vsub.f32 %v12639_v57, %v16182_v31  ;;  %v12926_v3 = vsub.f32 %v12641_v11, %v16184_v6  ;;  %v16188_v31 = vand.u32 4294901760, %v12525_v39  ;;  %v16189_v6 = vand.u32 4294901760, %v12566_v24 }
 0x238   :  { %16176 = vst [vmem:[#allocation133_spill] sm:$0xff] %v12895_v52  ;;  %v12916_v19 = vsub.f32 %v12591_v62, %v16180_v47  ;;  %v12933_v4 = vsub.f32 %v12650_v30, %v16186_v37  ;;  %v12936_v62 = vpack.c.bf16 %v4724_v15, %v4712_v61  ;;  %v16190_v47 = vld [vmem:[#allocation50_spill] sm:$0xff]  ;;  %v12955_v57 = vpack.c.bf16 %v5522_v55, %v5515_v18  ;;  %v16194_v37 = vld [vmem:[#allocation53_spill] sm:$0xff] }
 0x239   :  { %16183 = vst [vmem:[#allocation56_spill] sm:$0xff] %v12921_v36  ;;  %16185 = vst [vmem:[#allocation31_spill] sm:$0xff] %v12926_v3  ;;  %v12942_v11 = vsub.f32 %v12525_v39, %v16188_v31  ;;  %v12949_v30 = vsub.f32 %v12566_v24, %v16189_v6  ;;  %9113 = vmatpush1.bf16.msra.mxu1 %v16190_v47  ;;  %v4742_v31 = vand.u32 4294901760, %v12903_v54  ;;  %v4736_v26 = vand.u32 4294901760, %v12908_v2  ;;  %v16193_v6 = vld [vmem:[#allocation41_spill] sm:$0xff] }
 0x23a   :  { %16181 = vst [vmem:[#allocation26_spill] sm:$0xff] %v12916_v19  ;;  %16187 = vst [vmem:[#allocation102_spill] sm:$0xff] %v12933_v4  ;;  %v12962_v10 = vsub.f32 %v12582_v33, %v16192_v58  ;;  %9303 = vmatpush3.bf16.msra.mxu0 %v16193_v6  ;;  %9115 = vmatprep.subr.bf16.mxu1 %v16194_v37  ;;  %v16195_v15 = vand.u32 4294901760, %v12790_v45  ;;  %v16196_v2 = vmov 0.0|0.0   ;;  %v16198_v18 = vand.u32 4294901760, %v12804_v9 }
 0x23b   :  { %16191 = vst [vmem:[#allocation61_spill] sm:$0xff] %v12955_v57  ;;  %9304 = vmatprep.subr.bf16.mxu0 %v16196_v2  ;;  %v4748_v47 = vand.u32 4294901760, %v12942_v11  ;;  %v5529_v43 = vand.u32 4294901760, %v12949_v30  ;;  %v16199_v32 = vand.u32 4294901760, %v12809_v46  ;;  %v16201_v57 = vld [vmem:[#allocation18_spill] sm:$0xff]  ;;  %v16205_v37 = vand.u32 4294901760, %v12839_v51 }
 0x23c   :  { %v4753_v61 = vsub.f32 %v12790_v45, %v16195_v15  ;;  %v16197_v15 = vand.u32 4294901760, %v12795_v22  ;;  %v4759_v54 = vsub.f32 %v12804_v9, %v16198_v18  ;;  %v16200_v45 = vld [vmem:[#allocation60_spill] sm:$0xff]  ;;  %v5536_v18 = vand.u32 4294901760, %v12962_v10 }
 0x23d   :  { %v4771_v11 = vsub.f32 %v12809_v46, %v16199_v32  ;;  %9117 = vmatpush1.bf16.msra.mxu1 %v16200_v45  ;;  %v16203_v9 = vand.u32 4294901760, %v12814_v50  ;;  %v16204_v45 = vand.u32 4294901760, %v12822_v27  ;;  %v4777_v30 = vsub.f32 %v12839_v51, %v16205_v37  ;;  %v16209_v51 = vld [vmem:[#allocation93_spill] sm:$0xff] }
 0x23e   :  { %v4765_v55 = vsub.f32 %v12795_v22, %v16197_v15  ;;  %9306 = vmatpush3.bf16.msra.mxu0 %v16201_v57  ;;  %v16202_v15 = vld [vmem:[#allocation83_spill] sm:$0xff]  ;;  %v4754_v58 = vand.u32 4294901760, %v4753_v61  ;;  %v16206_v57 = vand.u32 4294901760, %v12844_v0  ;;  %v16207_v10 = vand.u32 4294901760, %v12849_v59 }
 0x23f   :  { %9119 = vmatprep.subr.bf16.mxu1 %v16202_v15  ;;  %v5542_v32 = vsub.f32 %v12814_v50, %v16203_v9  ;;  %v5549_v6 = vsub.f32 %v12822_v27, %v16204_v45  ;;  %9307 = vmatprep.subr.bf16.mxu0 %v16196_v2  ;;  %v16208_v9 = vand.u32 4294901760, %v12858_v44  ;;  %v4760_v27 = vand.u32 4294901760, %v4759_v54 }
 0x240   :  { %v4789_v15 = vsub.f32 %v12844_v0, %v16206_v57  ;;  %v4783_v46 = vsub.f32 %v12849_v59, %v16207_v10  ;;  %v4766_v45 = vand.u32 4294901760, %v4765_v55  ;;  %v16210_v61 = vand.u32 4294901760, %v12870_v63 }
 0x241   :  { %v4795_v50 = vsub.f32 %v12858_v44, %v16208_v9  ;;  %9121 = vmatpush1.bf16.msra.mxu1 %v16209_v51  ;;  %v16211_v0 = vand.u32 4294901760, %v12875_v16  ;;  %v16212_v59 = vand.u32 4294901760, %v12890_v8  ;;  %v16213_v55 = vand.u32 4294901760, %v12895_v52 }
 0x242   :  { %v5556_v57 = vsub.f32 %v12870_v63, %v16210_v61  ;;  %9309 = vmatpush3.bf16.msra.mxu0 %v12467_v17  ;;  %9123 = vmatprep.subr.bf16.mxu1 %v12476_v20  ;;  %v4772_v37 = vand.u32 4294901760, %v4771_v11  ;;  %v5543_v22 = vand.u32 4294901760, %v5542_v32  ;;  %v5550_v51 = vand.u32 4294901760, %v5549_v6  ;;  %v16217_v32 = vld [vmem:[#allocation115_spill] sm:$0xff]  ;;  %v16218_v20 = vld [vmem:[#allocation117_spill] sm:$0xff] }
 0x243   :  { %v5563_v10 = vsub.f32 %v12875_v16, %v16211_v0  ;;  %v4801_v9 = vsub.f32 %v12890_v8, %v16212_v59  ;;  %v4813_v54 = vsub.f32 %v12895_v52, %v16213_v55  ;;  %v4778_v61 = vand.u32 4294901760, %v4777_v30  ;;  %9310 = vmatprep.subr.bf16.mxu0 %v16196_v2 }
 0x244   :  { %v4790_v63 = vand.u32 4294901760, %v4789_v15  ;;  %v4784_v0 = vand.u32 4294901760, %v4783_v46  ;;  %v4796_v16 = vand.u32 4294901760, %v4795_v50  ;;  %v16214_v59 = vand.u32 4294901760, %v12883_v1  ;;  %v16219_v1 = vld [vmem:[#allocation122_spill] sm:$0xff] }
 0x245   :  { %v13037_v55 = vpack.c.bf16 %v4748_v47, %v4736_v26  ;;  %v16215_v17 = vand.u32 4294901760, %v12916_v19  ;;  %v16216_v6 = vand.u32 4294901760, %v12921_v36  ;;  %9125 = vmatpush1.bf16.msra.mxu1 %v16217_v32  ;;  %v5557_v46 = vand.u32 4294901760, %v5556_v57 }
 0x246   :  { %v13035_v8 = vpack.c.bf16 %v4742_v31, %v16214_v59  ;;  %v5564_v50 = vand.u32 4294901760, %v5563_v10  ;;  %v4802_v15 = vand.u32 4294901760, %v4801_v9  ;;  %v4814_v44 = vand.u32 4294901760, %v4813_v54  ;;  %9312 = vmatpush3.bf16.msra.mxu0 %v16218_v20  ;;  %9127 = vmatprep.subr.bf16.mxu1 %v16219_v1  ;;  %v13055_v59 = vpop.f32.mrb[2].mxu1  ;;  %v16248_v20 = vld [vmem:[#allocation72_spill] sm:$0xff] }
 0x247   :  { %v4807_v11 = vsub.f32 %v12916_v19, %v16215_v17  ;;  %v4819_v30 = vsub.f32 %v12921_v36, %v16216_v6  ;;  %v13048_v26 = vpack.c.bf16 %v5536_v18, %v5529_v43  ;;  %v13050_v47 = vpack.c.bf16 %v4766_v45, %v4754_v58  ;;  %16220 = vst [vmem:[#allocation63_spill] sm:$0xff] %v13055_v59  ;;  %v13057_v6 = vpop.f32.mrb[2].mxu0  ;;  %v16225_v45 = vld [vmem:[#allocation58_spill] sm:$0xff]  ;;  %v13077_v54 = vpop.f32.mrb[3].mxu1  ;;  %v16245_v36 = vld [vmem:[#allocation17_spill] sm:$0xff]  ;;  %v16247_v19 = vld [vmem:[#allocation39_spill] sm:$0xff] }
 0x248   :  { %v13052_v31 = vpack.c.bf16 %v4772_v37, %v4760_v27  ;;  %16221 = vst [vmem:[#allocation69_spill] sm:$0xff] %v13057_v6  ;;  %9313 = vmatprep.subr.bf16.mxu0 %v16196_v2  ;;  %v13060_v57 = vpack.c.bf16 %v5550_v51, %v5543_v22  ;;  %v13062_v10 = vpack.c.bf16 %v4790_v63, %v4778_v61  ;;  %v16222_v43 = vand.u32 4294901760, %v12926_v3  ;;  %v16223_v27 = vld [vmem:[#allocation119_spill] sm:$0xff]  ;;  %v13079_v22 = vpop.f32.mrb[3].mxu0 }
 0x249   :  { %v13064_v9 = vpack.c.bf16 %v4796_v16, %v4784_v0  ;;  %v13071_v18 = vadd.f32 %v16223_v27, %v13055_v59  ;;  %v13075_v37 = vadd.f32 %v16225_v45, %v13057_v6  ;;  %16227 = vst [vmem:[#allocation129_spill] sm:$0xff] %v13077_v54  ;;  %16228 = vst [vmem:[#allocation130_spill] sm:$0xff] %v13079_v22  ;;  %v4808_v51 = vand.u32 4294901760, %v4807_v11  ;;  %v16229_v16 = vld [vmem:[#allocation120_spill] sm:$0xff]  ;;  %v16231_v0 = vld [vmem:[#allocation123_spill] sm:$0xff] }
 0x24a   :  { %v5570_v58 = vsub.f32 %v12926_v3, %v16222_v43  ;;  %v4820_v63 = vand.u32 4294901760, %v4819_v30  ;;  %v13083_v61 = vadd.f32 %v16229_v16, %v13077_v54  ;;  %9129 = vmatpush1.bf16.msra.mxu1 %v16231_v0  ;;  %v13086_v43 = vpack.c.bf16 %v5564_v50, %v5557_v46  ;;  %v16234_v6 = vld [vmem:[#allocation68_spill] sm:$0xff] }
 0x24b   :  { %16224 = vst [vmem:[#allocation127_spill] sm:$0xff] %v13071_v18  ;;  %16226 = vst [vmem:[#allocation128_spill] sm:$0xff] %v13075_v37  ;;  %v13088_v27 = vpack.c.bf16 %v4814_v44, %v4802_v15  ;;  %v6490_v32 = vand.u32 2139095040, %v13071_v18  ;;  %9315 = vmatpush3.bf16.msra.mxu0 %v16234_v6  ;;  %v16235_v11 = vld [vmem:[#allocation136_spill] sm:$0xff]  ;;  %v16236_v30 = vand.u32 4294901760, %v12933_v4  ;;  %v6698_v15 = vand.u32 2139095040, %v13075_v37 }
 0x24c   :  { %16230 = vst [vmem:[#allocation131_spill] sm:$0xff] %v13083_v61  ;;  %9131 = vmatprep.subr.bf16.mxu1 %v16235_v11  ;;  %v15054_v44 = vand.u32 2147483647, %v13075_v37  ;;  %9316 = vmatprep.subr.bf16.mxu0 %v16196_v2  ;;  %v5571_v45 = vand.u32 4294901760, %v5570_v58  ;;  %v16241_v11 = vand.u32 2147483647, %v13071_v18  ;;  %v13108_v1 = vpack.c.bf16 %v4820_v63, %v4808_v51 }
 0x24d   :  { %v5577_v16 = vsub.f32 %v12933_v4, %v16236_v30  ;;  %v6491_v6 = vshrl.u32 %v6490_v32, 23  ;;  %v6699_v50 = vshrl.u32 %v6698_v15, 23  ;;  %v6594_v46 = vand.u32 2139095040, %v13083_v61  ;;  %v16250_v63 = vld [vmem:[#allocation46_spill] sm:$0xff]  ;;  %v16251_v0 = vld [vmem:[#allocation48_spill] sm:$0xff]  ;;  %v16253_v30 = vld [vmem:[#allocation13_spill] sm:$0xff] }
 0x24e   :  { %v6494_v17 = vand.u32 8388607, %v16241_v11  ;;  %16242 = vst [vmem:[#allocation132_spill] sm:$0xff] %v13108_v1  ;;  %v6702_v54 = vand.u32 8388607, %v15054_v44  ;;  %9133 = vmatpush1.bf16.msra.mxu1 %v16245_v36  ;;  %v16249_v11 = vld [vmem:[#allocation125_spill] sm:$0xff] }
 0x24f   :  { %v7790_v32 = vadd.s32 4294967169, %v6491_v6  ;;  %9318 = vmatpush3.bf16.msra.mxu0 %v16248_v20  ;;  %9135 = vmatprep.subr.bf16.mxu1 %v16249_v11  ;;  %v5578_v51 = vand.u32 4294901760, %v5577_v16  ;;  %v7798_v44 = vadd.s32 4294967169, %v6699_v50  ;;  %v6595_v4 = vshrl.u32 %v6594_v46, 23  ;;  %v16254_v36 = vld [vmem:[#allocation57_spill] sm:$0xff]  ;;  %v16255_v1 = vld [vmem:[#allocation66_spill] sm:$0xff] }
 0x250   :  { %9319 = vmatprep.subr.bf16.mxu0 %v16196_v2  ;;  %v16256_v59 = vld [vmem:[#allocation16_spill] sm:$0xff]  ;;  %v6495_v20 = vor.u32 8388608, %v6494_v17  ;;  %v6703_v11 = vor.u32 8388608, %v6702_v54  ;;  %v15058_v46 = vand.u32 2147483647, %v13083_v61  ;;  %v16257_v15 = vld [vmem:[#allocation126_spill] sm:$0xff] }
 0x251   :  { %v6497_v58 = vadd.s32 1, %v7790_v32  ;;  %v6705_v37 = vadd.s32 1, %v7798_v44  ;;  %v7794_v50 = vadd.s32 4294967169, %v6595_v4  ;;  %v16258_v18 = vld [vmem:[#allocation19_spill] sm:$0xff]  ;;  %v13137_v17 = vpack.c.bf16 %v5578_v51, %v5571_v45  ;;  %v16259_v51 = vld [vmem:[#allocation121_spill] sm:$0xff]  ;;  %v16261_v6 = vld [vmem:[#allocation34_spill] sm:$0xff] }
 0x252   :  { %9137 = vmatpush1.bf16.msra.mxu1 %v16257_v15  ;;  %v13152_v32 = vadd.f32 %v16259_v51, %v13079_v22  ;;  %v13157_v3 = vshll.u32 %v6703_v11, 8  ;;  %v13161_v4 = vand.u32 8388607, %v15058_v46  ;;  %v16263_v44 = vmov 2475754826  }
 0x253   :  { %vm6498_vm2 = vcmp.gt.s32.totalorder %v6497_v58, 0  ;;  %9321 = vmatpush3.bf16.msra.mxu0 %v16258_v18  ;;  %9139 = vmatprep.subr.bf16.mxu1 %v12763_v5  ;;  %vm6706_vm3 = vcmp.gt.s32.totalorder %v6705_v37, 0  ;;  %v13163_v18 = vadd.s32 1, %v7794_v50  ;;  %v16265_v46 = vmov 2102212464  }
 0x254   :  { %v6499_v54 = vsel %vm6498_vm2, %v6497_v58, 0  ;;  %9322 = vmatprep.subr.bf16.mxu0 %v16196_v2  ;;  %v6707_v45 = vsel %vm6706_vm3, %v6705_v37, 0  ;;  %16260 = vst [vmem:[#allocation135_spill] sm:$0xff] %v13152_v32  ;;  %v13155_v58 = vshll.u32 %v6495_v20, 8  ;;  %v16264_v20 = vmov 2131351028  }
 0x255   :  { %v13148_v16 = vshrl.u32 %v6499_v54, 5  ;;  %v6501_v5 = vand.u32 31, %v6499_v54  ;;  %4624 = vmatmul.mubr.f32.vlgmr.msra.gmra.mrb[6].mxu1 %v16261_v6  ;;  %v16262_v54 = vmov 683565275   ;;  %v13169_v15 = vand.u32 31, %v6707_v45 }
 0x256   :  { %9141 = vmatpush1.bf16.msra.mxu1 %v12765_v29  ;;  %7969 = vmatmul.mubr.f32.vlgmr.msra.gmra.mrb[6].mxu0 %v16261_v6  ;;  %v16266_v61 = vmov 920167782   ;;  %v13176_v29 = vshrl.u32 %v6707_v45, 5  ;;  %v16267_v45 = vmov 1326507024   ;;  %vm6602_vm8 = vcmp.gt.s32.totalorder %v13163_v18, 0 }
 0x257   :  { %v6502_v37 = vsub.s32 32, %v6501_v5  ;;  %v6504_v51 = vshll.u32 %v16262_v54, %v6501_v5  ;;  %v6507_v22 = vshll.u32 %v16263_v44, %v6501_v5  ;;  %9324 = vmatpush3.bf16.msra.mxu0 %v12768_v40  ;;  %9143 = vmatprep.subr.bf16.mxu1 %v12770_v42  ;;  %v6510_v11 = vshll.u32 %v16264_v20, %v6501_v5 }
 0x258   :  { %v6513_v50 = vshll.u32 %v16265_v46, %v6501_v5  ;;  %v6516_v24 = vshll.u32 %v16266_v61, %v6501_v5  ;;  %9325 = vmatprep.subr.bf16.mxu0 %v16196_v2  ;;  %4854 = vmatprep.mubr.f32.mxu1 %v15118_v14  ;;  %vm6519_vm4 = vcmp.lt.s32.totalorder %v13148_v16, 1  ;;  %vm6520_vm5 = vcmp.lt.s32.totalorder %v13148_v16, 2 }
 0x259   :  { %v6505_v6 = vshrl.u32 %v16263_v44, %v6502_v37  ;;  %v6508_v33 = vshrl.u32 %v16264_v20, %v6502_v37  ;;  %v6511_v40 = vshrl.u32 %v16265_v46, %v6502_v37  ;;  %8003 = vmatprep.mubr.msk.f32.mxu0 %vm9741_vm1, %v15118_v14  ;;  %v6503_v42 = vshrl.u32 %v16262_v54, %v6502_v37 }
 0x25a   :  { %v6514_v5 = vshrl.u32 %v16266_v61, %v6502_v37  ;;  %v6517_v7 = vshrl.u32 %v16267_v45, %v6502_v37  ;;  %9145 = vmatpush1.bf16.msra.mxu1 %v12772_v21  ;;  %v6710_v25 = vsub.s32 32, %v13169_v15  ;;  %vm6521_vm6 = vcmp.lt.s32.totalorder %v13148_v16, 3 }
 0x25b   :  { %v6506_v39 = vor.u32 %v6505_v6, %v6504_v51  ;;  %v6509_v23 = vor.u32 %v6508_v33, %v6507_v22  ;;  %v6512_v13 = vor.u32 %v6511_v40, %v6510_v11  ;;  %9327 = vmatpush3.bf16.msra.mxu0 %v12774_v12  ;;  %9147 = vmatprep.subr.bf16.mxu1 %v12797_v34  ;;  %vm6522_vm7 = vcmp.lt.s32.totalorder %v13148_v16, 4 }
 0x25c   :  { %v6515_v49 = vor.u32 %v6514_v5, %v6513_v50  ;;  %v6518_v56 = vor.u32 %v6517_v7, %v6516_v24  ;;  %9328 = vmatprep.subr.bf16.mxu0 %v16196_v2  ;;  %v6712_v24 = vshll.u32 %v16262_v54, %v13169_v15  ;;  %v6713_v50 = vshrl.u32 %v16263_v44, %v6710_v25 }
 0x25d   :  { %v6523_v21 = vsel %vm6519_vm4, %v6503_v42, %v6506_v39  ;;  %v6524_v37 = vsel %vm6522_vm7, %v6512_v13, 2102212464  ;;  %v6527_v33 = vsel %vm6519_vm4, %v6506_v39, %v6509_v23  ;;  %v6531_v12 = vsel %vm6519_vm4, %v6509_v23, %v6512_v13 }
 0x25e   :  { %v6525_v22 = vsel %vm6521_vm6, %v6509_v23, %v6524_v37  ;;  %v6528_v34 = vsel %vm6522_vm7, %v6515_v49, 920167782  ;;  %v6532_v51 = vsel %vm6522_vm7, %v6518_v56, 1326507024  ;;  %9149 = vmatpush1.bf16.msra.mxu1 %v12824_v53  ;;  %v6715_v39 = vshll.u32 %v16263_v44, %v13169_v15 }
 0x25f   :  { %v6529_v7 = vsel %vm6521_vm6, %v6512_v13, %v6528_v34  ;;  %v6533_v11 = vsel %vm6521_vm6, %v6515_v49, %v6532_v51  ;;  %9330 = vmatpush3.bf16.msra.mxu0 %v12827_v38  ;;  %v6526_v23 = vsel %vm6520_vm5, %v6523_v21, %v6525_v22  ;;  %v6716_v53 = vshrl.u32 %v16264_v20, %v6710_v25  ;;  %v16268_v22 = vld [vmem:[#allocation61_spill] sm:$0xff] }
 0x260   :  { %v6530_v56 = vsel %vm6520_vm5, %v6527_v33, %v6529_v7  ;;  %v6534_v6 = vsel %vm6520_vm5, %v6531_v12, %v6533_v11  ;;  %9151 = vmatprep.subr.bf16.mxu1 %v12877_v48  ;;  %9331 = vmatprep.subr.bf16.mxu0 %v16196_v2  ;;  %v6714_v42 = vor.u32 %v6713_v50, %v6712_v24  ;;  %vm6727_vm9 = vcmp.lt.s32.totalorder %v13176_v29, 1 }
 0x261   :  { %v13220_v49 = vmul.u32.u64.low %v13155_v58, %v6534_v6  ;;  %v13221_v13 = vmul.u32.u64.high %v13155_v58, %v6534_v6, %v13220_v49  ;;  %v13224_v40 = vmul.u32.u64.low %v13155_v58, %v6530_v56  ;;  %v13225_v38 = vmul.u32.u64.high %v13155_v58, %v6530_v56, %v13224_v40 }
 0x262   :  { %v6717_v5 = vor.u32 %v6716_v53, %v6715_v39  ;;  %v6718_v16 = vshll.u32 %v16264_v20, %v13169_v15  ;;  %v6719_v21 = vshrl.u32 %v16265_v46, %v6710_v25  ;;  %9153 = vmatpush1.bf16.msra.mxu1 %v12936_v62  ;;  %v6711_v48 = vshrl.u32 %v16262_v54, %v6710_v25 }
 0x263   :  { %v6721_v37 = vshll.u32 %v16265_v46, %v13169_v15  ;;  %v6722_v33 = vshrl.u32 %v16266_v61, %v6710_v25  ;;  %v6725_v12 = vshrl.u32 %v16267_v45, %v6710_v25  ;;  %9333 = vmatpush3.bf16.msra.mxu0 %v16268_v22  ;;  %v6542_v34 = vmul.u32 %v13155_v58, %v6526_v23 }
 0x264   :  { %v6720_v51 = vor.u32 %v6719_v21, %v6718_v16  ;;  %v6724_v24 = vshll.u32 %v16266_v61, %v13169_v15  ;;  %9155 = vmatprep.subr.bf16.mxu1 %v13035_v8  ;;  %9334 = vmatprep.subr.bf16.mxu0 %v16196_v2  ;;  %vm6544_vm10 = vc.u32 %v13221_v13, %v13224_v40  ;;  %v6545_v62 = vadd.s32 1, %v13225_v38 }
 0x265   :  { %v6723_v25 = vor.u32 %v6722_v33, %v6721_v37  ;;  %vm6728_vm11 = vcmp.lt.s32.totalorder %v13176_v29, 2  ;;  %vm6729_vm12 = vcmp.lt.s32.totalorder %v13176_v29, 3  ;;  %vm6730_vm15 = vcmp.lt.s32.totalorder %v13176_v29, 4  ;;  %v16271_v33 = vld [vmem:[#allocation43_spill] sm:$0xff] }
 0x266   :  { %v6726_v7 = vor.u32 %v6725_v12, %v6724_v24  ;;  %v6735_v15 = vsel %vm6727_vm9, %v6714_v42, %v6717_v5  ;;  %9157 = vmatpush1.bf16.msra.mxu1 %v13037_v55  ;;  %v6546_v8 = vsel %vm6544_vm10, %v6545_v62, %v13225_v38  ;;  %v6732_v58 = vsel %vm6730_vm15, %v6720_v51, 2102212464  ;;  %v16272_v12 = vld [vmem:[#allocation11_spill] sm:$0xff]  ;;  %v16273_v24 = vld [vmem:[#allocation54_spill] sm:$0xff] }
 0x267   :  { %v6736_v11 = vsel %vm6730_vm15, %v6723_v25, 920167782  ;;  %v6739_v50 = vsel %vm6727_vm9, %v6717_v5, %v6720_v51  ;;  %9336 = vmatpush3.bf16.msra.mxu0 %v13048_v26  ;;  %9159 = vmatprep.subr.bf16.mxu1 %v13050_v47  ;;  %v6547_v39 = vadd.s32 %v6546_v8, %v6542_v34  ;;  %v6731_v23 = vsel %vm6727_vm9, %v6711_v48, %v6714_v42  ;;  %v16270_v48 = vld [vmem:[#allocation38_spill] sm:$0xff]  ;;  %v16274_v62 = vld [vmem:[#allocation15_spill] sm:$0xff] }
 0x268   :  { %v6737_v56 = vsel %vm6729_vm12, %v6720_v51, %v6736_v11  ;;  %v6740_v6 = vsel %vm6730_vm15, %v6726_v7, 1326507024  ;;  %9337 = vmatprep.subr.bf16.mxu0 %v16196_v2  ;;  %v6733_v55 = vsel %vm6729_vm12, %v6717_v5, %v6732_v58  ;;  %v6603_v47 = vsel %vm6602_vm8, %v13163_v18, 0  ;;  %v16269_v18 = vld [vmem:[#allocation78_spill] sm:$0xff]  ;;  %v16286_v37 = vld [vmem:[#allocation127_spill] sm:$0xff] }
 0x269   :  { %v6738_v53 = vsel %vm6728_vm11, %v6735_v15, %v6737_v56  ;;  %v6741_v26 = vsel %vm6729_vm12, %v6723_v25, %v6740_v6  ;;  %v6548_v49 = vadd.s32 536870912, %v6547_v39  ;;  %v6734_v51 = vsel %vm6728_vm11, %v6731_v23, %v6733_v55  ;;  %v16299_v7 = vld [vmem:[#allocation35_spill] sm:$0xff]  ;;  %v16300_v15 = vld [vmem:[#allocation24_spill] sm:$0xff] }
 0x26a   :  { %v6742_v38 = vsel %vm6728_vm11, %v6739_v50, %v6741_v26  ;;  %v13276_v42 = vmul.u32.u64.low %v13157_v3, %v6738_v53  ;;  %v13277_v16 = vmul.u32.u64.high %v13157_v3, %v6738_v53, %v13276_v42  ;;  %9161 = vmatpush1.bf16.msra.mxu1 %v13052_v31  ;;  %v6605_v31 = vand.u32 31, %v6603_v47  ;;  %v16296_v53 = vld [vmem:[#allocation92_spill] sm:$0xff] }
 0x26b   :  { %v13282_v5 = vmul.u32.u64.low %v13157_v3, %v6742_v38  ;;  %v13283_v21 = vmul.u32.u64.high %v13157_v3, %v6742_v38, %v13282_v5  ;;  %9339 = vmatpush3.bf16.msra.mxu0 %v13060_v57  ;;  %9163 = vmatprep.subr.bf16.mxu1 %v13062_v10  ;;  %v13291_v34 = vshrl.u32 %v6548_v49, 30  ;;  %v6599_v57 = vor.u32 8388608, %v13161_v4  ;;  %v16289_v38 = vld [vmem:[#allocation75_spill] sm:$0xff] }
 0x26c   :  { %9340 = vmatprep.subr.bf16.mxu0 %v16196_v2  ;;  %v6753_v29 = vadd.s32 1, %v13277_v16  ;;  %v13306_v23 = vsub.s32 32, %v6605_v31  ;;  %v6802_v6 = vand.u32 2139095040, %v13152_v32  ;;  %v6750_v4 = vmul.u32 %v13157_v3, %v6734_v51 }
 0x26d   :  { %v6550_v56 = vshll.u32 %v13291_v34, 30  ;;  %vm6752_vm0 = vc.u32 %v13283_v21, %v13276_v42  ;;  %vm6489_vm2 = vcmp.lt.s32.totalorder %v16286_v37, 0  ;;  %v13329_v10 = vshll.u32 %v6599_v57, 8 }
 0x26e   :  { %9165 = vmatpush1.bf16.msra.mxu1 %v13064_v9  ;;  %v6754_v50 = vsel %vm6752_vm0, %v6753_v29, %v13277_v16  ;;  %v6609_v26 = vshrl.u32 %v16263_v44, %v13306_v23  ;;  %v6612_v16 = vshrl.u32 %v16264_v20, %v13306_v23  ;;  %v6615_v29 = vshrl.u32 %v16265_v46, %v13306_v23 }
 0x26f   :  { %9342 = vmatpush3.bf16.msra.mxu0 %v13086_v43  ;;  %v13318_v5 = vsub.s32 %v6547_v39, %v6550_v56  ;;  %9167 = vmatprep.subr.bf16.mxu1 %v13088_v27  ;;  %v6755_v43 = vadd.s32 %v6754_v50, %v6750_v4  ;;  %v16287_v39 = vand.u32 2147483647, %v13152_v32  ;;  %v6803_v50 = vshrl.u32 %v6802_v6, 23  ;;  %v16288_v4 = vld [vmem:[#allocation132_spill] sm:$0xff]  ;;  %v16290_v32 = vld [vmem:[#allocation62_spill] sm:$0xff] }
 0x270   :  { %9343 = vmatprep.subr.bf16.mxu0 %v16196_v2  ;;  %v6573_v57 = vsub.s32 4, %v13291_v34  ;;  %v13343_v3 = vshrl.u32 %v6603_v47, 5  ;;  %v16291_v51 = vpack.c.bf16 %v16289_v38, %v16290_v32  ;;  %v6611_v9 = vshll.u32 %v16263_v44, %v6605_v31 }
 0x271   :  { %v13333_v56 = vand.u32 8388607, %v16287_v39  ;;  %v6553_v27 = vsub.s32 0, %v13318_v5  ;;  %v6756_v22 = vadd.s32 536870912, %v6755_v43  ;;  %v6608_v39 = vshll.u32 %v16262_v54, %v6605_v31 }
 0x272   :  { %9169 = vmatpush1.bf16.msra.mxu1 %v16288_v4  ;;  %v6614_v6 = vshll.u32 %v16264_v20, %v6605_v31  ;;  %v6618_v4 = vshrl.u32 %v16266_v61, %v13306_v23  ;;  %v6621_v38 = vshrl.u32 %v16267_v45, %v13306_v23  ;;  %v6613_v52 = vor.u32 %v6612_v16, %v6611_v9  ;;  %v16302_v9 = vld [vmem:[#allocation49_spill] sm:$0xff]  ;;  %v16303_v16 = vld [vmem:[#allocation99_spill] sm:$0xff] }
 0x273   :  { %9345 = vmatpush3.bf16.msra.mxu0 %v13137_v17  ;;  %9171 = vmatprep.subr.bf16.mxu1 %v16291_v51  ;;  %v7791_v25 = vmin.u32 %v6553_v27, %v13318_v5  ;;  %v13356_v47 = vshrl.u32 %v6756_v22, 30  ;;  %v6610_v8 = vor.u32 %v6609_v26, %v6608_v39  ;;  %v6617_v17 = vshll.u32 %v16265_v46, %v6605_v31  ;;  %v16292_v51 = vld [vmem:[#allocation25_spill] sm:$0xff]  ;;  %v16297_v26 = vld [vmem:[#allocation88_spill] sm:$0xff] }
 0x274   :  { %9346 = vmatprep.subr.bf16.mxu0 %v16196_v2  ;;  %v16293_v27 = vand.u32 2147483647, %v16286_v37  ;;  %v6616_v55 = vor.u32 %v6615_v29, %v6614_v6  ;;  %v6620_v22 = vshll.u32 %v16266_v61, %v6605_v31  ;;  %v16298_v39 = vpack.c.bf16 %v16296_v53, %v16297_v26 }
 0x275   :  { %4856 = vmatmul.mubr.f32.vlgmr.msra.gmra.mrb[6].mxu1 %v16292_v51  ;;  %v6555_v49 = vclz %v7791_v25  ;;  %v6543_v58 = vadd.s32 %v13224_v40, %v13221_v13  ;;  %v6758_v11 = vshll.u32 %v13356_v47, 30  ;;  %v7802_v45 = vadd.s32 4294967169, %v6803_v50 }
 0x276   :  { %vm13364_vm3 = vcmp.le.f32.partialorder %v16293_v27, 0.7853982  ;;  %9173 = vmatpush1.bf16.msra.mxu1 %v16298_v39  ;;  %8004 = vmatmul.mubr.f32.vlgmr.msra.gmra.mrb[6].mxu0 %v16292_v51  ;;  %v6619_v27 = vor.u32 %v6618_v4, %v6617_v17  ;;  %v16301_v25 = vpack.c.bf16 %v16299_v7, %v16300_v15  ;;  %v16304_v31 = vpack.c.bf16 %v16302_v9, %v16303_v16 }
 0x277   :  { %v7792_v29 = vadd.s32 4294967294, %v6555_v49  ;;  %v6622_v6 = vor.u32 %v6621_v38, %v6620_v22  ;;  %vm6623_vm4 = vcmp.lt.s32.totalorder %v13343_v3, 1  ;;  %vm6626_vm5 = vcmp.lt.s32.totalorder %v13343_v3, 4  ;;  %4990 = vmatprep.mubr.f32.mxu1 %v15118_v14  ;;  %8038 = vmatprep.mubr.msk.f32.mxu0 %vm9741_vm1, %v15118_v14 }
 0x278   :  { %9348 = vmatpush3.bf16.msra.mxu0 %v16301_v25  ;;  %9175 = vmatprep.subr.bf16.mxu1 %v16304_v31  ;;  %v13386_v13 = vsub.s32 %v6755_v43, %v6758_v11  ;;  %vm6624_vm6 = vcmp.lt.s32.totalorder %v13343_v3, 2  ;;  %vm6625_vm7 = vcmp.lt.s32.totalorder %v13343_v3, 3  ;;  %v6632_v40 = vsel %vm6626_vm5, %v6619_v27, 920167782  ;;  %v16305_v43 = vld [vmem:[#allocation52_spill] sm:$0xff] }
 0x279   :  { %9349 = vmatprep.subr.bf16.mxu0 %v16196_v2  ;;  %vm7793_vm8 = vcmp.lt.s32.totalorder %v7792_v29, 0  ;;  %v6574_v49 = vsel %vm6489_vm2, %v6573_v57, %v13291_v34  ;;  %v6631_v38 = vsel %vm6623_vm4, %v6610_v8, %v6613_v52  ;;  %v6633_v11 = vsel %vm6625_vm7, %v6616_v55, %v6632_v40  ;;  %v16308_v57 = vld [vmem:[#allocation51_spill] sm:$0xff] }
 0x27a   :  { %v16306_v50 = vpack.c.bf16 %v16247_v19, %v16305_v43  ;;  %v6558_v4 = vsel %vm7793_vm8, 0, %v7792_v29  ;;  %v6761_v17 = vsub.s32 0, %v13386_v13  ;;  %v6607_v22 = vshrl.u32 %v16262_v54, %v13306_v23 }
 0x27b   :  { %v6635_v39 = vsel %vm6623_vm4, %v6613_v52, %v6616_v55  ;;  %v16307_v34 = vpack.c.bf16 %v16251_v0, %v16250_v63  ;;  %v16309_v25 = vpack.c.bf16 %v16253_v30, %v16308_v57  ;;  %v6559_v31 = vsub.s32 32, %v6558_v4 }
 0x27c   :  { %9177 = vmatpush1.bf16.msra.mxu1 %v16306_v50  ;;  %v6563_v40 = vsub.s32 4294967266, %v6558_v4  ;;  %v6628_v29 = vsel %vm6626_vm5, %v6616_v55, 2102212464  ;;  %v6636_v50 = vsel %vm6626_vm5, %v6622_v6, 1326507024  ;;  %v6560_v23 = vshll.u32 %v13318_v5, %v6558_v4 }
 0x27d   :  { %9351 = vmatpush3.bf16.msra.mxu0 %v16307_v34  ;;  %9179 = vmatprep.subr.bf16.mxu1 %v16309_v25  ;;  %v7799_v51 = vmin.u32 %v6761_v17, %v13386_v13  ;;  %v6634_v34 = vsel %vm6624_vm6, %v6631_v38, %v6633_v11  ;;  %v6637_v25 = vsel %vm6625_vm7, %v6619_v27, %v6636_v50  ;;  %v6809_v0 = vadd.s32 1, %v7802_v45 }
 0x27e   :  { %9352 = vmatprep.subr.bf16.mxu0 %v16196_v2  ;;  %v6561_v30 = vshrl.u32 %v6543_v58, %v6559_v31  ;;  %v6564_v57 = vadd.s32 127, %v6563_v40  ;;  %v6638_v55 = vsel %vm6624_vm6, %v6635_v39, %v6637_v25  ;;  %v16310_v6 = vpack.c.bf16 %v16255_v1, %v16254_v36  ;;  %v16313_v40 = vld [vmem:[#allocation96_spill] sm:$0xff]  ;;  %v16315_v25 = vld [vmem:[#allocation30_spill] sm:$0xff] }
 0x27f   :  { %v6576_v5 = vsel %vm13364_vm3, 0, %v6574_v49  ;;  %v6763_v4 = vclz %v7799_v51  ;;  %v6627_v38 = vsel %vm6623_vm4, %v6607_v22, %v6610_v8  ;;  %v6629_v27 = vsel %vm6625_vm7, %v6613_v52, %v6628_v29 }
 0x280   :  { %9181 = vmatpush1.bf16.msra.mxu1 %v16310_v6  ;;  %v16311_v58 = vpack.c.bf16 %v16116_v41, %v16256_v59  ;;  %v16312_v45 = vpack.c.bf16 %v16125_v28, %v16124_v35  ;;  %v6562_v11 = vor.u32 %v6561_v30, %v6560_v23  ;;  %v6565_v17 = vshll.u32 %v6564_v57, 23 }
 0x281   :  { %v13444_v39 = vmul.u32.u64.low %v13329_v10, %v6638_v55  ;;  %v13445_v49 = vmul.u32.u64.high %v13329_v10, %v6638_v55, %v13444_v39  ;;  %v7800_v8 = vadd.s32 4294967294, %v6763_v4  ;;  %vm6810_vm9 = vcmp.gt.s32.totalorder %v6809_v0, 0  ;;  %v16316_v55 = vld [vmem:[#allocation101_spill] sm:$0xff]  ;;  %v16318_v4 = vld [vmem:[#allocation55_spill] sm:$0xff] }
 0x282   :  { %9354 = vmatpush3.bf16.msra.mxu0 %v16311_v58  ;;  %9183 = vmatprep.subr.bf16.mxu1 %v16312_v45  ;;  %v13449_v51 = vmul.u32.u64.low %v13329_v10, %v6634_v34  ;;  %v13450_v52 = vmul.u32.u64.high %v13329_v10, %v6634_v34, %v13449_v51  ;;  %v6566_v22 = vor.u32 4788187, %v6565_v17  ;;  %v6751_v31 = vadd.s32 %v13276_v42, %v13283_v21  ;;  %v16319_v58 = vld [vmem:[#allocation80_spill] sm:$0xff] }
 0x283   :  { %9355 = vmatprep.subr.bf16.mxu0 %v16196_v2  ;;  %v6811_v57 = vsel %vm6810_vm9, %v6809_v0, 0  ;;  %v16314_v29 = vpack.c.bf16 %v12465_v60, %v16313_v40  ;;  %v6580_v50 = vadd.s32 3, %v6576_v5  ;;  %vm7801_vm10 = vcmp.lt.s32.totalorder %v7800_v8, 0 }
 0x284   :  { %v6630_v23 = vsel %vm6624_vm6, %v6627_v38, %v6629_v27  ;;  %v6813_v34 = vand.u32 31, %v6811_v57  ;;  %v16317_v6 = vpack.c.bf16 %v16315_v25, %v16316_v55  ;;  %v16320_v42 = vpack.c.bf16 %v16318_v4, %v16319_v58  ;;  %v16324_v25 = vld [vmem:[#allocation65_spill] sm:$0xff]  ;;  %v16325_v55 = vld [vmem:[#allocation118_spill] sm:$0xff] }
 0x285   :  { %9185 = vmatpush1.bf16.msra.mxu1 %v16314_v29  ;;  %v6567_v21 = vand.u32 2147483647, %v6566_v22  ;;  %v6569_v0 = vcvt.s32.f32 %v6562_v11  ;;  %v6766_v45 = vsel %vm7801_vm10, 0, %v7800_v8  ;;  %vm6648_vm11 = vc.u32 %v13445_v49, %v13449_v51  ;;  %v16321_v22 = vld [vmem:[#allocation116_spill] sm:$0xff]  ;;  %v16322_v11 = vld [vmem:[#allocation114_spill] sm:$0xff] }
 0x286   :  { %9357 = vmatpush3.bf16.msra.mxu0 %v16317_v6  ;;  %9187 = vmatprep.subr.bf16.mxu1 %v16320_v42  ;;  %v6767_v5 = vsub.s32 32, %v6766_v45  ;;  %v6771_v3 = vsub.s32 4294967266, %v6766_v45  ;;  %v6781_v38 = vsub.s32 4, %v13356_v47  ;;  %v6649_v27 = vadd.s32 1, %v13450_v52 }
 0x287   :  { %9358 = vmatprep.subr.bf16.mxu0 %v16196_v2  ;;  %v6570_v17 = vmul.f32 %v6569_v0, %v6567_v21  ;;  %v6646_v39 = vmul.u32 %v13329_v10, %v6630_v23  ;;  %v13473_v29 = vshrl.u32 %v6811_v57, 5  ;;  %v6814_v6 = vsub.s32 32, %v6813_v34 }
 0x288   :  { %v16323_v8 = vpack.c.bf16 %v16321_v22, %v16322_v11  ;;  %v6768_v42 = vshll.u32 %v13386_v13, %v6766_v45  ;;  %v6769_v30 = vshrl.u32 %v6751_v31, %v6767_v5  ;;  %v6772_v4 = vadd.s32 127, %v6771_v3 }
 0x289   :  { %v6650_v58 = vsel %vm6648_vm11, %v6649_v27, %v13450_v52  ;;  %v16326_v60 = vpack.c.bf16 %v16324_v25, %v16325_v55  ;;  %v16327_v10 = vpack.c.bf16 %v16270_v48, %v16269_v18  ;;  %v6571_v57 = vxor.u32 2147483648, %v6570_v17 }
 0x28a   :  { %9189 = vmatpush1.bf16.msra.mxu1 %v16323_v8  ;;  %v6651_v23 = vadd.s32 %v6650_v58, %v6646_v39  ;;  %v6816_v21 = vshll.u32 %v16262_v54, %v6813_v34  ;;  %v6817_v0 = vshrl.u32 %v16263_v44, %v6814_v6  ;;  %v6770_v13 = vor.u32 %v6769_v30, %v6768_v42  ;;  %v16330_v42 = vld [vmem:[#allocation73_spill] sm:$0xff] }
 0x28b   :  { %9360 = vmatpush3.bf16.msra.mxu0 %v16326_v60  ;;  %9191 = vmatprep.subr.bf16.mxu1 %v16327_v10  ;;  %v6773_v31 = vshll.u32 %v6772_v4, 23  ;;  %v6819_v52 = vshll.u32 %v16263_v44, %v6813_v34  ;;  %v6820_v45 = vshrl.u32 %v16264_v20, %v6814_v6  ;;  %v6572_v60 = vsel %vm6489_vm2, %v6571_v57, %v6570_v17  ;;  %v16331_v10 = vld [vmem:[#allocation67_spill] sm:$0xff] }
 0x28c   :  { %9361 = vmatprep.subr.bf16.mxu0 %v16196_v2  ;;  %v6652_v5 = vadd.s32 536870912, %v6651_v23  ;;  %v6822_v3 = vshll.u32 %v16264_v20, %v6813_v34  ;;  %v6823_v58 = vshrl.u32 %v16265_v46, %v6814_v6  ;;  %v16328_v27 = vpack.c.bf16 %v16272_v12, %v16271_v33 }
 0x28d   :  { %v6575_v30 = vsel %vm13364_vm3, %v16286_v37, %v6572_v60  ;;  %v6774_v4 = vor.u32 4788187, %v6773_v31  ;;  %v13501_v39 = vor.u32 %v6817_v0, %v6816_v21  ;;  %v6825_v8 = vshll.u32 %v16265_v46, %v6813_v34 }
 0x28e   :  { %9193 = vmatpush1.bf16.msra.mxu1 %v16328_v27  ;;  %v16329_v17 = vpack.c.bf16 %v16274_v62, %v16273_v24  ;;  %v16332_v57 = vpack.c.bf16 %v16330_v42, %v16331_v10  ;;  %9611 = vcosq.f32 %v6575_v30  ;;  %v6777_v20 = vcvt.s32.f32 %v6770_v13  ;;  %v16335_v42 = vld [vmem:[#allocation23_spill] sm:$0xff]  ;;  %v16344_v24 = vld [vmem:[#allocation133_spill] sm:$0xff]  ;;  %v16358_v62 = vld [vmem:[#allocation94_spill] sm:$0xff] }
 0x28f   :  { %v13510_v27 = vshrl.u32 %v6652_v5, 30  ;;  %v6826_v32 = vshrl.u32 %v16266_v61, %v6814_v6  ;;  %9613 = vsinq.f32 %v6575_v30  ;;  %v6775_v21 = vand.u32 2147483647, %v6774_v4  ;;  %v16336_v13 = vld [vmem:[#allocation79_spill] sm:$0xff]  ;;  %v16342_v4 = vld [vmem:[#allocation109_spill] sm:$0xff] }
 0x290   :  { %9363 = vmatpush3.bf16.msra.mxu0 %v16329_v17  ;;  %9195 = vmatprep.subr.bf16.mxu1 %v16332_v57  ;;  %v6821_v0 = vor.u32 %v6820_v45, %v6819_v52  ;;  %v16333_v31 = vmov 1326507024   ;;  %v13515_v46 = vand.u32 3, %v6580_v50  ;;  %v16334_v17 = vld [vmem:[#allocation128_spill] sm:$0xff]  ;;  %v16337_v5 = vpack.c.bf16 %v16335_v42, %v16336_v13  ;;  %v16341_v30 = vld [vmem:[#allocation95_spill] sm:$0xff] }
 0x291   :  { %9364 = vmatprep.subr.bf16.mxu0 %v16196_v2  ;;  %v6829_v60 = vshrl.u32 %v16333_v31, %v6814_v6  ;;  %vm6697_vm12 = vcmp.lt.s32.totalorder %v16334_v17, 0  ;;  %v6654_v44 = vshll.u32 %v13510_v27, 30  ;;  %v6827_v57 = vor.u32 %v6826_v32, %v6825_v8  ;;  %v16345_v8 = vld [vmem:[#allocation98_spill] sm:$0xff] }
 0x292   :  { %9197 = vmatpush1.bf16.msra.mxu1 %v16337_v5  ;;  %v16338_v10 = vand.u32 2147483647, %v16334_v17  ;;  %v6778_v52 = vmul.f32 %v6777_v20, %v6775_v21  ;;  %v6824_v45 = vor.u32 %v6823_v58, %v6822_v3  ;;  %v6828_v50 = vshll.u32 %v16266_v61, %v6813_v34  ;;  %v16353_v61 = vld [vmem:[#allocation31_spill] sm:$0xff] }
 0x293   :  { %v16343_v31 = vpack.c.bf16 %v16341_v30, %v16342_v4  ;;  %v16346_v32 = vpack.c.bf16 %v16344_v24, %v16345_v8  ;;  %v6782_v5 = vsel %vm6697_vm12, %v6781_v38, %v13356_v47  ;;  %vm6831_vm0 = vcmp.lt.s32.totalorder %v13473_v29, 1 }
 0x294   :  { %vm13524_vm15 = vcmp.le.f32.partialorder %v16338_v10, 0.7853982  ;;  %v13538_v10 = vsub.s32 %v6651_v23, %v6654_v44  ;;  %v16347_v20 = vor.u32 8388608, %v13333_v56  ;;  %v6779_v34 = vxor.u32 2147483648, %v6778_v52  ;;  %v16348_v44 = vld [vmem:[#allocation103_spill] sm:$0xff]  ;;  %v16349_v23 = vld [vmem:[#allocation56_spill] sm:$0xff] }
 0x295   :  { %9366 = vmatpush3.bf16.msra.mxu0 %v16343_v31  ;;  %9199 = vmatprep.subr.bf16.mxu1 %v16346_v32  ;;  %v6830_v58 = vor.u32 %v6829_v60, %v6828_v50  ;;  %vm6834_vm2 = vcmp.lt.s32.totalorder %v13473_v29, 4  ;;  %v6839_v21 = vsel %vm6831_vm0, %v13501_v39, %v6821_v0  ;;  %vm6582_vm3 = vcmp.lt.s32.totalorder %v13515_v46, 2  ;;  %v16350_v31 = vld [vmem:[#allocation26_spill] sm:$0xff] }
 0x296   :  { %v13543_v3 = vshll.u32 %v16347_v20, 8  ;;  %9367 = vmatprep.subr.bf16.mxu0 %v16196_v2  ;;  %vm7633_vm4 = vcmp.eq.s32.totalorder %v16348_v44, 0  ;;  %v6657_v47 = vsub.s32 0, %v13538_v10  ;;  %v6815_v56 = vshrl.u32 %v16262_v54, %v6814_v6  ;;  %v16352_v20 = vld [vmem:[#allocation102_spill] sm:$0xff] }
 0x297   :  { %vm6833_vm5 = vcmp.lt.s32.totalorder %v13473_v29, 3  ;;  %v6840_v38 = vsel %vm6834_vm2, %v6827_v57, 920167782  ;;  %v16351_v60 = vpack.c.bf16 %v16349_v23, %v16350_v31  ;;  %v6780_v50 = vsel %vm6697_vm12, %v6779_v34, %v6778_v52 }
 0x298   :  { %vm6832_vm6 = vcmp.lt.s32.totalorder %v13473_v29, 2  ;;  %v6841_v32 = vsel %vm6833_vm5, %v6824_v45, %v6840_v38  ;;  %v6843_v6 = vsel %vm6831_vm0, %v6821_v0, %v6824_v45  ;;  %v16354_v54 = vpack.c.bf16 %v16352_v20, %v16353_v61  ;;  %v16355_v38 = vld [vmem:[#allocation14_spill] sm:$0xff] }
 0x299   :  { %9201 = vmatpush1.bf16.msra.mxu1 %v16351_v60  ;;  %v6783_v23 = vsel %vm13524_vm15, %v16334_v17, %v6780_v50  ;;  %v7795_v60 = vmin.u32 %v6657_v47, %v13538_v10  ;;  %v6836_v52 = vsel %vm6834_vm2, %v6824_v45, 2102212464  ;;  %v6842_v34 = vsel %vm6832_vm6, %v6839_v21, %v6841_v32  ;;  %v16356_v47 = vld [vmem:[#allocation32_spill] sm:$0xff]  ;;  %v9612_v50 = vpop.eup %9611  ;;  %v16357_v32 = vld [vmem:[#allocation22_spill] sm:$0xff] }
 0x29a   :  { %9369 = vmatpush3.bf16.msra.mxu0 %v16354_v54  ;;  %9203 = vmatprep.subr.bf16.mxu1 %v16355_v38  ;;  %9615 = vcosq.f32 %v6783_v23  ;;  %v6844_v54 = vsel %vm6834_vm2, %v6830_v58, 1326507024  ;;  %v13583_v20 = vmul.u32.u64.low %v13543_v3, %v6842_v34  ;;  %v13584_v61 = vmul.u32.u64.high %v13543_v3, %v6842_v34, %v13583_v20  ;;  %v9614_v58 = vpop.eup %9613 }
 0x29b   :  { %9370 = vmatprep.subr.bf16.mxu0 %v16196_v2  ;;  %vm6583_vm7 = vcmp.eq.s32.totalorder %v13515_v46, 0  ;;  %v6784_v45 = vsel %vm13524_vm15, 0, %v6782_v5  ;;  %9617 = vsinq.f32 %v6783_v23  ;;  %v6659_v21 = vclz %v7795_v60  ;;  %v16359_v5 = vld [vmem:[#allocation28_spill] sm:$0xff] }
 0x29c   :  { %4993 = vmatmul.mubr.f32.vlgmr.msra.gmra.mrb[6].mxu1 %v16356_v47  ;;  %v6587_v38 = vxor.u32 2147483648, %v9612_v50  ;;  %v6835_v34 = vsel %vm6831_vm0, %v6815_v56, %v13501_v39  ;;  %v6837_v31 = vsel %vm6833_vm5, %v6821_v0, %v6836_v52  ;;  %v6845_v24 = vsel %vm6833_vm5, %v6827_v57, %v6844_v54  ;;  %v16360_v54 = vld [vmem:[#allocation50_spill] sm:$0xff] }
 0x29d   :  { %9205 = vmatpush1.bf16.msra.mxu1 %v16357_v32  ;;  %8039 = vmatmul.mubr.f32.vlgmr.msra.gmra.mrb[6].mxu0 %v16356_v47  ;;  %v6584_v23 = vxor.u32 2147483648, %v9614_v58  ;;  %vm6586_vm8 = vcmp.eq.s32.totalorder %v13515_v46, 2  ;;  %v7796_v60 = vadd.s32 4294967294, %v6659_v21  ;;  %v6846_v47 = vsel %vm6832_vm6, %v6843_v6, %v6845_v24 }
 0x29e   :  { %9372 = vmatpush3.bf16.msra.mxu0 %v16358_v62  ;;  %9207 = vmatprep.subr.bf16.mxu1 %v16359_v5  ;;  %v6588_v39 = vsel %vm6586_vm8, %v6587_v38, %v9614_v58  ;;  %v6788_v0 = vadd.s32 3, %v6784_v45  ;;  %v13608_v56 = vmul.u32.u64.low %v13543_v3, %v6846_v47  ;;  %v13609_v57 = vmul.u32.u64.high %v13543_v3, %v6846_v47, %v13608_v56  ;;  %v16361_v38 = vld [vmem:[#allocation40_spill] sm:$0xff]  ;;  %v16362_v58 = vld [vmem:[#allocation41_spill] sm:$0xff] }
 0x29f   :  { %9373 = vmatprep.subr.bf16.mxu0 %v16196_v2  ;;  %5095 = vmatprep.mubr.f32.mxu1 %v15118_v14  ;;  %v6585_v52 = vsel %vm6583_vm7, %v9612_v50, %v6584_v23  ;;  %vm7797_vm9 = vcmp.lt.s32.totalorder %v7796_v60, 0  ;;  %v6838_v24 = vsel %vm6832_vm6, %v6835_v34, %v6837_v31  ;;  %v6857_v6 = vadd.s32 1, %v13584_v61  ;;  %v16363_v47 = vld [vmem:[#allocation53_spill] sm:$0xff]  ;;  %v16364_v23 = vld [vmem:[#allocation63_spill] sm:$0xff] }
 0x2a0   :  { %8073 = vmatprep.mubr.msk.f32.mxu0 %vm9741_vm1, %v15118_v14  ;;  %9619 = vsinq.f32 %v16361_v38  ;;  %vm6579_vm10 = vweird.f32 %v16286_v37  ;;  %v6589_v45 = vsel %vm6582_vm3, %v6585_v52, %v6588_v39  ;;  %v6662_v21 = vsel %vm7797_vm9, 0, %v7796_v60 }
 0x2a1   :  { %9209 = vmatpush1.bf16.msra.mxu1 %v16360_v54  ;;  %v6590_v50 = vsel %vm6579_vm10, nan, %v6589_v45  ;;  %v6647_v29 = vadd.s32 %v13449_v51, %v13445_v49  ;;  %v6663_v31 = vsub.s32 32, %v6662_v21  ;;  %v6667_v34 = vsub.s32 4294967266, %v6662_v21  ;;  %v16365_v51 = vld [vmem:[#allocation60_spill] sm:$0xff] }
 0x2a2   :  { %9375 = vmatpush3.bf16.msra.mxu0 %v16362_v58  ;;  %9211 = vmatprep.subr.bf16.mxu1 %v16363_v47  ;;  %v13631_v37 = vsel %vm7633_vm4, %v16364_v23, %v6590_v50  ;;  %v6789_v46 = vand.u32 3, %v6788_v0  ;;  %v6854_v60 = vmul.u32 %v13543_v3, %v6838_v24  ;;  %vm6856_vm11 = vc.u32 %v13609_v57, %v13583_v20  ;;  %v16366_v45 = vld [vmem:[#allocation112_spill] sm:$0xff]  ;;  %v16368_v50 = vld [vmem:[#allocation139_spill] sm:$0xff]  ;;  %v16369_v3 = vld [vmem:[#allocation18_spill] sm:$0xff] }
 0x2a3   :  { %9376 = vmatprep.subr.bf16.mxu0 %v16196_v2  ;;  %v6664_v39 = vshll.u32 %v13538_v10, %v6662_v21  ;;  %v6665_v56 = vshrl.u32 %v6647_v29, %v6663_v31  ;;  %v6668_v52 = vadd.s32 127, %v6667_v34  ;;  %v6858_v49 = vsel %vm6856_vm11, %v6857_v6, %v13584_v61  ;;  %v16370_v24 = vld [vmem:[#allocation83_spill] sm:$0xff] }
 0x2a4   :  { %v9616_v38 = vpop.eup %9615  ;;  %v16367_v44 = vsub.s32 4, %v16366_v45  ;;  %v6859_v23 = vadd.s32 %v6858_v49, %v6854_v60  ;;  %vm6794_vm12 = vcmp.eq.s32.totalorder %v6789_v46, 2  ;;  %vm6791_vm15 = vcmp.eq.s32.totalorder %v6789_v46, 0  ;;  %v16372_v60 = vld [vmem:[#allocation93_spill] sm:$0xff] }
 0x2a5   :  { %9213 = vmatpush1.bf16.msra.mxu1 %v16365_v51  ;;  %v9618_v47 = vpop.eup %9617  ;;  %v6795_v10 = vxor.u32 2147483648, %v9616_v38  ;;  %v6666_v21 = vor.u32 %v6665_v56, %v6664_v39  ;;  %v6669_v29 = vshll.u32 %v6668_v52, 23  ;;  %v16374_v39 = vld [vmem:[#allocation27_spill] sm:$0xff]  ;;  %v16375_v56 = vld [vmem:[#allocation45_spill] sm:$0xff]  ;;  %vm6787_vm2 = vweird.f32 %v16334_v17 }
 0x2a6   :  { %v6470_v0 = vsel %vm6385_vm13, %v16367_v44, %v16366_v45  ;;  %9378 = vmatpush3.bf16.msra.mxu0 %v16369_v3  ;;  %9215 = vmatprep.subr.bf16.mxu1 %v16370_v24  ;;  %v6792_v61 = vxor.u32 2147483648, %v9618_v47  ;;  %v6860_v6 = vadd.s32 536870912, %v6859_v23  ;;  %vm6790_vm13 = vcmp.lt.s32.totalorder %v6789_v46, 2  ;;  %v16373_v44 = vld [vmem:[#allocation44_spill] sm:$0xff]  ;;  %v16378_v17 = vld [vmem:[#allocation117_spill] sm:$0xff]  ;;  %v16393_v3 = vld [vmem:[#allocation75_spill] sm:$0xff] }
 0x2a7   :  { %9379 = vmatprep.subr.bf16.mxu0 %v16196_v2  ;;  %v6472_v34 = vsel %vm12393_vm14, 0, %v6470_v0  ;;  %v6796_v51 = vsel %vm6794_vm12, %v6795_v10, %v9618_v47  ;;  %v6670_v45 = vor.u32 4788187, %v6669_v29  ;;  %vm7635_vm0 = vcmp.eq.s32.totalorder %v16373_v44, 0  ;;  %v16376_v29 = vld [vmem:[#allocation69_spill] sm:$0xff] }
 0x2a8   :  { %v6793_v49 = vsel %vm6791_vm15, %v9616_v38, %v6792_v61  ;;  %v13651_v24 = vshrl.u32 %v6860_v6, 30  ;;  %v6673_v0 = vcvt.s32.f32 %v6666_v21  ;;  %v6476_v38 = vadd.s32 3, %v6472_v34 }
 0x2a9   :  { %9217 = vmatpush1.bf16.msra.mxu1 %v16372_v60  ;;  %v6797_v52 = vsel %vm6790_vm13, %v6793_v49, %v6796_v51  ;;  %v6671_v31 = vand.u32 2147483647, %v6670_v45  ;;  %v6677_v44 = vsub.s32 4, %v13510_v27  ;;  %v16379_v51 = vld [vmem:[#allocation122_spill] sm:$0xff]  ;;  %v16380_v45 = vld [vmem:[#allocation131_spill] sm:$0xff]  ;;  %v16394_v58 = vand.u32 4294901760, %v16393_v3 }
 0x2aa   :  { %9381 = vmatpush3.bf16.msra.mxu0 %v16374_v39  ;;  %9219 = vmatprep.subr.bf16.mxu1 %v16375_v56  ;;  %v9620_v47 = vpop.eup %9619  ;;  %v6798_v10 = vsel %vm6787_vm2, nan, %v6797_v52  ;;  %v6862_v46 = vshll.u32 %v13651_v24, 30  ;;  %v16377_v39 = vld [vmem:[#allocation115_spill] sm:$0xff]  ;;  %vm6593_vm14 = vcmp.lt.s32.totalorder %v16380_v45, 0  ;;  %v6477_v49 = vand.u32 3, %v6476_v38 }
 0x2ab   :  { %9382 = vmatprep.subr.bf16.mxu0 %v16196_v2  ;;  %v13659_v61 = vsel %vm7635_vm0, %v16376_v29, %v6798_v10  ;;  %v6674_v6 = vmul.f32 %v6673_v0, %v6671_v31  ;;  %v16381_v52 = vand.u32 2147483647, %v16380_v45  ;;  %v6678_v0 = vsel %vm6593_vm14, %v6677_v44, %v13510_v27  ;;  %v16384_v10 = vld [vmem:[#allocation123_spill] sm:$0xff]  ;;  %v16385_v29 = vld [vmem:[#allocation124_spill] sm:$0xff]  ;;  %v16388_v44 = vld [vmem:[#allocation17_spill] sm:$0xff] }
 0x2ac   :  { %v13663_v56 = vsub.s32 %v6859_v23, %v6862_v46  ;;  %v6480_v46 = vxor.u32 2147483648, %v9620_v47  ;;  %vm6479_vm4 = vcmp.eq.s32.totalorder %v6477_v49, 0  ;;  %vm6482_vm5 = vcmp.eq.s32.totalorder %v6477_v49, 2 }
 0x2ad   :  { %9221 = vmatpush1.bf16.msra.mxu1 %v16377_v39  ;;  %v6675_v21 = vxor.u32 2147483648, %v6674_v6  ;;  %vm13672_vm3 = vcmp.le.f32.partialorder %v16381_v52, 0.7853982  ;;  %v16386_v39 = vld [vmem:[#allocation68_spill] sm:$0xff]  ;;  %vm6478_vm6 = vcmp.lt.s32.totalorder %v6477_v49, 2  ;;  %vm6475_vm8 = vweird.f32 %v16368_v50 }
 0x2ae   :  { %9384 = vmatpush3.bf16.msra.mxu0 %v16378_v17  ;;  %9223 = vmatprep.subr.bf16.mxu1 %v16379_v51  ;;  %v6865_v34 = vsub.s32 0, %v13663_v56  ;;  %v6483_v51 = vxor.u32 2147483648, %v16385_v29  ;;  %v16387_v52 = vld [vmem:[#allocation136_spill] sm:$0xff]  ;;  %v6680_v27 = vsel %vm13672_vm3, 0, %v6678_v0  ;;  %v16407_v50 = vand.u32 4294901760, %v16247_v19 }
 0x2af   :  { %9385 = vmatprep.subr.bf16.mxu0 %v16196_v2  ;;  %v6676_v23 = vsel %vm6593_vm14, %v6675_v21, %v6674_v6  ;;  %v6481_v21 = vsel %vm6479_vm4, %v16385_v29, %v6480_v46  ;;  %v6684_v0 = vadd.s32 3, %v6680_v27  ;;  %v16397_v29 = vand.u32 4294901760, %v16296_v53  ;;  %v16403_v53 = vld [vmem:[#allocation110_spill] sm:$0xff] }
 0x2b0   :  { %v6679_v17 = vsel %vm13672_vm3, %v16380_v45, %v6676_v23  ;;  %v7803_v38 = vmin.u32 %v6865_v34, %v13663_v56  ;;  %v6484_v23 = vsel %vm6482_vm5, %v6483_v51, %v9620_v47  ;;  %v16395_v47 = vld [vmem:[#allocation126_spill] sm:$0xff]  ;;  %v16396_v51 = vand.u32 4294901760, %v16297_v26 }
 0x2b1   :  { %9225 = vmatpush1.bf16.msra.mxu1 %v16384_v10  ;;  %9621 = vcosq.f32 %v6679_v17  ;;  %v16389_v10 = vld [vmem:[#allocation72_spill] sm:$0xff]  ;;  %v16402_v26 = vand.u32 4294901760, %v16302_v9  ;;  %vm7632_vm9 = vcmp.eq.s32.totalorder %v16403_v53, 0  ;;  %v16406_v9 = vand.u32 4294901760, %v16305_v43  ;;  %v16415_v43 = vld [vmem:[#allocation134_spill] sm:$0xff] }
 0x2b2   :  { %9387 = vmatpush3.bf16.msra.mxu0 %v16386_v39  ;;  %9227 = vmatprep.subr.bf16.mxu1 %v16387_v52  ;;  %9623 = vsinq.f32 %v6679_v17  ;;  %v6867_v6 = vclz %v7803_v38  ;;  %v16390_v39 = vld [vmem:[#allocation125_spill] sm:$0xff]  ;;  %v16391_v52 = vld [vmem:[#allocation62_spill] sm:$0xff]  ;;  %v9742_v17 = vmov 1966171168   ;;  %vm6683_vm12 = vweird.f32 %v16380_v45 }
 0x2b3   :  { %9388 = vmatprep.subr.bf16.mxu0 %v16196_v2  ;;  %v16392_v60 = vand.u32 4294901760, %v16391_v52  ;;  %v7675_v38 = vunpack.c.l.s4 %v9742_v17  ;;  %v16398_v52 = vand.u32 4294901760, %v16300_v15  ;;  %v16400_v17 = vld [vmem:[#allocation19_spill] sm:$0xff]  ;;  %v6685_v15 = vand.u32 3, %v6684_v0  ;;  %v16428_v45 = vld [vmem:[#allocation101_spill] sm:$0xff] }
 0x2b4   :  { %v7804_v34 = vadd.s32 4294967294, %v6867_v6  ;;  %v9236_v6 = vpack.c.bf16 %v16397_v29, %v16396_v51  ;;  %v16404_v51 = vld [vmem:[#allocation33_spill] sm:$0xff]  ;;  %v9240_v0 = vpack.c.bf16 %v16407_v50, %v16406_v9  ;;  %v16417_v53 = vand.u32 4294901760, %v16254_v36 }
 0x2b5   :  { %9229 = vmatpush1.bf16.msra.mxu1 %v16388_v44  ;;  %v9234_v31 = vpack.c.bf16 %v16394_v58, %v16392_v60  ;;  %v6485_v44 = vsel %vm6478_vm6, %v6481_v21, %v6484_v23  ;;  %v16399_v58 = vand.u32 4294901760, %v16299_v7  ;;  %v6855_v60 = vadd.s32 %v13583_v20, %v13609_v57 }
 0x2b6   :  { %9390 = vmatpush3.bf16.msra.mxu0 %v16389_v10  ;;  %9231 = vmatprep.subr.bf16.mxu1 %v16390_v39  ;;  %vm7805_vm7 = vcmp.lt.s32.totalorder %v7804_v34, 0  ;;  %v16401_v21 = vand.u32 4294901760, %v16303_v16  ;;  %v6486_v7 = vsel %vm6475_vm8, nan, %v6485_v44  ;;  %v7676_v29 = vunpack.c.0.s8 %v7675_v38  ;;  %v16411_v38 = vld [vmem:[#allocation51_spill] sm:$0xff] }
 0x2b7   :  { %9391 = vmatprep.subr.bf16.mxu0 %v16196_v2  ;;  %v6870_v46 = vsel %vm7805_vm7, 0, %v7804_v34  ;;  %v9395_v3 = vpack.c.bf16 %v16399_v58, %v16398_v52  ;;  %v16405_v16 = vlaneseq  ;;  %v16408_v44 = vand.u32 4294901760, %v16250_v63  ;;  %v16409_v58 = vld [vmem:[#allocation48_spill] sm:$0xff]  ;;  %v16416_v63 = vld [vmem:[#allocation70_spill] sm:$0xff] }
 0x2b8   :  { %v6871_v49 = vsub.s32 32, %v6870_v46  ;;  %v6875_v27 = vsub.s32 4294967266, %v6870_v46  ;;  %v9238_v23 = vpack.c.bf16 %v16402_v26, %v16401_v21  ;;  %v6872_v20 = vshll.u32 %v13663_v56, %v6870_v46  ;;  %v16413_v26 = vld [vmem:[#allocation13_spill] sm:$0xff] }
 0x2b9   :  { %9233 = vmatpush1.bf16.msra.mxu1 %v16395_v47  ;;  %v7678_v52 = vshrl.u32 %v16405_v16, 7  ;;  %v16410_v56 = vand.u32 4294901760, %v16409_v58  ;;  %v7645_v19 = vsel %vm7632_vm9, %v16415_v43, %v6486_v7  ;;  %vm6690_vm10 = vcmp.eq.s32.totalorder %v6685_v15, 2 }
 0x2ba   :  { %9393 = vmatpush3.bf16.msra.mxu0 %v16400_v17  ;;  %9235 = vmatprep.subr.bf16.mxu1 %v9234_v31  ;;  %v6873_v57 = vshrl.u32 %v6855_v60, %v6871_v49  ;;  %v6876_v34 = vadd.s32 127, %v6875_v27  ;;  %vm7634_vm11 = vcmp.eq.s32.totalorder %v16416_v63, 0  ;;  %vm6687_vm15 = vcmp.eq.s32.totalorder %v6685_v15, 0  ;;  %v16434_v63 = vld [vmem:[#allocation55_spill] sm:$0xff] }
 0x2bb   :  { %9394 = vmatprep.subr.bf16.mxu0 %v16196_v2  ;;  %v9622_v31 = vpop.eup %9621  ;;  %v9398_v46 = vpack.c.bf16 %v16410_v56, %v16408_v44  ;;  %vm6686_vm13 = vcmp.lt.s32.totalorder %v6685_v15, 2  ;;  %v16418_v7 = vand.u32 4294901760, %v16255_v1  ;;  %v16420_v50 = vand.u32 4294901760, %v16116_v41  ;;  %v16424_v41 = vld [vmem:[#allocation129_spill] sm:$0xff] }
 0x2bc   :  { %5099 = vmatmul.mubr.f32.vlgmr.msra.gmra.mrb[6].mxu1 %v16404_v51  ;;  %v9624_v60 = vpop.eup %9623  ;;  %v6691_v49 = vxor.u32 2147483648, %v9622_v31  ;;  %v6874_v27 = vor.u32 %v6873_v57, %v6872_v20  ;;  %v6877_v21 = vshll.u32 %v6876_v34, 23  ;;  %v16419_v34 = vand.u32 4294901760, %v16256_v59 }
 0x2bd   :  { %9237 = vmatpush1.bf16.msra.mxu1 %v9236_v6  ;;  %8074 = vmatmul.mubr.f32.vlgmr.msra.gmra.mrb[6].mxu0 %v16404_v51  ;;  %v16412_v6 = vand.u32 4294901760, %v16411_v38  ;;  %v16414_v51 = vand.u32 4294901760, %v16413_v26  ;;  %v6688_v9 = vxor.u32 2147483648, %v9624_v60  ;;  %v9244_v57 = vpack.c.bf16 %v16418_v7, %v16417_v53  ;;  %v16430_v26 = vld [vmem:[#allocation30_spill] sm:$0xff] }
 0x2be   :  { %9396 = vmatpush3.bf16.msra.mxu0 %v9395_v3  ;;  %9239 = vmatprep.subr.bf16.mxu1 %v9238_v23  ;;  %v6692_v3 = vsel %vm6690_vm10, %v6691_v49, %v9624_v60  ;;  %v6878_v23 = vor.u32 4788187, %v6877_v21  ;;  %v9401_v44 = vpack.c.bf16 %v16420_v50, %v16419_v34  ;;  %v6881_v60 = vcvt.s32.f32 %v6874_v27  ;;  %v16426_v27 = vld [vmem:[#allocation97_spill] sm:$0xff] }
 0x2bf   :  { %v9242_v16 = vpack.c.bf16 %v16414_v51, %v16412_v6  ;;  %9397 = vmatprep.subr.bf16.mxu0 %v16196_v2  ;;  %5265 = vmatprep.mubr.f32.mxu1 %v15118_v14  ;;  %v6689_v20 = vsel %vm6687_vm15, %v9622_v31, %v6688_v9  ;;  %v16421_v49 = vand.u32 4294901760, %v16124_v35  ;;  %v16422_v15 = vand.u32 4294901760, %v16125_v28 }
 0x2c0   :  { %8108 = vmatprep.mubr.msk.f32.mxu0 %vm9741_vm1, %v15118_v14  ;;  %v6693_v58 = vsel %vm6686_vm13, %v6689_v20, %v6692_v3  ;;  %v6879_v56 = vand.u32 2147483647, %v6878_v23  ;;  %v13754_v21 = vsub.s32 %v7676_v29, %v7678_v52  ;;  %v16425_v28 = vand.u32 4294901760, %v16313_v40  ;;  %v16436_v20 = vld [vmem:[#allocation135_spill] sm:$0xff] }
 0x2c1   :  { %9241 = vmatpush1.bf16.msra.mxu1 %v9240_v0  ;;  %v9246_v31 = vpack.c.bf16 %v16422_v15, %v16421_v49  ;;  %v16423_v0 = vld [vmem:[#allocation113_spill] sm:$0xff]  ;;  %v6694_v1 = vsel %vm6683_vm12, nan, %v6693_v58  ;;  %v16427_v29 = vand.u32 4294901760, %v16426_v27  ;;  %v16429_v6 = vand.u32 4294901760, %v16428_v45 }
 0x2c2   :  { %9399 = vmatpush3.bf16.msra.mxu0 %v9398_v46  ;;  %9243 = vmatprep.subr.bf16.mxu1 %v9242_v16  ;;  %v7670_v36 = vcombine.low %v16423_v0, %v7645_v19  ;;  %v7647_v59 = vsel %vm7634_vm11, %v16424_v41, %v6694_v1  ;;  %v6882_v46 = vmul.f32 %v6881_v60, %v6879_v56  ;;  %v6885_v16 = vsub.s32 4, %v13651_v24  ;;  %v16432_v19 = vld [vmem:[#allocation80_spill] sm:$0xff] }
 0x2c3   :  { %9400 = vmatprep.subr.bf16.mxu0 %v16196_v2  ;;  %v7671_v35 = vcombine.low %v13631_v37, %v7647_v59  ;;  %v9248_v52 = vpack.c.bf16 %v16427_v29, %v16425_v28  ;;  %v16431_v51 = vand.u32 4294901760, %v16430_v26  ;;  %v16433_v9 = vand.u32 4294901760, %v16432_v19  ;;  %v16450_v59 = vld [vmem:[#allocation15_spill] sm:$0xff]  ;;  %v16454_v28 = vld [vmem:[#allocation73_spill] sm:$0xff] }
 0x2c4   :  { %v6883_v38 = vxor.u32 2147483648, %v6882_v46  ;;  %v16435_v3 = vand.u32 4294901760, %v16434_v63  ;;  %v13777_v37 = vrot.slane %v7670_v36, %v13754_v21  ;;  %vm6801_vm0 = vcmp.lt.s32.totalorder %v16436_v20, 0 }
 0x2c5   :  { %9245 = vmatpush1.bf16.msra.mxu1 %v9244_v57  ;;  %v9404_v43 = vpack.c.bf16 %v16431_v51, %v16429_v6  ;;  %v13780_v40 = vrot.slane %v7671_v35, %v13754_v21  ;;  %v16437_v53 = vand.u32 2147483647, %v16436_v20  ;;  %v6886_v34 = vsel %vm6801_vm0, %v6885_v16, %v13651_v24  ;;  %v16452_v16 = vld [vmem:[#allocation67_spill] sm:$0xff] }
 0x2c6   :  { %9402 = vmatpush3.bf16.msra.mxu0 %v9401_v44  ;;  %9247 = vmatprep.subr.bf16.mxu1 %v9246_v31  ;;  %v9250_v23 = vpack.c.bf16 %v16435_v3, %v16433_v9  ;;  %v6884_v57 = vsel %vm6801_vm0, %v6883_v38, %v6882_v46  ;;  %v16440_v58 = vand.u32 4294901760, %v16322_v11  ;;  %v16441_v56 = vand.u32 4294901760, %v16321_v22 }
 0x2c7   :  { %9403 = vmatprep.subr.bf16.mxu0 %v16196_v2  ;;  %vm13786_vm2 = vcmp.le.f32.partialorder %v16437_v53, 0.7853982  ;;  %v7702_v50 = vcombine.low %v13777_v37, %v13780_v40  ;;  %v16442_v49 = vand.u32 4294901760, %v16325_v55  ;;  %v16443_v24 = vand.u32 4294901760, %v16324_v25  ;;  %v16448_v25 = vld [vmem:[#allocation54_spill] sm:$0xff]  ;;  %v16465_v53 = vld [vmem:[#allocation56_spill] sm:$0xff] }
 0x2c8   :  { %v6887_v44 = vsel %vm13786_vm2, %v16436_v20, %v6884_v57  ;;  %v9252_v60 = vpack.c.bf16 %v16441_v56, %v16440_v58  ;;  %v16444_v31 = vand.u32 4294901760, %v16269_v18  ;;  %v16445_v0 = vand.u32 4294901760, %v16270_v48 }
 0x2c9   :  { %9249 = vmatpush1.bf16.msra.mxu1 %v9248_v52  ;;  %9625 = vcosq.f32 %v6887_v44  ;;  %v9407_v15 = vpack.c.bf16 %v16443_v24, %v16442_v49  ;;  %v6888_v1 = vsel %vm13786_vm2, 0, %v6886_v34  ;;  %v16446_v22 = vand.u32 4294901760, %v16271_v33  ;;  %v16469_v34 = vld [vmem:[#allocation102_spill] sm:$0xff] }
 0x2ca   :  { %9405 = vmatpush3.bf16.msra.mxu0 %v9404_v43  ;;  %9251 = vmatprep.subr.bf16.mxu1 %v9250_v23  ;;  %v9254_v36 = vpack.c.bf16 %v16445_v0, %v16444_v31  ;;  %9627 = vsinq.f32 %v6887_v44  ;;  %v16447_v11 = vand.u32 4294901760, %v16272_v12  ;;  %v6892_v41 = vadd.s32 3, %v6888_v1  ;;  %v16461_v43 = vld [vmem:[#allocation133_spill] sm:$0xff]  ;;  %v16471_v49 = vld [vmem:[#allocation74_spill] sm:$0xff] }
 0x2cb   :  { %9406 = vmatprep.subr.bf16.mxu0 %v16196_v2  ;;  %v16449_v18 = vand.u32 4294901760, %v16448_v25  ;;  %v16451_v48 = vand.u32 4294901760, %v16450_v59  ;;  %v16453_v35 = vand.u32 4294901760, %v16452_v16  ;;  %v16455_v27 = vand.u32 4294901760, %v16454_v28  ;;  %v16472_v31 = vld [vmem:[#allocation14_spill] sm:$0xff]  ;;  %v16481_v25 = vld [vmem:[#allocation93_spill] sm:$0xff] }
 0x2cc   :  { %v9256_v55 = vpack.c.bf16 %v16447_v11, %v16446_v22  ;;  %v16456_v33 = vand.u32 4294901760, %v16336_v13  ;;  %v16457_v12 = vand.u32 4294901760, %v16335_v42  ;;  %v6893_v38 = vand.u32 3, %v6892_v41  ;;  %v16463_v42 = vld [vmem:[#allocation26_spill] sm:$0xff]  ;;  %v16474_v22 = vld [vmem:[#allocation25_spill] sm:$0xff] }
 0x2cd   :  { %9253 = vmatpush1.bf16.msra.mxu1 %v9252_v60  ;;  %v9410_v46 = vpack.c.bf16 %v16451_v48, %v16449_v18  ;;  %v9258_v29 = vpack.c.bf16 %v16455_v27, %v16453_v35  ;;  %v16458_v45 = vand.u32 4294901760, %v16342_v4  ;;  %v16459_v6 = vand.u32 4294901760, %v16341_v30  ;;  %v16467_v30 = vld [vmem:[#allocation31_spill] sm:$0xff]  ;;  %v16473_v0 = vld [vmem:[#allocation130_spill] sm:$0xff]  ;;  %v16476_v11 = vld [vmem:[#allocation53_spill] sm:$0xff] }
 0x2ce   :  { %9408 = vmatpush3.bf16.msra.mxu0 %v9407_v15  ;;  %9255 = vmatprep.subr.bf16.mxu1 %v9254_v36  ;;  %v9260_v52 = vpack.c.bf16 %v16457_v12, %v16456_v33  ;;  %v16460_v51 = vand.u32 4294901760, %v16345_v8  ;;  %v16462_v19 = vand.u32 4294901760, %v16461_v43  ;;  %v16464_v23 = vand.u32 4294901760, %v16463_v42  ;;  %v16482_v18 = vld [vmem:[#allocation27_spill] sm:$0xff]  ;;  %v16483_v59 = vld [vmem:[#allocation45_spill] sm:$0xff]  ;;  %v16486_v33 = vld [vmem:[#allocation122_spill] sm:$0xff] }
 0x2cf   :  { %9409 = vmatprep.subr.bf16.mxu0 %v16196_v2  ;;  %v9413_v26 = vpack.c.bf16 %v16459_v6, %v16458_v45  ;;  %v16466_v7 = vand.u32 4294901760, %v16465_v53  ;;  %vm6898_vm14 = vcmp.eq.s32.totalorder %v6893_v38, 2  ;;  %v16468_v8 = vand.u32 4294901760, %v16467_v30  ;;  %v16484_v35 = vld [vmem:[#allocation115_spill] sm:$0xff]  ;;  %v16488_v45 = vld [vmem:[#allocation68_spill] sm:$0xff] }
 0x2d0   :  { %v9262_v9 = vpack.c.bf16 %v16462_v19, %v16460_v51  ;;  %v16470_v44 = vand.u32 4294901760, %v16469_v34  ;;  %vm6895_vm3 = vcmp.eq.s32.totalorder %v6893_v38, 0  ;;  %vm6894_vm4 = vcmp.lt.s32.totalorder %v6893_v38, 2  ;;  %v16487_v38 = vld [vmem:[#allocation123_spill] sm:$0xff]  ;;  %v16489_v6 = vld [vmem:[#allocation136_spill] sm:$0xff]  ;;  %v16490_v51 = vld [vmem:[#allocation17_spill] sm:$0xff] }
 0x2d1   :  { %9257 = vmatpush1.bf16.msra.mxu1 %v9256_v55  ;;  %v9264_v57 = vpack.c.bf16 %v16466_v7, %v16464_v23  ;;  %vm7636_vm5 = vcmp.eq.s32.totalorder %v16471_v49, 0  ;;  %vm6891_vm6 = vweird.f32 %v16436_v20  ;;  %v16475_v20 = vld [vmem:[#allocation41_spill] sm:$0xff] }
 0x2d2   :  { %9411 = vmatpush3.bf16.msra.mxu0 %v9410_v46  ;;  %9259 = vmatprep.subr.bf16.mxu1 %v9258_v29  ;;  %v9416_v58 = vpack.c.bf16 %v16470_v44, %v16468_v8  ;;  %v16480_v55 = vld [vmem:[#allocation89_spill] sm:$0xff] }
 0x2d3   :  { %9412 = vmatprep.subr.bf16.mxu0 %v16196_v2  ;;  %v9626_v63 = vpop.eup %9625  ;;  %v6025_v41 = vadd.s32 768, %v16480_v55  ;;  %v6026_v48 = vadd.s32 896, %v16480_v55  ;;  %v16485_v29 = vld [vmem:[#allocation117_spill] sm:$0xff] }
 0x2d4   :  { %v9628_v13 = vpop.eup %9627  ;;  %v6899_v3 = vxor.u32 2147483648, %v9626_v63 }
 0x2d5   :  { %9261 = vmatpush1.bf16.msra.mxu1 %v9260_v52  ;;  %v6896_v4 = vxor.u32 2147483648, %v9628_v13  ;;  %v13879_v46 = vmul.u32.u64.low 2643056798, %v6025_v41  ;;  %v13880_v16 = vmul.u32.u64.high 2643056798, %v6025_v41, %v13879_v46 }
 0x2d6   :  { %9414 = vmatpush3.bf16.msra.mxu0 %v9413_v26  ;;  %9263 = vmatprep.subr.bf16.mxu1 %v9262_v9  ;;  %v6900_v56 = vsel %vm6898_vm14, %v6899_v3, %v9628_v13  ;;  %v13888_v12 = vmul.u32.u64.low 2643056798, %v6026_v48  ;;  %v13889_v52 = vmul.u32.u64.high 2643056798, %v6026_v48, %v13888_v12  ;;  %v6028_v9 = vadd.s32 1152, %v16480_v55 }
 0x2d7   :  { %9415 = vmatprep.subr.bf16.mxu0 %v16196_v2  ;;  %v6897_v60 = vsel %vm6895_vm3, %v9626_v63, %v6896_v4  ;;  %v6104_v26 = vshrl.u32 %v13880_v16, 3 }
 0x2d8   :  { %v6901_v24 = vsel %vm6894_vm4, %v6897_v60, %v6900_v56  ;;  %v6115_v19 = vshrl.u32 %v13889_v52, 3  ;;  %v13906_v42 = vmul.u32.u64.low 2643056798, %v6028_v9  ;;  %v13907_v23 = vmul.u32.u64.high 2643056798, %v6028_v9, %v13906_v42 }
 0x2d9   :  { %9265 = vmatpush1.bf16.msra.mxu1 %v9264_v57  ;;  %v6902_v15 = vsel %vm6891_vm6, nan, %v6901_v24  ;;  %v6105_v63 = vmul.u32 13, %v6104_v26 }
 0x2da   :  { %9417 = vmatpush3.bf16.msra.mxu0 %v9416_v58  ;;  %9267 = vmatprep.subr.bf16.mxu1 %v16472_v31  ;;  %v13850_v36 = vsel %vm7636_vm5, %v16473_v0, %v6902_v15  ;;  %v6116_v3 = vmul.u32 13, %v6115_v19 }
 0x2db   :  { %9418 = vmatprep.subr.bf16.mxu0 %v16196_v2  ;;  %v7672_v1 = vcombine.low %v13659_v61, %v13850_v36 }
 0x2dc   :  { %5267 = vmatmul.mubr.f32.vlgmr.msra.gmra.mrb[6].mxu1 %v16474_v22  ;;  %v6117_v53 = vsub.s32 %v6026_v48, %v6116_v3 }
 0x2dd   :  { %9269 = vmatpush1.bf16.msra.mxu1 %v16357_v32  ;;  %8109 = vmatmul.mubr.f32.vlgmr.msra.gmra.mrb[6].mxu0 %v16474_v22  ;;  %v16477_v32 = vld [vmem:[#allocation60_spill] sm:$0xff] }
 0x2de   :  { %9420 = vmatpush3.bf16.msra.mxu0 %v16358_v62  ;;  %9271 = vmatprep.subr.bf16.mxu1 %v16359_v5  ;;  %v16478_v62 = vld [vmem:[#allocation18_spill] sm:$0xff]  ;;  %v16479_v5 = vld [vmem:[#allocation83_spill] sm:$0xff]  ;;  %vm6182_vm10 = vcmp.ne.s32.totalorder %v6117_v53, 0  ;;  %vm6195_vm11 = vcmp.lt.s32.totalorder %v6117_v53, 0  ;;  %v6221_v7 = vadd.s32 13, %v6117_v53 }
 0x2df   :  { %9421 = vmatprep.subr.bf16.mxu0 %v16196_v2  ;;  %5369 = vmatprep.mubr.f32.mxu1 %v15118_v14  ;;  %vm6208_vm13 = vmand %vm6195_vm11, %vm6182_vm10 }
 0x2e0   :  { %8143 = vmatprep.mubr.msk.f32.mxu0 %vm9741_vm1, %v15118_v14  ;;  %v13916_v8 = vsel %vm6208_vm13, %v6221_v7, %v6117_v53  ;;  %v16493_v53 = vmov 2131351028   ;;  %v16495_v7 = vmov 920167782  }
 0x2e1   :  { %9273 = vmatpush1.bf16.msra.mxu1 %v16360_v54  ;;  %v6027_v54 = vadd.s32 1024, %v16480_v55  ;;  %vm6247_vm14 = vcmp.gt.s32.totalorder %v13916_v8, 6 }
 0x2e2   :  { %9423 = vmatpush3.bf16.msra.mxu0 %v16475_v20  ;;  %9275 = vmatprep.subr.bf16.mxu1 %v16476_v11  ;;  %v6260_v56 = vsel %vm6247_vm14, 1.5707964, %v15118_v14 }
 0x2e3   :  { %9424 = vmatprep.subr.bf16.mxu0 %v16196_v2  ;;  %v13883_v28 = vmul.u32.u64.low 2643056798, %v6027_v54  ;;  %v13884_v27 = vmul.u32.u64.high 2643056798, %v6027_v54, %v13883_v28 }
 0x2e5   :  { %9277 = vmatpush1.bf16.msra.mxu1 %v16477_v32  ;;  %v6126_v43 = vshrl.u32 %v13884_v27, 3 }
 0x2e6   :  { %9426 = vmatpush3.bf16.msra.mxu0 %v16478_v62  ;;  %9279 = vmatprep.subr.bf16.mxu1 %v16479_v5 }
 0x2e7   :  { %9427 = vmatprep.subr.bf16.mxu0 %v16196_v2  ;;  %v6127_v13 = vmul.u32 13, %v6126_v43 }
 0x2e9   :  { %9281 = vmatpush1.bf16.msra.mxu1 %v16481_v25 }
 0x2ea   :  { %9429 = vmatpush3.bf16.msra.mxu0 %v16482_v18  ;;  %9283 = vmatprep.subr.bf16.mxu1 %v16483_v59 }
 0x2eb   :  { %9430 = vmatprep.subr.bf16.mxu0 %v16196_v2 }
 0x2ed   :  { %9285 = vmatpush1.bf16.msra.mxu1 %v16484_v35 }
 0x2ee   :  { %9432 = vmatpush3.bf16.msra.mxu0 %v16485_v29  ;;  %9287 = vmatprep.subr.bf16.mxu1 %v16486_v33 }
 0x2ef   :  { %9433 = vmatprep.subr.bf16.mxu0 %v16196_v2 }
 0x2f1   :  { %9289 = vmatpush1.bf16.msra.mxu1 %v16487_v38 }
 0x2f2   :  { %9435 = vmatpush3.bf16.msra.mxu0 %v16488_v45  ;;  %9291 = vmatprep.subr.bf16.mxu1 %v16489_v6 }
 0x2f3   :  { %9436 = vmatprep.subr.bf16.mxu0 %v16196_v2 }
 0x2f5   :  { %9293 = vmatpush1.bf16.msra.mxu1 %v16490_v51 }
 0x2f6   :  { %9438 = vmatpush3.bf16.msra.mxu0 %v16389_v10  ;;  %9295 = vmatprep.subr.bf16.mxu1 %v16390_v39  ;;  %v6106_v10 = vsub.s32 %v6025_v41, %v6105_v63  ;;  %v6128_v39 = vsub.s32 %v6027_v54, %v6127_v13  ;;  %v16491_v13 = vmov 683565275  }
 0x2f7   :  { %9439 = vmatprep.subr.bf16.mxu0 %v16196_v2  ;;  %v6137_v2 = vshrl.u32 %v13907_v23, 3 }
 0x2f8   :  { %vm6181_vm1 = vcmp.ne.s32.totalorder %v6106_v10, 0  ;;  %vm6194_vm7 = vcmp.lt.s32.totalorder %v6106_v10, 0  ;;  %vm6183_vm8 = vcmp.ne.s32.totalorder %v6128_v39, 0  ;;  %vm6196_vm9 = vcmp.lt.s32.totalorder %v6128_v39, 0 }
 0x2f9   :  { %9297 = vmatpush1.bf16.msra.mxu1 %v16395_v47  ;;  %vm6207_vm12 = vmand %vm6194_vm7, %vm6181_vm1  ;;  %v6220_v47 = vadd.s32 13, %v6106_v10  ;;  %v6138_v57 = vmul.u32 13, %v6137_v2 }
 0x2fa   :  { %9441 = vmatpush3.bf16.msra.mxu0 %v16400_v17  ;;  %vm6209_vm15 = vmand %vm6196_vm9, %vm6183_vm8  ;;  %v6222_v17 = vadd.s32 13, %v6128_v39 }
 0x2fb   :  { %v13912_v4 = vsel %vm6207_vm12, %v6220_v47, %v6106_v10  ;;  %v6139_v34 = vsub.s32 %v6028_v9, %v6138_v57  ;;  %v16492_v10 = vmov 2475754826   ;;  %v16494_v47 = vmov 2102212464  }
 0x2fc   :  { %5371 = vmatmul.mubr.f32.vlgmr.msra.gmra.mrb[6].mxu1 %v16474_v22  ;;  %v13914_v30 = vsel %vm6209_vm15, %v6222_v17, %v6128_v39  ;;  %vm6246_vm0 = vcmp.gt.s32.totalorder %v13912_v4, 6 }
 0x2fd   :  { %8144 = vmatmul.mubr.f32.vlgmr.msra.gmra.mrb[6].mxu0 %v16474_v22  ;;  %vm6248_vm2 = vcmp.gt.s32.totalorder %v13914_v30, 6  ;;  %v6259_v44 = vsel %vm6246_vm0, 1.5707964, %v15118_v14  ;;  %vm6184_vm3 = vcmp.ne.s32.totalorder %v6139_v34, 0  ;;  %vm6197_vm4 = vcmp.lt.s32.totalorder %v6139_v34, 0 }
 0x2fe   :  { %v6261_v58 = vsel %vm6248_vm2, 1.5707964, %v15118_v14  ;;  %v6223_v31 = vadd.s32 13, %v6139_v34  ;;  %vm6210_vm5 = vmand %vm6197_vm4, %vm6184_vm3 }
 0x300   :  { %v13945_v25 = vsel %vm6210_vm5, %v6223_v31, %v6139_v34 }
 0x301   :  { %vm6249_vm6 = vcmp.gt.s32.totalorder %v13945_v25, 6 }
 0x302   :  { %v13954_v26 = vsel %vm6249_vm6, 1.5707964, %v15118_v14 }
 0x304   :  { %v13924_v60 = vpop.f32.mrb[4].mxu1 }
 0x305   :  { %v13927_v49 = vadd.f32 %v6259_v44, %v13924_v60  ;;  %v13929_v24 = vpop.f32.mrb[4].mxu0  ;;  %v13931_v15 = vpop.f32.mrb[5].mxu1 }
 0x306   :  { %v13934_v0 = vadd.f32 %v6261_v58, %v13929_v24  ;;  %v13937_v22 = vadd.f32 %v6260_v56, %v13931_v15  ;;  %v13939_v20 = vpop.f32.mrb[5].mxu0 }
 0x307   :  { %v6903_v11 = vand.u32 2147483647, %v13927_v49  ;;  %v6906_v32 = vand.u32 2139095040, %v13927_v49  ;;  %vm6905_vm4 = vcmp.lt.s32.totalorder %v13927_v49, 0 }
 0x308   :  { %v7111_v62 = vand.u32 2147483647, %v13934_v0  ;;  %v7114_v5 = vand.u32 2139095040, %v13934_v0  ;;  %v7010_v48 = vand.u32 2139095040, %v13937_v22  ;;  %v7007_v19 = vand.u32 2147483647, %v13937_v22 }
 0x309   :  { %v6907_v41 = vshrl.u32 %v6906_v32, 23  ;;  %v6910_v54 = vand.u32 8388607, %v6903_v11  ;;  %v16496_v32 = vmov 1326507024  }
 0x30a   :  { %v7115_v18 = vshrl.u32 %v7114_v5, 23  ;;  %v7118_v59 = vand.u32 8388607, %v7111_v62  ;;  %v7011_v35 = vshrl.u32 %v7010_v48, 23  ;;  %vm14073_vm6 = vcmp.le.f32.partialorder %v6903_v11, 0.7853982 }
 0x30b   :  { %v7806_v46 = vadd.s32 4294967169, %v6907_v41  ;;  %v6911_v27 = vor.u32 8388608, %v6910_v54 }
 0x30c   :  { %v7814_v16 = vadd.s32 4294967169, %v7115_v18  ;;  %v7119_v29 = vor.u32 8388608, %v7118_v59  ;;  %v7810_v12 = vadd.s32 4294967169, %v7011_v35 }
 0x30d   :  { %v6913_v28 = vadd.s32 1, %v7806_v46  ;;  %v13956_v51 = vshll.u32 %v6911_v27, 8 }
 0x30e   :  { %v7121_v33 = vadd.s32 1, %v7814_v16  ;;  %v13958_v43 = vshll.u32 %v7119_v29, 8  ;;  %v13961_v9 = vadd.s32 1, %v7810_v12 }
 0x30f   :  { %vm6914_vm1 = vcmp.gt.s32.totalorder %v6913_v28, 0 }
 0x310   :  { %v6915_v52 = vsel %vm6914_vm1, %v6913_v28, 0  ;;  %vm7122_vm7 = vcmp.gt.s32.totalorder %v7121_v33, 0  ;;  %vm7018_vm12 = vcmp.gt.s32.totalorder %v13961_v9, 0 }
 0x311   :  { %v6916_v38 = vshrl.u32 %v6915_v52, 5  ;;  %v6917_v45 = vand.u32 31, %v6915_v52  ;;  %v7123_v6 = vsel %vm7122_vm7, %v7121_v33, 0 }
 0x312   :  { %v13964_v42 = vshrl.u32 %v7123_v6, 5  ;;  %v7125_v23 = vand.u32 31, %v7123_v6 }
 0x313   :  { %v6918_v63 = vsub.s32 32, %v6917_v45  ;;  %v6920_v3 = vshll.u32 %v16491_v13, %v6917_v45  ;;  %v6923_v39 = vshll.u32 %v16492_v10, %v6917_v45  ;;  %v6926_v2 = vshll.u32 %v16493_v53, %v6917_v45 }
 0x314   :  { %v6929_v17 = vshll.u32 %v16494_v47, %v6917_v45  ;;  %v6932_v57 = vshll.u32 %v16495_v7, %v6917_v45  ;;  %vm6935_vm8 = vcmp.lt.s32.totalorder %v6916_v38, 1  ;;  %vm6936_vm9 = vcmp.lt.s32.totalorder %v6916_v38, 2 }
 0x315   :  { %v6921_v34 = vshrl.u32 %v16492_v10, %v6918_v63  ;;  %v6924_v44 = vshrl.u32 %v16493_v53, %v6918_v63  ;;  %v6927_v58 = vshrl.u32 %v16494_v47, %v6918_v63  ;;  %v6919_v56 = vshrl.u32 %v16491_v13, %v6918_v63 }
 0x316   :  { %v6930_v31 = vshrl.u32 %v16495_v7, %v6918_v63  ;;  %v6933_v5 = vshrl.u32 %v16496_v32, %v6918_v63  ;;  %v7126_v59 = vsub.s32 32, %v7125_v23  ;;  %vm6937_vm10 = vcmp.lt.s32.totalorder %v6916_v38, 3 }
 0x317   :  { %v6922_v41 = vor.u32 %v6921_v34, %v6920_v3  ;;  %v6925_v54 = vor.u32 %v6924_v44, %v6923_v39  ;;  %v6928_v18 = vor.u32 %v6927_v58, %v6926_v2  ;;  %vm6938_vm11 = vcmp.lt.s32.totalorder %v6916_v38, 4 }
 0x318   :  { %v6931_v48 = vor.u32 %v6930_v31, %v6929_v17  ;;  %v6934_v46 = vor.u32 %v6933_v5, %v6932_v57  ;;  %v7128_v52 = vshll.u32 %v16491_v13, %v7125_v23  ;;  %v7129_v63 = vshrl.u32 %v16492_v10, %v7126_v59 }
 0x319   :  { %v6939_v16 = vsel %vm6935_vm8, %v6919_v56, %v6922_v41  ;;  %v6940_v35 = vsel %vm6938_vm11, %v6928_v18, 2102212464  ;;  %v6943_v28 = vsel %vm6935_vm8, %v6922_v41, %v6925_v54  ;;  %v6947_v27 = vsel %vm6935_vm8, %v6925_v54, %v6928_v18 }
 0x31a   :  { %v6941_v29 = vsel %vm6937_vm10, %v6925_v54, %v6940_v35  ;;  %v6944_v33 = vsel %vm6938_vm11, %v6931_v48, 920167782  ;;  %v6948_v12 = vsel %vm6938_vm11, %v6934_v46, 1326507024  ;;  %v7131_v3 = vshll.u32 %v16492_v10, %v7125_v23 }
 0x31b   :  { %v6945_v45 = vsel %vm6937_vm10, %v6928_v18, %v6944_v33  ;;  %v6949_v6 = vsel %vm6937_vm10, %v6931_v48, %v6948_v12  ;;  %v6942_v39 = vsel %vm6936_vm9, %v6939_v16, %v6941_v29  ;;  %v7132_v57 = vshrl.u32 %v16493_v53, %v7126_v59 }
 0x31c   :  { %v6946_v2 = vsel %vm6936_vm9, %v6943_v28, %v6945_v45  ;;  %v6950_v17 = vsel %vm6936_vm9, %v6947_v27, %v6949_v6  ;;  %v7130_v31 = vor.u32 %v7129_v63, %v7128_v52  ;;  %v7134_v41 = vshll.u32 %v16493_v53, %v7125_v23 }
 0x31d   :  { %v13988_v34 = vmul.u32.u64.low %v13956_v51, %v6950_v17  ;;  %v13989_v44 = vmul.u32.u64.high %v13956_v51, %v6950_v17, %v13988_v34  ;;  %v13992_v58 = vmul.u32.u64.low %v13956_v51, %v6946_v2  ;;  %v13993_v56 = vmul.u32.u64.high %v13956_v51, %v6946_v2, %v13992_v58 }
 0x31e   :  { %v7133_v5 = vor.u32 %v7132_v57, %v7131_v3  ;;  %v7135_v54 = vshrl.u32 %v16494_v47, %v7126_v59  ;;  %v7127_v38 = vshrl.u32 %v16491_v13, %v7126_v59  ;;  %v7137_v18 = vshll.u32 %v16494_v47, %v7125_v23 }
 0x31f   :  { %v7138_v48 = vshrl.u32 %v16495_v7, %v7126_v59  ;;  %v7141_v46 = vshrl.u32 %v16496_v32, %v7126_v59  ;;  %v6958_v16 = vmul.u32 %v13956_v51, %v6942_v39  ;;  %v7140_v28 = vshll.u32 %v16495_v7, %v7125_v23 }
 0x320   :  { %v7136_v35 = vor.u32 %v7135_v54, %v7134_v41  ;;  %vm7143_vm15 = vcmp.lt.s32.totalorder %v13964_v42, 1  ;;  %vm6960_vm13 = vc.u32 %v13989_v44, %v13992_v58  ;;  %v6961_v27 = vadd.s32 1, %v13993_v56 }
 0x321   :  { %v7139_v29 = vor.u32 %v7138_v48, %v7137_v18  ;;  %vm7144_vm0 = vcmp.lt.s32.totalorder %v13964_v42, 2  ;;  %v7142_v33 = vor.u32 %v7141_v46, %v7140_v28  ;;  %vm7145_vm2 = vcmp.lt.s32.totalorder %v13964_v42, 3 }
 0x322   :  { %vm7146_vm14 = vcmp.lt.s32.totalorder %v13964_v42, 4  ;;  %v7151_v59 = vsel %vm7143_vm15, %v7130_v31, %v7133_v5  ;;  %v6962_v51 = vsel %vm6960_vm13, %v6961_v27, %v13993_v56  ;;  %v7155_v52 = vsel %vm7143_vm15, %v7133_v5, %v7136_v35 }
 0x323   :  { %v7148_v12 = vsel %vm7146_vm14, %v7136_v35, 2102212464  ;;  %v7152_v23 = vsel %vm7146_vm14, %v7139_v29, 920167782  ;;  %v6963_v45 = vadd.s32 %v6962_v51, %v6958_v16  ;;  %v7147_v6 = vsel %vm7143_vm15, %v7127_v38, %v7130_v31 }
 0x324   :  { %v7153_v63 = vsel %vm7145_vm2, %v7136_v35, %v7152_v23  ;;  %v7156_v3 = vsel %vm7146_vm14, %v7142_v33, 1326507024  ;;  %v7149_v39 = vsel %vm7145_vm2, %v7133_v5, %v7148_v12  ;;  %v7019_v57 = vsel %vm7018_vm12, %v13961_v9, 0 }
 0x325   :  { %v7154_v2 = vsel %vm7144_vm0, %v7151_v59, %v7153_v63  ;;  %v7157_v17 = vsel %vm7145_vm2, %v7139_v29, %v7156_v3  ;;  %v6964_v34 = vadd.s32 536870912, %v6963_v45  ;;  %v14030_v38 = vadd.f32 %v13954_v26, %v13939_v20 }
 0x326   :  { %v7158_v56 = vsel %vm7144_vm0, %v7155_v52, %v7157_v17  ;;  %v14020_v41 = vmul.u32.u64.low %v13958_v43, %v7154_v2  ;;  %v14021_v54 = vmul.u32.u64.high %v13958_v43, %v7154_v2, %v14020_v41  ;;  %v7150_v9 = vsel %vm7144_vm0, %v7147_v6, %v7149_v39 }
 0x327   :  { %v14025_v31 = vmul.u32.u64.low %v13958_v43, %v7158_v56  ;;  %v14026_v5 = vmul.u32.u64.high %v13958_v43, %v7158_v56, %v14025_v31  ;;  %v14032_v18 = vshrl.u32 %v6964_v34, 30  ;;  %v7021_v48 = vand.u32 31, %v7019_v57 }
 0x328   :  { %v7169_v16 = vadd.s32 1, %v14021_v54  ;;  %v7014_v35 = vand.u32 8388607, %v7007_v19  ;;  %v7166_v27 = vmul.u32 %v13958_v43, %v7150_v9  ;;  %v7218_v26 = vand.u32 2139095040, %v14030_v38 }
 0x329   :  { %v6966_v46 = vshll.u32 %v14032_v18, 30  ;;  %v7022_v28 = vsub.s32 32, %v7021_v48  ;;  %vm7168_vm3 = vc.u32 %v14026_v5, %v14020_v41  ;;  %v7215_v51 = vand.u32 2147483647, %v14030_v38 }
 0x32a   :  { %v7170_v42 = vsel %vm7168_vm3, %v7169_v16, %v14021_v54  ;;  %v7015_v23 = vor.u32 8388608, %v7014_v35  ;;  %v14052_v63 = vshrl.u32 %v7019_v57, 5  ;;  %v7219_v3 = vshrl.u32 %v7218_v26, 23 }
 0x32b   :  { %v14044_v29 = vsub.s32 %v6963_v45, %v6966_v46  ;;  %v7171_v33 = vadd.s32 %v7170_v42, %v7166_v27  ;;  %v7025_v59 = vshrl.u32 %v16492_v10, %v7022_v28  ;;  %v7028_v52 = vshrl.u32 %v16493_v53, %v7022_v28 }
 0x32c   :  { %v7031_v43 = vshrl.u32 %v16494_v47, %v7022_v28  ;;  %v7024_v45 = vshll.u32 %v16491_v13, %v7021_v48  ;;  %v7027_v2 = vshll.u32 %v16492_v10, %v7021_v48  ;;  %v7030_v17 = vshll.u32 %v16493_v53, %v7021_v48 }
 0x32d   :  { %v6969_v12 = vsub.s32 0, %v14044_v29  ;;  %v7172_v6 = vadd.s32 536870912, %v7171_v33  ;;  %v7034_v34 = vshrl.u32 %v16495_v7, %v7022_v28  ;;  %v7033_v31 = vshll.u32 %v16494_v47, %v7021_v48 }
 0x32e   :  { %v7026_v54 = vor.u32 %v7025_v59, %v7024_v45  ;;  %v7037_v9 = vshrl.u32 %v16496_v32, %v7022_v28  ;;  %v7029_v46 = vor.u32 %v7028_v52, %v7027_v2  ;;  %v7032_v16 = vor.u32 %v7031_v43, %v7030_v17 }
 0x32f   :  { %v7807_v39 = vmin.u32 %v6969_v12, %v14044_v29  ;;  %v14059_v56 = vshrl.u32 %v7172_v6, 30  ;;  %v7036_v35 = vshll.u32 %v16495_v7, %v7021_v48  ;;  %v6959_v27 = vadd.s32 %v13992_v58, %v13989_v44 }
 0x330   :  { %v7035_v42 = vor.u32 %v7034_v34, %v7033_v31  ;;  %v14068_v12 = vshll.u32 %v7015_v23, 8  ;;  %vm7042_vm5 = vcmp.lt.s32.totalorder %v14052_v63, 4  ;;  %v7818_v45 = vadd.s32 4294967169, %v7219_v3 }
 0x331   :  { %v6971_v57 = vclz %v7807_v39  ;;  %v7174_v26 = vshll.u32 %v14059_v56, 30  ;;  %v7038_v6 = vor.u32 %v7037_v9, %v7036_v35  ;;  %vm7039_vm1 = vcmp.lt.s32.totalorder %v14052_v63, 1 }
 0x332   :  { %vm7041_vm7 = vcmp.lt.s32.totalorder %v14052_v63, 3  ;;  %v7048_v44 = vsel %vm7042_vm5, %v7035_v42, 920167782  ;;  %vm7040_vm9 = vcmp.lt.s32.totalorder %v14052_v63, 2  ;;  %v7047_v58 = vsel %vm7039_vm1, %v7026_v54, %v7029_v46 }
 0x333   :  { %v7808_v59 = vadd.s32 4294967294, %v6971_v57  ;;  %v14077_v48 = vsub.s32 %v7171_v33, %v7174_v26  ;;  %v7049_v11 = vsel %vm7041_vm7, %v7032_v16, %v7048_v44  ;;  %v6989_v33 = vsub.s32 4, %v14032_v18 }
 0x334   :  { %v7051_v3 = vsel %vm7039_vm1, %v7029_v46, %v7032_v16  ;;  %v7044_v17 = vsel %vm7042_vm5, %v7032_v16, 2102212464  ;;  %v7052_v34 = vsel %vm7042_vm5, %v7038_v6, 1326507024  ;;  %v7023_v9 = vshrl.u32 %v16491_v13, %v7022_v28 }
 0x335   :  { %vm7809_vm8 = vcmp.lt.s32.totalorder %v7808_v59, 0  ;;  %v7177_v43 = vsub.s32 0, %v14077_v48  ;;  %v7050_v57 = vsel %vm7040_vm9, %v7047_v58, %v7049_v11  ;;  %v7053_v35 = vsel %vm7041_vm7, %v7035_v42, %v7052_v34 }
 0x336   :  { %v6974_v23 = vsel %vm7809_vm8, 0, %v7808_v59  ;;  %v7054_v16 = vsel %vm7040_vm9, %v7051_v3, %v7053_v35  ;;  %v6990_v6 = vsel %vm6905_vm4, %v6989_v33, %v14032_v18  ;;  %v7043_v28 = vsel %vm7039_vm1, %v7023_v9, %v7026_v54 }
 0x337   :  { %v6975_v39 = vsub.s32 32, %v6974_v23  ;;  %v6979_v2 = vsub.s32 4294967266, %v6974_v23  ;;  %v7815_v31 = vmin.u32 %v7177_v43, %v14077_v48  ;;  %v6976_v26 = vshll.u32 %v14044_v29, %v6974_v23 }
 0x338   :  { %v7045_v58 = vsel %vm7041_vm7, %v7029_v46, %v7044_v17  ;;  %v7225_v18 = vadd.s32 1, %v7818_v45  ;;  %v6992_v54 = vsel %vm14073_vm6, 0, %v6990_v6  ;;  %vm7113_vm10 = vcmp.lt.s32.totalorder %v13934_v0, 0 }
 0x339   :  { %v6977_v59 = vshrl.u32 %v6959_v27, %v6975_v39  ;;  %v6980_v44 = vadd.s32 127, %v6979_v2  ;;  %v7179_v43 = vclz %v7815_v31  ;;  %v14126_v46 = vand.u32 8388607, %v7215_v51 }
 0x33a   :  { %v14113_v29 = vmul.u32.u64.low %v14068_v12, %v7054_v16  ;;  %v14114_v27 = vmul.u32.u64.high %v14068_v12, %v7054_v16, %v14113_v29  ;;  %v14117_v3 = vmul.u32.u64.low %v14068_v12, %v7050_v57  ;;  %v14118_v39 = vmul.u32.u64.high %v14068_v12, %v7050_v57, %v14117_v3 }
 0x33b   :  { %v6978_v11 = vor.u32 %v6977_v59, %v6976_v26  ;;  %v6981_v42 = vshll.u32 %v6980_v44, 23  ;;  %v7816_v23 = vadd.s32 4294967294, %v7179_v43  ;;  %v7197_v2 = vsub.s32 4, %v14059_v56 }
 0x33c   :  { %v7046_v17 = vsel %vm7040_vm9, %v7043_v28, %v7045_v58  ;;  %vm7226_vm12 = vcmp.gt.s32.totalorder %v7225_v18, 0  ;;  %vm7064_vm15 = vc.u32 %v14114_v27, %v14117_v3  ;;  %v7167_v9 = vadd.s32 %v14020_v41, %v14026_v5 }
 0x33d   :  { %v6982_v33 = vor.u32 4788187, %v6981_v42  ;;  %vm7817_vm11 = vcmp.lt.s32.totalorder %v7816_v23, 0  ;;  %v6985_v31 = vcvt.s32.f32 %v6978_v11  ;;  %v7065_v26 = vadd.s32 1, %v14118_v39 }
 0x33e   :  { %v7182_v45 = vsel %vm7817_vm11, 0, %v7816_v23  ;;  %v6996_v44 = vadd.s32 3, %v6992_v54  ;;  %v7062_v16 = vmul.u32 %v14068_v12, %v7046_v17  ;;  %v7227_v63 = vsel %vm7226_vm12, %v7225_v18, 0 }
 0x33f   :  { %v6983_v34 = vand.u32 2147483647, %v6982_v33  ;;  %v7183_v57 = vsub.s32 32, %v7182_v45  ;;  %v7187_v35 = vsub.s32 4294967266, %v7182_v45  ;;  %v7184_v6 = vshll.u32 %v14077_v48, %v7182_v45 }
 0x340   :  { %v7066_v58 = vsel %vm7064_vm15, %v7065_v26, %v14118_v39  ;;  %v7198_v41 = vsel %vm7113_vm10, %v7197_v2, %v14059_v56  ;;  %v7229_v42 = vand.u32 31, %v7227_v63  ;;  %vm14144_vm13 = vcmp.le.f32.partialorder %v7111_v62, 0.7853982 }
 0x341   :  { %v6986_v59 = vmul.f32 %v6985_v31, %v6983_v34  ;;  %v7185_v43 = vshrl.u32 %v7167_v9, %v7183_v57  ;;  %v7188_v28 = vadd.s32 127, %v7187_v35  ;;  %v7067_v5 = vadd.s32 %v7066_v58, %v7062_v16 }
 0x342   :  { %v14150_v18 = vand.u32 3, %v6996_v44  ;;  %v7230_v33 = vsub.s32 32, %v7229_v42  ;;  %v7200_v62 = vsel %vm14144_vm13, 0, %v7198_v41  ;;  %v7223_v2 = vor.u32 8388608, %v14126_v46 }
 0x343   :  { %v6987_v11 = vxor.u32 2147483648, %v6986_v59  ;;  %v7186_v12 = vor.u32 %v7185_v43, %v7184_v6  ;;  %v7189_v23 = vshll.u32 %v7188_v28, 23  ;;  %v7068_v39 = vadd.s32 536870912, %v7067_v5 }
 0x344   :  { %v14160_v34 = vshrl.u32 %v7227_v63, 5  ;;  %v7233_v31 = vshrl.u32 %v16492_v10, %v7230_v33  ;;  %v7236_v57 = vshrl.u32 %v16493_v53, %v7230_v33  ;;  %v7232_v35 = vshll.u32 %v16491_v13, %v7229_v42 }
 0x345   :  { %v6988_v48 = vsel %vm6905_vm4, %v6987_v11, %v6986_v59  ;;  %v7190_v54 = vor.u32 4788187, %v7189_v23  ;;  %v14158_v17 = vshrl.u32 %v7068_v39, 30  ;;  %v7193_v9 = vcvt.s32.f32 %v7186_v12 }
 0x346   :  { %v6991_v56 = vsel %vm14073_vm6, %v13927_v49, %v6988_v48  ;;  %v7238_v26 = vshll.u32 %v16493_v53, %v7229_v42  ;;  %v7239_v46 = vshrl.u32 %v16494_v47, %v7230_v33  ;;  %v7235_v44 = vshll.u32 %v16492_v10, %v7229_v42 }
 0x347   :  { %9629 = vcosq.f32 %v6991_v56  ;;  %v7191_v45 = vand.u32 2147483647, %v7190_v54  ;;  %v7070_v52 = vshll.u32 %v14158_v17, 30  ;;  %v7241_v16 = vshll.u32 %v16494_v47, %v7229_v42 }
 0x348   :  { %9631 = vsinq.f32 %v6991_v56  ;;  %v7242_v63 = vshrl.u32 %v16495_v7, %v7230_v33  ;;  %vm7002_vm0 = vcmp.eq.s32.totalorder %v14150_v18, 2  ;;  %v7234_v43 = vor.u32 %v7233_v31, %v7232_v35 }
 0x349   :  { %v7194_v59 = vmul.f32 %v7193_v9, %v7191_v45  ;;  %v14172_v6 = vsub.s32 %v7067_v5, %v7070_v52  ;;  %v7240_v28 = vor.u32 %v7239_v46, %v7238_v26  ;;  %vm6999_vm2 = vcmp.eq.s32.totalorder %v14150_v18, 0 }
 0x34a   :  { %v7237_v11 = vor.u32 %v7236_v57, %v7235_v44  ;;  %v7243_v41 = vor.u32 %v7242_v63, %v7241_v16  ;;  %v7245_v12 = vshrl.u32 %v16496_v32, %v7230_v33  ;;  %vm6998_vm14 = vcmp.lt.s32.totalorder %v14150_v18, 2 }
 0x34b   :  { %v7195_v58 = vxor.u32 2147483648, %v7194_v59  ;;  %vm7637_vm3 = vcmp.eq.s32.totalorder %v13912_v4, 0  ;;  %v7204_v23 = vadd.s32 3, %v7200_v62  ;;  %v7073_v48 = vsub.s32 0, %v14172_v6 }
 0x34c   :  { %v7244_v39 = vshll.u32 %v16495_v7, %v7229_v42  ;;  %v7263_v5 = vshll.u32 %v7223_v2, 8  ;;  %vm6995_vm4 = vweird.f32 %v13927_v49  ;;  %v7231_v54 = vshrl.u32 %v16491_v13, %v7230_v33 }
 0x34d   :  { %v7196_v56 = vsel %vm7113_vm10, %v7195_v58, %v7194_v59  ;;  %vm7247_vm5 = vcmp.lt.s32.totalorder %v14160_v34, 1  ;;  %vm7250_vm6 = vcmp.lt.s32.totalorder %v14160_v34, 4  ;;  %v7811_v31 = vmin.u32 %v7073_v48, %v14172_v6 }
 0x34e   :  { %v7199_v62 = vsel %vm14144_vm13, %v13934_v0, %v7196_v56  ;;  %v7246_v45 = vor.u32 %v7245_v12, %v7244_v39  ;;  %v7252_v42 = vsel %vm7250_vm6, %v7240_v28, 2102212464  ;;  %vm7248_vm1 = vcmp.lt.s32.totalorder %v14160_v34, 2 }
 0x34f   :  { %9633 = vcosq.f32 %v7199_v62  ;;  %v7255_v33 = vsel %vm7247_vm5, %v7234_v43, %v7237_v11  ;;  %v7256_v2 = vsel %vm7250_vm6, %v7243_v41, 920167782  ;;  %v7075_v57 = vclz %v7811_v31 }
 0x350   :  { %9635 = vsinq.f32 %v7199_v62  ;;  %vm7249_vm7 = vcmp.lt.s32.totalorder %v14160_v34, 3  ;;  %v7251_v29 = vsel %vm7247_vm5, %v7231_v54, %v7234_v43  ;;  %v7259_v59 = vsel %vm7247_vm5, %v7237_v11, %v7240_v28 }
 0x351   :  { %v9630_v9 = vpop.eup %9629  ;;  %v7253_v26 = vsel %vm7249_vm7, %v7237_v11, %v7252_v42  ;;  %v7257_v46 = vsel %vm7249_vm7, %v7240_v28, %v7256_v2  ;;  %v7812_v16 = vadd.s32 4294967294, %v7075_v57  ;;  %v7260_v58 = vsel %vm7250_vm6, %v7246_v45, 1326507024 }
 0x352   :  { %v9632_v52 = vpop.eup %9631  ;;  %v7003_v35 = vxor.u32 2147483648, %v9630_v9  ;;  %v7258_v63 = vsel %vm7248_vm1, %v7255_v33, %v7257_v46  ;;  %v7261_v48 = vsel %vm7249_vm7, %v7243_v41, %v7260_v58  ;;  %v7063_v28 = vadd.s32 %v14117_v3, %v14114_v27 }
 0x353   :  { %v7000_v44 = vxor.u32 2147483648, %v9632_v52  ;;  %v14208_v43 = vmul.u32.u64.low %v7263_v5, %v7258_v63  ;;  %v14209_v39 = vmul.u32.u64.high %v7263_v5, %v7258_v63, %v14208_v43  ;;  %vm7813_vm8 = vcmp.lt.s32.totalorder %v7812_v16, 0 }
 0x354   :  { %v7004_v12 = vsel %vm7002_vm0, %v7003_v35, %v9632_v52  ;;  %v7262_v11 = vsel %vm7248_vm1, %v7259_v59, %v7261_v48  ;;  %v7078_v62 = vsel %vm7813_vm8, 0, %v7812_v16  ;;  %v7254_v2 = vsel %vm7248_vm1, %v7251_v29, %v7253_v26 }
 0x355   :  { %v7001_v56 = vsel %vm6999_vm2, %v9630_v9, %v7000_v44  ;;  %v14220_v31 = vmul.u32.u64.low %v7263_v5, %v7262_v11  ;;  %v14221_v41 = vmul.u32.u64.high %v7263_v5, %v7262_v11, %v14220_v31  ;;  %v7079_v42 = vsub.s32 32, %v7078_v62 }
 0x356   :  { %v7005_v54 = vsel %vm6998_vm14, %v7001_v56, %v7004_v12  ;;  %v7083_v33 = vsub.s32 4294967266, %v7078_v62  ;;  %v7205_v3 = vand.u32 3, %v7204_v23  ;;  %v7273_v18 = vadd.s32 1, %v14209_v39 }
 0x357   :  { %v7006_v45 = vsel %vm6995_vm4, nan, %v7005_v54  ;;  %v7080_v9 = vshll.u32 %v14172_v6, %v7078_v62  ;;  %v7081_v57 = vshrl.u32 %v7063_v28, %v7079_v42  ;;  %v7270_v49 = vmul.u32 %v7263_v5, %v7254_v2 }
 0x358   :  { %v14230_v27 = vsel %vm7637_vm3, %v13924_v60, %v7006_v45  ;;  %v7084_v52 = vadd.s32 127, %v7083_v33  ;;  %vm7272_vm9 = vc.u32 %v14221_v41, %v14208_v43  ;;  %vm7210_vm10 = vcmp.eq.s32.totalorder %v7205_v3, 2 }
 0x359   :  { %v9634_v35 = vpop.eup %9633  ;;  %v7082_v29 = vor.u32 %v7081_v57, %v7080_v9  ;;  %v7274_v4 = vsel %vm7272_vm9, %v7273_v18, %v14209_v39  ;;  %vm7207_vm11 = vcmp.eq.s32.totalorder %v7205_v3, 0  ;;  %vm7206_vm12 = vcmp.lt.s32.totalorder %v7205_v3, 2 }
 0x35a   :  { %v9636_v46 = vpop.eup %9635  ;;  %v7211_v34 = vxor.u32 2147483648, %v9634_v35  ;;  %v7085_v26 = vshll.u32 %v7084_v52, 23  ;;  %v7275_v23 = vadd.s32 %v7274_v4, %v7270_v49  ;;  %vm7639_vm15 = vcmp.eq.s32.totalorder %v13914_v30, 0 }
 0x35b   :  { %v7208_v60 = vxor.u32 2147483648, %v9636_v46  ;;  %vm7203_vm13 = vweird.f32 %v13934_v0  ;;  %v7089_v58 = vcvt.s32.f32 %v7082_v29  ;;  %v7093_v28 = vsub.s32 4, %v14158_v17 }
 0x35c   :  { %v7212_v59 = vsel %vm7210_vm10, %v7211_v34, %v9636_v46  ;;  %v7086_v44 = vor.u32 4788187, %v7085_v26  ;;  %v7276_v5 = vadd.s32 536870912, %v7275_v23  ;;  %vm7009_vm0 = vcmp.lt.s32.totalorder %v13937_v22, 0 }
 0x35d   :  { %v7209_v6 = vsel %vm7207_vm11, %v9634_v35, %v7208_v60  ;;  %vm7008_vm2 = vcmp.le.f32.partialorder %v7007_v19, 0.7853982  ;;  %v7094_v0 = vsel %vm7009_vm0, %v7093_v28, %v14158_v17  ;;  %v7271_v57 = vadd.s32 %v14208_v43, %v14221_v41 }
 0x35e   :  { %v7213_v16 = vsel %vm7206_vm12, %v7209_v6, %v7212_v59  ;;  %v7087_v63 = vand.u32 2147483647, %v7086_v44  ;;  %v7277_v48 = vshrl.u32 %v7276_v5, 30  ;;  %vm7638_vm6 = vcmp.eq.s32.totalorder %v13916_v8, 0 }
 0x35f   :  { %v7214_v12 = vsel %vm7203_vm13, nan, %v7213_v16  ;;  %vm7099_vm1 = vweird.f32 %v13937_v22  ;;  %vm7217_vm7 = vcmp.lt.s32.totalorder %v14030_v38, 0  ;;  %vm7216_vm8 = vcmp.le.f32.partialorder %v7215_v51, 0.7853982 }
 0x360   :  { %v14240_v39 = vsel %vm7639_vm15, %v13929_v24, %v7214_v12  ;;  %v7090_v56 = vmul.f32 %v7089_v58, %v7087_v63  ;;  %v7278_v11 = vshll.u32 %v7277_v48, 30  ;;  %v7096_v24 = vsel %vm7008_vm2, 0, %v7094_v0 }
 0x361   :  { %v7100_v2 = vadd.s32 3, %v7096_v24  ;;  %v7301_v12 = vsub.s32 4, %v7277_v48  ;;  %vm7640_vm12 = vcmp.eq.s32.totalorder %v13945_v25, 0  ;;  %vm7307_vm15 = vweird.f32 %v14030_v38 }
 0x362   :  { %v7091_v54 = vxor.u32 2147483648, %v7090_v56  ;;  %v7279_v62 = vsub.s32 %v7275_v23, %v7278_v11 }
 0x363   :  { %v7101_v18 = vand.u32 3, %v7100_v2  ;;  %v7302_v11 = vsel %vm7217_vm7, %v7301_v12, %v7277_v48  ;;  %v6031_v2 = vadd.s32 1536, %v16480_v55 }
 0x364   :  { %v7092_v30 = vsel %vm7009_vm0, %v7091_v54, %v7090_v56  ;;  %v7281_v45 = vsub.s32 0, %v7279_v62  ;;  %v7694_v56 = vrot.slane %v7672_v1, %v13754_v21  ;;  %v7710_v54 = vrot.slane %v7702_v50, %v13754_v21 }
 0x365   :  { %v7095_v31 = vsel %vm7008_vm2, %v13937_v22, %v7092_v30  ;;  %vm7106_vm3 = vcmp.eq.s32.totalorder %v7101_v18, 2  ;;  %vm7103_vm4 = vcmp.eq.s32.totalorder %v7101_v18, 0  ;;  %vm7102_vm5 = vcmp.lt.s32.totalorder %v7101_v18, 2 }
 0x366   :  { %9637 = vcosq.f32 %v7095_v31  ;;  %v7819_v42 = vmin.u32 %v7281_v45, %v7279_v62  ;;  %v7304_v36 = vsel %vm7216_vm8, 0, %v7302_v11 }
 0x367   :  { %9639 = vsinq.f32 %v7095_v31 }
 0x368   :  { %v7283_v33 = vclz %v7819_v42 }
 0x36a   :  { %v7820_v3 = vadd.s32 4294967294, %v7283_v33  ;;  %v6029_v33 = vadd.s32 1280, %v16480_v55 }
 0x36c   :  { %vm7821_vm14 = vcmp.lt.s32.totalorder %v7820_v3, 0 }
 0x36d   :  { %v7286_v9 = vsel %vm7821_vm14, 0, %v7820_v3  ;;  %v6030_v3 = vadd.s32 1408, %v16480_v55 }
 0x36e   :  { %v7287_v19 = vsub.s32 32, %v7286_v9  ;;  %v7291_v52 = vsub.s32 4294967266, %v7286_v9  ;;  %v7288_v46 = vshll.u32 %v7279_v62, %v7286_v9  ;;  %v7308_v62 = vadd.s32 3, %v7304_v36 }
 0x36f   :  { %v14278_v18 = vmul.u32.u64.low 2643056798, %v6029_v33  ;;  %v14279_v9 = vmul.u32.u64.high 2643056798, %v6029_v33, %v14278_v18 }
 0x370   :  { %v9638_v35 = vpop.eup %9637  ;;  %v7289_v34 = vshrl.u32 %v7271_v57, %v7287_v19  ;;  %v7292_v29 = vadd.s32 127, %v7291_v52  ;;  %v7309_v30 = vand.u32 3, %v7308_v62 }
 0x371   :  { %v9640_v17 = vpop.eup %9639  ;;  %v7107_v49 = vxor.u32 2147483648, %v9638_v35  ;;  %v14281_v25 = vmul.u32.u64.low 2643056798, %v6031_v2  ;;  %v14282_v57 = vmul.u32.u64.high 2643056798, %v6031_v2, %v14281_v25 }
 0x372   :  { %v7104_v26 = vxor.u32 2147483648, %v9640_v17  ;;  %v7290_v60 = vor.u32 %v7289_v34, %v7288_v46  ;;  %v7293_v23 = vshll.u32 %v7292_v29, 23  ;;  %vm7314_vm9 = vcmp.eq.s32.totalorder %v7309_v30, 2 }
 0x373   :  { %v7108_v4 = vsel %vm7106_vm3, %v7107_v49, %v9640_v17  ;;  %vm7311_vm10 = vcmp.eq.s32.totalorder %v7309_v30, 0  ;;  %vm7310_vm11 = vcmp.lt.s32.totalorder %v7309_v30, 2  ;;  %v6170_v52 = vshrl.u32 %v14282_v57, 3 }
 0x374   :  { %v7105_v59 = vsel %vm7103_vm4, %v9638_v35, %v7104_v26  ;;  %v7294_v41 = vor.u32 4788187, %v7293_v23  ;;  %v7297_v16 = vcvt.s32.f32 %v7290_v60 }
 0x375   :  { %v7109_v43 = vsel %vm7102_vm5, %v7105_v59, %v7108_v4  ;;  %v6171_v49 = vmul.u32 13, %v6170_v52 }
 0x376   :  { %v7110_v44 = vsel %vm7099_vm1, nan, %v7109_v43  ;;  %v7295_v5 = vand.u32 2147483647, %v7294_v41 }
 0x377   :  { %v7651_v6 = vsel %vm7638_vm6, %v13931_v15, %v7110_v44  ;;  %v6172_v55 = vsub.s32 %v6031_v2, %v6171_v49 }
 0x378   :  { %v7673_v63 = vcombine.low %v14230_v27, %v7651_v6  ;;  %v7298_v58 = vmul.f32 %v7297_v16, %v7295_v5 }
 0x379   :  { %vm6187_vm2 = vcmp.ne.s32.totalorder %v6172_v55, 0  ;;  %vm6200_vm14 = vcmp.lt.s32.totalorder %v6172_v55, 0  ;;  %v6226_v4 = vadd.s32 13, %v6172_v55 }
 0x37a   :  { %v7701_v8 = vrot.slane %v7673_v63, %v13754_v21  ;;  %v7299_v28 = vxor.u32 2147483648, %v7298_v58  ;;  %vm6213_vm6 = vmand %vm6200_vm14, %vm6187_vm2 }
 0x37b   :  { %v14292_v59 = vsel %vm6213_vm6, %v6226_v4, %v6172_v55 }
 0x37c   :  { %v7703_v22 = vcombine.low %v7694_v56, %v7701_v8  ;;  %v7300_v15 = vsel %vm7217_vm7, %v7299_v28, %v7298_v58 }
 0x37d   :  { %v7303_v27 = vsel %vm7216_vm8, %v14030_v38, %v7300_v15  ;;  %v14284_v38 = vmul.u32.u64.low 2643056798, %v6030_v3  ;;  %v14285_v19 = vmul.u32.u64.high 2643056798, %v6030_v3, %v14284_v38  ;;  %vm6252_vm8 = vcmp.gt.s32.totalorder %v14292_v59, 6 }
 0x37e   :  { %v7717_v61 = vrot.slane %v7703_v22, %v13754_v21  ;;  %9641 = vcosq.f32 %v7303_v27  ;;  %v6265_v44 = vsel %vm6252_vm8, 1.5707964, %v15118_v14 }
 0x37f   :  { %9643 = vsinq.f32 %v7303_v27  ;;  %v6159_v35 = vshrl.u32 %v14285_v19, 3 }
 0x380   :  { %v7718_v1 = vcombine.low %v7710_v54, %v7717_v61 }
 0x381   :  { %v6160_v46 = vmul.u32 13, %v6159_v35 }
 0x382   :  { %7760 = vst [vmem:[#allocation7] sm:$0xff] %v7718_v1 }
 0x383   :  { %v6161_v29 = vsub.s32 %v6030_v3, %v6160_v46 }
 0x385   :  { %vm6186_vm3 = vcmp.ne.s32.totalorder %v6161_v29, 0  ;;  %vm6199_vm4 = vcmp.lt.s32.totalorder %v6161_v29, 0  ;;  %v6225_v60 = vadd.s32 13, %v6161_v29 }
 0x386   :  { %vm6212_vm1 = vmand %vm6199_vm4, %vm6186_vm3 }
 0x387   :  { %v14294_v43 = vsel %vm6212_vm1, %v6225_v60, %v6161_v29 }
 0x388   :  { %v9642_v0 = vpop.eup %9641 }
 0x389   :  { %v9644_v51 = vpop.eup %9643  ;;  %v7315_v31 = vxor.u32 2147483648, %v9642_v0 }
 0x38a   :  { %v7312_v48 = vxor.u32 2147483648, %v9644_v51 }
 0x38b   :  { %v7316_v45 = vsel %vm7314_vm9, %v7315_v31, %v9644_v51  ;;  %vm6251_vm9 = vcmp.gt.s32.totalorder %v14294_v43, 6 }
 0x38c   :  { %v7313_v24 = vsel %vm7311_vm10, %v9642_v0, %v7312_v48  ;;  %v6264_v6 = vsel %vm6251_vm9, 1.5707964, %v15118_v14 }
 0x38d   :  { %v7317_v37 = vsel %vm7310_vm11, %v7313_v24, %v7316_v45 }
 0x38e   :  { %v7318_v40 = vsel %vm7307_vm15, nan, %v7317_v37 }
 0x38f   :  { %v14271_v50 = vsel %vm7640_vm12, %v13939_v20, %v7318_v40  ;;  %v6148_v20 = vshrl.u32 %v14279_v9, 3 }
 0x390   :  { %v7719_v42 = vcombine.low %v14240_v39, %v14271_v50 }
 0x391   :  { %v6149_v17 = vmul.u32 13, %v6148_v20 }
 0x393   :  { %v6150_v34 = vsub.s32 %v6029_v33, %v6149_v17 }
 0x395   :  { %vm6185_vm13 = vcmp.ne.s32.totalorder %v6150_v34, 0  ;;  %vm6198_vm0 = vcmp.lt.s32.totalorder %v6150_v34, 0  ;;  %v6224_v26 = vadd.s32 13, %v6150_v34 }
 0x396   :  { %vm6211_vm5 = vmand %vm6198_vm0, %vm6185_vm13 }
 0x397   :  { %v14290_v23 = vsel %vm6211_vm5, %v6224_v26, %v6150_v34 }
 0x398   :  { %vm6250_vm7 = vcmp.gt.s32.totalorder %v14290_v23, 6 }
 0x399   :  { %v6263_v41 = vsel %vm6250_vm7, 1.5707964, %v15118_v14 }
 0x3cf   :  { %v14302_v5 = vpop.f32.mrb[6].mxu1 }
 0x3d0   :  { %v14305_v16 = vadd.f32 %v6263_v41, %v14302_v5  ;;  %v14307_v63 = vpop.f32.mrb[6].mxu0  ;;  %v14309_v58 = vpop.f32.mrb[7].mxu1 }
 0x3d1   :  { %v14312_v12 = vadd.f32 %v6265_v44, %v14307_v63  ;;  %v14315_v56 = vadd.f32 %v6264_v6, %v14309_v58  ;;  %v8145_v8 = vpop.f32.mrb[7].mxu0 }
 0x3d2   :  { %v7319_v28 = vand.u32 2147483647, %v14305_v16  ;;  %v7322_v14 = vand.u32 2139095040, %v14305_v16 }
 0x3d3   :  { %v7527_v22 = vand.u32 2147483647, %v14312_v12  ;;  %v7530_v15 = vand.u32 2139095040, %v14312_v12  ;;  %v7426_v36 = vand.u32 2139095040, %v14315_v56 }
 0x3d4   :  { %v7323_v11 = vshrl.u32 %v7322_v14, 23  ;;  %v7326_v27 = vand.u32 8388607, %v7319_v28 }
 0x3d5   :  { %v7531_v54 = vshrl.u32 %v7530_v15, 23  ;;  %v7534_v61 = vand.u32 8388607, %v7527_v22  ;;  %v7427_v30 = vshrl.u32 %v7426_v36, 23 }
 0x3d6   :  { %v7822_v1 = vadd.s32 4294967169, %v7323_v11  ;;  %v7327_v51 = vor.u32 8388608, %v7326_v27 }
 0x3d7   :  { %v7830_v62 = vadd.s32 4294967169, %v7531_v54  ;;  %v7535_v31 = vor.u32 8388608, %v7534_v61  ;;  %v7826_v45 = vadd.s32 4294967169, %v7427_v30 }
 0x3d8   :  { %v7329_v0 = vadd.s32 1, %v7822_v1  ;;  %v14326_v2 = vshll.u32 %v7327_v51, 8 }
 0x3d9   :  { %v7537_v48 = vadd.s32 1, %v7830_v62  ;;  %v14328_v3 = vshll.u32 %v7535_v31, 8  ;;  %v14330_v18 = vadd.s32 1, %v7826_v45 }
 0x3da   :  { %vm7330_vm10 = vcmp.gt.s32.totalorder %v7329_v0, 0 }
 0x3db   :  { %v7331_v24 = vsel %vm7330_vm10, %v7329_v0, 0  ;;  %vm7538_vm11 = vcmp.gt.s32.totalorder %v7537_v48, 0  ;;  %vm7434_vm2 = vcmp.gt.s32.totalorder %v14330_v18, 0 }
 0x3dc   :  { %v7332_v37 = vshrl.u32 %v7331_v24, 5  ;;  %v7333_v40 = vand.u32 31, %v7331_v24  ;;  %v7539_v33 = vsel %vm7538_vm11, %v7537_v48, 0 }
 0x3dd   :  { %v14333_v57 = vshrl.u32 %v7539_v33, 5  ;;  %v7541_v38 = vand.u32 31, %v7539_v33 }
 0x3de   :  { %v7334_v9 = vsub.s32 32, %v7333_v40  ;;  %v7336_v25 = vshll.u32 %v16491_v13, %v7333_v40  ;;  %v7339_v19 = vshll.u32 %v16492_v10, %v7333_v40  ;;  %v7342_v20 = vshll.u32 %v16493_v53, %v7333_v40 }
 0x3df   :  { %v7345_v52 = vshll.u32 %v16494_v47, %v7333_v40  ;;  %v7348_v35 = vshll.u32 %v16495_v7, %v7333_v40  ;;  %vm7351_vm12 = vcmp.lt.s32.totalorder %v7332_v37, 1  ;;  %vm7352_vm15 = vcmp.lt.s32.totalorder %v7332_v37, 2 }
 0x3e0   :  { %v7337_v17 = vshrl.u32 %v16492_v10, %v7334_v9  ;;  %v7340_v49 = vshrl.u32 %v16493_v53, %v7334_v9  ;;  %v7343_v46 = vshrl.u32 %v16494_v47, %v7334_v9  ;;  %v7335_v34 = vshrl.u32 %v16491_v13, %v7334_v9 }
 0x3e1   :  { %v7346_v55 = vshrl.u32 %v16495_v7, %v7334_v9  ;;  %v7349_v29 = vshrl.u32 %v16496_v32, %v7334_v9  ;;  %v7542_v41 = vsub.s32 32, %v7541_v38  ;;  %vm7353_vm13 = vcmp.lt.s32.totalorder %v7332_v37, 3 }
 0x3e2   :  { %v7338_v26 = vor.u32 %v7337_v17, %v7336_v25  ;;  %v7341_v4 = vor.u32 %v7340_v49, %v7339_v19  ;;  %v7344_v60 = vor.u32 %v7343_v46, %v7342_v20  ;;  %vm7354_vm0 = vcmp.lt.s32.totalorder %v7332_v37, 4 }
 0x3e3   :  { %v7347_v44 = vor.u32 %v7346_v55, %v7345_v52  ;;  %v7350_v6 = vor.u32 %v7349_v29, %v7348_v35  ;;  %v7544_v36 = vshll.u32 %v16491_v13, %v7541_v38  ;;  %v7545_v30 = vshrl.u32 %v16492_v10, %v7542_v41 }
 0x3e4   :  { %v7355_v8 = vsel %vm7351_vm12, %v7335_v34, %v7338_v26  ;;  %v7356_v14 = vsel %vm7354_vm0, %v7344_v60, 2102212464  ;;  %v7359_v15 = vsel %vm7351_vm12, %v7338_v26, %v7341_v4  ;;  %v7363_v11 = vsel %vm7351_vm12, %v7341_v4, %v7344_v60 }
 0x3e5   :  { %v7357_v27 = vsel %vm7353_vm13, %v7341_v4, %v7356_v14  ;;  %v7360_v54 = vsel %vm7354_vm0, %v7347_v44, 920167782  ;;  %v7364_v61 = vsel %vm7354_vm0, %v7350_v6, 1326507024  ;;  %v7547_v0 = vshll.u32 %v16492_v10, %v7541_v38 }
 0x3e6   :  { %v7361_v1 = vsel %vm7353_vm13, %v7344_v60, %v7360_v54  ;;  %v7365_v62 = vsel %vm7353_vm13, %v7347_v44, %v7364_v61  ;;  %v7358_v51 = vsel %vm7352_vm15, %v7355_v8, %v7357_v27  ;;  %v7548_v45 = vshrl.u32 %v16493_v53, %v7542_v41 }
 0x3e7   :  { %v7362_v31 = vsel %vm7352_vm15, %v7359_v15, %v7361_v1  ;;  %v7366_v48 = vsel %vm7352_vm15, %v7363_v11, %v7365_v62  ;;  %v7546_v25 = vor.u32 %v7545_v30, %v7544_v36  ;;  %v7550_v20 = vshll.u32 %v16493_v53, %v7541_v38 }
 0x3e8   :  { %v14357_v24 = vmul.u32.u64.low %v14326_v2, %v7366_v48  ;;  %v14358_v40 = vmul.u32.u64.high %v14326_v2, %v7366_v48, %v14357_v24  ;;  %v14361_v33 = vmul.u32.u64.low %v14326_v2, %v7362_v31  ;;  %v14362_v9 = vmul.u32.u64.high %v14326_v2, %v7362_v31, %v14361_v33 }
 0x3e9   :  { %v7549_v19 = vor.u32 %v7548_v45, %v7547_v0  ;;  %v7551_v52 = vshrl.u32 %v16494_v47, %v7542_v41  ;;  %v7543_v37 = vshrl.u32 %v16491_v13, %v7542_v41  ;;  %v7553_v35 = vshll.u32 %v16494_v47, %v7541_v38 }
 0x3ea   :  { %v7554_v17 = vshrl.u32 %v16495_v7, %v7542_v41  ;;  %v7557_v49 = vshrl.u32 %v16496_v32, %v7542_v41  ;;  %v7374_v46 = vmul.u32 %v14326_v2, %v7358_v51  ;;  %v7556_v55 = vshll.u32 %v16495_v7, %v7541_v38 }
 0x3eb   :  { %v7552_v34 = vor.u32 %v7551_v52, %v7550_v20  ;;  %vm7559_vm14 = vcmp.lt.s32.totalorder %v14333_v57, 1  ;;  %vm7376_vm3 = vc.u32 %v14358_v40, %v14361_v33  ;;  %v7377_v29 = vadd.s32 1, %v14362_v9 }
 0x3ec   :  { %v7555_v26 = vor.u32 %v7554_v17, %v7553_v35  ;;  %vm7560_vm4 = vcmp.lt.s32.totalorder %v14333_v57, 2  ;;  %v7558_v4 = vor.u32 %v7557_v49, %v7556_v55  ;;  %vm7561_vm5 = vcmp.lt.s32.totalorder %v14333_v57, 3 }
 0x3ed   :  { %vm7562_vm6 = vcmp.lt.s32.totalorder %v14333_v57, 4  ;;  %v7567_v60 = vsel %vm7559_vm14, %v7546_v25, %v7549_v19  ;;  %v7378_v2 = vsel %vm7376_vm3, %v7377_v29, %v14362_v9  ;;  %v7571_v44 = vsel %vm7559_vm14, %v7549_v19, %v7552_v34 }
 0x3ee   :  { %v7564_v41 = vsel %vm7562_vm6, %v7552_v34, 2102212464  ;;  %v7568_v38 = vsel %vm7562_vm6, %v7555_v26, 920167782  ;;  %v7379_v6 = vadd.s32 %v7378_v2, %v7374_v46  ;;  %v7563_v8 = vsel %vm7559_vm14, %v7543_v37, %v7546_v25 }
 0x3ef   :  { %v7569_v14 = vsel %vm7561_vm5, %v7552_v34, %v7568_v38  ;;  %v7572_v15 = vsel %vm7562_vm6, %v7558_v4, 1326507024  ;;  %v7565_v11 = vsel %vm7561_vm5, %v7549_v19, %v7564_v41  ;;  %v7435_v61 = vsel %vm7434_vm2, %v14330_v18, 0 }
 0x3f0   :  { %v7570_v27 = vsel %vm7560_vm4, %v7567_v60, %v7569_v14  ;;  %v7573_v54 = vsel %vm7561_vm5, %v7555_v26, %v7572_v15  ;;  %v7380_v36 = vadd.s32 536870912, %v7379_v6  ;;  %v7423_v31 = vand.u32 2147483647, %v14315_v56 }
 0x3f1   :  { %v7574_v1 = vsel %vm7560_vm4, %v7571_v44, %v7573_v54  ;;  %v14389_v62 = vmul.u32.u64.low %v14328_v3, %v7570_v27  ;;  %v14390_v30 = vmul.u32.u64.high %v14328_v3, %v7570_v27, %v14389_v62  ;;  %v7566_v18 = vsel %vm7560_vm4, %v7563_v8, %v7565_v11 }
 0x3f2   :  { %v14394_v0 = vmul.u32.u64.low %v14328_v3, %v7574_v1  ;;  %v14395_v51 = vmul.u32.u64.high %v14328_v3, %v7574_v1, %v14394_v0  ;;  %v14398_v48 = vshrl.u32 %v7380_v36, 30  ;;  %v7437_v45 = vand.u32 31, %v7435_v61 }
 0x3f3   :  { %v7585_v9 = vadd.s32 1, %v14390_v30  ;;  %v7582_v19 = vmul.u32 %v14328_v3, %v7566_v18  ;;  %v7430_v20 = vand.u32 8388607, %v7423_v31  ;;  %v7436_v3 = vshrl.u32 %v7435_v61, 5 }
 0x3f4   :  { %v7382_v24 = vshll.u32 %v14398_v48, 30  ;;  %v7438_v25 = vsub.s32 32, %v7437_v45  ;;  %vm7584_vm1 = vc.u32 %v14395_v51, %v14389_v62  ;;  %v7440_v29 = vshll.u32 %v16491_v13, %v7437_v45 }
 0x3f5   :  { %v7586_v37 = vsel %vm7584_vm1, %v7585_v9, %v14390_v30  ;;  %v7431_v55 = vor.u32 8388608, %v7430_v20  ;;  %v7443_v4 = vshll.u32 %v16492_v10, %v7437_v45  ;;  %v7446_v60 = vshll.u32 %v16493_v53, %v7437_v45 }
 0x3f6   :  { %v7383_v52 = vsub.s32 %v7379_v6, %v7382_v24  ;;  %v7587_v35 = vadd.s32 %v7586_v37, %v7582_v19  ;;  %v7441_v57 = vshrl.u32 %v16492_v10, %v7438_v25  ;;  %v7444_v49 = vshrl.u32 %v16493_v53, %v7438_v25 }
 0x3f7   :  { %v7447_v46 = vshrl.u32 %v16494_v47, %v7438_v25  ;;  %v7450_v2 = vshrl.u32 %v16495_v7, %v7438_v25  ;;  %v7449_v44 = vshll.u32 %v16494_v47, %v7437_v45  ;;  %v7453_v6 = vshrl.u32 %v16496_v32, %v7438_v25 }
 0x3f8   :  { %v7385_v17 = vsub.s32 0, %v7383_v52  ;;  %v7588_v34 = vadd.s32 536870912, %v7587_v35  ;;  %v7442_v38 = vor.u32 %v7441_v57, %v7440_v29  ;;  %v7445_v14 = vor.u32 %v7444_v49, %v7443_v4 }
 0x3f9   :  { %v7448_v15 = vor.u32 %v7447_v46, %v7446_v60  ;;  %v7452_v11 = vshll.u32 %v16495_v7, %v7437_v45  ;;  %v7451_v54 = vor.u32 %v7450_v2, %v7449_v44  ;;  %vm7458_vm7 = vcmp.lt.s32.totalorder %v7436_v3, 4 }
 0x3fa   :  { %v7823_v26 = vmin.u32 %v7385_v17, %v7383_v52  ;;  %v14417_v41 = vshrl.u32 %v7588_v34, 30  ;;  %v7471_v53 = vshll.u32 %v7431_v55, 8  ;;  %vm7455_vm8 = vcmp.lt.s32.totalorder %v7436_v3, 1 }
 0x3fb   :  { %v7454_v61 = vor.u32 %v7453_v6, %v7452_v11  ;;  %vm7457_vm9 = vcmp.lt.s32.totalorder %v7436_v3, 3  ;;  %v7464_v1 = vsel %vm7458_vm7, %v7451_v54, 920167782  ;;  %v7375_v47 = vadd.s32 %v14361_v33, %v14358_v40 }
 0x3fc   :  { %v7387_v8 = vclz %v7823_v26  ;;  %v7590_v27 = vshll.u32 %v14417_v41, 30  ;;  %v7463_v32 = vsel %vm7455_vm8, %v7442_v38, %v7445_v14  ;;  %v7465_v7 = vsel %vm7457_vm9, %v7448_v15, %v7464_v1 }
 0x3fd   :  { %vm7456_vm11 = vcmp.lt.s32.totalorder %v7436_v3, 2  ;;  %v7467_v18 = vsel %vm7455_vm8, %v7445_v14, %v7448_v15  ;;  %v7460_v9 = vsel %vm7458_vm7, %v7448_v15, 2102212464  ;;  %v7468_v19 = vsel %vm7458_vm7, %v7454_v61, 1326507024 }
 0x3fe   :  { %v7824_v10 = vadd.s32 4294967294, %v7387_v8  ;;  %v7591_v36 = vsub.s32 %v7587_v35, %v7590_v27  ;;  %v7439_v37 = vshrl.u32 %v16491_v13, %v7438_v25  ;;  %v7466_v40 = vsel %vm7456_vm11, %v7463_v32, %v7465_v7 }
 0x3ff   :  { %v7469_v33 = vsel %vm7457_vm9, %v7451_v54, %v7468_v19  ;;  %v7461_v55 = vsel %vm7457_vm9, %v7445_v14, %v7460_v9  ;;  %v14440_v25 = vmul.u32.u64.low %v7471_v53, %v7466_v40  ;;  %v14441_v2 = vmul.u32.u64.high %v7471_v53, %v7466_v40, %v14440_v25 }
 0x400   :  { %vm7825_vm10 = vcmp.lt.s32.totalorder %v7824_v10, 0  ;;  %v7593_v0 = vsub.s32 0, %v7591_v36  ;;  %v7470_v49 = vsel %vm7456_vm11, %v7467_v18, %v7469_v33  ;;  %v7459_v34 = vsel %vm7455_vm8, %v7439_v37, %v7442_v38 }
 0x401   :  { %v7390_v30 = vsel %vm7825_vm10, 0, %v7824_v10  ;;  %v14437_v4 = vmul.u32.u64.low %v7471_v53, %v7470_v49  ;;  %v14438_v60 = vmul.u32.u64.high %v7471_v53, %v7470_v49, %v14437_v4  ;;  %v7462_v44 = vsel %vm7456_vm11, %v7459_v34, %v7461_v55 }
 0x402   :  { %v7391_v45 = vsub.s32 32, %v7390_v30  ;;  %v7395_v24 = vsub.s32 4294967266, %v7390_v30  ;;  %v7831_v20 = vmin.u32 %v7593_v0, %v7591_v36  ;;  %v7392_v35 = vshll.u32 %v7383_v52, %v7390_v30 }
 0x403   :  { %vm7480_vm15 = vc.u32 %v14438_v60, %v14440_v25  ;;  %v7583_v38 = vadd.s32 %v14389_v62, %v14395_v51  ;;  %v7481_v27 = vadd.s32 1, %v14441_v2  ;;  %v7405_v10 = vsub.s32 4, %v14398_v48 }
 0x404   :  { %v7393_v57 = vshrl.u32 %v7375_v47, %v7391_v45  ;;  %v7396_v17 = vadd.s32 127, %v7395_v24  ;;  %v7595_v46 = vclz %v7831_v20  ;;  %v7478_v61 = vmul.u32 %v7471_v53, %v7462_v44 }
 0x405   :  { %v7482_v32 = vsel %vm7480_vm15, %v7481_v27, %v14441_v2  ;;  %vm7321_vm13 = vcmp.lt.s32.totalorder %v14305_v16, 0  ;;  %vm7320_vm0 = vcmp.le.f32.partialorder %v7319_v28, 0.7853982  ;;  %v7613_v33 = vsub.s32 4, %v14417_v41 }
 0x406   :  { %v7394_v29 = vor.u32 %v7393_v57, %v7392_v35  ;;  %v7397_v26 = vshll.u32 %v7396_v17, 23  ;;  %v7832_v13 = vadd.s32 4294967294, %v7595_v46  ;;  %v7483_v30 = vadd.s32 %v7482_v32, %v7478_v61 }
 0x407   :  { %v7406_v51 = vsel %vm7321_vm13, %v7405_v10, %v14398_v48  ;;  %vm7529_vm2 = vcmp.lt.s32.totalorder %v14312_v12, 0  ;;  %vm14464_vm14 = vcmp.le.f32.partialorder %v7527_v22, 0.7853982  ;;  %vm7641_vm6 = vcmp.eq.s32.totalorder %v14290_v23, 0 }
 0x408   :  { %v7398_v52 = vor.u32 4788187, %v7397_v26  ;;  %vm7833_vm12 = vcmp.lt.s32.totalorder %v7832_v13, 0  ;;  %v7401_v8 = vcvt.s32.f32 %v7394_v29  ;;  %v7484_v45 = vadd.s32 536870912, %v7483_v30 }
 0x409   :  { %v7598_v15 = vsel %vm7833_vm12, 0, %v7832_v13  ;;  %v7408_v9 = vsel %vm7320_vm0, 0, %v7406_v51  ;;  %v7614_v46 = vsel %vm7529_vm2, %v7613_v33, %v14417_v41  ;;  %vm7411_vm7 = vweird.f32 %v14305_v16 }
 0x40a   :  { %v7399_v6 = vand.u32 2147483647, %v7398_v52  ;;  %v7599_v14 = vsub.s32 32, %v7598_v15  ;;  %v7603_v11 = vsub.s32 4294967266, %v7598_v15  ;;  %v7600_v1 = vshll.u32 %v7591_v36, %v7598_v15 }
 0x40b   :  { %v14457_v24 = vshrl.u32 %v7484_v45, 30  ;;  %v7412_v28 = vadd.s32 3, %v7408_v9  ;;  %v7616_v4 = vsel %vm14464_vm14, 0, %v7614_v46  ;;  %vm7643_vm11 = vcmp.eq.s32.totalorder %v14292_v59, 0 }
 0x40c   :  { %v7402_v54 = vmul.f32 %v7401_v8, %v7399_v6  ;;  %v7601_v3 = vshrl.u32 %v7583_v38, %v7599_v14  ;;  %v7604_v47 = vadd.s32 127, %v7603_v11  ;;  %v7620_v6 = vadd.s32 3, %v7616_v4 }
 0x40d   :  { %v7486_v37 = vshll.u32 %v14457_v24, 30  ;;  %v7413_v34 = vand.u32 3, %v7412_v28  ;;  %v7479_v11 = vadd.s32 %v14440_v25, %v14438_v60  ;;  %vm7619_vm12 = vweird.f32 %v14312_v12 }
 0x40e   :  { %v7403_v7 = vxor.u32 2147483648, %v7402_v54  ;;  %v7602_v0 = vor.u32 %v7601_v3, %v7600_v1  ;;  %v7605_v18 = vshll.u32 %v7604_v47, 23  ;;  %v7621_v61 = vand.u32 3, %v7620_v6 }
 0x40f   :  { %v7487_v35 = vsub.s32 %v7483_v30, %v7486_v37  ;;  %vm7418_vm3 = vcmp.eq.s32.totalorder %v7413_v34, 2  ;;  %vm7415_vm4 = vcmp.eq.s32.totalorder %v7413_v34, 0  ;;  %vm7414_vm5 = vcmp.lt.s32.totalorder %v7413_v34, 2 }
 0x410   :  { %v7404_v62 = vsel %vm7321_vm13, %v7403_v7, %v7402_v54  ;;  %v7606_v36 = vor.u32 4788187, %v7605_v18  ;;  %v7609_v20 = vcvt.s32.f32 %v7602_v0  ;;  %vm7626_vm8 = vcmp.eq.s32.totalorder %v7621_v61, 2 }
 0x411   :  { %v7407_v53 = vsel %vm7320_vm0, %v14305_v16, %v7404_v62  ;;  %v7489_v48 = vsub.s32 0, %v7487_v35  ;;  %vm7623_vm9 = vcmp.eq.s32.totalorder %v7621_v61, 0  ;;  %vm7622_vm10 = vcmp.lt.s32.totalorder %v7621_v61, 2 }
 0x412   :  { %9645 = vcosq.f32 %v7407_v53  ;;  %v7607_v19 = vand.u32 2147483647, %v7606_v36  ;;  %v7509_v9 = vsub.s32 4, %v14457_v24  ;;  %vm7425_vm15 = vcmp.lt.s32.totalorder %v14315_v56, 0 }
 0x413   :  { %9647 = vsinq.f32 %v7407_v53  ;;  %v7827_v29 = vmin.u32 %v7489_v48, %v7487_v35  ;;  %vm7424_vm13 = vcmp.le.f32.partialorder %v7423_v31, 0.7853982  ;;  %v7727_v34 = vrot.slane %v7719_v42, %v13754_v21 }
 0x414   :  { %v7610_v40 = vmul.f32 %v7609_v20, %v7607_v19  ;;  %v7510_v59 = vsel %vm7425_vm15, %v7509_v9, %v14457_v24  ;;  %v16503_v4 = vlaneseq }
 0x415   :  { %v7491_v13 = vclz %v7827_v29  ;;  %v7512_v37 = vsel %vm7424_vm13, 0, %v7510_v59 }
 0x416   :  { %v7611_v57 = vxor.u32 2147483648, %v7610_v40 }
 0x417   :  { %v7828_v44 = vadd.s32 4294967294, %v7491_v13 }
 0x418   :  { %v7612_v49 = vsel %vm7529_vm2, %v7611_v57, %v7610_v40  ;;  %v7516_v40 = vadd.s32 3, %v7512_v37 }
 0x419   :  { %v7615_v55 = vsel %vm14464_vm14, %v14312_v12, %v7612_v49  ;;  %vm7829_vm1 = vcmp.lt.s32.totalorder %v7828_v44, 0 }
 0x41a   :  { %9649 = vcosq.f32 %v7615_v55  ;;  %v7494_v38 = vsel %vm7829_vm1, 0, %v7828_v44  ;;  %v7517_v33 = vand.u32 3, %v7516_v40 }
 0x41b   :  { %9651 = vsinq.f32 %v7615_v55  ;;  %v7495_v27 = vsub.s32 32, %v7494_v38  ;;  %v7499_v54 = vsub.s32 4294967266, %v7494_v38  ;;  %v7496_v1 = vshll.u32 %v7487_v35, %v7494_v38 }
 0x41c   :  { %v9646_v26 = vpop.eup %9645  ;;  %vm7522_vm0 = vcmp.eq.s32.totalorder %v7517_v33, 2  ;;  %vm7519_vm2 = vcmp.eq.s32.totalorder %v7517_v33, 0  ;;  %vm7518_vm14 = vcmp.lt.s32.totalorder %v7517_v33, 2 }
 0x41d   :  { %v9648_v22 = vpop.eup %9647  ;;  %v7419_v2 = vxor.u32 2147483648, %v9646_v26  ;;  %v7497_v3 = vshrl.u32 %v7479_v11, %v7495_v27  ;;  %v7500_v47 = vadd.s32 127, %v7499_v54 }
 0x41e   :  { %v7416_v52 = vxor.u32 2147483648, %v9648_v22 }
 0x41f   :  { %v7420_v41 = vsel %vm7418_vm3, %v7419_v2, %v9648_v22  ;;  %v7498_v30 = vor.u32 %v7497_v3, %v7496_v1  ;;  %v7501_v0 = vshll.u32 %v7500_v47, 23  ;;  %vm7642_vm3 = vcmp.eq.s32.totalorder %v14294_v43, 0 }
 0x420   :  { %v7417_v8 = vsel %vm7415_vm4, %v9646_v26, %v7416_v52  ;;  %vm7515_vm4 = vweird.f32 %v14315_v56 }
 0x421   :  { %v7421_v15 = vsel %vm7414_vm5, %v7417_v8, %v7420_v41  ;;  %v7502_v62 = vor.u32 4788187, %v7501_v0  ;;  %v7505_v51 = vcvt.s32.f32 %v7498_v30  ;;  %vm7763_vm5 = vcmp.lt.s32.totalorder %v16503_v4, 640 }
 0x422   :  { %v7422_v14 = vsel %vm7411_vm7, nan, %v7421_v15 }
 0x423   :  { %v7654_v10 = vsel %vm7641_vm6, %v14302_v5, %v7422_v14  ;;  %v7503_v25 = vand.u32 2147483647, %v7502_v62 }
 0x424   :  { %v9650_v32 = vpop.eup %9649 }
 0x425   :  { %v9652_v7 = vpop.eup %9651  ;;  %v7627_v23 = vxor.u32 2147483648, %v9650_v32  ;;  %v7506_v36 = vmul.f32 %v7505_v51, %v7503_v25 }
 0x426   :  { %v7624_v16 = vxor.u32 2147483648, %v9652_v7 }
 0x427   :  { %v7628_v18 = vsel %vm7626_vm8, %v7627_v23, %v9652_v7  ;;  %v7507_v19 = vxor.u32 2147483648, %v7506_v36 }
 0x428   :  { %v7625_v60 = vsel %vm7623_vm9, %v9650_v32, %v7624_v16 }
 0x429   :  { %v7629_v5 = vsel %vm7622_vm10, %v7625_v60, %v7628_v18  ;;  %v7508_v20 = vsel %vm7425_vm15, %v7507_v19, %v7506_v36 }
 0x42a   :  { %v7630_v45 = vsel %vm7619_vm12, nan, %v7629_v5  ;;  %v7511_v12 = vsel %vm7424_vm13, %v14315_v56, %v7508_v20 }
 0x42b   :  { %v7656_v53 = vsel %vm7643_vm11, %v14307_v63, %v7630_v45  ;;  %9653 = vcosq.f32 %v7511_v12 }
 0x42c   :  { %9655 = vsinq.f32 %v7511_v12  ;;  %v7741_v55 = vrot.slane %v7656_v53, %v13754_v21 }
 0x42e   :  { %v7756_v43 = vrot.slane %v7741_v55, %v13754_v21 }
 0x435   :  { %v9654_v63 = vpop.eup %9653 }
 0x436   :  { %v9656_v28 = vpop.eup %9655  ;;  %v7523_v35 = vxor.u32 2147483648, %v9654_v63 }
 0x437   :  { %v7520_v57 = vxor.u32 2147483648, %v9656_v28 }
 0x438   :  { %v7524_v48 = vsel %vm7522_vm0, %v7523_v35, %v9656_v28 }
 0x439   :  { %v7521_v17 = vsel %vm7519_vm2, %v9654_v63, %v7520_v57 }
 0x43a   :  { %v7525_v31 = vsel %vm7518_vm14, %v7521_v17, %v7524_v48 }
 0x43b   :  { %v7526_v24 = vsel %vm7515_vm4, nan, %v7525_v31 }
 0x43c   :  { %v7655_v49 = vsel %vm7642_vm3, %v14309_v58, %v7526_v24 }
 0x43d   :  { %v7720_v46 = vcombine.low %v7654_v10, %v7655_v49 }
 0x43f   :  { %v7734_v29 = vrot.slane %v7720_v46, %v13754_v21 }
 0x441   :  { %v7742_v26 = vcombine.low %v7727_v34, %v7734_v29 }
 0x443   :  { %v7749_v56 = vrot.slane %v7742_v26, %v13754_v21 }
 0x445   :  { %v7757_v58 = vcombine.low %v7749_v56, %v7756_v43 }
 0x447   :  { %7765 = vst.msk [vmem:[#allocation7 + $0x8] sm:$0x1f] %vm7763_vm5, %v7757_v58 }
 0x448   :  { %9712 = shalt.err (!%p9709_p6)
}
 0x449   :  { %s9713_s12 = scalar_lea.hbm %s14514_s2, 208 }
 0x44a   :  { %p9714_p7 = scmp.ne.s32.totalorder %s14514_s2, %s9713_s12  ;;  %p9717_p8 = scmp.lt.u32.totalorder %s9713_s12, %s14514_s2 }
 0x44c   :  { %p9719_p9 = pnand %p9717_p8, %p9714_p7 }
 0x44e   :  { %9722 = shalt.err (!%p9719_p9)
}
 0x44f   :  { %7775 = dma.vmem_to_hbm [thread:$0]  %s7773_s7, 208, %s14514_s2, [#allocation4]  }
 0x450   :  { %9727 = dma.done.wait [#allocation4], 208  }
 0x451   :  { %9728 = vsyncadd [#allocation4], 4294967088 }
 0x452   :  { %7779 = vsyncpa [#allocation3], 1 }
 0x453   :  { %7780 = vsyncpa [#allocation6], 1 }
 0x454   :  { %7781 = vsyncpa [#allocation4], 1 }

</bundles_post_ra>
